<compile_context>
chip_gen: v5e
topology: v5e:2x2
jax: 0.10.0
libtpu: 0.0.40
codegen_flags: <defaults>
</compile_context>

<pallas_src>
import functools

import numpy as np

import jax
import jax.numpy as jnp
from jax.experimental import pallas as pl
from jax.experimental.pallas import tpu as pltpu

NEG_SLOPE = 0.01  # F.leaky_relu default negative_slope


def _round_up(x, m):
    return ((x + m - 1) // m) * m


def _num_tensorcores_per_chip():
    try:
        kind = jax.devices()[0].device_kind.lower()
    except Exception:
        return 1
    return 2 if ("v7" in kind or "7x" in kind) else 1


_NUM_TC = _num_tensorcores_per_chip()


# ---------------------------------------------------------------------------
# Pallas kernels
# ---------------------------------------------------------------------------
def _mm_bias_lrelu_kernel(a_ref, b_ref, bias_ref, o_ref):
    acc = jnp.dot(a_ref[...], b_ref[...], preferred_element_type=jnp.float32)
    acc = acc + bias_ref[...]                      # (1, N) bias broadcasts
    acc = jnp.maximum(acc, acc * NEG_SLOPE)        # leaky_relu, f32 on the VPU
    o_ref[...] = acc.astype(o_ref.dtype)


def matmul_bias_lrelu(a, b, bias, *, out_dtype=jnp.bfloat16):
    """leaky_relu(a @ b + bias); a:(M,K) bf16, b:(K,N) bf16, bias:(1,N) f32.

    Single M block on single-TensorCore chips (v5e/v6e); two balanced
    'parallel' blocks on v7x so both cores get work (ragged last block is
    masked by Pallas).
    """
    M, K = a.shape
    _, N = b.shape
    if _NUM_TC > 1 and M > 1024:
        tm = _round_up(pl.cdiv(M, _NUM_TC), 8)
    else:
        tm = M
    grid_m = pl.cdiv(M, tm)
    return pl.pallas_call(
        _mm_bias_lrelu_kernel,
        out_shape=jax.ShapeDtypeStruct((M, N), out_dtype),
        grid=(grid_m,),
        in_specs=[
            pl.BlockSpec((tm, K), lambda i: (i, 0)),
            pl.BlockSpec((K, N), lambda i: (0, 0)),
            pl.BlockSpec((1, N), lambda i: (0, 0)),
        ],
        out_specs=pl.BlockSpec((tm, N), lambda i: (i, 0)),
        compiler_params=pltpu.CompilerParams(
            dimension_semantics=("parallel",)),
    )(a, b, bias)


def _tail_kernel(cols2_ref, w2_ref, b2_ref, s3_ref, w3_ref, b3_ref,
                 wl1_hbm, bl1_ref, wl2_ref, bl2_ref, o_ref,
                 wl1_vmem, dma_sem, *, batch, tap_rows):
    # Start the (largest) MLP-weight DMA now; it overlaps with the conv work.
    wl1_cp = pltpu.make_async_copy(wl1_hbm, wl1_vmem, dma_sem)
    wl1_cp.start()

    # conv2 with pool1 folded in (k=6, s=4, 0.25-scaled weights): one matmul.
    z2 = jnp.dot(cols2_ref[...], w2_ref[...],
                 preferred_element_type=jnp.float32)
    z2 = z2 + b2_ref[...]
    z2 = jnp.maximum(z2, z2 * NEG_SLOPE)           # (B*64, 128), rows=(n,ho,wo)

    # conv3 with pool2 folded in (k=4, s=2): gather the 16 spatial taps of
    # every output pixel via a constant one-hot matmul (keeps the gather on
    # the MXU; no strided VMEM access), then one matmul over K = 16*128.
    g = jnp.dot(s3_ref[...], z2.astype(jnp.bfloat16),
                preferred_element_type=jnp.float32).astype(jnp.bfloat16)
    rows = 9 * batch
    cols3 = jnp.concatenate(
        [g[t * tap_rows:t * tap_rows + rows, :] for t in range(16)], axis=1)
    z3 = jnp.dot(cols3, w3_ref[...], preferred_element_type=jnp.float32)
    z3 = z3 + b3_ref[...]
    z3 = jnp.maximum(z3, z3 * NEG_SLOPE)           # (9*B, 128), rows=(h3,w3,n)

    # Flatten (lane-concat; wl1 rows were pre-permuted to match torch's NCHW
    # view order) and run the MLP head; the hidden never leaves VMEM.
    x1 = jnp.concatenate(
        [z3[batch * hw:batch * (hw + 1), :] for hw in range(9)],
        axis=1).astype(jnp.bfloat16)               # (B, 9*128)
    wl1_cp.wait()
    h = jnp.dot(x1, wl1_vmem[...], preferred_element_type=jnp.float32)
    h = h + bl1_ref[...]
    h = jnp.maximum(h, h * NEG_SLOPE)
    # TODO(synk): nn.Dropout(p=0.1) is identity at inference; training-mode RNG mask not implemented.
    o = jnp.dot(h.astype(jnp.bfloat16), wl2_ref[...],
                preferred_element_type=jnp.float32)
    o_ref[...] = (o + bl2_ref[...]).astype(o_ref.dtype)


def fused_tail(cols2, prep):
    """pool1+conv2 -> pool2+conv3 -> flatten -> l1 -> l2 in one Pallas call."""
    M2, K2 = cols2.shape
    B = M2 // 64
    tap_rows = prep["s3"].shape[0] // 16
    hidden = prep["wl1"].shape[1]
    out_dim = prep["wl2"].shape[1]
    kernel = functools.partial(_tail_kernel, batch=B, tap_rows=tap_rows)
    return pl.pallas_call(
        kernel,
        out_shape=jax.ShapeDtypeStruct((B, out_dim), jnp.float32),
        grid=(1,),
        in_specs=[
            pl.BlockSpec((M2, K2), lambda i: (0, 0)),
            pl.BlockSpec((K2, 128), lambda i: (0, 0)),
            pl.BlockSpec((1, 128), lambda i: (0, 0)),
            pl.BlockSpec(prep["s3"].shape, lambda i: (0, 0)),
            pl.BlockSpec(prep["w3"].shape, lambda i: (0, 0)),
            pl.BlockSpec((1, 128), lambda i: (0, 0)),
            pl.BlockSpec(memory_space=pl.ANY),     # wl1: manual in-kernel DMA
            pl.BlockSpec((1, hidden), lambda i: (0, 0)),
            pl.BlockSpec((hidden, out_dim), lambda i: (0, 0)),
            pl.BlockSpec((1, out_dim), lambda i: (0, 0)),
        ],
        out_specs=pl.BlockSpec((B, out_dim), lambda i: (0, 0)),
        scratch_shapes=[
            pltpu.VMEM(prep["wl1"].shape, jnp.bfloat16),
            pltpu.SemaphoreType.DMA,
        ],
        compiler_params=pltpu.CompilerParams(
            dimension_semantics=("arbitrary",)),
    )(cols2, prep["w2"], prep["b2"], prep["s3"], prep["w3"], prep["b3"],
      prep["wl1"], prep["bl1"], prep["wl2"], prep["bl2"])


# ---------------------------------------------------------------------------
# Glue (im2col) and one-time parameter preparation (hoisted out of forward)
# ---------------------------------------------------------------------------
def _im2col(x, k, s, p):
    """x: NHWC -> (N*Ho*Wo, k*k*C); patch layout (kh, kw) outer, Cin inner."""
    N, H, W, C = x.shape
    if p:
        x = jnp.pad(x, ((0, 0), (p, p), (p, p), (0, 0)))
    Hp, Wp = H + 2 * p, W + 2 * p
    Ho = (Hp - k) // s + 1
    Wo = (Wp - k) // s + 1
    cols = []
    for di in range(k):
        for dj in range(k):
            cols.append(x[:, di:di + s * (Ho - 1) + 1:s,
                          dj:dj + s * (Wo - 1) + 1:s, :])
    patches = jnp.stack(cols, axis=3)              # (N, Ho, Wo, k*k, C)
    return patches.reshape(N * Ho * Wo, k * k * C), (N, Ho, Wo)


def _pad_axis(x, axis, new_size):
    pad = [(0, 0)] * x.ndim
    pad[axis] = (0, new_size - x.shape[axis])
    return jnp.pad(x, pad)


def _fold_input_pool(w):
    """AvgPool2d(2,2) applied to this conv's input == same conv with a
    2x-dilated kernel extent, doubled stride and 0.25-scaled weights.
    w: (kh, kw, Cin, Cout) -> (2kh, 2kw, Cin, Cout)."""
    return 0.25 * jnp.repeat(jnp.repeat(w, 2, axis=0), 2, axis=1)


def _conv3_gather_matrix(batch):
    """Constant one-hot matrix selecting conv2-output rows for conv3's taps.

    conv3 with pool2 folded has k=4, s=2 on the 8x8 conv2 map -> 3x3 output.
    Row layout: 16 tap-major blocks of `tap_rows` rows; row (h3*3+w3)*B + n of
    block (kh*4+kw) selects conv2 row n*64 + (2*h3+kh)*8 + (2*w3+kw).
    """
    tap_rows = _round_up(9 * batch, 8)
    s3 = np.zeros((16 * tap_rows, 64 * batch), np.float32)
    for kh in range(4):
        for kw in range(4):
            t = kh * 4 + kw
            for h3 in range(3):
                for w3 in range(3):
                    for n in range(batch):
                        r = t * tap_rows + (h3 * 3 + w3) * batch + n
                        c = n * 64 + (2 * h3 + kh) * 8 + (2 * w3 + kw)
                        s3[r, c] = 1.0
    return jnp.asarray(s3, jnp.bfloat16)


def prepare_params(params, batch):
    """One-time prep: pool folding, channel padding, im2col weight reshape,
    l1 row permutation, bf16 casts and bias reshapes (all hoisted)."""
    in_ch = params["w1"].shape[2]
    hidden = params["wl1"].shape[1]
    out_dim = params["wl2"].shape[1]

    # conv1: Cout zero-padded 64->128 so its output store is lane-dense.
    w1 = _pad_axis(params["w1"], 3, 128).reshape(8 * 8 * in_ch, 128)
    b1 = _pad_axis(params["b1"], 0, 128).reshape(1, 128)

    # conv2 with pool1 folded (k=6, s=4); only the 64 real input channels are
    # kept on the K side; Cout zero-padded to 128 for lane-dense z2.
    w2f = _fold_input_pool(params["w2"])                   # (6,6,64,64)
    w2 = _pad_axis(w2f, 3, 128).reshape(6 * 6 * 64, 128)
    b2 = _pad_axis(params["b2"], 0, 128).reshape(1, 128)

    # conv3 with pool2 folded (k=4, s=2); Cin zero-padded to 128 to match z2's
    # 128 lanes (padded channels are exactly zero), Cout is already 128.
    w3f = _fold_input_pool(params["w3"])                   # (4,4,64,128)
    w3 = _pad_axis(w3f, 2, 128).reshape(4 * 4 * 128, 128)
    b3 = params["b3"].reshape(1, 128)

    # l1 rows permuted so the kernel's (h3, w3, c)-ordered lane-concat flatten
    # matches torch's x.view(B, -1) on an NCHW tensor (c, h3, w3 order).
    wl1p = (params["wl1"].reshape(128, 3, 3, hidden)
            .transpose(1, 2, 0, 3).reshape(128 * 9, hidden))

    return {
        "w1": w1.astype(jnp.bfloat16), "b1": b1.astype(jnp.float32),
        "w2": w2.astype(jnp.bfloat16), "b2": b2.astype(jnp.float32),
        "w3": w3.astype(jnp.bfloat16), "b3": b3.astype(jnp.float32),
        "s3": _conv3_gather_matrix(batch),
        "wl1": wl1p.astype(jnp.bfloat16),
        "bl1": params["bl1"].reshape(1, hidden).astype(jnp.float32),
        "wl2": params["wl2"].astype(jnp.bfloat16),
        "bl2": params["bl2"].reshape(1, out_dim).astype(jnp.float32),
    }


def init_params(key, in_ch, out_dim, hidden=256):
    ks = jax.random.split(key, 10)

    def norm(k, shape, fan_in):
        return jax.random.normal(k, shape, jnp.float32) / jnp.sqrt(float(fan_in))

    return {
        "w1": norm(ks[0], (8, 8, in_ch, 64), 8 * 8 * in_ch),
        "b1": norm(ks[1], (64,), 8 * 8 * in_ch),
        "w2": norm(ks[2], (3, 3, 64, 64), 3 * 3 * 64),
        "b2": norm(ks[3], (64,), 3 * 3 * 64),
        "w3": norm(ks[4], (2, 2, 64, 128), 2 * 2 * 64),
        "b3": norm(ks[5], (128,), 2 * 2 * 64),
        "wl1": norm(ks[6], (128 * 3 * 3, hidden), 128 * 3 * 3),
        "bl1": norm(ks[7], (hidden,), 128 * 3 * 3),
        "wl2": norm(ks[8], (hidden, out_dim), hidden),
        "bl2": norm(ks[9], (out_dim,), hidden),
    }


@jax.jit
def conv_forward(prep, x_nchw):
    B = x_nchw.shape[0]
    # NCHW -> NHWC once at the boundary; im2col columns are emitted in bf16.
    x = jnp.transpose(x_nchw, (0, 2, 3, 1)).astype(jnp.bfloat16)

    # conv1 + leaky_relu (output stays bf16, lane-dense 128 channels).
    cols1, (_, Ho, Wo) = _im2col(x, k=8, s=2, p=1)         # (B*34*34, 8*8*Cin)
    assert Ho % 2 == 0 and Wo % 2 == 0                     # pool-folding needs even maps
    y1 = matmul_bias_lrelu(cols1, prep["w1"], prep["b1"])  # (B*34*34, 128) bf16

    # pool1 + conv2 are a single k=6/s=4 conv; build its im2col columns from
    # the 64 real channels only (padded channels carry exact zeros).
    y1 = y1.reshape(B, Ho, Wo, 128)[..., :64]
    cols2, _ = _im2col(y1, k=6, s=4, p=0)                  # (B*64, 2304) bf16

    # Fused tail: conv2'(+lrelu) -> conv3'(+lrelu) -> flatten -> l1(+lrelu)
    # -> (dropout=identity) -> l2, all inside one Pallas kernel.
    return fused_tail(cols2, prep)


def reference_forward(params, x_nchw):
    """Plain-JAX f32 reference (mirrors the PyTorch module) for a sanity check."""
    lrelu = lambda v: jnp.where(v > 0, v, v * NEG_SLOPE)

    def conv(x, w, b, s, p):
        y = jax.lax.conv_general_dilated(
            x, jnp.transpose(w, (3, 2, 0, 1)),             # (kh,kw,Cin,Cout) -> OIHW
            window_strides=(s, s), padding=[(p, p), (p, p)],
            dimension_numbers=("NCHW", "OIHW", "NCHW"))
        return y + b[None, :, None, None]

    def pool(x):
        B, C, H, W = x.shape
        return x.reshape(B, C, H // 2, 2, W // 2, 2).mean((3, 5))

    x = x_nchw.astype(jnp.float32)
    x = pool(lrelu(conv(x, params["w1"], params["b1"], 2, 1)))
    x = pool(lrelu(conv(x, params["w2"], params["b2"], 2, 0)))
    x = lrelu(conv(x, params["w3"], params["b3"], 1, 0))
    x = x.reshape(x.shape[0], -1)
    x = lrelu(x @ params["wl1"] + params["bl1"])
    return x @ params["wl2"] + params["bl2"]


if __name__ == "__main__":
    key = jax.random.PRNGKey(0)
    k_x, k_p = jax.random.split(key)

    batch, in_ch, spatial, out_dim = 2, 4, 72, 6           # 72x72 -> 3x3x128 at conv3
    x = jax.random.normal(k_x, (batch, in_ch, spatial, spatial), jnp.float32)
    params = init_params(k_p, in_ch, out_dim, hidden=256)
    prep = prepare_params(params, batch)                   # one-time, hoisted

    y = jax.block_until_ready(conv_forward(prep, x))
    assert y.shape == (batch, out_dim), y.shape
    assert bool(jnp.all(jnp.isfinite(y)))

    # Tolerance test of the bf16 MXU / pool-folded path against an f32 reference.
    y_ref = jax.block_until_ready(reference_forward(params, x))
    assert jnp.allclose(y, y_ref, rtol=5e-2, atol=1e-2), (
        float(jnp.max(jnp.abs(y - y_ref))))

    print("KERNEL_OK")
</pallas_src>

<mosaic_0001>
module attributes {stable_mosaic.version = 11 : i64} {
  func.func @_mm_bias_lrelu_kernel(%arg0: i32, %arg1: memref<2312x256xbf16, #tpu.memory_space<vmem>>, %arg2: memref<256x128xbf16, #tpu.memory_space<vmem>>, %arg3: memref<1x128xf32, #tpu.memory_space<vmem>>, %arg4: memref<2312x128xbf16, #tpu.memory_space<vmem>>) attributes {dimension_semantics = [#tpu.dimension_semantics<parallel>], iteration_bounds = array<i64: 1>, scalar_prefetch = 0 : i64, scratch_operands = 0 : i64, tpu.core_type = #tpu.core_type<tc>, window_params = [{transform_indices = @transform_0, window_bounds = array<i64: 2312, 256>}, {pipeline_mode = #tpu.pipeline_mode<synchronous>, transform_indices = @transform_1, window_bounds = array<i64: 256, 128>}, {pipeline_mode = #tpu.pipeline_mode<synchronous>, transform_indices = @transform_2, window_bounds = array<i64: 1, 128>}, {transform_indices = @transform_3, window_bounds = array<i64: 2312, 128>}]} {
    %c0 = arith.constant 0 : index
    %c0_0 = arith.constant 0 : index
    %0 = vector.load %arg1[%c0, %c0_0] : memref<2312x256xbf16, #tpu.memory_space<vmem>>, vector<2312x256xbf16>
    %c0_1 = arith.constant 0 : index
    %c0_2 = arith.constant 0 : index
    %1 = vector.load %arg2[%c0_1, %c0_2] : memref<256x128xbf16, #tpu.memory_space<vmem>>, vector<256x128xbf16>
    %cst = arith.constant dense<0.000000e+00> : vector<2312x128xf32>
    %2 = tpu.matmul %0, %1, %cst {dimension_numbers = #tpu.dot_dimension_numbers<[1], [0], [0], [1], [0, 0, 1, 1], [], []>} : vector<2312x256xbf16>, vector<256x128xbf16>, vector<2312x128xf32> -> vector<2312x128xf32>
    %c0_3 = arith.constant 0 : index
    %c0_4 = arith.constant 0 : index
    %3 = vector.load %arg3[%c0_3, %c0_4] : memref<1x128xf32, #tpu.memory_space<vmem>>, vector<1x128xf32>
    %4 = vector.broadcast %3 : vector<1x128xf32> to vector<2312x128xf32>
    %5 = arith.addf %2, %4 : vector<2312x128xf32>
    %cst_5 = arith.constant 0.00999999977 : f32
    %6 = vector.broadcast %cst_5 : f32 to vector<2312x128xf32>
    %7 = arith.mulf %5, %6 : vector<2312x128xf32>
    %8 = arith.maximumf %5, %7 : vector<2312x128xf32>
    %9 = arith.truncf %8 : vector<2312x128xf32> to vector<2312x128xbf16>
    %c0_6 = arith.constant 0 : index
    %c0_7 = arith.constant 0 : index
    %10 = vector.load %arg4[%c0_6, %c0_7] : memref<2312x128xbf16, #tpu.memory_space<vmem>>, vector<2312x128xbf16>
    tpu.vector_store %arg4[%c0_6, %c0_7], %9 {strides = array<i32>} : memref<2312x128xbf16, #tpu.memory_space<vmem>>, vector<2312x128xbf16>,
    return
  }
  func.func @transform_0(%arg0: i32) -> (i32, i32) {
    %c0_i32 = arith.constant 0 : i32
    %c0_i32_0 = arith.constant 0 : i32
    return %arg0, %c0_i32 : i32, i32
  }
  func.func @transform_1(%arg0: i32) -> (i32, i32) {
    %c0_i32 = arith.constant 0 : i32
    %c0_i32_0 = arith.constant 0 : i32
    %c0_i32_1 = arith.constant 0 : i32
    return %c0_i32, %c0_i32_0 : i32, i32
  }
  func.func @transform_2(%arg0: i32) -> (i32, i32) {
    %c0_i32 = arith.constant 0 : i32
    %c0_i32_0 = arith.constant 0 : i32
    %c0_i32_1 = arith.constant 0 : i32
    return %c0_i32, %c0_i32_0 : i32, i32
  }
  func.func @transform_3(%arg0: i32) -> (i32, i32) {
    %c0_i32 = arith.constant 0 : i32
    %c0_i32_0 = arith.constant 0 : i32
    return %arg0, %c0_i32 : i32, i32
  }
}

module attributes {stable_mosaic.version = 11 : i64} {
  func.func @_tail_kernel(%arg0: i32, %arg1: memref<128x2304xbf16, #tpu.memory_space<vmem>>, %arg2: memref<2304x128xbf16, #tpu.memory_space<vmem>>, %arg3: memref<1x128xf32, #tpu.memory_space<vmem>>, %arg4: memref<384x128xbf16, #tpu.memory_space<vmem>>, %arg5: memref<2048x128xbf16, #tpu.memory_space<vmem>>, %arg6: memref<1x128xf32, #tpu.memory_space<vmem>>, %arg7: memref<1152x256xbf16, #tpu.memory_space<any>>, %arg8: memref<1x256xf32, #tpu.memory_space<vmem>>, %arg9: memref<256x6xbf16, #tpu.memory_space<vmem>>, %arg10: memref<1x6xf32, #tpu.memory_space<vmem>>, %arg11: memref<2x6xf32, #tpu.memory_space<vmem>>, %arg12: memref<1152x256xbf16, #tpu.memory_space<vmem>>, %arg13: memref<!tpu.dma_semaphore, #tpu.memory_space<semaphore_mem>>) attributes {dimension_semantics = [#tpu.dimension_semantics<arbitrary>], iteration_bounds = array<i64: 1>, scalar_prefetch = 0 : i64, scratch_operands = 2 : i64, tpu.core_type = #tpu.core_type<tc>, window_params = [{pipeline_mode = #tpu.pipeline_mode<synchronous>, transform_indices = @transform_0, window_bounds = array<i64: 128, 2304>}, {pipeline_mode = #tpu.pipeline_mode<synchronous>, transform_indices = @transform_1, window_bounds = array<i64: 2304, 128>}, {pipeline_mode = #tpu.pipeline_mode<synchronous>, transform_indices = @transform_2, window_bounds = array<i64: 1, 128>}, {pipeline_mode = #tpu.pipeline_mode<synchronous>, transform_indices = @transform_3, window_bounds = array<i64: 384, 128>}, {pipeline_mode = #tpu.pipeline_mode<synchronous>, transform_indices = @transform_4, window_bounds = array<i64: 2048, 128>}, {pipeline_mode = #tpu.pipeline_mode<synchronous>, transform_indices = @transform_5, window_bounds = array<i64: 1, 128>}, {}, {pipeline_mode = #tpu.pipeline_mode<synchronous>, transform_indices = @transform_7, window_bounds = array<i64: 1, 256>}, {pipeline_mode = #tpu.pipeline_mode<synchronous>, transform_indices = @transform_8, window_bounds = array<i64: 256, 6>}, {pipeline_mode = #tpu.pipeline_mode<synchronous>, transform_indices = @transform_9, window_bounds = array<i64: 1, 6>}, {pipeline_mode = #tpu.pipeline_mode<synchronous>, transform_indices = @transform_10, window_bounds = array<i64: 2, 6>}]} {
    tpu.enqueue_dma source(%arg7 : memref<1152x256xbf16, #tpu.memory_space<any>>) target(%arg12 : memref<1152x256xbf16, #tpu.memory_space<vmem>>) target_semaphore(%arg13 : memref<!tpu.dma_semaphore, #tpu.memory_space<semaphore_mem>>)
    %c0 = arith.constant 0 : index
    %c0_0 = arith.constant 0 : index
    %0 = vector.load %arg1[%c0, %c0_0] : memref<128x2304xbf16, #tpu.memory_space<vmem>>, vector<128x2304xbf16>
    %c0_1 = arith.constant 0 : index
    %c0_2 = arith.constant 0 : index
    %1 = vector.load %arg2[%c0_1, %c0_2] : memref<2304x128xbf16, #tpu.memory_space<vmem>>, vector<2304x128xbf16>
    %cst = arith.constant dense<0.000000e+00> : vector<128x128xf32>
    %2 = tpu.matmul %0, %1, %cst {dimension_numbers = #tpu.dot_dimension_numbers<[1], [0], [0], [1], [0, 0, 1, 1], [], []>} : vector<128x2304xbf16>, vector<2304x128xbf16>, vector<128x128xf32> -> vector<128x128xf32>
    %c0_3 = arith.constant 0 : index
    %c0_4 = arith.constant 0 : index
    %3 = vector.load %arg3[%c0_3, %c0_4] : memref<1x128xf32, #tpu.memory_space<vmem>>, vector<1x128xf32>
    %4 = vector.broadcast %3 : vector<1x128xf32> to vector<128x128xf32>
    %5 = arith.addf %2, %4 : vector<128x128xf32>
    %cst_5 = arith.constant 0.00999999977 : f32
    %6 = vector.broadcast %cst_5 : f32 to vector<128x128xf32>
    %7 = arith.mulf %5, %6 : vector<128x128xf32>
    %8 = arith.maximumf %5, %7 : vector<128x128xf32>
    %c0_6 = arith.constant 0 : index
    %c0_7 = arith.constant 0 : index
    %9 = vector.load %arg4[%c0_6, %c0_7] : memref<384x128xbf16, #tpu.memory_space<vmem>>, vector<384x128xbf16>
    %10 = arith.truncf %8 : vector<128x128xf32> to vector<128x128xbf16>
    %cst_8 = arith.constant dense<0.000000e+00> : vector<384x128xf32>
    %11 = tpu.matmul %9, %10, %cst_8 {dimension_numbers = #tpu.dot_dimension_numbers<[1], [0], [0], [1], [0, 0, 1, 1], [], []>} : vector<384x128xbf16>, vector<128x128xbf16>, vector<384x128xf32> -> vector<384x128xf32>
    %12 = arith.truncf %11 : vector<384x128xf32> to vector<384x128xbf16>
    %13 = vector.extract_strided_slice %12 {offsets = [0, 0], sizes = [18, 128], strides = [1, 1]} : vector<384x128xbf16> to vector<18x128xbf16>
    %14 = vector.extract_strided_slice %12 {offsets = [24, 0], sizes = [18, 128], strides = [1, 1]} : vector<384x128xbf16> to vector<18x128xbf16>
    %15 = vector.extract_strided_slice %12 {offsets = [48, 0], sizes = [18, 128], strides = [1, 1]} : vector<384x128xbf16> to vector<18x128xbf16>
    %16 = vector.extract_strided_slice %12 {offsets = [72, 0], sizes = [18, 128], strides = [1, 1]} : vector<384x128xbf16> to vector<18x128xbf16>
    %17 = vector.extract_strided_slice %12 {offsets = [96, 0], sizes = [18, 128], strides = [1, 1]} : vector<384x128xbf16> to vector<18x128xbf16>
    %18 = vector.extract_strided_slice %12 {offsets = [120, 0], sizes = [18, 128], strides = [1, 1]} : vector<384x128xbf16> to vector<18x128xbf16>
    %19 = vector.extract_strided_slice %12 {offsets = [144, 0], sizes = [18, 128], strides = [1, 1]} : vector<384x128xbf16> to vector<18x128xbf16>
    %20 = vector.extract_strided_slice %12 {offsets = [168, 0], sizes = [18, 128], strides = [1, 1]} : vector<384x128xbf16> to vector<18x128xbf16>
    %21 = vector.extract_strided_slice %12 {offsets = [192, 0], sizes = [18, 128], strides = [1, 1]} : vector<384x128xbf16> to vector<18x128xbf16>
    %22 = vector.extract_strided_slice %12 {offsets = [216, 0], sizes = [18, 128], strides = [1, 1]} : vector<384x128xbf16> to vector<18x128xbf16>
    %23 = vector.extract_strided_slice %12 {offsets = [240, 0], sizes = [18, 128], strides = [1, 1]} : vector<384x128xbf16> to vector<18x128xbf16>
    %24 = vector.extract_strided_slice %12 {offsets = [264, 0], sizes = [18, 128], strides = [1, 1]} : vector<384x128xbf16> to vector<18x128xbf16>
    %25 = vector.extract_strided_slice %12 {offsets = [288, 0], sizes = [18, 128], strides = [1, 1]} : vector<384x128xbf16> to vector<18x128xbf16>
    %26 = vector.extract_strided_slice %12 {offsets = [312, 0], sizes = [18, 128], strides = [1, 1]} : vector<384x128xbf16> to vector<18x128xbf16>
    %27 = vector.extract_strided_slice %12 {offsets = [336, 0], sizes = [18, 128], strides = [1, 1]} : vector<384x128xbf16> to vector<18x128xbf16>
    %28 = vector.extract_strided_slice %12 {offsets = [360, 0], sizes = [18, 128], strides = [1, 1]} : vector<384x128xbf16> to vector<18x128xbf16>
    %29 = tpu.concatenate %13, %14, %15, %16, %17, %18, %19, %20, %21, %22, %23, %24, %25, %26, %27, %28 in 1 : vector<18x128xbf16>, vector<18x128xbf16>, vector<18x128xbf16>, vector<18x128xbf16>, vector<18x128xbf16>, vector<18x128xbf16>, vector<18x128xbf16>, vector<18x128xbf16>, vector<18x128xbf16>, vector<18x128xbf16>, vector<18x128xbf16>, vector<18x128xbf16>, vector<18x128xbf16>, vector<18x128xbf16>, vector<18x128xbf16>, vector<18x128xbf16> -> vector<18x2048xbf16>
    %c0_9 = arith.constant 0 : index
    %c0_10 = arith.constant 0 : index
    %30 = vector.load %arg5[%c0_9, %c0_10] : memref<2048x128xbf16, #tpu.memory_space<vmem>>, vector<2048x128xbf16>
    %cst_11 = arith.constant dense<0.000000e+00> : vector<18x128xf32>
    %31 = tpu.matmul %29, %30, %cst_11 {dimension_numbers = #tpu.dot_dimension_numbers<[1], [0], [0], [1], [0, 0, 1, 1], [], []>} : vector<18x2048xbf16>, vector<2048x128xbf16>, vector<18x128xf32> -> vector<18x128xf32>
    %c0_12 = arith.constant 0 : index
    %c0_13 = arith.constant 0 : index
    %32 = vector.load %arg6[%c0_12, %c0_13] : memref<1x128xf32, #tpu.memory_space<vmem>>, vector<1x128xf32>
    %33 = vector.broadcast %32 : vector<1x128xf32> to vector<18x128xf32>
    %34 = arith.addf %31, %33 : vector<18x128xf32>
    %cst_14 = arith.constant 0.00999999977 : f32
    %35 = vector.broadcast %cst_14 : f32 to vector<18x128xf32>
    %36 = arith.mulf %34, %35 : vector<18x128xf32>
    %37 = arith.maximumf %34, %36 : vector<18x128xf32>
    %38 = vector.extract_strided_slice %37 {offsets = [0, 0], sizes = [2, 128], strides = [1, 1]} : vector<18x128xf32> to vector<2x128xf32>
    %39 = vector.extract_strided_slice %37 {offsets = [2, 0], sizes = [2, 128], strides = [1, 1]} : vector<18x128xf32> to vector<2x128xf32>
    %40 = vector.extract_strided_slice %37 {offsets = [4, 0], sizes = [2, 128], strides = [1, 1]} : vector<18x128xf32> to vector<2x128xf32>
    %41 = vector.extract_strided_slice %37 {offsets = [6, 0], sizes = [2, 128], strides = [1, 1]} : vector<18x128xf32> to vector<2x128xf32>
    %42 = vector.extract_strided_slice %37 {offsets = [8, 0], sizes = [2, 128], strides = [1, 1]} : vector<18x128xf32> to vector<2x128xf32>
    %43 = vector.extract_strided_slice %37 {offsets = [10, 0], sizes = [2, 128], strides = [1, 1]} : vector<18x128xf32> to vector<2x128xf32>
    %44 = vector.extract_strided_slice %37 {offsets = [12, 0], sizes = [2, 128], strides = [1, 1]} : vector<18x128xf32> to vector<2x128xf32>
    %45 = vector.extract_strided_slice %37 {offsets = [14, 0], sizes = [2, 128], strides = [1, 1]} : vector<18x128xf32> to vector<2x128xf32>
    %46 = vector.extract_strided_slice %37 {offsets = [16, 0], sizes = [2, 128], strides = [1, 1]} : vector<18x128xf32> to vector<2x128xf32>
    %47 = tpu.concatenate %38, %39, %40, %41, %42, %43, %44, %45, %46 in 1 : vector<2x128xf32>, vector<2x128xf32>, vector<2x128xf32>, vector<2x128xf32>, vector<2x128xf32>, vector<2x128xf32>, vector<2x128xf32>, vector<2x128xf32>, vector<2x128xf32> -> vector<2x1152xf32>
    %48 = arith.truncf %47 : vector<2x1152xf32> to vector<2x1152xbf16>
    tpu.wait_dma2 semaphore(%arg13 : memref<!tpu.dma_semaphore, #tpu.memory_space<semaphore_mem>>) src(%arg7 : memref<1152x256xbf16, #tpu.memory_space<any>>) dst(%arg12 : memref<1152x256xbf16, #tpu.memory_space<vmem>>)
    %c0_15 = arith.constant 0 : index
    %c0_16 = arith.constant 0 : index
    %49 = vector.load %arg12[%c0_15, %c0_16] : memref<1152x256xbf16, #tpu.memory_space<vmem>>, vector<1152x256xbf16>
    %cst_17 = arith.constant dense<0.000000e+00> : vector<2x256xf32>
    %50 = tpu.matmul %48, %49, %cst_17 {dimension_numbers = #tpu.dot_dimension_numbers<[1], [0], [0], [1], [0, 0, 1, 1], [], []>} : vector<2x1152xbf16>, vector<1152x256xbf16>, vector<2x256xf32> -> vector<2x256xf32>
    %c0_18 = arith.constant 0 : index
    %c0_19 = arith.constant 0 : index
    %51 = vector.load %arg8[%c0_18, %c0_19] : memref<1x256xf32, #tpu.memory_space<vmem>>, vector<1x256xf32>
    %52 = vector.broadcast %51 : vector<1x256xf32> to vector<2x256xf32>
    %53 = arith.addf %50, %52 : vector<2x256xf32>
    %cst_20 = arith.constant 0.00999999977 : f32
    %54 = vector.broadcast %cst_20 : f32 to vector<2x256xf32>
    %55 = arith.mulf %53, %54 : vector<2x256xf32>
    %56 = arith.maximumf %53, %55 : vector<2x256xf32>
    %57 = arith.truncf %56 : vector<2x256xf32> to vector<2x256xbf16>
    %c0_21 = arith.constant 0 : index
    %c0_22 = arith.constant 0 : index
    %58 = vector.load %arg9[%c0_21, %c0_22] : memref<256x6xbf16, #tpu.memory_space<vmem>>, vector<256x6xbf16>
    %cst_23 = arith.constant dense<0.000000e+00> : vector<2x6xf32>
    %59 = tpu.matmul %57, %58, %cst_23 {dimension_numbers = #tpu.dot_dimension_numbers<[1], [0], [0], [1], [0, 0, 1, 1], [], []>} : vector<2x256xbf16>, vector<256x6xbf16>, vector<2x6xf32> -> vector<2x6xf32>
    %c0_24 = arith.constant 0 : index
    %c0_25 = arith.constant 0 : index
    %60 = vector.load %arg10[%c0_24, %c0_25] : memref<1x6xf32, #tpu.memory_space<vmem>>, vector<1x6xf32>
    %61 = vector.broadcast %60 : vector<1x6xf32> to vector<2x6xf32>
    %62 = arith.addf %59, %61 : vector<2x6xf32>
    %c0_26 = arith.constant 0 : index
    %c0_27 = arith.constant 0 : index
    %63 = vector.load %arg11[%c0_26, %c0_27] : memref<2x6xf32, #tpu.memory_space<vmem>>, vector<2x6xf32>
    tpu.vector_store %arg11[%c0_26, %c0_27], %62 {strides = array<i32>} : memref<2x6xf32, #tpu.memory_space<vmem>>, vector<2x6xf32>,
    return
  }
  func.func @transform_0(%arg0: i32) -> (i32, i32) {
    %c0_i32 = arith.constant 0 : i32
    %c0_i32_0 = arith.constant 0 : i32
    %c0_i32_1 = arith.constant 0 : i32
    return %c0_i32, %c0_i32_0 : i32, i32
  }
  func.func @transform_1(%arg0: i32) -> (i32, i32) {
    %c0_i32 = arith.constant 0 : i32
    %c0_i32_0 = arith.constant 0 : i32
    %c0_i32_1 = arith.constant 0 : i32
    return %c0_i32, %c0_i32_0 : i32, i32
  }
  func.func @transform_2(%arg0: i32) -> (i32, i32) {
    %c0_i32 = arith.constant 0 : i32
    %c0_i32_0 = arith.constant 0 : i32
    %c0_i32_1 = arith.constant 0 : i32
    return %c0_i32, %c0_i32_0 : i32, i32
  }
  func.func @transform_3(%arg0: i32) -> (i32, i32) {
    %c0_i32 = arith.constant 0 : i32
    %c0_i32_0 = arith.constant 0 : i32
    %c0_i32_1 = arith.constant 0 : i32
    return %c0_i32, %c0_i32_0 : i32, i32
  }
  func.func @transform_4(%arg0: i32) -> (i32, i32) {
    %c0_i32 = arith.constant 0 : i32
    %c0_i32_0 = arith.constant 0 : i32
    %c0_i32_1 = arith.constant 0 : i32
    return %c0_i32, %c0_i32_0 : i32, i32
  }
  func.func @transform_5(%arg0: i32) -> (i32, i32) {
    %c0_i32 = arith.constant 0 : i32
    %c0_i32_0 = arith.constant 0 : i32
    %c0_i32_1 = arith.constant 0 : i32
    return %c0_i32, %c0_i32_0 : i32, i32
  }
  func.func @transform_7(%arg0: i32) -> (i32, i32) {
    %c0_i32 = arith.constant 0 : i32
    %c0_i32_0 = arith.constant 0 : i32
    %c0_i32_1 = arith.constant 0 : i32
    return %c0_i32, %c0_i32_0 : i32, i32
  }
  func.func @transform_8(%arg0: i32) -> (i32, i32) {
    %c0_i32 = arith.constant 0 : i32
    %c0_i32_0 = arith.constant 0 : i32
    %c0_i32_1 = arith.constant 0 : i32
    return %c0_i32, %c0_i32_0 : i32, i32
  }
  func.func @transform_9(%arg0: i32) -> (i32, i32) {
    %c0_i32 = arith.constant 0 : i32
    %c0_i32_0 = arith.constant 0 : i32
    %c0_i32_1 = arith.constant 0 : i32
    return %c0_i32, %c0_i32_0 : i32, i32
  }
  func.func @transform_10(%arg0: i32) -> (i32, i32) {
    %c0_i32 = arith.constant 0 : i32
    %c0_i32_0 = arith.constant 0 : i32
    %c0_i32_1 = arith.constant 0 : i32
    return %c0_i32, %c0_i32_0 : i32, i32
  }
}

</mosaic_0001>

<bundles_post_ra>
// kernel: conv_forward.2
= control target key start
LH: loop header
LB: loop body
LE: loop exit
PB: predicated region body
PF: predicated region fallthrough
CT: control target
= control target key end

     0   :  { %s9472_s1 = inlined_call_operand.vmem [shape: bf16[256,128], index: 1, kind: input, shape index: {}]   ;;  %s9473_s2 = inlined_call_operand.vmem [shape: f32[1,128], index: 2, kind: input, shape index: {}]   ;;  %s9474_s0 = inlined_call_operand.vmem [shape: bf16[2312,256], index: 0, kind: input, shape index: {}]   ;;  %s9475_s3 = inlined_call_operand.vmem [shape: bf16[2312,128], index: 3, kind: output, shape index: {}]  }
   0x1   :  { %v6019_v0 = vld [vmem:[%s9472_s1 + $0x38] sm:$0xff]  ;;  %v6018_v2 = vld [vmem:[%s9472_s1 + $0x30] sm:$0xff]  ;;  %v6017_v4 = vld [vmem:[%s9472_s1 + $0x28] sm:$0xff] }
   0x2   :  { %v6027_v1 = vld [vmem:[%s9472_s1 + $0x78] sm:$0xff]  ;;  %1882 = vmatpush.bf16.msra.mxu0 %v6019_v0  ;;  %6891 = vmatpush.bf16.msra.mxu2 %v6019_v0  ;;  %v6026_v3 = vld [vmem:[%s9472_s1 + $0x70] sm:$0xff]  ;;  %v6025_v5 = vld [vmem:[%s9472_s1 + $0x68] sm:$0xff] }
   0x3   :  { %2615 = vmatpush.bf16.msra.mxu1 %v6027_v1  ;;  %6899 = vmatpush.bf16.msra.mxu3 %v6027_v1  ;;  %v6016_v6 = vld [vmem:[%s9472_s1 + $0x20] sm:$0xff]  ;;  %v6015_v8 = vld [vmem:[%s9472_s1 + $0x18] sm:$0xff]  ;;  %v6014_v10 = vld [vmem:[%s9472_s1 + $0x10] sm:$0xff] }
   0x4   :  { %v6024_v7 = vld [vmem:[%s9472_s1 + $0x60] sm:$0xff]  ;;  %v6023_v9 = vld [vmem:[%s9472_s1 + $0x58] sm:$0xff]  ;;  %v6022_v11 = vld [vmem:[%s9472_s1 + $0x50] sm:$0xff] }
   0x5   :  { %v6013_v12 = vld [vmem:[%s9472_s1 + $0x8] sm:$0xff]  ;;  %v6012_v14 = vld [vmem:[%s9472_s1] sm:$0xff]  ;;  %v5870_v22 = vld [vmem:[%s9474_s0 + $0x494] sm:$0xf] }
   0x6   :  { %1883 = vmatpush.bf16.msra.mxu0 %v6018_v2  ;;  %6892 = vmatpush.bf16.msra.mxu2 %v6018_v2  ;;  %v6021_v13 = vld [vmem:[%s9472_s1 + $0x48] sm:$0xff]  ;;  %v6020_v15 = vld [vmem:[%s9472_s1 + $0x40] sm:$0xff]  ;;  %v5096_v23 = vld [vmem:[%s9474_s0 + $0x498] sm:$0xf0] }
   0x7   :  { %2616 = vmatpush.bf16.msra.mxu1 %v6026_v3  ;;  %6900 = vmatpush.bf16.msra.mxu3 %v6026_v3  ;;  %v4510_v16 = vld [vmem:[%s9474_s0] sm:$0xf]  ;;  %v5725_v17 = vld [vmem:[%s9474_s0 + $0x4] sm:$0xf0]  ;;  %v5724_v20 = vld [vmem:[%s9474_s0 + $0x4] sm:$0xf]  ;;  %v5099_v27 = vor.u32 %v5870_v22, %v5096_v23 }
   0x8   :  { %v5086_v18 = vld [vmem:[%s9474_s0 + $0x480] sm:$0xf]  ;;  %v5869_v19 = vld [vmem:[%s9474_s0 + $0x484] sm:$0xf0]  ;;  %v4512_v21 = vld [vmem:[%s9474_s0 + $0x8] sm:$0xf0]  ;;  %v4511_v24 = vor.u32 %v5725_v17, %v4510_v16 }
   0x9   :  { %v5087_v25 = vor.u32 %v5869_v19, %v5086_v18  ;;  %v4515_v26 = vor.u32 %v5724_v20, %v4512_v21  ;;  %v4518_v28 = vld [vmem:[%s9474_s0 + $0x10] sm:$0xf]  ;;  %v5727_v29 = vld [vmem:[%s9474_s0 + $0x14] sm:$0xf0]  ;;  %v5726_v32 = vld [vmem:[%s9474_s0 + $0x14] sm:$0xf] }
   0xa   :  { %1884 = vmatpush.bf16.msra.mxu0 %v6017_v4  ;;  %6893 = vmatpush.bf16.msra.mxu2 %v6017_v4  ;;  %v5094_v30 = vld [vmem:[%s9474_s0 + $0x490] sm:$0xf]  ;;  %v5871_v31 = vld [vmem:[%s9474_s0 + $0x494] sm:$0xf0]  ;;  %v4520_v33 = vld [vmem:[%s9474_s0 + $0x18] sm:$0xf0]  ;;  %v4519_v36 = vor.u32 %v5727_v29, %v4518_v28 }
   0xb   :  { %2617 = vmatpush.bf16.msra.mxu1 %v6025_v5  ;;  %6901 = vmatpush.bf16.msra.mxu3 %v6025_v5  ;;  %v5872_v34 = vld [vmem:[%s9474_s0 + $0x4a4] sm:$0xf]  ;;  %v5104_v35 = vld [vmem:[%s9474_s0 + $0x4a8] sm:$0xf0]  ;;  %v5095_v37 = vor.u32 %v5871_v31, %v5094_v30  ;;  %v4523_v38 = vor.u32 %v5726_v32, %v4520_v33  ;;  %v4526_v40 = vld [vmem:[%s9474_s0 + $0x20] sm:$0xf] }
   0xc   :  { %v5107_v39 = vor.u32 %v5872_v34, %v5104_v35  ;;  %v5729_v41 = vld [vmem:[%s9474_s0 + $0x24] sm:$0xf0]  ;;  %v5102_v42 = vld [vmem:[%s9474_s0 + $0x4a0] sm:$0xf]  ;;  %v5728_v44 = vld [vmem:[%s9474_s0 + $0x24] sm:$0xf] }
   0xd   :  { %v5873_v43 = vld [vmem:[%s9474_s0 + $0x4a4] sm:$0xf0]  ;;  %v4528_v45 = vld [vmem:[%s9474_s0 + $0x28] sm:$0xf0]  ;;  %v5874_v46 = vld [vmem:[%s9474_s0 + $0x4b4] sm:$0xf]  ;;  %v4527_v48 = vor.u32 %v5729_v41, %v4526_v40 }
   0xe   :  { %1885 = vmatpush.bf16.msra.mxu0 %v6016_v6  ;;  %6894 = vmatpush.bf16.msra.mxu2 %v6016_v6  ;;  %v5112_v47 = vld [vmem:[%s9474_s0 + $0x4b8] sm:$0xf0]  ;;  %v5103_v49 = vor.u32 %v5873_v43, %v5102_v42  ;;  %v4531_v50 = vor.u32 %v5728_v44, %v4528_v45  ;;  %v4534_v52 = vld [vmem:[%s9474_s0 + $0x30] sm:$0xf]  ;;  %v5731_v53 = vld [vmem:[%s9474_s0 + $0x34] sm:$0xf0] }
   0xf   :  { %2618 = vmatpush.bf16.msra.mxu1 %v6024_v7  ;;  %6902 = vmatpush.bf16.msra.mxu3 %v6024_v7  ;;  %v5115_v51 = vor.u32 %v5874_v46, %v5112_v47  ;;  %v5110_v54 = vld [vmem:[%s9474_s0 + $0x4b0] sm:$0xf]  ;;  %v5875_v55 = vld [vmem:[%s9474_s0 + $0x4b4] sm:$0xf0]  ;;  %v5730_v56 = vld [vmem:[%s9474_s0 + $0x34] sm:$0xf]  ;;  %v4535_v60 = vor.u32 %v5731_v53, %v4534_v52 }
  0x10   :  { %v4536_v57 = vld [vmem:[%s9474_s0 + $0x38] sm:$0xf0]  ;;  %v5876_v58 = vld [vmem:[%s9474_s0 + $0x4c4] sm:$0xf]  ;;  %v5120_v59 = vld [vmem:[%s9474_s0 + $0x4c8] sm:$0xf0]  ;;  %v5111_v61 = vor.u32 %v5875_v55, %v5110_v54 }
  0x11   :  { %v4539_v62 = vor.u32 %v5730_v56, %v4536_v57  ;;  %v5123_v63 = vor.u32 %v5876_v58, %v5120_v59  ;;  %v4542_v0 = vld [vmem:[%s9474_s0 + $0x40] sm:$0xf]  ;;  %v5733_v1 = vld [vmem:[%s9474_s0 + $0x44] sm:$0xf0]  ;;  %v5732_v4 = vld [vmem:[%s9474_s0 + $0x44] sm:$0xf] }
  0x12   :  { %1886 = vmatpush.bf16.msra.mxu0 %v6015_v8  ;;  %6895 = vmatpush.bf16.msra.mxu2 %v6015_v8  ;;  %v5118_v2 = vld [vmem:[%s9474_s0 + $0x4c0] sm:$0xf]  ;;  %v5877_v3 = vld [vmem:[%s9474_s0 + $0x4c4] sm:$0xf0]  ;;  %v4544_v5 = vld [vmem:[%s9474_s0 + $0x48] sm:$0xf0]  ;;  %v4543_v8 = vor.u32 %v5733_v1, %v4542_v0 }
  0x13   :  { %2619 = vmatpush.bf16.msra.mxu1 %v6023_v9  ;;  %6903 = vmatpush.bf16.msra.mxu3 %v6023_v9  ;;  %v5878_v6 = vld [vmem:[%s9474_s0 + $0x4d4] sm:$0xf]  ;;  %v5128_v7 = vld [vmem:[%s9474_s0 + $0x4d8] sm:$0xf0]  ;;  %v5119_v9 = vor.u32 %v5877_v3, %v5118_v2  ;;  %v5880_v18 = vld [vmem:[%s9474_s0 + $0x4e4] sm:$0xf] }
  0x14   :  { %v5734_v16 = vld [vmem:[%s9474_s0 + $0x54] sm:$0xf]  ;;  %v4552_v17 = vld [vmem:[%s9474_s0 + $0x58] sm:$0xf0]  ;;  %v5136_v19 = vld [vmem:[%s9474_s0 + $0x4e8] sm:$0xf0] }
  0x15   :  { %v4555_v22 = vor.u32 %v5734_v16, %v4552_v17  ;;  %v5139_v23 = vor.u32 %v5880_v18, %v5136_v19  ;;  %v5736_v28 = vld [vmem:[%s9474_s0 + $0x64] sm:$0xf]  ;;  %v4560_v29 = vld [vmem:[%s9474_s0 + $0x68] sm:$0xf0]  ;;  %v5882_v30 = vld [vmem:[%s9474_s0 + $0x4f4] sm:$0xf] }
  0x16   :  { %1887 = vmatpush.bf16.msra.mxu0 %v6014_v10  ;;  %6896 = vmatpush.bf16.msra.mxu2 %v6014_v10  ;;  %v4547_v10 = vor.u32 %v5732_v4, %v4544_v5  ;;  %v5144_v31 = vld [vmem:[%s9474_s0 + $0x4f8] sm:$0xf0]  ;;  %v4563_v34 = vor.u32 %v5736_v28, %v4560_v29  ;;  %v5738_v40 = vld [vmem:[%s9474_s0 + $0x74] sm:$0xf]  ;;  %v5884_v42 = vld [vmem:[%s9474_s0 + $0x504] sm:$0xf] }
  0x17   :  { %2620 = vmatpush.bf16.msra.mxu1 %v6022_v11  ;;  %6904 = vmatpush.bf16.msra.mxu3 %v6022_v11  ;;  %v5131_v11 = vor.u32 %v5878_v6, %v5128_v7  ;;  %v5147_v35 = vor.u32 %v5882_v30, %v5144_v31  ;;  %v4568_v41 = vld [vmem:[%s9474_s0 + $0x78] sm:$0xf0]  ;;  %v5152_v43 = vld [vmem:[%s9474_s0 + $0x508] sm:$0xf0]  ;;  %v5740_v52 = vld [vmem:[%s9474_s0 + $0x84] sm:$0xf] }
  0x18   :  { %v4571_v46 = vor.u32 %v5738_v40, %v4568_v41  ;;  %v5155_v47 = vor.u32 %v5884_v42, %v5152_v43  ;;  %v4576_v53 = vld [vmem:[%s9474_s0 + $0x88] sm:$0xf0]  ;;  %v5886_v54 = vld [vmem:[%s9474_s0 + $0x514] sm:$0xf]  ;;  %v5160_v55 = vld [vmem:[%s9474_s0 + $0x518] sm:$0xf0] }
  0x19   :  { %v7200_v56 = vld [vmem:[%s9473_s2] ss:$0 sm:$0xff]  ;;  %v4582_v6 = vld [vmem:[%s9474_s0 + $0x90] sm:$0xf]  ;;  %v5168_v16 = vld [vmem:[%s9474_s0 + $0x528] sm:$0xf0] }
  0x1a   :  { %1888 = vmatpush.bf16.msra.mxu0 %v6013_v12  ;;  %6897 = vmatpush.bf16.msra.mxu2 %v6013_v12  ;;  %v4550_v12 = vld [vmem:[%s9474_s0 + $0x50] sm:$0xf]  ;;  %v5166_v40 = vld [vmem:[%s9474_s0 + $0x520] sm:$0xf]  ;;  %v5889_v41 = vld [vmem:[%s9474_s0 + $0x524] sm:$0xf0] }
  0x1b   :  { %2621 = vmatpush.bf16.msra.mxu1 %v6021_v13  ;;  %6905 = vmatpush.bf16.msra.mxu3 %v6021_v13  ;;  %v5735_v13 = vld [vmem:[%s9474_s0 + $0x54] sm:$0xf0]  ;;  %v5744_v42 = vld [vmem:[%s9474_s0 + $0xa4] sm:$0xf]  ;;  %v4592_v43 = vld [vmem:[%s9474_s0 + $0xa8] sm:$0xf0] }
  0x1c   :  { %v4551_v20 = vor.u32 %v5735_v13, %v4550_v12  ;;  %v5742_v12 = vld [vmem:[%s9474_s0 + $0x94] sm:$0xf]  ;;  %v4584_v13 = vld [vmem:[%s9474_s0 + $0x98] sm:$0xf0] }
  0x1e   :  { %1889 = vmatpush.bf16.msra.mxu0 %v6012_v14  ;;  %6898 = vmatpush.bf16.msra.mxu2 %v6012_v14  ;;  %v5126_v14 = vld [vmem:[%s9474_s0 + $0x4d0] sm:$0xf] }
  0x1f   :  { %2622 = vmatpush.bf16.msra.mxu1 %v6020_v15  ;;  %6906 = vmatpush.bf16.msra.mxu3 %v6020_v15  ;;  %v5879_v15 = vld [vmem:[%s9474_s0 + $0x4d4] sm:$0xf0] }
  0x20   :  { %v5127_v21 = vor.u32 %v5879_v15, %v5126_v14  ;;  %v5888_v15 = vld [vmem:[%s9474_s0 + $0x524] sm:$0xf] }
  0x21   :  { %1890 = vmatmul.bf16.vlgmr.msra.gmra.mxu0 %v4511_v24  ;;  %2250 = vmatmul.bf16.vlgmr.msra.gmra.mxu2 %v5087_v25  ;;  %v4558_v24 = vld [vmem:[%s9474_s0 + $0x60] sm:$0xf]  ;;  %v5737_v25 = vld [vmem:[%s9474_s0 + $0x64] sm:$0xf0] }
  0x22   :  { %2623 = vmatmul.bf16.vlgmr.msra.gmra.mxu1 %v4515_v26  ;;  %2988 = vmatmul.bf16.vlgmr.msra.gmra.mxu3 %v5099_v27  ;;  %v5134_v26 = vld [vmem:[%s9474_s0 + $0x4e0] sm:$0xf]  ;;  %v5881_v27 = vld [vmem:[%s9474_s0 + $0x4e4] sm:$0xf0]  ;;  %v4559_v32 = vor.u32 %v5737_v25, %v4558_v24  ;;  %v4587_v24 = vor.u32 %v5742_v12, %v4584_v13  ;;  %v5171_v25 = vor.u32 %v5888_v15, %v5168_v16  ;;  %v4598_v12 = vld [vmem:[%s9474_s0 + $0xb0] sm:$0xf] }
  0x23   :  { %v5135_v33 = vor.u32 %v5881_v27, %v5134_v26  ;;  %v5747_v15 = vld [vmem:[%s9474_s0 + $0xb4] sm:$0xf0]  ;;  %v5174_v16 = vld [vmem:[%s9474_s0 + $0x530] sm:$0xf] }
  0x31   :  { %1895 = vmatmul.bf16.gmra.mxu0 %v4519_v36  ;;  %2255 = vmatmul.bf16.gmra.mxu2 %v5095_v37  ;;  %v4566_v36 = vld [vmem:[%s9474_s0 + $0x70] sm:$0xf]  ;;  %v5739_v37 = vld [vmem:[%s9474_s0 + $0x74] sm:$0xf0] }
  0x32   :  { %2628 = vmatmul.bf16.gmra.mxu1 %v4523_v38  ;;  %2993 = vmatmul.bf16.gmra.mxu3 %v5107_v39  ;;  %v5142_v38 = vld [vmem:[%s9474_s0 + $0x4f0] sm:$0xf]  ;;  %v5883_v39 = vld [vmem:[%s9474_s0 + $0x4f4] sm:$0xf0]  ;;  %v4567_v44 = vor.u32 %v5739_v37, %v4566_v36  ;;  %v4590_v36 = vld [vmem:[%s9474_s0 + $0xa0] sm:$0xf] }
  0x33   :  { %v5143_v45 = vor.u32 %v5883_v39, %v5142_v38  ;;  %v5745_v39 = vld [vmem:[%s9474_s0 + $0xa4] sm:$0xf0] }
  0x41   :  { %1900 = vmatmul.bf16.gmra.mxu0 %v4527_v48  ;;  %2260 = vmatmul.bf16.gmra.mxu2 %v5103_v49  ;;  %v4574_v48 = vld [vmem:[%s9474_s0 + $0x80] sm:$0xf]  ;;  %v5741_v49 = vld [vmem:[%s9474_s0 + $0x84] sm:$0xf0] }
  0x42   :  { %2633 = vmatmul.bf16.gmra.mxu1 %v4531_v50  ;;  %2998 = vmatmul.bf16.gmra.mxu3 %v5115_v51  ;;  %v5150_v50 = vld [vmem:[%s9474_s0 + $0x500] sm:$0xf]  ;;  %v5885_v51 = vld [vmem:[%s9474_s0 + $0x504] sm:$0xf0]  ;;  %v4575_v57 = vor.u32 %v5741_v49, %v4574_v48  ;;  %v4591_v49 = vor.u32 %v5745_v39, %v4590_v36 }
  0x43   :  { %v5151_v58 = vor.u32 %v5885_v51, %v5150_v50 }
  0x51   :  { %1905 = vmatmul.bf16.gmra.mxu0 %v4535_v60  ;;  %2265 = vmatmul.bf16.gmra.mxu2 %v5111_v61  ;;  %v4579_v60 = vor.u32 %v5740_v52, %v4576_v53  ;;  %v5163_v61 = vor.u32 %v5886_v54, %v5160_v55  ;;  %v5167_v53 = vor.u32 %v5889_v41, %v5166_v40 }
  0x52   :  { %2638 = vmatmul.bf16.gmra.mxu1 %v4539_v62  ;;  %3003 = vmatmul.bf16.gmra.mxu3 %v5123_v63 }
  0x61   :  { %1910 = vmatmul.bf16.gmra.mxu0 %v4543_v8  ;;  %2270 = vmatmul.bf16.gmra.mxu2 %v5119_v9  ;;  %v5743_v9 = vld [vmem:[%s9474_s0 + $0x94] sm:$0xf0] }
  0x62   :  { %2643 = vmatmul.bf16.gmra.mxu1 %v4547_v10  ;;  %3008 = vmatmul.bf16.gmra.mxu3 %v5131_v11  ;;  %v5158_v10 = vld [vmem:[%s9474_s0 + $0x510] sm:$0xf]  ;;  %v5887_v11 = vld [vmem:[%s9474_s0 + $0x514] sm:$0xf0] }
  0x71   :  { %1915 = vmatmul.bf16.gmra.mxu0 %v4551_v20  ;;  %2275 = vmatmul.bf16.gmra.mxu2 %v5127_v21  ;;  %v4583_v20 = vor.u32 %v5743_v9, %v4582_v6  ;;  %v5159_v21 = vor.u32 %v5887_v11, %v5158_v10 }
  0x72   :  { %2648 = vmatmul.bf16.gmra.mxu1 %v4555_v22  ;;  %3013 = vmatmul.bf16.gmra.mxu3 %v5139_v23 }
  0x81   :  { %1920 = vmatmul.bf16.gmra.mxu0 %v4559_v32  ;;  %2280 = vmatmul.bf16.gmra.mxu2 %v5135_v33 }
  0x82   :  { %2653 = vmatmul.bf16.gmra.mxu1 %v4563_v34  ;;  %3018 = vmatmul.bf16.gmra.mxu3 %v5147_v35 }
  0x91   :  { %1925 = vmatmul.bf16.gmra.mxu0 %v4567_v44  ;;  %2285 = vmatmul.bf16.gmra.mxu2 %v5143_v45 }
  0x92   :  { %2658 = vmatmul.bf16.gmra.mxu1 %v4571_v46  ;;  %3023 = vmatmul.bf16.gmra.mxu3 %v5155_v47  ;;  %v5890_v46 = vld [vmem:[%s9474_s0 + $0x534] sm:$0xf]  ;;  %v5176_v47 = vld [vmem:[%s9474_s0 + $0x538] sm:$0xf0] }
  0x9e   :  { %v1891_v59 = vpop.f32.mrf.mxu0 }
  0x9f   :  { %v2624_v62 = vpop.f32.mrf.mxu1  ;;  %v1892_v63 = vadd.f32 %v7200_v56, %v1891_v59 }
  0xa1   :  { %1930 = vmatmul.bf16.gmra.mxu0 %v4575_v57  ;;  %2290 = vmatmul.bf16.gmra.mxu2 %v5151_v58  ;;  %v2625_v1 = vadd.f32 %v2624_v62, %v1892_v63  ;;  %v4595_v57 = vor.u32 %v5744_v42, %v4592_v43  ;;  %v5179_v58 = vor.u32 %v5890_v46, %v5176_v47 }
  0xa2   :  { %2663 = vmatmul.bf16.gmra.mxu1 %v4579_v60  ;;  %3028 = vmatmul.bf16.gmra.mxu3 %v5163_v61 }
  0xa3   :  { %v3348_v7 = vmul.f32 0.01, %v2625_v1 }
  0xa4   :  { %v7203_v0 = vpop.f32.mrf.mxu2 }
  0xa5   :  { %v2989_v2 = vpop.f32.mrf.mxu3  ;;  %v3637_v18 = vmax.f32 %v2625_v1, %v3348_v7 }
  0xa6   :  { %v1893_v3 = vpop.f32.mrf.mxu0 }
  0xa7   :  { %v1894_v4 = vadd.f32 %v7200_v56, %v1893_v3  ;;  %v2626_v5 = vpop.f32.mrf.mxu1 }
  0xa9   :  { %v2627_v8 = vadd.f32 %v2626_v5, %v1894_v4 }
  0xab   :  { %v3349_v14 = vmul.f32 0.01, %v2627_v8 }
  0xac   :  { %v7230_v17 = vpop.f32.mrf.mxu2 }
  0xad   :  { %v3638_v19 = vmax.f32 %v2627_v8, %v3349_v14  ;;  %v2991_v22 = vpop.f32.mrf.mxu3 }
  0xae   :  { %v1896_v23 = vpop.f32.mrf.mxu0 }
  0xaf   :  { %v6031_v26 = vpack.c.bf16 %v3638_v19, %v3637_v18  ;;  %v2629_v27 = vpop.f32.mrf.mxu1  ;;  %v1897_v28 = vadd.f32 %v7200_v56, %v1896_v23  ;;  %v5891_v18 = vld [vmem:[%s9474_s0 + $0x534] sm:$0xf0]  ;;  %v5746_v19 = vld [vmem:[%s9474_s0 + $0xb4] sm:$0xf]  ;;  %v5892_v23 = vld [vmem:[%s9474_s0 + $0x544] sm:$0xf] }
  0xb1   :  { %6032 = vst [vmem:[%s9475_s3] sm:$0xff] %v6031_v26   ;;  %1935 = vmatmul.bf16.gmra.mxu0 %v4583_v20  ;;  %2295 = vmatmul.bf16.gmra.mxu2 %v5159_v21  ;;  %v2630_v30 = vadd.f32 %v2629_v27, %v1897_v28  ;;  %v4600_v20 = vld [vmem:[%s9474_s0 + $0xb8] sm:$0xf0]  ;;  %v4599_v26 = vor.u32 %v5747_v15, %v4598_v12 }
  0xb2   :  { %2668 = vmatmul.bf16.gmra.mxu1 %v4587_v24  ;;  %3033 = vmatmul.bf16.gmra.mxu3 %v5171_v25  ;;  %v5184_v24 = vld [vmem:[%s9474_s0 + $0x548] sm:$0xf0] }
  0xb3   :  { %v3350_v37 = vmul.f32 0.01, %v2630_v30 }
  0xb4   :  { %v2256_v29 = vpop.f32.mrf.mxu2 }
  0xb5   :  { %v2994_v31 = vpop.f32.mrf.mxu3  ;;  %v2257_v33 = vadd.f32 %v7200_v56, %v2256_v29  ;;  %v3639_v50 = vmax.f32 %v2630_v30, %v3350_v37  ;;  %v5175_v30 = vor.u32 %v5891_v18, %v5174_v16 }
  0xb6   :  { %v1898_v32 = vpop.f32.mrf.mxu0 }
  0xb7   :  { %v1899_v34 = vadd.f32 %v7200_v56, %v1898_v32  ;;  %v2631_v35 = vpop.f32.mrf.mxu1  ;;  %v2990_v44 = vadd.f32 %v2989_v2, %v2257_v33 }
  0xb9   :  { %v2632_v38 = vadd.f32 %v2631_v35, %v1899_v34  ;;  %v3494_v59 = vmul.f32 0.01, %v2990_v44  ;;  %v4603_v34 = vor.u32 %v5746_v19, %v4600_v20 }
  0xbb   :  { %v3351_v45 = vmul.f32 0.01, %v2632_v38  ;;  %v3783_v2 = vmax.f32 %v2990_v44, %v3494_v59  ;;  %v4608_v59 = vld [vmem:[%s9474_s0 + $0xc8] sm:$0xf0] }
  0xbc   :  { %v2258_v48 = vpop.f32.mrf.mxu2 }
  0xbd   :  { %v3640_v51 = vmax.f32 %v2632_v38, %v3351_v45  ;;  %v2259_v52 = vadd.f32 %v7200_v56, %v2258_v48  ;;  %v2996_v54 = vpop.f32.mrf.mxu3 }
  0xbe   :  { %v1901_v55 = vpop.f32.mrf.mxu0 }
  0xbf   :  { %v6036_v60 = vpack.c.bf16 %v3640_v51, %v3639_v50  ;;  %v2992_v61 = vadd.f32 %v2991_v22, %v2259_v52  ;;  %v2634_v62 = vpop.f32.mrf.mxu1  ;;  %v1902_v1 = vadd.f32 %v7200_v56, %v1901_v55  ;;  %v4606_v51 = vld [vmem:[%s9474_s0 + $0xc0] sm:$0xf] }
  0xc0   :  { %v5182_v55 = vld [vmem:[%s9474_s0 + $0x540] sm:$0xf] }
  0xc1   :  { %6748 = vst [vmem:[%s9475_s3 + $0x8] sm:$0xff] %v6036_v60   ;;  %v3495_v63 = vmul.f32 0.01, %v2992_v61  ;;  %1940 = vmatmul.bf16.gmra.mxu0 %v4591_v49  ;;  %2300 = vmatmul.bf16.gmra.mxu2 %v5167_v53  ;;  %v2635_v6 = vadd.f32 %v2634_v62, %v1902_v1  ;;  %v5894_v62 = vld [vmem:[%s9474_s0 + $0x554] sm:$0xf] }
  0xc2   :  { %2673 = vmatmul.bf16.gmra.mxu1 %v4595_v57  ;;  %3038 = vmatmul.bf16.gmra.mxu3 %v5179_v58  ;;  %v5893_v57 = vld [vmem:[%s9474_s0 + $0x544] sm:$0xf0]  ;;  %v5748_v58 = vld [vmem:[%s9474_s0 + $0xc4] sm:$0xf] }
  0xc3   :  { %v3784_v3 = vmax.f32 %v2992_v61, %v3495_v63  ;;  %v3352_v13 = vmul.f32 0.01, %v2635_v6  ;;  %v5192_v63 = vld [vmem:[%s9474_s0 + $0x558] sm:$0xf0] }
  0xc4   :  { %v2261_v4 = vpop.f32.mrf.mxu2 }
  0xc5   :  { %v6396_v5 = vpack.c.bf16 %v3784_v3, %v3783_v2  ;;  %v2999_v7 = vpop.f32.mrf.mxu3  ;;  %v2262_v9 = vadd.f32 %v7200_v56, %v2261_v4  ;;  %v3641_v27 = vmax.f32 %v2635_v6, %v3352_v13  ;;  %v5183_v6 = vor.u32 %v5893_v57, %v5182_v55 }
  0xc6   :  { %v1903_v8 = vpop.f32.mrf.mxu0 }
  0xc7   :  { %6820 = vst [vmem:[%s9475_s3 + $0x248] sm:$0xff] %v6396_v5   ;;  %v1904_v10 = vadd.f32 %v7200_v56, %v1903_v8  ;;  %v2636_v11 = vpop.f32.mrf.mxu1  ;;  %v2995_v21 = vadd.f32 %v2994_v31, %v2262_v9  ;;  %v5187_v31 = vor.u32 %v5892_v23, %v5184_v24 }
  0xc9   :  { %v2637_v14 = vadd.f32 %v2636_v11, %v1904_v10  ;;  %v3496_v35 = vmul.f32 0.01, %v2995_v21  ;;  %v4611_v10 = vor.u32 %v5748_v58, %v4608_v59 }
  0xcb   :  { %v3353_v22 = vmul.f32 0.01, %v2637_v14  ;;  %v3785_v41 = vmax.f32 %v2995_v21, %v3496_v35  ;;  %v4616_v35 = vld [vmem:[%s9474_s0 + $0xd8] sm:$0xf0] }
  0xcc   :  { %v2263_v25 = vpop.f32.mrf.mxu2 }
  0xcd   :  { %v3642_v28 = vmax.f32 %v2637_v14, %v3353_v22  ;;  %v2264_v29 = vadd.f32 %v7200_v56, %v2263_v25  ;;  %v3001_v32 = vpop.f32.mrf.mxu3 }
  0xce   :  { %v1906_v33 = vpop.f32.mrf.mxu0 }
  0xcf   :  { %v6041_v36 = vpack.c.bf16 %v3642_v28, %v3641_v27  ;;  %v2997_v37 = vadd.f32 %v2996_v54, %v2264_v29  ;;  %v2639_v38 = vpop.f32.mrf.mxu1  ;;  %v1907_v40 = vadd.f32 %v7200_v56, %v1906_v33  ;;  %v5749_v54 = vld [vmem:[%s9474_s0 + $0xc4] sm:$0xf0]  ;;  %v4614_v28 = vld [vmem:[%s9474_s0 + $0xd0] sm:$0xf] }
  0xd0   :  { %v4607_v2 = vor.u32 %v5749_v54, %v4606_v51  ;;  %v5190_v33 = vld [vmem:[%s9474_s0 + $0x550] sm:$0xf] }
  0xd1   :  { %6749 = vst [vmem:[%s9475_s3 + $0x10] sm:$0xff] %v6041_v36   ;;  %v3497_v39 = vmul.f32 0.01, %v2997_v37  ;;  %1945 = vmatmul.bf16.gmra.mxu0 %v4599_v26  ;;  %2305 = vmatmul.bf16.gmra.mxu2 %v5175_v30  ;;  %v2640_v45 = vadd.f32 %v2639_v38, %v1907_v40  ;;  %v5896_v38 = vld [vmem:[%s9474_s0 + $0x564] sm:$0xf] }
  0xd2   :  { %2678 = vmatmul.bf16.gmra.mxu1 %v4603_v34  ;;  %3043 = vmatmul.bf16.gmra.mxu3 %v5187_v31  ;;  %v5895_v34 = vld [vmem:[%s9474_s0 + $0x554] sm:$0xf0]  ;;  %v5750_v31 = vld [vmem:[%s9474_s0 + $0xd4] sm:$0xf] }
  0xd3   :  { %v3786_v42 = vmax.f32 %v2997_v37, %v3497_v39  ;;  %v3354_v52 = vmul.f32 0.01, %v2640_v45  ;;  %v5200_v39 = vld [vmem:[%s9474_s0 + $0x568] sm:$0xf0] }
  0xd4   :  { %v2266_v43 = vpop.f32.mrf.mxu2 }
  0xd5   :  { %v6401_v44 = vpack.c.bf16 %v3786_v42, %v3785_v41  ;;  %v3004_v46 = vpop.f32.mrf.mxu3  ;;  %v2267_v48 = vadd.f32 %v7200_v56, %v2266_v43  ;;  %v3643_v3 = vmax.f32 %v2640_v45, %v3354_v52  ;;  %v5191_v45 = vor.u32 %v5895_v34, %v5190_v33 }
  0xd6   :  { %v1908_v47 = vpop.f32.mrf.mxu0 }
  0xd7   :  { %6821 = vst [vmem:[%s9475_s3 + $0x250] sm:$0xff] %v6401_v44   ;;  %v1909_v49 = vadd.f32 %v7200_v56, %v1908_v47  ;;  %v2641_v50 = vpop.f32.mrf.mxu1  ;;  %v3000_v60 = vadd.f32 %v2999_v7, %v2267_v48  ;;  %v5195_v7 = vor.u32 %v5894_v62, %v5192_v63 }
  0xd9   :  { %v2642_v53 = vadd.f32 %v2641_v50, %v1909_v49  ;;  %v3498_v11 = vmul.f32 0.01, %v3000_v60  ;;  %v4619_v49 = vor.u32 %v5750_v31, %v4616_v35 }
  0xdb   :  { %v3355_v61 = vmul.f32 0.01, %v2642_v53  ;;  %v3787_v18 = vmax.f32 %v3000_v60, %v3498_v11  ;;  %v4624_v11 = vld [vmem:[%s9474_s0 + $0xe8] sm:$0xf0] }
  0xdc   :  { %v2268_v1 = vpop.f32.mrf.mxu2 }
  0xdd   :  { %v3644_v4 = vmax.f32 %v2642_v53, %v3355_v61  ;;  %v2269_v5 = vadd.f32 %v7200_v56, %v2268_v1  ;;  %v3006_v8 = vpop.f32.mrf.mxu3 }
  0xde   :  { %v1911_v9 = vpop.f32.mrf.mxu0 }
  0xdf   :  { %v6046_v12 = vpack.c.bf16 %v3644_v4, %v3643_v3  ;;  %v3002_v13 = vadd.f32 %v3001_v32, %v2269_v5  ;;  %v2644_v14 = vpop.f32.mrf.mxu1  ;;  %v1912_v16 = vadd.f32 %v7200_v56, %v1911_v9  ;;  %v5751_v32 = vld [vmem:[%s9474_s0 + $0xd4] sm:$0xf0]  ;;  %v4622_v4 = vld [vmem:[%s9474_s0 + $0xe0] sm:$0xf] }
  0xe0   :  { %v4615_v41 = vor.u32 %v5751_v32, %v4614_v28  ;;  %v5198_v9 = vld [vmem:[%s9474_s0 + $0x560] sm:$0xf] }
  0xe1   :  { %6750 = vst [vmem:[%s9475_s3 + $0x18] sm:$0xff] %v6046_v12   ;;  %v3499_v15 = vmul.f32 0.01, %v3002_v13  ;;  %1950 = vmatmul.bf16.gmra.mxu0 %v4607_v2  ;;  %2310 = vmatmul.bf16.gmra.mxu2 %v5183_v6  ;;  %v2645_v22 = vadd.f32 %v2644_v14, %v1912_v16  ;;  %v5898_v14 = vld [vmem:[%s9474_s0 + $0x574] sm:$0xf] }
  0xe2   :  { %2683 = vmatmul.bf16.gmra.mxu1 %v4611_v10  ;;  %3048 = vmatmul.bf16.gmra.mxu3 %v5195_v7  ;;  %v5897_v10 = vld [vmem:[%s9474_s0 + $0x564] sm:$0xf0]  ;;  %v5752_v7 = vld [vmem:[%s9474_s0 + $0xe4] sm:$0xf] }
  0xe3   :  { %v3788_v19 = vmax.f32 %v3002_v13, %v3499_v15  ;;  %v3356_v29 = vmul.f32 0.01, %v2645_v22  ;;  %v5208_v15 = vld [vmem:[%s9474_s0 + $0x578] sm:$0xf0] }
  0xe4   :  { %v2271_v20 = vpop.f32.mrf.mxu2 }
  0xe5   :  { %v6406_v21 = vpack.c.bf16 %v3788_v19, %v3787_v18  ;;  %v3009_v23 = vpop.f32.mrf.mxu3  ;;  %v2272_v25 = vadd.f32 %v7200_v56, %v2271_v20  ;;  %v3645_v42 = vmax.f32 %v2645_v22, %v3356_v29  ;;  %v5199_v22 = vor.u32 %v5897_v10, %v5198_v9 }
  0xe6   :  { %v1913_v24 = vpop.f32.mrf.mxu0 }
  0xe7   :  { %6822 = vst [vmem:[%s9475_s3 + $0x258] sm:$0xff] %v6406_v21   ;;  %v1914_v26 = vadd.f32 %v7200_v56, %v1913_v24  ;;  %v2646_v27 = vpop.f32.mrf.mxu1  ;;  %v3005_v36 = vadd.f32 %v3004_v46, %v2272_v25  ;;  %v5203_v46 = vor.u32 %v5896_v38, %v5200_v39 }
  0xe9   :  { %v2647_v30 = vadd.f32 %v2646_v27, %v1914_v26  ;;  %v3500_v50 = vmul.f32 0.01, %v3005_v36  ;;  %v4627_v26 = vor.u32 %v5752_v7, %v4624_v11 }
  0xeb   :  { %v3357_v37 = vmul.f32 0.01, %v2647_v30  ;;  %v3789_v57 = vmax.f32 %v3005_v36, %v3500_v50  ;;  %v4632_v50 = vld [vmem:[%s9474_s0 + $0xf8] sm:$0xf0] }
  0xec   :  { %v2273_v40 = vpop.f32.mrf.mxu2 }
  0xed   :  { %v3646_v43 = vmax.f32 %v2647_v30, %v3357_v37  ;;  %v2274_v44 = vadd.f32 %v7200_v56, %v2273_v40  ;;  %v3011_v47 = vpop.f32.mrf.mxu3 }
  0xee   :  { %v1916_v48 = vpop.f32.mrf.mxu0 }
  0xef   :  { %v6051_v51 = vpack.c.bf16 %v3646_v43, %v3645_v42  ;;  %v3007_v52 = vadd.f32 %v3006_v8, %v2274_v44  ;;  %v2649_v53 = vpop.f32.mrf.mxu1  ;;  %v1917_v55 = vadd.f32 %v7200_v56, %v1916_v48  ;;  %v5753_v8 = vld [vmem:[%s9474_s0 + $0xe4] sm:$0xf0]  ;;  %v4630_v43 = vld [vmem:[%s9474_s0 + $0xf0] sm:$0xf] }
  0xf0   :  { %v4623_v18 = vor.u32 %v5753_v8, %v4622_v4  ;;  %v5206_v48 = vld [vmem:[%s9474_s0 + $0x570] sm:$0xf] }
  0xf1   :  { %6751 = vst [vmem:[%s9475_s3 + $0x20] sm:$0xff] %v6051_v51   ;;  %v3501_v54 = vmul.f32 0.01, %v3007_v52  ;;  %1955 = vmatmul.bf16.gmra.mxu0 %v4615_v41  ;;  %2315 = vmatmul.bf16.gmra.mxu2 %v5191_v45  ;;  %v2650_v61 = vadd.f32 %v2649_v53, %v1917_v55  ;;  %v5900_v53 = vld [vmem:[%s9474_s0 + $0x584] sm:$0xf] }
  0xf2   :  { %2688 = vmatmul.bf16.gmra.mxu1 %v4619_v49  ;;  %3053 = vmatmul.bf16.gmra.mxu3 %v5203_v46  ;;  %v5899_v49 = vld [vmem:[%s9474_s0 + $0x574] sm:$0xf0]  ;;  %v5754_v46 = vld [vmem:[%s9474_s0 + $0xf4] sm:$0xf] }
  0xf3   :  { %v3790_v58 = vmax.f32 %v3007_v52, %v3501_v54  ;;  %v3358_v5 = vmul.f32 0.01, %v2650_v61  ;;  %v5216_v54 = vld [vmem:[%s9474_s0 + $0x588] sm:$0xf0] }
  0xf4   :  { %v2276_v59 = vpop.f32.mrf.mxu2 }
  0xf5   :  { %v6411_v60 = vpack.c.bf16 %v3790_v58, %v3789_v57  ;;  %v3014_v62 = vpop.f32.mrf.mxu3  ;;  %v2277_v1 = vadd.f32 %v7200_v56, %v2276_v59  ;;  %v3647_v19 = vmax.f32 %v2650_v61, %v3358_v5  ;;  %v5207_v61 = vor.u32 %v5899_v49, %v5206_v48 }
  0xf6   :  { %v1918_v63 = vpop.f32.mrf.mxu0 }
  0xf7   :  { %6823 = vst [vmem:[%s9475_s3 + $0x260] sm:$0xff] %v6411_v60   ;;  %v1919_v2 = vadd.f32 %v7200_v56, %v1918_v63  ;;  %v2651_v3 = vpop.f32.mrf.mxu1  ;;  %v3010_v12 = vadd.f32 %v3009_v23, %v2277_v1  ;;  %v5211_v23 = vor.u32 %v5898_v14, %v5208_v15 }
  0xf9   :  { %v2652_v6 = vadd.f32 %v2651_v3, %v1919_v2  ;;  %v3502_v27 = vmul.f32 0.01, %v3010_v12  ;;  %v4635_v2 = vor.u32 %v5754_v46, %v4632_v50 }
  0xfb   :  { %v3359_v13 = vmul.f32 0.01, %v2652_v6  ;;  %v3791_v34 = vmax.f32 %v3010_v12, %v3502_v27  ;;  %v4640_v27 = vld [vmem:[%s9474_s0 + $0x108] sm:$0xf0] }
  0xfc   :  { %v2278_v16 = vpop.f32.mrf.mxu2 }
  0xfd   :  { %v3648_v20 = vmax.f32 %v2652_v6, %v3359_v13  ;;  %v2279_v21 = vadd.f32 %v7200_v56, %v2278_v16  ;;  %v3016_v24 = vpop.f32.mrf.mxu3 }
  0xfe   :  { %v1921_v25 = vpop.f32.mrf.mxu0 }
  0xff   :  { %v6056_v28 = vpack.c.bf16 %v3648_v20, %v3647_v19  ;;  %v3012_v29 = vadd.f32 %v3011_v47, %v2279_v21  ;;  %v2654_v30 = vpop.f32.mrf.mxu1  ;;  %v1922_v33 = vadd.f32 %v7200_v56, %v1921_v25  ;;  %v5755_v47 = vld [vmem:[%s9474_s0 + $0xf4] sm:$0xf0]  ;;  %v4638_v20 = vld [vmem:[%s9474_s0 + $0x100] sm:$0xf] }
 0x100   :  { %v4631_v57 = vor.u32 %v5755_v47, %v4630_v43  ;;  %v5214_v25 = vld [vmem:[%s9474_s0 + $0x580] sm:$0xf] }
 0x101   :  { %6752 = vst [vmem:[%s9475_s3 + $0x28] sm:$0xff] %v6056_v28   ;;  %v3503_v32 = vmul.f32 0.01, %v3012_v29  ;;  %1960 = vmatmul.bf16.gmra.mxu0 %v4623_v18  ;;  %2320 = vmatmul.bf16.gmra.mxu2 %v5199_v22  ;;  %v2655_v37 = vadd.f32 %v2654_v30, %v1922_v33  ;;  %v5902_v30 = vld [vmem:[%s9474_s0 + $0x594] sm:$0xf] }
 0x102   :  { %2693 = vmatmul.bf16.gmra.mxu1 %v4627_v26  ;;  %3058 = vmatmul.bf16.gmra.mxu3 %v5211_v23  ;;  %v5901_v26 = vld [vmem:[%s9474_s0 + $0x584] sm:$0xf0]  ;;  %v5756_v23 = vld [vmem:[%s9474_s0 + $0x104] sm:$0xf] }
 0x103   :  { %v3792_v31 = vmax.f32 %v3012_v29, %v3503_v32  ;;  %v3360_v44 = vmul.f32 0.01, %v2655_v37  ;;  %v5224_v32 = vld [vmem:[%s9474_s0 + $0x598] sm:$0xf0] }
 0x104   :  { %v2281_v35 = vpop.f32.mrf.mxu2 }
 0x105   :  { %v6416_v36 = vpack.c.bf16 %v3792_v31, %v3791_v34  ;;  %v3019_v38 = vpop.f32.mrf.mxu3  ;;  %v2282_v40 = vadd.f32 %v7200_v56, %v2281_v35  ;;  %v3649_v58 = vmax.f32 %v2655_v37, %v3360_v44  ;;  %v5215_v37 = vor.u32 %v5901_v26, %v5214_v25 }
 0x106   :  { %v1923_v39 = vpop.f32.mrf.mxu0 }
 0x107   :  { %6824 = vst [vmem:[%s9475_s3 + $0x268] sm:$0xff] %v6416_v36   ;;  %v1924_v41 = vadd.f32 %v7200_v56, %v1923_v39  ;;  %v2656_v42 = vpop.f32.mrf.mxu1  ;;  %v3015_v51 = vadd.f32 %v3014_v62, %v2282_v40  ;;  %v5219_v62 = vor.u32 %v5900_v53, %v5216_v54 }
 0x109   :  { %v2657_v45 = vadd.f32 %v2656_v42, %v1924_v41  ;;  %v3504_v3 = vmul.f32 0.01, %v3015_v51  ;;  %v4643_v41 = vor.u32 %v5756_v23, %v4640_v27 }
 0x10b   :  { %v3361_v52 = vmul.f32 0.01, %v2657_v45  ;;  %v3793_v10 = vmax.f32 %v3015_v51, %v3504_v3  ;;  %v4648_v3 = vld [vmem:[%s9474_s0 + $0x118] sm:$0xf0] }
 0x10c   :  { %v2283_v55 = vpop.f32.mrf.mxu2 }
 0x10d   :  { %v3650_v59 = vmax.f32 %v2657_v45, %v3361_v52  ;;  %v2284_v60 = vadd.f32 %v7200_v56, %v2283_v55  ;;  %v3021_v63 = vpop.f32.mrf.mxu3 }
 0x10e   :  { %v1926_v1 = vpop.f32.mrf.mxu0 }
 0x10f   :  { %v6061_v4 = vpack.c.bf16 %v3650_v59, %v3649_v58  ;;  %v3017_v5 = vadd.f32 %v3016_v24, %v2284_v60  ;;  %v2659_v6 = vpop.f32.mrf.mxu1  ;;  %v1927_v9 = vadd.f32 %v7200_v56, %v1926_v1  ;;  %v5757_v24 = vld [vmem:[%s9474_s0 + $0x104] sm:$0xf0]  ;;  %v4646_v59 = vld [vmem:[%s9474_s0 + $0x110] sm:$0xf] }
 0x110   :  { %v4639_v34 = vor.u32 %v5757_v24, %v4638_v20  ;;  %v5222_v1 = vld [vmem:[%s9474_s0 + $0x590] sm:$0xf] }
 0x111   :  { %6753 = vst [vmem:[%s9475_s3 + $0x30] sm:$0xff] %v6061_v4   ;;  %v3505_v8 = vmul.f32 0.01, %v3017_v5  ;;  %1965 = vmatmul.bf16.gmra.mxu0 %v4631_v57  ;;  %2325 = vmatmul.bf16.gmra.mxu2 %v5207_v61  ;;  %v2660_v13 = vadd.f32 %v2659_v6, %v1927_v9  ;;  %v5904_v6 = vld [vmem:[%s9474_s0 + $0x5a4] sm:$0xf] }
 0x112   :  { %2698 = vmatmul.bf16.gmra.mxu1 %v4635_v2  ;;  %3063 = vmatmul.bf16.gmra.mxu3 %v5219_v62  ;;  %v5903_v2 = vld [vmem:[%s9474_s0 + $0x594] sm:$0xf0]  ;;  %v5758_v62 = vld [vmem:[%s9474_s0 + $0x114] sm:$0xf] }
 0x113   :  { %v3794_v7 = vmax.f32 %v3017_v5, %v3505_v8  ;;  %v3362_v21 = vmul.f32 0.01, %v2660_v13  ;;  %v5232_v8 = vld [vmem:[%s9474_s0 + $0x5a8] sm:$0xf0] }
 0x114   :  { %v2286_v11 = vpop.f32.mrf.mxu2 }
 0x115   :  { %v6421_v12 = vpack.c.bf16 %v3794_v7, %v3793_v10  ;;  %v3024_v14 = vpop.f32.mrf.mxu3  ;;  %v2287_v16 = vadd.f32 %v7200_v56, %v2286_v11  ;;  %v3651_v31 = vmax.f32 %v2660_v13, %v3362_v21  ;;  %v5223_v13 = vor.u32 %v5903_v2, %v5222_v1 }
 0x116   :  { %v1928_v15 = vpop.f32.mrf.mxu0 }
 0x117   :  { %6825 = vst [vmem:[%s9475_s3 + $0x270] sm:$0xff] %v6421_v12   ;;  %v1929_v18 = vadd.f32 %v7200_v56, %v1928_v15  ;;  %v2661_v19 = vpop.f32.mrf.mxu1  ;;  %v3020_v28 = vadd.f32 %v3019_v38, %v2287_v16  ;;  %v5227_v38 = vor.u32 %v5902_v30, %v5224_v32 }
 0x119   :  { %v2662_v22 = vadd.f32 %v2661_v19, %v1929_v18  ;;  %v3506_v42 = vmul.f32 0.01, %v3020_v28  ;;  %v4651_v18 = vor.u32 %v5758_v62, %v4648_v3 }
 0x11b   :  { %v3363_v29 = vmul.f32 0.01, %v2662_v22  ;;  %v3795_v49 = vmax.f32 %v3020_v28, %v3506_v42  ;;  %v4656_v42 = vld [vmem:[%s9474_s0 + $0x128] sm:$0xf0] }
 0x11c   :  { %v2288_v33 = vpop.f32.mrf.mxu2 }
 0x11d   :  { %v3652_v35 = vmax.f32 %v2662_v22, %v3363_v29  ;;  %v2289_v36 = vadd.f32 %v7200_v56, %v2288_v33  ;;  %v3026_v39 = vpop.f32.mrf.mxu3 }
 0x11e   :  { %v1931_v40 = vpop.f32.mrf.mxu0 }
 0x11f   :  { %v6066_v43 = vpack.c.bf16 %v3652_v35, %v3651_v31  ;;  %v3022_v44 = vadd.f32 %v3021_v63, %v2289_v36  ;;  %v2664_v45 = vpop.f32.mrf.mxu1  ;;  %v1932_v48 = vadd.f32 %v7200_v56, %v1931_v40  ;;  %v5759_v63 = vld [vmem:[%s9474_s0 + $0x114] sm:$0xf0]  ;;  %v4654_v35 = vld [vmem:[%s9474_s0 + $0x120] sm:$0xf] }
 0x120   :  { %v4647_v10 = vor.u32 %v5759_v63, %v4646_v59  ;;  %v5230_v40 = vld [vmem:[%s9474_s0 + $0x5a0] sm:$0xf] }
 0x121   :  { %6754 = vst [vmem:[%s9475_s3 + $0x38] sm:$0xff] %v6066_v43   ;;  %v3507_v47 = vmul.f32 0.01, %v3022_v44  ;;  %1970 = vmatmul.bf16.gmra.mxu0 %v4639_v34  ;;  %2330 = vmatmul.bf16.gmra.mxu2 %v5215_v37  ;;  %v2665_v52 = vadd.f32 %v2664_v45, %v1932_v48  ;;  %v5906_v45 = vld [vmem:[%s9474_s0 + $0x5b4] sm:$0xf] }
 0x122   :  { %2703 = vmatmul.bf16.gmra.mxu1 %v4643_v41  ;;  %3068 = vmatmul.bf16.gmra.mxu3 %v5227_v38  ;;  %v5905_v41 = vld [vmem:[%s9474_s0 + $0x5a4] sm:$0xf0]  ;;  %v5760_v38 = vld [vmem:[%s9474_s0 + $0x124] sm:$0xf] }
 0x123   :  { %v3796_v46 = vmax.f32 %v3022_v44, %v3507_v47  ;;  %v3364_v60 = vmul.f32 0.01, %v2665_v52  ;;  %v5240_v47 = vld [vmem:[%s9474_s0 + $0x5b8] sm:$0xf0] }
 0x124   :  { %v2291_v50 = vpop.f32.mrf.mxu2 }
 0x125   :  { %v6426_v51 = vpack.c.bf16 %v3796_v46, %v3795_v49  ;;  %v3029_v53 = vpop.f32.mrf.mxu3  ;;  %v2292_v55 = vadd.f32 %v7200_v56, %v2291_v50  ;;  %v3653_v7 = vmax.f32 %v2665_v52, %v3364_v60  ;;  %v5231_v52 = vor.u32 %v5905_v41, %v5230_v40 }
 0x126   :  { %v1933_v54 = vpop.f32.mrf.mxu0 }
 0x127   :  { %6826 = vst [vmem:[%s9475_s3 + $0x278] sm:$0xff] %v6426_v51   ;;  %v1934_v57 = vadd.f32 %v7200_v56, %v1933_v54  ;;  %v2666_v58 = vpop.f32.mrf.mxu1  ;;  %v3025_v4 = vadd.f32 %v3024_v14, %v2292_v55  ;;  %v5235_v14 = vor.u32 %v5904_v6, %v5232_v8 }
 0x129   :  { %v2667_v61 = vadd.f32 %v2666_v58, %v1934_v57  ;;  %v3508_v19 = vmul.f32 0.01, %v3025_v4  ;;  %v4659_v57 = vor.u32 %v5760_v38, %v4656_v42 }
 0x12b   :  { %v3365_v5 = vmul.f32 0.01, %v2667_v61  ;;  %v3797_v26 = vmax.f32 %v3025_v4, %v3508_v19  ;;  %v4664_v19 = vld [vmem:[%s9474_s0 + $0x138] sm:$0xf0] }
 0x12c   :  { %v2293_v9 = vpop.f32.mrf.mxu2 }
 0x12d   :  { %v3654_v11 = vmax.f32 %v2667_v61, %v3365_v5  ;;  %v2294_v12 = vadd.f32 %v7200_v56, %v2293_v9  ;;  %v3031_v15 = vpop.f32.mrf.mxu3 }
 0x12e   :  { %v1936_v16 = vpop.f32.mrf.mxu0 }
 0x12f   :  { %v6071_v20 = vpack.c.bf16 %v3654_v11, %v3653_v7  ;;  %v3027_v21 = vadd.f32 %v3026_v39, %v2294_v12  ;;  %v2669_v22 = vpop.f32.mrf.mxu1  ;;  %v1937_v25 = vadd.f32 %v7200_v56, %v1936_v16  ;;  %v5761_v39 = vld [vmem:[%s9474_s0 + $0x124] sm:$0xf0]  ;;  %v4662_v11 = vld [vmem:[%s9474_s0 + $0x130] sm:$0xf] }
 0x130   :  { %v4655_v49 = vor.u32 %v5761_v39, %v4654_v35  ;;  %v5238_v16 = vld [vmem:[%s9474_s0 + $0x5b0] sm:$0xf] }
 0x131   :  { %6755 = vst [vmem:[%s9475_s3 + $0x40] sm:$0xff] %v6071_v20   ;;  %v3509_v24 = vmul.f32 0.01, %v3027_v21  ;;  %1975 = vmatmul.bf16.gmra.mxu0 %v4647_v10  ;;  %2335 = vmatmul.bf16.gmra.mxu2 %v5223_v13  ;;  %v2670_v29 = vadd.f32 %v2669_v22, %v1937_v25  ;;  %v5908_v22 = vld [vmem:[%s9474_s0 + $0x5c4] sm:$0xf] }
 0x132   :  { %2708 = vmatmul.bf16.gmra.mxu1 %v4651_v18  ;;  %3073 = vmatmul.bf16.gmra.mxu3 %v5235_v14  ;;  %v5907_v18 = vld [vmem:[%s9474_s0 + $0x5b4] sm:$0xf0]  ;;  %v5762_v14 = vld [vmem:[%s9474_s0 + $0x134] sm:$0xf] }
 0x133   :  { %v3798_v23 = vmax.f32 %v3027_v21, %v3509_v24  ;;  %v3366_v36 = vmul.f32 0.01, %v2670_v29  ;;  %v5248_v24 = vld [vmem:[%s9474_s0 + $0x5c8] sm:$0xf0] }
 0x134   :  { %v2296_v27 = vpop.f32.mrf.mxu2 }
 0x135   :  { %v6431_v28 = vpack.c.bf16 %v3798_v23, %v3797_v26  ;;  %v3034_v30 = vpop.f32.mrf.mxu3  ;;  %v2297_v33 = vadd.f32 %v7200_v56, %v2296_v27  ;;  %v3655_v46 = vmax.f32 %v2670_v29, %v3366_v36  ;;  %v5239_v29 = vor.u32 %v5907_v18, %v5238_v16  ;;  %v7609_v16 = vld [vmem:[%s9473_s2] ss:$0 sm:$0xff] }
 0x136   :  { %v1938_v32 = vpop.f32.mrf.mxu0 }
 0x137   :  { %6827 = vst [vmem:[%s9475_s3 + $0x280] sm:$0xff] %v6431_v28   ;;  %v1939_v34 = vadd.f32 %v7200_v56, %v1938_v32  ;;  %v2671_v31 = vpop.f32.mrf.mxu1  ;;  %v3030_v43 = vadd.f32 %v3029_v53, %v2297_v33  ;;  %v5243_v53 = vor.u32 %v5906_v45, %v5240_v47 }
 0x139   :  { %v2672_v37 = vadd.f32 %v2671_v31, %v1939_v34  ;;  %v3510_v58 = vmul.f32 0.01, %v3030_v43  ;;  %v4667_v34 = vor.u32 %v5762_v14, %v4664_v19 }
 0x13b   :  { %v3367_v44 = vmul.f32 0.01, %v2672_v37  ;;  %v3799_v2 = vmax.f32 %v3030_v43, %v3510_v58  ;;  %v4672_v58 = vld [vmem:[%s9474_s0 + $0x148] sm:$0xf0] }
 0x13c   :  { %v2298_v48 = vpop.f32.mrf.mxu2 }
 0x13d   :  { %v3656_v50 = vmax.f32 %v2672_v37, %v3367_v44  ;;  %v2299_v51 = vadd.f32 %v7200_v56, %v2298_v48  ;;  %v3036_v54 = vpop.f32.mrf.mxu3 }
 0x13e   :  { %v1941_v55 = vpop.f32.mrf.mxu0 }
 0x13f   :  { %v6076_v59 = vpack.c.bf16 %v3656_v50, %v3655_v46  ;;  %v3032_v60 = vadd.f32 %v3031_v15, %v2299_v51  ;;  %v2674_v61 = vpop.f32.mrf.mxu1  ;;  %v1942_v1 = vadd.f32 %v7200_v56, %v1941_v55  ;;  %v5763_v15 = vld [vmem:[%s9474_s0 + $0x134] sm:$0xf0]  ;;  %v4670_v50 = vld [vmem:[%s9474_s0 + $0x140] sm:$0xf] }
 0x140   :  { %v4663_v26 = vor.u32 %v5763_v15, %v4662_v11  ;;  %v5246_v55 = vld [vmem:[%s9474_s0 + $0x5c0] sm:$0xf] }
 0x141   :  { %6756 = vst [vmem:[%s9475_s3 + $0x48] sm:$0xff] %v6076_v59   ;;  %v3511_v63 = vmul.f32 0.01, %v3032_v60  ;;  %1980 = vmatmul.bf16.gmra.mxu0 %v4655_v49  ;;  %2340 = vmatmul.bf16.gmra.mxu2 %v5231_v52  ;;  %v2675_v5 = vadd.f32 %v2674_v61, %v1942_v1  ;;  %v5910_v61 = vld [vmem:[%s9474_s0 + $0x5d4] sm:$0xf] }
 0x142   :  { %2713 = vmatmul.bf16.gmra.mxu1 %v4659_v57  ;;  %3078 = vmatmul.bf16.gmra.mxu3 %v5243_v53  ;;  %v5909_v57 = vld [vmem:[%s9474_s0 + $0x5c4] sm:$0xf0]  ;;  %v5764_v53 = vld [vmem:[%s9474_s0 + $0x144] sm:$0xf] }
 0x143   :  { %v3800_v62 = vmax.f32 %v3032_v60, %v3511_v63  ;;  %v3368_v12 = vmul.f32 0.01, %v2675_v5  ;;  %v5256_v63 = vld [vmem:[%s9474_s0 + $0x5d8] sm:$0xf0] }
 0x144   :  { %v2301_v3 = vpop.f32.mrf.mxu2 }
 0x145   :  { %v6436_v4 = vpack.c.bf16 %v3800_v62, %v3799_v2  ;;  %v3039_v6 = vpop.f32.mrf.mxu3  ;;  %v2302_v9 = vadd.f32 %v7200_v56, %v2301_v3  ;;  %v3657_v23 = vmax.f32 %v2675_v5, %v3368_v12  ;;  %v5247_v5 = vor.u32 %v5909_v57, %v5246_v55 }
 0x146   :  { %v1943_v8 = vpop.f32.mrf.mxu0 }
 0x147   :  { %6828 = vst [vmem:[%s9475_s3 + $0x288] sm:$0xff] %v6436_v4   ;;  %v1944_v10 = vadd.f32 %v7200_v56, %v1943_v8  ;;  %v2676_v7 = vpop.f32.mrf.mxu1  ;;  %v3035_v20 = vadd.f32 %v3034_v30, %v2302_v9  ;;  %v5251_v30 = vor.u32 %v5908_v22, %v5248_v24 }
 0x149   :  { %v2677_v13 = vadd.f32 %v2676_v7, %v1944_v10  ;;  %v3512_v31 = vmul.f32 0.01, %v3035_v20  ;;  %v4675_v10 = vor.u32 %v5764_v53, %v4672_v58 }
 0x14b   :  { %v3369_v21 = vmul.f32 0.01, %v2677_v13  ;;  %v3801_v41 = vmax.f32 %v3035_v20, %v3512_v31  ;;  %v4680_v31 = vld [vmem:[%s9474_s0 + $0x158] sm:$0xf0] }
 0x14c   :  { %v2303_v25 = vpop.f32.mrf.mxu2 }
 0x14d   :  { %v3658_v27 = vmax.f32 %v2677_v13, %v3369_v21  ;;  %v2304_v28 = vadd.f32 %v7200_v56, %v2303_v25  ;;  %v3041_v32 = vpop.f32.mrf.mxu3 }
 0x14e   :  { %v1946_v33 = vpop.f32.mrf.mxu0 }
 0x14f   :  { %v6081_v35 = vpack.c.bf16 %v3658_v27, %v3657_v23  ;;  %v3037_v36 = vadd.f32 %v3036_v54, %v2304_v28  ;;  %v2679_v37 = vpop.f32.mrf.mxu1  ;;  %v1947_v40 = vadd.f32 %v7200_v56, %v1946_v33  ;;  %v5765_v54 = vld [vmem:[%s9474_s0 + $0x144] sm:$0xf0]  ;;  %v4678_v27 = vld [vmem:[%s9474_s0 + $0x150] sm:$0xf] }
 0x150   :  { %v4671_v2 = vor.u32 %v5765_v54, %v4670_v50  ;;  %v5254_v33 = vld [vmem:[%s9474_s0 + $0x5d0] sm:$0xf] }
 0x151   :  { %6757 = vst [vmem:[%s9475_s3 + $0x50] sm:$0xff] %v6081_v35   ;;  %v3513_v39 = vmul.f32 0.01, %v3037_v36  ;;  %1985 = vmatmul.bf16.gmra.mxu0 %v4663_v26  ;;  %2345 = vmatmul.bf16.gmra.mxu2 %v5239_v29  ;;  %v2680_v44 = vadd.f32 %v2679_v37, %v1947_v40  ;;  %v5912_v37 = vld [vmem:[%s9474_s0 + $0x5e4] sm:$0xf] }
 0x152   :  { %2718 = vmatmul.bf16.gmra.mxu1 %v4667_v34  ;;  %3083 = vmatmul.bf16.gmra.mxu3 %v5251_v30  ;;  %v5911_v34 = vld [vmem:[%s9474_s0 + $0x5d4] sm:$0xf0]  ;;  %v5766_v30 = vld [vmem:[%s9474_s0 + $0x154] sm:$0xf] }
 0x153   :  { %v3802_v38 = vmax.f32 %v3037_v36, %v3513_v39  ;;  %v3370_v51 = vmul.f32 0.01, %v2680_v44  ;;  %v5264_v39 = vld [vmem:[%s9474_s0 + $0x5e8] sm:$0xf0] }
 0x154   :  { %v2306_v42 = vpop.f32.mrf.mxu2 }
 0x155   :  { %v6441_v43 = vpack.c.bf16 %v3802_v38, %v3801_v41  ;;  %v3044_v45 = vpop.f32.mrf.mxu3  ;;  %v2307_v48 = vadd.f32 %v7200_v56, %v2306_v42  ;;  %v3659_v62 = vmax.f32 %v2680_v44, %v3370_v51  ;;  %v5255_v44 = vor.u32 %v5911_v34, %v5254_v33 }
 0x156   :  { %v1948_v47 = vpop.f32.mrf.mxu0 }
 0x157   :  { %6829 = vst [vmem:[%s9475_s3 + $0x290] sm:$0xff] %v6441_v43   ;;  %v1949_v49 = vadd.f32 %v7200_v56, %v1948_v47  ;;  %v2681_v46 = vpop.f32.mrf.mxu1  ;;  %v3040_v59 = vadd.f32 %v3039_v6, %v2307_v48  ;;  %v5259_v6 = vor.u32 %v5910_v61, %v5256_v63 }
 0x159   :  { %v2682_v52 = vadd.f32 %v2681_v46, %v1949_v49  ;;  %v3514_v7 = vmul.f32 0.01, %v3040_v59  ;;  %v4683_v49 = vor.u32 %v5766_v30, %v4680_v31 }
 0x15b   :  { %v3371_v60 = vmul.f32 0.01, %v2682_v52  ;;  %v3803_v18 = vmax.f32 %v3040_v59, %v3514_v7  ;;  %v4688_v7 = vld [vmem:[%s9474_s0 + $0x168] sm:$0xf0] }
 0x15c   :  { %v2308_v1 = vpop.f32.mrf.mxu2 }
 0x15d   :  { %v3660_v3 = vmax.f32 %v2682_v52, %v3371_v60  ;;  %v2309_v4 = vadd.f32 %v7200_v56, %v2308_v1  ;;  %v3046_v8 = vpop.f32.mrf.mxu3 }
 0x15e   :  { %v1951_v9 = vpop.f32.mrf.mxu0 }
 0x15f   :  { %v6086_v11 = vpack.c.bf16 %v3660_v3, %v3659_v62  ;;  %v3042_v12 = vadd.f32 %v3041_v32, %v2309_v4  ;;  %v2684_v13 = vpop.f32.mrf.mxu1  ;;  %v1952_v56 = vadd.f32 %v7609_v16, %v1951_v9  ;;  %v5767_v32 = vld [vmem:[%s9474_s0 + $0x154] sm:$0xf0]  ;;  %v4686_v3 = vld [vmem:[%s9474_s0 + $0x160] sm:$0xf] }
 0x160   :  { %v4679_v41 = vor.u32 %v5767_v32, %v4678_v27  ;;  %v5262_v9 = vld [vmem:[%s9474_s0 + $0x5e0] sm:$0xf] }
 0x161   :  { %6758 = vst [vmem:[%s9475_s3 + $0x58] sm:$0xff] %v6086_v11   ;;  %v3515_v15 = vmul.f32 0.01, %v3042_v12  ;;  %1990 = vmatmul.bf16.gmra.mxu0 %v4671_v2  ;;  %2350 = vmatmul.bf16.gmra.mxu2 %v5247_v5  ;;  %v2685_v21 = vadd.f32 %v2684_v13, %v1952_v56  ;;  %v5914_v13 = vld [vmem:[%s9474_s0 + $0x5f4] sm:$0xf] }
 0x162   :  { %2723 = vmatmul.bf16.gmra.mxu1 %v4675_v10  ;;  %3088 = vmatmul.bf16.gmra.mxu3 %v5259_v6  ;;  %v5913_v10 = vld [vmem:[%s9474_s0 + $0x5e4] sm:$0xf0]  ;;  %v5768_v6 = vld [vmem:[%s9474_s0 + $0x164] sm:$0xf] }
 0x163   :  { %v3804_v14 = vmax.f32 %v3042_v12, %v3515_v15  ;;  %v3372_v28 = vmul.f32 0.01, %v2685_v21  ;;  %v5272_v15 = vld [vmem:[%s9474_s0 + $0x5f8] sm:$0xf0] }
 0x164   :  { %v2311_v19 = vpop.f32.mrf.mxu2 }
 0x165   :  { %v6446_v20 = vpack.c.bf16 %v3804_v14, %v3803_v18  ;;  %v3049_v22 = vpop.f32.mrf.mxu3  ;;  %v2312_v25 = vadd.f32 %v7609_v16, %v2311_v19  ;;  %v3661_v38 = vmax.f32 %v2685_v21, %v3372_v28  ;;  %v5263_v21 = vor.u32 %v5913_v10, %v5262_v9 }
 0x166   :  { %v1953_v24 = vpop.f32.mrf.mxu0 }
 0x167   :  { %6830 = vst [vmem:[%s9475_s3 + $0x298] sm:$0xff] %v6446_v20   ;;  %v1954_v26 = vadd.f32 %v7609_v16, %v1953_v24  ;;  %v2686_v23 = vpop.f32.mrf.mxu1  ;;  %v3045_v35 = vadd.f32 %v3044_v45, %v2312_v25  ;;  %v5267_v45 = vor.u32 %v5912_v37, %v5264_v39 }
 0x169   :  { %v2687_v29 = vadd.f32 %v2686_v23, %v1954_v26  ;;  %v3516_v46 = vmul.f32 0.01, %v3045_v35  ;;  %v4691_v26 = vor.u32 %v5768_v6, %v4688_v7 }
 0x16b   :  { %v3373_v36 = vmul.f32 0.01, %v2687_v29  ;;  %v3805_v57 = vmax.f32 %v3045_v35, %v3516_v46  ;;  %v4696_v46 = vld [vmem:[%s9474_s0 + $0x178] sm:$0xf0] }
 0x16c   :  { %v2313_v40 = vpop.f32.mrf.mxu2 }
 0x16d   :  { %v3662_v42 = vmax.f32 %v2687_v29, %v3373_v36  ;;  %v2314_v43 = vadd.f32 %v7609_v16, %v2313_v40  ;;  %v3051_v47 = vpop.f32.mrf.mxu3 }
 0x16e   :  { %v1956_v48 = vpop.f32.mrf.mxu0 }
 0x16f   :  { %v6091_v50 = vpack.c.bf16 %v3662_v42, %v3661_v38  ;;  %v3047_v51 = vadd.f32 %v3046_v8, %v2314_v43  ;;  %v2689_v52 = vpop.f32.mrf.mxu1  ;;  %v1957_v55 = vadd.f32 %v7609_v16, %v1956_v48  ;;  %v5769_v8 = vld [vmem:[%s9474_s0 + $0x164] sm:$0xf0]  ;;  %v4694_v42 = vld [vmem:[%s9474_s0 + $0x170] sm:$0xf] }
 0x170   :  { %v4687_v18 = vor.u32 %v5769_v8, %v4686_v3  ;;  %v5270_v48 = vld [vmem:[%s9474_s0 + $0x5f0] sm:$0xf] }
 0x171   :  { %6759 = vst [vmem:[%s9475_s3 + $0x60] sm:$0xff] %v6091_v50   ;;  %v3517_v54 = vmul.f32 0.01, %v3047_v51  ;;  %1995 = vmatmul.bf16.gmra.mxu0 %v4679_v41  ;;  %2355 = vmatmul.bf16.gmra.mxu2 %v5255_v44  ;;  %v2690_v60 = vadd.f32 %v2689_v52, %v1957_v55  ;;  %v5916_v52 = vld [vmem:[%s9474_s0 + $0x604] sm:$0xf] }
 0x172   :  { %2728 = vmatmul.bf16.gmra.mxu1 %v4683_v49  ;;  %3093 = vmatmul.bf16.gmra.mxu3 %v5267_v45  ;;  %v5915_v49 = vld [vmem:[%s9474_s0 + $0x5f4] sm:$0xf0]  ;;  %v5770_v45 = vld [vmem:[%s9474_s0 + $0x174] sm:$0xf] }
 0x173   :  { %v3806_v53 = vmax.f32 %v3047_v51, %v3517_v54  ;;  %v3374_v4 = vmul.f32 0.01, %v2690_v60  ;;  %v5280_v54 = vld [vmem:[%s9474_s0 + $0x608] sm:$0xf0] }
 0x174   :  { %v2316_v58 = vpop.f32.mrf.mxu2 }
 0x175   :  { %v6451_v59 = vpack.c.bf16 %v3806_v53, %v3805_v57  ;;  %v3054_v61 = vpop.f32.mrf.mxu3  ;;  %v2317_v1 = vadd.f32 %v7609_v16, %v2316_v58  ;;  %v3663_v14 = vmax.f32 %v2690_v60, %v3374_v4  ;;  %v5271_v60 = vor.u32 %v5915_v49, %v5270_v48 }
 0x176   :  { %v1958_v63 = vpop.f32.mrf.mxu0 }
 0x177   :  { %6831 = vst [vmem:[%s9475_s3 + $0x2a0] sm:$0xff] %v6451_v59   ;;  %v1959_v2 = vadd.f32 %v7609_v16, %v1958_v63  ;;  %v2691_v62 = vpop.f32.mrf.mxu1  ;;  %v3050_v11 = vadd.f32 %v3049_v22, %v2317_v1  ;;  %v5275_v22 = vor.u32 %v5914_v13, %v5272_v15 }
 0x179   :  { %v2692_v5 = vadd.f32 %v2691_v62, %v1959_v2  ;;  %v3518_v23 = vmul.f32 0.01, %v3050_v11  ;;  %v4699_v2 = vor.u32 %v5770_v45, %v4696_v46 }
 0x17b   :  { %v3375_v12 = vmul.f32 0.01, %v2692_v5  ;;  %v3807_v34 = vmax.f32 %v3050_v11, %v3518_v23  ;;  %v4704_v23 = vld [vmem:[%s9474_s0 + $0x188] sm:$0xf0] }
 0x17c   :  { %v2318_v56 = vpop.f32.mrf.mxu2 }
 0x17d   :  { %v3664_v19 = vmax.f32 %v2692_v5, %v3375_v12  ;;  %v2319_v20 = vadd.f32 %v7609_v16, %v2318_v56  ;;  %v3056_v24 = vpop.f32.mrf.mxu3 }
 0x17e   :  { %v1961_v25 = vpop.f32.mrf.mxu0 }
 0x17f   :  { %v6096_v27 = vpack.c.bf16 %v3664_v19, %v3663_v14  ;;  %v3052_v28 = vadd.f32 %v3051_v47, %v2319_v20  ;;  %v2694_v29 = vpop.f32.mrf.mxu1  ;;  %v1962_v33 = vadd.f32 %v7609_v16, %v1961_v25  ;;  %v5771_v47 = vld [vmem:[%s9474_s0 + $0x174] sm:$0xf0]  ;;  %v4702_v19 = vld [vmem:[%s9474_s0 + $0x180] sm:$0xf] }
 0x180   :  { %v4695_v57 = vor.u32 %v5771_v47, %v4694_v42  ;;  %v5278_v25 = vld [vmem:[%s9474_s0 + $0x600] sm:$0xf] }
 0x181   :  { %6760 = vst [vmem:[%s9475_s3 + $0x68] sm:$0xff] %v6096_v27   ;;  %v3519_v32 = vmul.f32 0.01, %v3052_v28  ;;  %2000 = vmatmul.bf16.gmra.mxu0 %v4687_v18  ;;  %2360 = vmatmul.bf16.gmra.mxu2 %v5263_v21  ;;  %v2695_v36 = vadd.f32 %v2694_v29, %v1962_v33  ;;  %v5918_v29 = vld [vmem:[%s9474_s0 + $0x614] sm:$0xf] }
 0x182   :  { %2733 = vmatmul.bf16.gmra.mxu1 %v4691_v26  ;;  %3098 = vmatmul.bf16.gmra.mxu3 %v5275_v22  ;;  %v5917_v26 = vld [vmem:[%s9474_s0 + $0x604] sm:$0xf0]  ;;  %v5772_v22 = vld [vmem:[%s9474_s0 + $0x184] sm:$0xf] }
 0x183   :  { %v3808_v30 = vmax.f32 %v3052_v28, %v3519_v32  ;;  %v3376_v43 = vmul.f32 0.01, %v2695_v36  ;;  %v5288_v32 = vld [vmem:[%s9474_s0 + $0x618] sm:$0xf0] }
 0x184   :  { %v2321_v31 = vpop.f32.mrf.mxu2 }
 0x185   :  { %v6456_v35 = vpack.c.bf16 %v3808_v30, %v3807_v34  ;;  %v3059_v37 = vpop.f32.mrf.mxu3  ;;  %v2322_v40 = vadd.f32 %v7609_v16, %v2321_v31  ;;  %v3665_v53 = vmax.f32 %v2695_v36, %v3376_v43  ;;  %v5279_v36 = vor.u32 %v5917_v26, %v5278_v25 }
 0x186   :  { %v1963_v39 = vpop.f32.mrf.mxu0 }
 0x187   :  { %6832 = vst [vmem:[%s9475_s3 + $0x2a8] sm:$0xff] %v6456_v35   ;;  %v1964_v41 = vadd.f32 %v7609_v16, %v1963_v39  ;;  %v2696_v38 = vpop.f32.mrf.mxu1  ;;  %v3055_v50 = vadd.f32 %v3054_v61, %v2322_v40  ;;  %v5283_v61 = vor.u32 %v5916_v52, %v5280_v54 }
 0x189   :  { %v2697_v44 = vadd.f32 %v2696_v38, %v1964_v41  ;;  %v3520_v62 = vmul.f32 0.01, %v3055_v50  ;;  %v4707_v41 = vor.u32 %v5772_v22, %v4704_v23 }
 0x18b   :  { %v3377_v51 = vmul.f32 0.01, %v2697_v44  ;;  %v3809_v10 = vmax.f32 %v3055_v50, %v3520_v62  ;;  %v4712_v62 = vld [vmem:[%s9474_s0 + $0x198] sm:$0xf0] }
 0x18c   :  { %v2323_v55 = vpop.f32.mrf.mxu2 }
 0x18d   :  { %v3666_v58 = vmax.f32 %v2697_v44, %v3377_v51  ;;  %v2324_v59 = vadd.f32 %v7609_v16, %v2323_v55  ;;  %v3061_v63 = vpop.f32.mrf.mxu3 }
 0x18e   :  { %v1966_v1 = vpop.f32.mrf.mxu0 }
 0x18f   :  { %v6101_v3 = vpack.c.bf16 %v3666_v58, %v3665_v53  ;;  %v3057_v4 = vadd.f32 %v3056_v24, %v2324_v59  ;;  %v2699_v5 = vpop.f32.mrf.mxu1  ;;  %v1967_v9 = vadd.f32 %v7609_v16, %v1966_v1  ;;  %v5773_v24 = vld [vmem:[%s9474_s0 + $0x184] sm:$0xf0]  ;;  %v4710_v58 = vld [vmem:[%s9474_s0 + $0x190] sm:$0xf] }
 0x190   :  { %v4703_v34 = vor.u32 %v5773_v24, %v4702_v19  ;;  %v5286_v1 = vld [vmem:[%s9474_s0 + $0x610] sm:$0xf] }
 0x191   :  { %6761 = vst [vmem:[%s9475_s3 + $0x70] sm:$0xff] %v6101_v3   ;;  %v3521_v8 = vmul.f32 0.01, %v3057_v4  ;;  %2005 = vmatmul.bf16.gmra.mxu0 %v4695_v57  ;;  %2365 = vmatmul.bf16.gmra.mxu2 %v5271_v60  ;;  %v2700_v12 = vadd.f32 %v2699_v5, %v1967_v9  ;;  %v5920_v5 = vld [vmem:[%s9474_s0 + $0x624] sm:$0xf] }
 0x192   :  { %2738 = vmatmul.bf16.gmra.mxu1 %v4699_v2  ;;  %3103 = vmatmul.bf16.gmra.mxu3 %v5283_v61  ;;  %v5919_v2 = vld [vmem:[%s9474_s0 + $0x614] sm:$0xf0]  ;;  %v5774_v61 = vld [vmem:[%s9474_s0 + $0x194] sm:$0xf] }
 0x193   :  { %v3810_v6 = vmax.f32 %v3057_v4, %v3521_v8  ;;  %v3378_v20 = vmul.f32 0.01, %v2700_v12  ;;  %v5296_v8 = vld [vmem:[%s9474_s0 + $0x628] sm:$0xf0] }
 0x194   :  { %v2326_v7 = vpop.f32.mrf.mxu2 }
 0x195   :  { %v6461_v11 = vpack.c.bf16 %v3810_v6, %v3809_v10  ;;  %v3064_v13 = vpop.f32.mrf.mxu3  ;;  %v2327_v56 = vadd.f32 %v7609_v16, %v2326_v7  ;;  %v3667_v30 = vmax.f32 %v2700_v12, %v3378_v20  ;;  %v5287_v12 = vor.u32 %v5919_v2, %v5286_v1 }
 0x196   :  { %v1968_v15 = vpop.f32.mrf.mxu0 }
 0x197   :  { %6833 = vst [vmem:[%s9475_s3 + $0x2b0] sm:$0xff] %v6461_v11   ;;  %v1969_v18 = vadd.f32 %v7609_v16, %v1968_v15  ;;  %v2701_v14 = vpop.f32.mrf.mxu1  ;;  %v3060_v27 = vadd.f32 %v3059_v37, %v2327_v56  ;;  %v5291_v37 = vor.u32 %v5918_v29, %v5288_v32 }
 0x199   :  { %v2702_v21 = vadd.f32 %v2701_v14, %v1969_v18  ;;  %v3522_v38 = vmul.f32 0.01, %v3060_v27  ;;  %v4715_v18 = vor.u32 %v5774_v61, %v4712_v62 }
 0x19b   :  { %v3379_v28 = vmul.f32 0.01, %v2702_v21  ;;  %v3811_v49 = vmax.f32 %v3060_v27, %v3522_v38  ;;  %v4720_v38 = vld [vmem:[%s9474_s0 + $0x1a8] sm:$0xf0] }
 0x19c   :  { %v2328_v33 = vpop.f32.mrf.mxu2 }
 0x19d   :  { %v3668_v31 = vmax.f32 %v2702_v21, %v3379_v28  ;;  %v2329_v35 = vadd.f32 %v7609_v16, %v2328_v33  ;;  %v3066_v39 = vpop.f32.mrf.mxu3 }
 0x19e   :  { %v1971_v40 = vpop.f32.mrf.mxu0 }
 0x19f   :  { %v6106_v42 = vpack.c.bf16 %v3668_v31, %v3667_v30  ;;  %v3062_v43 = vadd.f32 %v3061_v63, %v2329_v35  ;;  %v2704_v44 = vpop.f32.mrf.mxu1  ;;  %v1972_v48 = vadd.f32 %v7609_v16, %v1971_v40  ;;  %v5775_v63 = vld [vmem:[%s9474_s0 + $0x194] sm:$0xf0]  ;;  %v4718_v31 = vld [vmem:[%s9474_s0 + $0x1a0] sm:$0xf] }
 0x1a0   :  { %v4711_v10 = vor.u32 %v5775_v63, %v4710_v58  ;;  %v5294_v40 = vld [vmem:[%s9474_s0 + $0x620] sm:$0xf] }
 0x1a1   :  { %6762 = vst [vmem:[%s9475_s3 + $0x78] sm:$0xff] %v6106_v42   ;;  %v3523_v47 = vmul.f32 0.01, %v3062_v43  ;;  %2010 = vmatmul.bf16.gmra.mxu0 %v4703_v34  ;;  %2370 = vmatmul.bf16.gmra.mxu2 %v5279_v36  ;;  %v2705_v51 = vadd.f32 %v2704_v44, %v1972_v48  ;;  %v5922_v44 = vld [vmem:[%s9474_s0 + $0x634] sm:$0xf] }
 0x1a2   :  { %2743 = vmatmul.bf16.gmra.mxu1 %v4707_v41  ;;  %3108 = vmatmul.bf16.gmra.mxu3 %v5291_v37  ;;  %v5921_v41 = vld [vmem:[%s9474_s0 + $0x624] sm:$0xf0]  ;;  %v5776_v37 = vld [vmem:[%s9474_s0 + $0x1a4] sm:$0xf] }
 0x1a3   :  { %v3812_v45 = vmax.f32 %v3062_v43, %v3523_v47  ;;  %v3380_v59 = vmul.f32 0.01, %v2705_v51  ;;  %v5304_v47 = vld [vmem:[%s9474_s0 + $0x638] sm:$0xf0] }
 0x1a4   :  { %v2331_v46 = vpop.f32.mrf.mxu2 }
 0x1a5   :  { %v6466_v50 = vpack.c.bf16 %v3812_v45, %v3811_v49  ;;  %v3069_v52 = vpop.f32.mrf.mxu3  ;;  %v2332_v55 = vadd.f32 %v7609_v16, %v2331_v46  ;;  %v3669_v6 = vmax.f32 %v2705_v51, %v3380_v59  ;;  %v5295_v51 = vor.u32 %v5921_v41, %v5294_v40 }
 0x1a6   :  { %v1973_v54 = vpop.f32.mrf.mxu0 }
 0x1a7   :  { %6834 = vst [vmem:[%s9475_s3 + $0x2b8] sm:$0xff] %v6466_v50   ;;  %v1974_v57 = vadd.f32 %v7609_v16, %v1973_v54  ;;  %v2706_v53 = vpop.f32.mrf.mxu1  ;;  %v3065_v3 = vadd.f32 %v3064_v13, %v2332_v55  ;;  %v5299_v13 = vor.u32 %v5920_v5, %v5296_v8 }
 0x1a9   :  { %v2707_v60 = vadd.f32 %v2706_v53, %v1974_v57  ;;  %v3524_v14 = vmul.f32 0.01, %v3065_v3  ;;  %v4723_v57 = vor.u32 %v5776_v37, %v4720_v38 }
 0x1ab   :  { %v3381_v4 = vmul.f32 0.01, %v2707_v60  ;;  %v3813_v26 = vmax.f32 %v3065_v3, %v3524_v14  ;;  %v4728_v14 = vld [vmem:[%s9474_s0 + $0x1b8] sm:$0xf0] }
 0x1ac   :  { %v2333_v9 = vpop.f32.mrf.mxu2 }
 0x1ad   :  { %v3670_v7 = vmax.f32 %v2707_v60, %v3381_v4  ;;  %v2334_v11 = vadd.f32 %v7609_v16, %v2333_v9  ;;  %v3071_v15 = vpop.f32.mrf.mxu3 }
 0x1ae   :  { %v1976_v56 = vpop.f32.mrf.mxu0 }
 0x1af   :  { %v6111_v19 = vpack.c.bf16 %v3670_v7, %v3669_v6  ;;  %v3067_v20 = vadd.f32 %v3066_v39, %v2334_v11  ;;  %v2709_v21 = vpop.f32.mrf.mxu1  ;;  %v1977_v25 = vadd.f32 %v7609_v16, %v1976_v56  ;;  %v5777_v39 = vld [vmem:[%s9474_s0 + $0x1a4] sm:$0xf0]  ;;  %v4726_v7 = vld [vmem:[%s9474_s0 + $0x1b0] sm:$0xf] }
 0x1b0   :  { %v4719_v49 = vor.u32 %v5777_v39, %v4718_v31  ;;  %v5302_v56 = vld [vmem:[%s9474_s0 + $0x630] sm:$0xf] }
 0x1b1   :  { %6763 = vst [vmem:[%s9475_s3 + $0x80] sm:$0xff] %v6111_v19   ;;  %v3525_v24 = vmul.f32 0.01, %v3067_v20  ;;  %2015 = vmatmul.bf16.gmra.mxu0 %v4711_v10  ;;  %2375 = vmatmul.bf16.gmra.mxu2 %v5287_v12  ;;  %v2710_v28 = vadd.f32 %v2709_v21, %v1977_v25  ;;  %v5924_v21 = vld [vmem:[%s9474_s0 + $0x644] sm:$0xf] }
 0x1b2   :  { %2748 = vmatmul.bf16.gmra.mxu1 %v4715_v18  ;;  %3113 = vmatmul.bf16.gmra.mxu3 %v5299_v13  ;;  %v5923_v18 = vld [vmem:[%s9474_s0 + $0x634] sm:$0xf0]  ;;  %v5778_v13 = vld [vmem:[%s9474_s0 + $0x1b4] sm:$0xf] }
 0x1b3   :  { %v3814_v22 = vmax.f32 %v3067_v20, %v3525_v24  ;;  %v3382_v35 = vmul.f32 0.01, %v2710_v28  ;;  %v5312_v24 = vld [vmem:[%s9474_s0 + $0x648] sm:$0xf0] }
 0x1b4   :  { %v2336_v23 = vpop.f32.mrf.mxu2 }
 0x1b5   :  { %v6471_v27 = vpack.c.bf16 %v3814_v22, %v3813_v26  ;;  %v3074_v29 = vpop.f32.mrf.mxu3  ;;  %v2337_v33 = vadd.f32 %v7609_v16, %v2336_v23  ;;  %v3671_v45 = vmax.f32 %v2710_v28, %v3382_v35  ;;  %v5303_v28 = vor.u32 %v5923_v18, %v5302_v56 }
 0x1b6   :  { %v1978_v32 = vpop.f32.mrf.mxu0 }
 0x1b7   :  { %6835 = vst [vmem:[%s9475_s3 + $0x2c0] sm:$0xff] %v6471_v27   ;;  %v1979_v34 = vadd.f32 %v7609_v16, %v1978_v32  ;;  %v2711_v30 = vpop.f32.mrf.mxu1  ;;  %v3070_v42 = vadd.f32 %v3069_v52, %v2337_v33  ;;  %v5307_v52 = vor.u32 %v5922_v44, %v5304_v47 }
 0x1b9   :  { %v2712_v36 = vadd.f32 %v2711_v30, %v1979_v34  ;;  %v3526_v53 = vmul.f32 0.01, %v3070_v42  ;;  %v4731_v34 = vor.u32 %v5778_v13, %v4728_v14 }
 0x1bb   :  { %v3383_v43 = vmul.f32 0.01, %v2712_v36  ;;  %v3815_v2 = vmax.f32 %v3070_v42, %v3526_v53  ;;  %v4736_v53 = vld [vmem:[%s9474_s0 + $0x1c8] sm:$0xf0] }
 0x1bc   :  { %v2338_v48 = vpop.f32.mrf.mxu2 }
 0x1bd   :  { %v3672_v46 = vmax.f32 %v2712_v36, %v3383_v43  ;;  %v2339_v50 = vadd.f32 %v7609_v16, %v2338_v48  ;;  %v3076_v54 = vpop.f32.mrf.mxu3 }
 0x1be   :  { %v1981_v55 = vpop.f32.mrf.mxu0 }
 0x1bf   :  { %v6116_v58 = vpack.c.bf16 %v3672_v46, %v3671_v45  ;;  %v3072_v59 = vadd.f32 %v3071_v15, %v2339_v50  ;;  %v2714_v60 = vpop.f32.mrf.mxu1  ;;  %v1982_v1 = vadd.f32 %v7609_v16, %v1981_v55  ;;  %v5779_v15 = vld [vmem:[%s9474_s0 + $0x1b4] sm:$0xf0]  ;;  %v4734_v46 = vld [vmem:[%s9474_s0 + $0x1c0] sm:$0xf] }
 0x1c0   :  { %v4727_v26 = vor.u32 %v5779_v15, %v4726_v7  ;;  %v5310_v55 = vld [vmem:[%s9474_s0 + $0x640] sm:$0xf] }
 0x1c1   :  { %6764 = vst [vmem:[%s9475_s3 + $0x88] sm:$0xff] %v6116_v58   ;;  %v3527_v63 = vmul.f32 0.01, %v3072_v59  ;;  %2020 = vmatmul.bf16.gmra.mxu0 %v4719_v49  ;;  %2380 = vmatmul.bf16.gmra.mxu2 %v5295_v51  ;;  %v2715_v4 = vadd.f32 %v2714_v60, %v1982_v1  ;;  %v5926_v60 = vld [vmem:[%s9474_s0 + $0x654] sm:$0xf] }
 0x1c2   :  { %2753 = vmatmul.bf16.gmra.mxu1 %v4723_v57  ;;  %3118 = vmatmul.bf16.gmra.mxu3 %v5307_v52  ;;  %v5925_v57 = vld [vmem:[%s9474_s0 + $0x644] sm:$0xf0]  ;;  %v5780_v52 = vld [vmem:[%s9474_s0 + $0x1c4] sm:$0xf] }
 0x1c3   :  { %v3816_v61 = vmax.f32 %v3072_v59, %v3527_v63  ;;  %v3384_v11 = vmul.f32 0.01, %v2715_v4  ;;  %v5320_v63 = vld [vmem:[%s9474_s0 + $0x658] sm:$0xf0] }
 0x1c4   :  { %v2341_v62 = vpop.f32.mrf.mxu2 }
 0x1c5   :  { %v6476_v3 = vpack.c.bf16 %v3816_v61, %v3815_v2  ;;  %v3079_v5 = vpop.f32.mrf.mxu3  ;;  %v2342_v9 = vadd.f32 %v7609_v16, %v2341_v62  ;;  %v3673_v22 = vmax.f32 %v2715_v4, %v3384_v11  ;;  %v5311_v4 = vor.u32 %v5925_v57, %v5310_v55 }
 0x1c6   :  { %v1983_v8 = vpop.f32.mrf.mxu0 }
 0x1c7   :  { %6836 = vst [vmem:[%s9475_s3 + $0x2c8] sm:$0xff] %v6476_v3   ;;  %v1984_v10 = vadd.f32 %v7609_v16, %v1983_v8  ;;  %v2716_v6 = vpop.f32.mrf.mxu1  ;;  %v3075_v19 = vadd.f32 %v3074_v29, %v2342_v9  ;;  %v5315_v29 = vor.u32 %v5924_v21, %v5312_v24 }
 0x1c9   :  { %v2717_v12 = vadd.f32 %v2716_v6, %v1984_v10  ;;  %v3528_v30 = vmul.f32 0.01, %v3075_v19  ;;  %v4739_v10 = vor.u32 %v5780_v52, %v4736_v53 }
 0x1cb   :  { %v3385_v20 = vmul.f32 0.01, %v2717_v12  ;;  %v3817_v41 = vmax.f32 %v3075_v19, %v3528_v30  ;;  %v4744_v30 = vld [vmem:[%s9474_s0 + $0x1d8] sm:$0xf0] }
 0x1cc   :  { %v2343_v25 = vpop.f32.mrf.mxu2 }
 0x1cd   :  { %v3674_v23 = vmax.f32 %v2717_v12, %v3385_v20  ;;  %v2344_v27 = vadd.f32 %v7609_v16, %v2343_v25  ;;  %v3081_v32 = vpop.f32.mrf.mxu3 }
 0x1ce   :  { %v1986_v33 = vpop.f32.mrf.mxu0 }
 0x1cf   :  { %v6121_v31 = vpack.c.bf16 %v3674_v23, %v3673_v22  ;;  %v3077_v35 = vadd.f32 %v3076_v54, %v2344_v27  ;;  %v2719_v36 = vpop.f32.mrf.mxu1  ;;  %v1987_v40 = vadd.f32 %v7609_v16, %v1986_v33  ;;  %v5781_v54 = vld [vmem:[%s9474_s0 + $0x1c4] sm:$0xf0]  ;;  %v4742_v23 = vld [vmem:[%s9474_s0 + $0x1d0] sm:$0xf] }
 0x1d0   :  { %v4735_v2 = vor.u32 %v5781_v54, %v4734_v46  ;;  %v5318_v33 = vld [vmem:[%s9474_s0 + $0x650] sm:$0xf] }
 0x1d1   :  { %6765 = vst [vmem:[%s9475_s3 + $0x90] sm:$0xff] %v6121_v31   ;;  %v3529_v39 = vmul.f32 0.01, %v3077_v35  ;;  %2025 = vmatmul.bf16.gmra.mxu0 %v4727_v26  ;;  %2385 = vmatmul.bf16.gmra.mxu2 %v5303_v28  ;;  %v2720_v43 = vadd.f32 %v2719_v36, %v1987_v40  ;;  %v5928_v36 = vld [vmem:[%s9474_s0 + $0x664] sm:$0xf] }
 0x1d2   :  { %2758 = vmatmul.bf16.gmra.mxu1 %v4731_v34  ;;  %3123 = vmatmul.bf16.gmra.mxu3 %v5315_v29  ;;  %v5927_v34 = vld [vmem:[%s9474_s0 + $0x654] sm:$0xf0]  ;;  %v5782_v29 = vld [vmem:[%s9474_s0 + $0x1d4] sm:$0xf] }
 0x1d3   :  { %v3818_v37 = vmax.f32 %v3077_v35, %v3529_v39  ;;  %v3386_v50 = vmul.f32 0.01, %v2720_v43  ;;  %v5328_v39 = vld [vmem:[%s9474_s0 + $0x668] sm:$0xf0] }
 0x1d4   :  { %v2346_v38 = vpop.f32.mrf.mxu2 }
 0x1d5   :  { %v6481_v42 = vpack.c.bf16 %v3818_v37, %v3817_v41  ;;  %v3084_v44 = vpop.f32.mrf.mxu3  ;;  %v2347_v48 = vadd.f32 %v7609_v16, %v2346_v38  ;;  %v3675_v61 = vmax.f32 %v2720_v43, %v3386_v50  ;;  %v5319_v43 = vor.u32 %v5927_v34, %v5318_v33 }
 0x1d6   :  { %v1988_v47 = vpop.f32.mrf.mxu0 }
 0x1d7   :  { %6837 = vst [vmem:[%s9475_s3 + $0x2d0] sm:$0xff] %v6481_v42   ;;  %v1989_v49 = vadd.f32 %v7609_v16, %v1988_v47  ;;  %v2721_v45 = vpop.f32.mrf.mxu1  ;;  %v3080_v58 = vadd.f32 %v3079_v5, %v2347_v48  ;;  %v5323_v5 = vor.u32 %v5926_v60, %v5320_v63 }
 0x1d9   :  { %v2722_v51 = vadd.f32 %v2721_v45, %v1989_v49  ;;  %v3530_v6 = vmul.f32 0.01, %v3080_v58  ;;  %v4747_v49 = vor.u32 %v5782_v29, %v4744_v30 }
 0x1db   :  { %v3387_v59 = vmul.f32 0.01, %v2722_v51  ;;  %v3819_v18 = vmax.f32 %v3080_v58, %v3530_v6  ;;  %v4752_v6 = vld [vmem:[%s9474_s0 + $0x1e8] sm:$0xf0] }
 0x1dc   :  { %v2348_v1 = vpop.f32.mrf.mxu2 }
 0x1dd   :  { %v3676_v62 = vmax.f32 %v2722_v51, %v3387_v59  ;;  %v2349_v3 = vadd.f32 %v7609_v16, %v2348_v1  ;;  %v3086_v8 = vpop.f32.mrf.mxu3 }
 0x1de   :  { %v1991_v9 = vpop.f32.mrf.mxu0 }
 0x1df   :  { %v6126_v7 = vpack.c.bf16 %v3676_v62, %v3675_v61  ;;  %v3082_v11 = vadd.f32 %v3081_v32, %v2349_v3  ;;  %v2724_v12 = vpop.f32.mrf.mxu1  ;;  %v1992_v56 = vadd.f32 %v7609_v16, %v1991_v9  ;;  %v5783_v32 = vld [vmem:[%s9474_s0 + $0x1d4] sm:$0xf0]  ;;  %v4750_v62 = vld [vmem:[%s9474_s0 + $0x1e0] sm:$0xf] }
 0x1e0   :  { %v4743_v41 = vor.u32 %v5783_v32, %v4742_v23  ;;  %v5326_v9 = vld [vmem:[%s9474_s0 + $0x660] sm:$0xf] }
 0x1e1   :  { %6766 = vst [vmem:[%s9475_s3 + $0x98] sm:$0xff] %v6126_v7   ;;  %v3531_v15 = vmul.f32 0.01, %v3082_v11  ;;  %2030 = vmatmul.bf16.gmra.mxu0 %v4735_v2  ;;  %2390 = vmatmul.bf16.gmra.mxu2 %v5311_v4  ;;  %v2725_v20 = vadd.f32 %v2724_v12, %v1992_v56  ;;  %v5930_v12 = vld [vmem:[%s9474_s0 + $0x674] sm:$0xf] }
 0x1e2   :  { %2763 = vmatmul.bf16.gmra.mxu1 %v4739_v10  ;;  %3128 = vmatmul.bf16.gmra.mxu3 %v5323_v5  ;;  %v5929_v10 = vld [vmem:[%s9474_s0 + $0x664] sm:$0xf0]  ;;  %v5784_v5 = vld [vmem:[%s9474_s0 + $0x1e4] sm:$0xf] }
 0x1e3   :  { %v3820_v13 = vmax.f32 %v3082_v11, %v3531_v15  ;;  %v3388_v27 = vmul.f32 0.01, %v2725_v20  ;;  %v5336_v15 = vld [vmem:[%s9474_s0 + $0x678] sm:$0xf0] }
 0x1e4   :  { %v2351_v14 = vpop.f32.mrf.mxu2 }
 0x1e5   :  { %v6486_v19 = vpack.c.bf16 %v3820_v13, %v3819_v18  ;;  %v3089_v21 = vpop.f32.mrf.mxu3  ;;  %v2352_v25 = vadd.f32 %v7609_v16, %v2351_v14  ;;  %v3677_v37 = vmax.f32 %v2725_v20, %v3388_v27  ;;  %v5327_v20 = vor.u32 %v5929_v10, %v5326_v9 }
 0x1e6   :  { %v1993_v24 = vpop.f32.mrf.mxu0 }
 0x1e7   :  { %6838 = vst [vmem:[%s9475_s3 + $0x2d8] sm:$0xff] %v6486_v19   ;;  %v1994_v26 = vadd.f32 %v7609_v16, %v1993_v24  ;;  %v2726_v22 = vpop.f32.mrf.mxu1  ;;  %v3085_v31 = vadd.f32 %v3084_v44, %v2352_v25  ;;  %v5331_v44 = vor.u32 %v5928_v36, %v5328_v39 }
 0x1e9   :  { %v2727_v28 = vadd.f32 %v2726_v22, %v1994_v26  ;;  %v3532_v45 = vmul.f32 0.01, %v3085_v31  ;;  %v4755_v26 = vor.u32 %v5784_v5, %v4752_v6 }
 0x1eb   :  { %v3389_v35 = vmul.f32 0.01, %v2727_v28  ;;  %v3821_v57 = vmax.f32 %v3085_v31, %v3532_v45  ;;  %v4760_v45 = vld [vmem:[%s9474_s0 + $0x1f8] sm:$0xf0] }
 0x1ec   :  { %v2353_v40 = vpop.f32.mrf.mxu2 }
 0x1ed   :  { %v3678_v38 = vmax.f32 %v2727_v28, %v3389_v35  ;;  %v2354_v42 = vadd.f32 %v7609_v16, %v2353_v40  ;;  %v3091_v47 = vpop.f32.mrf.mxu3 }
 0x1ee   :  { %v1996_v48 = vpop.f32.mrf.mxu0 }
 0x1ef   :  { %v6131_v46 = vpack.c.bf16 %v3678_v38, %v3677_v37  ;;  %v3087_v50 = vadd.f32 %v3086_v8, %v2354_v42  ;;  %v2729_v51 = vpop.f32.mrf.mxu1  ;;  %v1997_v55 = vadd.f32 %v7609_v16, %v1996_v48  ;;  %v5785_v8 = vld [vmem:[%s9474_s0 + $0x1e4] sm:$0xf0]  ;;  %v4758_v38 = vld [vmem:[%s9474_s0 + $0x1f0] sm:$0xf] }
 0x1f0   :  { %v4751_v18 = vor.u32 %v5785_v8, %v4750_v62  ;;  %v5334_v48 = vld [vmem:[%s9474_s0 + $0x670] sm:$0xf] }
 0x1f1   :  { %6767 = vst [vmem:[%s9475_s3 + $0xa0] sm:$0xff] %v6131_v46   ;;  %v3533_v54 = vmul.f32 0.01, %v3087_v50  ;;  %2035 = vmatmul.bf16.gmra.mxu0 %v4743_v41  ;;  %2395 = vmatmul.bf16.gmra.mxu2 %v5319_v43  ;;  %v2730_v59 = vadd.f32 %v2729_v51, %v1997_v55  ;;  %v5932_v51 = vld [vmem:[%s9474_s0 + $0x684] sm:$0xf] }
 0x1f2   :  { %2768 = vmatmul.bf16.gmra.mxu1 %v4747_v49  ;;  %3133 = vmatmul.bf16.gmra.mxu3 %v5331_v44  ;;  %v5931_v49 = vld [vmem:[%s9474_s0 + $0x674] sm:$0xf0]  ;;  %v5786_v44 = vld [vmem:[%s9474_s0 + $0x1f4] sm:$0xf] }
 0x1f3   :  { %v3822_v52 = vmax.f32 %v3087_v50, %v3533_v54  ;;  %v3390_v3 = vmul.f32 0.01, %v2730_v59  ;;  %v5344_v54 = vld [vmem:[%s9474_s0 + $0x688] sm:$0xf0] }
 0x1f4   :  { %v2356_v53 = vpop.f32.mrf.mxu2 }
 0x1f5   :  { %v6491_v58 = vpack.c.bf16 %v3822_v52, %v3821_v57  ;;  %v3094_v60 = vpop.f32.mrf.mxu3  ;;  %v2357_v1 = vadd.f32 %v7609_v16, %v2356_v53  ;;  %v3679_v13 = vmax.f32 %v2730_v59, %v3390_v3  ;;  %v5335_v59 = vor.u32 %v5931_v49, %v5334_v48 }
 0x1f6   :  { %v1998_v63 = vpop.f32.mrf.mxu0 }
 0x1f7   :  { %6839 = vst [vmem:[%s9475_s3 + $0x2e0] sm:$0xff] %v6491_v58   ;;  %v1999_v2 = vadd.f32 %v7609_v16, %v1998_v63  ;;  %v2731_v61 = vpop.f32.mrf.mxu1  ;;  %v3090_v7 = vadd.f32 %v3089_v21, %v2357_v1  ;;  %v5339_v21 = vor.u32 %v5930_v12, %v5336_v15 }
 0x1f9   :  { %v2732_v4 = vadd.f32 %v2731_v61, %v1999_v2  ;;  %v3534_v22 = vmul.f32 0.01, %v3090_v7  ;;  %v4763_v2 = vor.u32 %v5786_v44, %v4760_v45 }
 0x1fb   :  { %v3391_v11 = vmul.f32 0.01, %v2732_v4  ;;  %v3823_v34 = vmax.f32 %v3090_v7, %v3534_v22 }
 0x1fc   :  { %v2358_v56 = vpop.f32.mrf.mxu2 }
 0x1fd   :  { %v3680_v14 = vmax.f32 %v2732_v4, %v3391_v11  ;;  %v2359_v19 = vadd.f32 %v7609_v16, %v2358_v56  ;;  %v3096_v24 = vpop.f32.mrf.mxu3 }
 0x1fe   :  { %v2001_v25 = vpop.f32.mrf.mxu0 }
 0x1ff   :  { %v6136_v23 = vpack.c.bf16 %v3680_v14, %v3679_v13  ;;  %v3092_v27 = vadd.f32 %v3091_v47, %v2359_v19  ;;  %v2734_v28 = vpop.f32.mrf.mxu1  ;;  %v2002_v33 = vadd.f32 %v7609_v16, %v2001_v25  ;;  %v5787_v47 = vld [vmem:[%s9474_s0 + $0x1f4] sm:$0xf0]  ;;  %v4766_v14 = vld [vmem:[%s9474_s0 + $0x200] sm:$0xf] }
 0x200   :  { %v4759_v57 = vor.u32 %v5787_v47, %v4758_v38  ;;  %v5342_v25 = vld [vmem:[%s9474_s0 + $0x680] sm:$0xf] }
 0x201   :  { %6768 = vst [vmem:[%s9475_s3 + $0xa8] sm:$0xff] %v6136_v23   ;;  %v3535_v32 = vmul.f32 0.01, %v3092_v27  ;;  %2040 = vmatmul.bf16.gmra.mxu0 %v4751_v18  ;;  %2400 = vmatmul.bf16.gmra.mxu2 %v5327_v20  ;;  %v2735_v35 = vadd.f32 %v2734_v28, %v2002_v33  ;;  %v5352_v28 = vld [vmem:[%s9474_s0 + $0x698] sm:$0xf0] }
 0x202   :  { %2773 = vmatmul.bf16.gmra.mxu1 %v4755_v26  ;;  %3138 = vmatmul.bf16.gmra.mxu3 %v5339_v21  ;;  %v5933_v26 = vld [vmem:[%s9474_s0 + $0x684] sm:$0xf0]  ;;  %v4768_v21 = vld [vmem:[%s9474_s0 + $0x208] sm:$0xf0] }
 0x203   :  { %v3824_v29 = vmax.f32 %v3092_v27, %v3535_v32  ;;  %v3392_v42 = vmul.f32 0.01, %v2735_v35  ;;  %v5934_v27 = vld [vmem:[%s9474_s0 + $0x694] sm:$0xf] }
 0x204   :  { %v2361_v30 = vpop.f32.mrf.mxu2 }
 0x205   :  { %v6496_v31 = vpack.c.bf16 %v3824_v29, %v3823_v34  ;;  %v3099_v36 = vpop.f32.mrf.mxu3  ;;  %v2362_v40 = vadd.f32 %v7609_v16, %v2361_v30  ;;  %v3681_v52 = vmax.f32 %v2735_v35, %v3392_v42  ;;  %v8018_v30 = vld [vmem:[%s9473_s2] ss:$0 sm:$0xff]  ;;  %v5343_v35 = vor.u32 %v5933_v26, %v5342_v25 }
 0x206   :  { %v2003_v39 = vpop.f32.mrf.mxu0 }
 0x207   :  { %6840 = vst [vmem:[%s9475_s3 + $0x2e8] sm:$0xff] %v6496_v31   ;;  %v2004_v41 = vadd.f32 %v7609_v16, %v2003_v39  ;;  %v2736_v37 = vpop.f32.mrf.mxu1  ;;  %v3095_v46 = vadd.f32 %v3094_v60, %v2362_v40  ;;  %v5347_v60 = vor.u32 %v5932_v51, %v5344_v54 }
 0x209   :  { %v2737_v43 = vadd.f32 %v2736_v37, %v2004_v41  ;;  %v3536_v61 = vmul.f32 0.01, %v3095_v46  ;;  %v5355_v41 = vor.u32 %v5934_v27, %v5352_v28 }
 0x20b   :  { %v3393_v50 = vmul.f32 0.01, %v2737_v43  ;;  %v3825_v10 = vmax.f32 %v3095_v46, %v3536_v61  ;;  %v4776_v61 = vld [vmem:[%s9474_s0 + $0x218] sm:$0xf0] }
 0x20c   :  { %v2363_v55 = vpop.f32.mrf.mxu2 }
 0x20d   :  { %v3682_v53 = vmax.f32 %v2737_v43, %v3393_v50  ;;  %v2364_v58 = vadd.f32 %v7609_v16, %v2363_v55  ;;  %v3101_v63 = vpop.f32.mrf.mxu3 }
 0x20e   :  { %v2006_v1 = vpop.f32.mrf.mxu0 }
 0x20f   :  { %v6141_v62 = vpack.c.bf16 %v3682_v53, %v3681_v52  ;;  %v3097_v3 = vadd.f32 %v3096_v24, %v2364_v58  ;;  %v2739_v4 = vpop.f32.mrf.mxu1  ;;  %v2007_v9 = vadd.f32 %v7609_v16, %v2006_v1  ;;  %v5789_v24 = vld [vmem:[%s9474_s0 + $0x204] sm:$0xf0]  ;;  %v4774_v53 = vld [vmem:[%s9474_s0 + $0x210] sm:$0xf] }
 0x210   :  { %v4767_v33 = vor.u32 %v5789_v24, %v4766_v14  ;;  %v5350_v1 = vld [vmem:[%s9474_s0 + $0x690] sm:$0xf] }
 0x211   :  { %6769 = vst [vmem:[%s9475_s3 + $0xb0] sm:$0xff] %v6141_v62   ;;  %v3537_v8 = vmul.f32 0.01, %v3097_v3  ;;  %2045 = vmatmul.bf16.gmra.mxu0 %v4759_v57  ;;  %2405 = vmatmul.bf16.gmra.mxu2 %v5335_v59  ;;  %v2740_v11 = vadd.f32 %v2739_v4, %v2007_v9  ;;  %v5936_v4 = vld [vmem:[%s9474_s0 + $0x6a4] sm:$0xf] }
 0x212   :  { %2778 = vmatmul.bf16.gmra.mxu1 %v4763_v2  ;;  %3143 = vmatmul.bf16.gmra.mxu3 %v5347_v60  ;;  %v5935_v2 = vld [vmem:[%s9474_s0 + $0x694] sm:$0xf0]  ;;  %v5790_v60 = vld [vmem:[%s9474_s0 + $0x214] sm:$0xf] }
 0x213   :  { %v3826_v5 = vmax.f32 %v3097_v3, %v3537_v8  ;;  %v3394_v19 = vmul.f32 0.01, %v2740_v11  ;;  %v5360_v8 = vld [vmem:[%s9474_s0 + $0x6a8] sm:$0xf0] }
 0x214   :  { %v2366_v6 = vpop.f32.mrf.mxu2 }
 0x215   :  { %v6501_v7 = vpack.c.bf16 %v3826_v5, %v3825_v10  ;;  %v3104_v12 = vpop.f32.mrf.mxu3  ;;  %v2367_v56 = vadd.f32 %v7609_v16, %v2366_v6  ;;  %v3683_v34 = vmax.f32 %v2740_v11, %v3394_v19  ;;  %v5351_v11 = vor.u32 %v5935_v2, %v5350_v1 }
 0x216   :  { %v2008_v15 = vpop.f32.mrf.mxu0 }
 0x217   :  { %6841 = vst [vmem:[%s9475_s3 + $0x2f0] sm:$0xff] %v6501_v7   ;;  %v2009_v18 = vadd.f32 %v7609_v16, %v2008_v15  ;;  %v2741_v13 = vpop.f32.mrf.mxu1  ;;  %v5788_v16 = vld [vmem:[%s9474_s0 + $0x204] sm:$0xf]  ;;  %v3100_v22 = vadd.f32 %v3099_v36, %v2367_v56 }
 0x218   :  { %v4771_v40 = vor.u32 %v5788_v16, %v4768_v21 }
 0x219   :  { %v2742_v20 = vadd.f32 %v2741_v13, %v2009_v18  ;;  %v3538_v37 = vmul.f32 0.01, %v3100_v22  ;;  %v4779_v18 = vor.u32 %v5790_v60, %v4776_v61 }
 0x21b   :  { %v3395_v23 = vmul.f32 0.01, %v2742_v20  ;;  %v3827_v49 = vmax.f32 %v3100_v22, %v3538_v37  ;;  %v4784_v37 = vld [vmem:[%s9474_s0 + $0x228] sm:$0xf0] }
 0x21c   :  { %v2368_v32 = vpop.f32.mrf.mxu2 }
 0x21d   :  { %v3684_v29 = vmax.f32 %v2742_v20, %v3395_v23  ;;  %v2369_v31 = vadd.f32 %v8018_v30, %v2368_v32  ;;  %v3106_v36 = vpop.f32.mrf.mxu3 }
 0x21e   :  { %v2011_v39 = vpop.f32.mrf.mxu0 }
 0x21f   :  { %v6146_v38 = vpack.c.bf16 %v3684_v29, %v3683_v34  ;;  %v3102_v42 = vadd.f32 %v3101_v63, %v2369_v31  ;;  %v2744_v43 = vpop.f32.mrf.mxu1  ;;  %v2012_v48 = vadd.f32 %v8018_v30, %v2011_v39  ;;  %v5791_v63 = vld [vmem:[%s9474_s0 + $0x214] sm:$0xf0]  ;;  %v4782_v29 = vld [vmem:[%s9474_s0 + $0x220] sm:$0xf] }
 0x220   :  { %v4775_v10 = vor.u32 %v5791_v63, %v4774_v53  ;;  %v5358_v39 = vld [vmem:[%s9474_s0 + $0x6a0] sm:$0xf] }
 0x221   :  { %6770 = vst [vmem:[%s9475_s3 + $0xb8] sm:$0xff] %v6146_v38   ;;  %v3539_v47 = vmul.f32 0.01, %v3102_v42  ;;  %2050 = vmatmul.bf16.gmra.mxu0 %v4767_v33  ;;  %2410 = vmatmul.bf16.gmra.mxu2 %v5343_v35  ;;  %v2745_v50 = vadd.f32 %v2744_v43, %v2012_v48  ;;  %v5938_v43 = vld [vmem:[%s9474_s0 + $0x6b4] sm:$0xf] }
 0x222   :  { %2783 = vmatmul.bf16.gmra.mxu1 %v4771_v40  ;;  %3148 = vmatmul.bf16.gmra.mxu3 %v5355_v41  ;;  %v5937_v40 = vld [vmem:[%s9474_s0 + $0x6a4] sm:$0xf0]  ;;  %v5792_v41 = vld [vmem:[%s9474_s0 + $0x224] sm:$0xf] }
 0x223   :  { %v3828_v44 = vmax.f32 %v3102_v42, %v3539_v47  ;;  %v3396_v58 = vmul.f32 0.01, %v2745_v50  ;;  %v5368_v47 = vld [vmem:[%s9474_s0 + $0x6b8] sm:$0xf0] }
 0x224   :  { %v2371_v45 = vpop.f32.mrf.mxu2 }
 0x225   :  { %v6506_v46 = vpack.c.bf16 %v3828_v44, %v3827_v49  ;;  %v3109_v51 = vpop.f32.mrf.mxu3  ;;  %v2372_v55 = vadd.f32 %v8018_v30, %v2371_v45  ;;  %v3685_v5 = vmax.f32 %v2745_v50, %v3396_v58  ;;  %v5359_v50 = vor.u32 %v5937_v40, %v5358_v39 }
 0x226   :  { %v2013_v54 = vpop.f32.mrf.mxu0 }
 0x227   :  { %6842 = vst [vmem:[%s9475_s3 + $0x2f8] sm:$0xff] %v6506_v46   ;;  %v2014_v57 = vadd.f32 %v8018_v30, %v2013_v54  ;;  %v2746_v52 = vpop.f32.mrf.mxu1  ;;  %v3105_v62 = vadd.f32 %v3104_v12, %v2372_v55  ;;  %v5363_v12 = vor.u32 %v5936_v4, %v5360_v8 }
 0x229   :  { %v2747_v59 = vadd.f32 %v2746_v52, %v2014_v57  ;;  %v3540_v13 = vmul.f32 0.01, %v3105_v62  ;;  %v4787_v57 = vor.u32 %v5792_v41, %v4784_v37 }
 0x22b   :  { %v3397_v3 = vmul.f32 0.01, %v2747_v59  ;;  %v3829_v26 = vmax.f32 %v3105_v62, %v3540_v13  ;;  %v4792_v13 = vld [vmem:[%s9474_s0 + $0x238] sm:$0xf0] }
 0x22c   :  { %v2373_v9 = vpop.f32.mrf.mxu2 }
 0x22d   :  { %v3686_v6 = vmax.f32 %v2747_v59, %v3397_v3  ;;  %v2374_v7 = vadd.f32 %v8018_v30, %v2373_v9  ;;  %v3111_v15 = vpop.f32.mrf.mxu3 }
 0x22e   :  { %v2016_v56 = vpop.f32.mrf.mxu0 }
 0x22f   :  { %v6151_v14 = vpack.c.bf16 %v3686_v6, %v3685_v5  ;;  %v3107_v19 = vadd.f32 %v3106_v36, %v2374_v7  ;;  %v2749_v20 = vpop.f32.mrf.mxu1  ;;  %v2017_v25 = vadd.f32 %v8018_v30, %v2016_v56  ;;  %v5793_v36 = vld [vmem:[%s9474_s0 + $0x224] sm:$0xf0]  ;;  %v4790_v6 = vld [vmem:[%s9474_s0 + $0x230] sm:$0xf] }
 0x230   :  { %v4783_v49 = vor.u32 %v5793_v36, %v4782_v29  ;;  %v5366_v56 = vld [vmem:[%s9474_s0 + $0x6b0] sm:$0xf] }
 0x231   :  { %6771 = vst [vmem:[%s9475_s3 + $0xc0] sm:$0xff] %v6151_v14   ;;  %v3541_v24 = vmul.f32 0.01, %v3107_v19  ;;  %2055 = vmatmul.bf16.gmra.mxu0 %v4775_v10  ;;  %2415 = vmatmul.bf16.gmra.mxu2 %v5351_v11  ;;  %v2750_v23 = vadd.f32 %v2749_v20, %v2017_v25  ;;  %v5940_v20 = vld [vmem:[%s9474_s0 + $0x6c4] sm:$0xf] }
 0x232   :  { %2788 = vmatmul.bf16.gmra.mxu1 %v4779_v18  ;;  %3153 = vmatmul.bf16.gmra.mxu3 %v5363_v12  ;;  %v5939_v18 = vld [vmem:[%s9474_s0 + $0x6b4] sm:$0xf0]  ;;  %v5794_v12 = vld [vmem:[%s9474_s0 + $0x234] sm:$0xf] }
 0x233   :  { %v3830_v16 = vmax.f32 %v3107_v19, %v3541_v24  ;;  %v3398_v31 = vmul.f32 0.01, %v2750_v23  ;;  %v5376_v24 = vld [vmem:[%s9474_s0 + $0x6c8] sm:$0xf0] }
 0x234   :  { %v2376_v21 = vpop.f32.mrf.mxu2 }
 0x235   :  { %v6511_v22 = vpack.c.bf16 %v3830_v16, %v3829_v26  ;;  %v3114_v27 = vpop.f32.mrf.mxu3  ;;  %v2377_v32 = vadd.f32 %v8018_v30, %v2376_v21  ;;  %v3687_v44 = vmax.f32 %v2750_v23, %v3398_v31  ;;  %v5367_v23 = vor.u32 %v5939_v18, %v5366_v56 }
 0x236   :  { %v2018_v28 = vpop.f32.mrf.mxu0 }
 0x237   :  { %6843 = vst [vmem:[%s9475_s3 + $0x300] sm:$0xff] %v6511_v22   ;;  %v2019_v33 = vadd.f32 %v8018_v30, %v2018_v28  ;;  %v2751_v34 = vpop.f32.mrf.mxu1  ;;  %v3110_v38 = vadd.f32 %v3109_v51, %v2377_v32  ;;  %v5371_v51 = vor.u32 %v5938_v43, %v5368_v47 }
 0x239   :  { %v2752_v35 = vadd.f32 %v2751_v34, %v2019_v33  ;;  %v3542_v52 = vmul.f32 0.01, %v3110_v38  ;;  %v4795_v33 = vor.u32 %v5794_v12, %v4792_v13 }
 0x23b   :  { %v3399_v42 = vmul.f32 0.01, %v2752_v35  ;;  %v3831_v2 = vmax.f32 %v3110_v38, %v3542_v52  ;;  %v4800_v52 = vld [vmem:[%s9474_s0 + $0x248] sm:$0xf0] }
 0x23c   :  { %v2378_v48 = vpop.f32.mrf.mxu2 }
 0x23d   :  { %v3688_v45 = vmax.f32 %v2752_v35, %v3399_v42  ;;  %v2379_v46 = vadd.f32 %v8018_v30, %v2378_v48  ;;  %v3116_v54 = vpop.f32.mrf.mxu3 }
 0x23e   :  { %v2021_v55 = vpop.f32.mrf.mxu0 }
 0x23f   :  { %v6156_v53 = vpack.c.bf16 %v3688_v45, %v3687_v44  ;;  %v3112_v58 = vadd.f32 %v3111_v15, %v2379_v46  ;;  %v2754_v59 = vpop.f32.mrf.mxu1  ;;  %v2022_v1 = vadd.f32 %v8018_v30, %v2021_v55  ;;  %v5795_v15 = vld [vmem:[%s9474_s0 + $0x234] sm:$0xf0]  ;;  %v4798_v45 = vld [vmem:[%s9474_s0 + $0x240] sm:$0xf] }
 0x240   :  { %v4791_v26 = vor.u32 %v5795_v15, %v4790_v6  ;;  %v5374_v55 = vld [vmem:[%s9474_s0 + $0x6c0] sm:$0xf] }
 0x241   :  { %6772 = vst [vmem:[%s9475_s3 + $0xc8] sm:$0xff] %v6156_v53   ;;  %v3543_v63 = vmul.f32 0.01, %v3112_v58  ;;  %2060 = vmatmul.bf16.gmra.mxu0 %v4783_v49  ;;  %2420 = vmatmul.bf16.gmra.mxu2 %v5359_v50  ;;  %v2755_v3 = vadd.f32 %v2754_v59, %v2022_v1  ;;  %v5942_v59 = vld [vmem:[%s9474_s0 + $0x6d4] sm:$0xf] }
 0x242   :  { %2793 = vmatmul.bf16.gmra.mxu1 %v4787_v57  ;;  %3158 = vmatmul.bf16.gmra.mxu3 %v5371_v51  ;;  %v5941_v57 = vld [vmem:[%s9474_s0 + $0x6c4] sm:$0xf0]  ;;  %v5796_v51 = vld [vmem:[%s9474_s0 + $0x244] sm:$0xf] }
 0x243   :  { %v3832_v60 = vmax.f32 %v3112_v58, %v3543_v63  ;;  %v3400_v7 = vmul.f32 0.01, %v2755_v3  ;;  %v5384_v63 = vld [vmem:[%s9474_s0 + $0x6d8] sm:$0xf0] }
 0x244   :  { %v2381_v61 = vpop.f32.mrf.mxu2 }
 0x245   :  { %v6516_v62 = vpack.c.bf16 %v3832_v60, %v3831_v2  ;;  %v3119_v4 = vpop.f32.mrf.mxu3  ;;  %v2382_v9 = vadd.f32 %v8018_v30, %v2381_v61  ;;  %v3689_v16 = vmax.f32 %v2755_v3, %v3400_v7  ;;  %v5375_v3 = vor.u32 %v5941_v57, %v5374_v55 }
 0x246   :  { %v2023_v8 = vpop.f32.mrf.mxu0 }
 0x247   :  { %6844 = vst [vmem:[%s9475_s3 + $0x308] sm:$0xff] %v6516_v62   ;;  %v2024_v10 = vadd.f32 %v8018_v30, %v2023_v8  ;;  %v2756_v5 = vpop.f32.mrf.mxu1  ;;  %v3115_v14 = vadd.f32 %v3114_v27, %v2382_v9  ;;  %v5379_v27 = vor.u32 %v5940_v20, %v5376_v24 }
 0x249   :  { %v2757_v11 = vadd.f32 %v2756_v5, %v2024_v10  ;;  %v3544_v34 = vmul.f32 0.01, %v3115_v14  ;;  %v4803_v10 = vor.u32 %v5796_v51, %v4800_v52 }
 0x24b   :  { %v3401_v19 = vmul.f32 0.01, %v2757_v11  ;;  %v3833_v40 = vmax.f32 %v3115_v14, %v3544_v34  ;;  %v4808_v34 = vld [vmem:[%s9474_s0 + $0x258] sm:$0xf0] }
 0x24c   :  { %v2383_v25 = vpop.f32.mrf.mxu2 }
 0x24d   :  { %v3690_v21 = vmax.f32 %v2757_v11, %v3401_v19  ;;  %v2384_v22 = vadd.f32 %v8018_v30, %v2383_v25  ;;  %v3121_v28 = vpop.f32.mrf.mxu3 }
 0x24e   :  { %v2026_v32 = vpop.f32.mrf.mxu0 }
 0x24f   :  { %v6161_v29 = vpack.c.bf16 %v3690_v21, %v3689_v16  ;;  %v3117_v31 = vadd.f32 %v3116_v54, %v2384_v22  ;;  %v2759_v35 = vpop.f32.mrf.mxu1  ;;  %v2027_v39 = vadd.f32 %v8018_v30, %v2026_v32  ;;  %v5797_v54 = vld [vmem:[%s9474_s0 + $0x244] sm:$0xf0]  ;;  %v4806_v21 = vld [vmem:[%s9474_s0 + $0x250] sm:$0xf] }
 0x250   :  { %v4799_v2 = vor.u32 %v5797_v54, %v4798_v45  ;;  %v5382_v32 = vld [vmem:[%s9474_s0 + $0x6d0] sm:$0xf] }
 0x251   :  { %6773 = vst [vmem:[%s9475_s3 + $0xd0] sm:$0xff] %v6161_v29   ;;  %v3545_v36 = vmul.f32 0.01, %v3117_v31  ;;  %2065 = vmatmul.bf16.gmra.mxu0 %v4791_v26  ;;  %2425 = vmatmul.bf16.gmra.mxu2 %v5367_v23  ;;  %v2760_v42 = vadd.f32 %v2759_v35, %v2027_v39  ;;  %v5944_v35 = vld [vmem:[%s9474_s0 + $0x6e4] sm:$0xf] }
 0x252   :  { %2798 = vmatmul.bf16.gmra.mxu1 %v4795_v33  ;;  %3163 = vmatmul.bf16.gmra.mxu3 %v5379_v27  ;;  %v5943_v33 = vld [vmem:[%s9474_s0 + $0x6d4] sm:$0xf0]  ;;  %v5798_v27 = vld [vmem:[%s9474_s0 + $0x254] sm:$0xf] }
 0x253   :  { %v3834_v41 = vmax.f32 %v3117_v31, %v3545_v36  ;;  %v3402_v46 = vmul.f32 0.01, %v2760_v42  ;;  %v5392_v36 = vld [vmem:[%s9474_s0 + $0x6e8] sm:$0xf0] }
 0x254   :  { %v2386_v37 = vpop.f32.mrf.mxu2 }
 0x255   :  { %v6521_v38 = vpack.c.bf16 %v3834_v41, %v3833_v40  ;;  %v3124_v43 = vpop.f32.mrf.mxu3  ;;  %v2387_v48 = vadd.f32 %v8018_v30, %v2386_v37  ;;  %v3691_v60 = vmax.f32 %v2760_v42, %v3402_v46  ;;  %v5383_v42 = vor.u32 %v5943_v33, %v5382_v32 }
 0x256   :  { %v2028_v47 = vpop.f32.mrf.mxu0 }
 0x257   :  { %6845 = vst [vmem:[%s9475_s3 + $0x310] sm:$0xff] %v6521_v38   ;;  %v2029_v49 = vadd.f32 %v8018_v30, %v2028_v47  ;;  %v2761_v44 = vpop.f32.mrf.mxu1  ;;  %v3120_v53 = vadd.f32 %v3119_v4, %v2387_v48  ;;  %v5387_v4 = vor.u32 %v5942_v59, %v5384_v63 }
 0x259   :  { %v2762_v50 = vadd.f32 %v2761_v44, %v2029_v49  ;;  %v3546_v5 = vmul.f32 0.01, %v3120_v53  ;;  %v4811_v49 = vor.u32 %v5798_v27, %v4808_v34 }
 0x25b   :  { %v3403_v58 = vmul.f32 0.01, %v2762_v50  ;;  %v3835_v18 = vmax.f32 %v3120_v53, %v3546_v5  ;;  %v4816_v5 = vld [vmem:[%s9474_s0 + $0x268] sm:$0xf0] }
 0x25c   :  { %v2388_v1 = vpop.f32.mrf.mxu2 }
 0x25d   :  { %v3692_v61 = vmax.f32 %v2762_v50, %v3403_v58  ;;  %v2389_v62 = vadd.f32 %v8018_v30, %v2388_v1  ;;  %v3126_v8 = vpop.f32.mrf.mxu3 }
 0x25e   :  { %v2031_v9 = vpop.f32.mrf.mxu0 }
 0x25f   :  { %v6166_v6 = vpack.c.bf16 %v3692_v61, %v3691_v60  ;;  %v3122_v7 = vadd.f32 %v3121_v28, %v2389_v62  ;;  %v2764_v11 = vpop.f32.mrf.mxu1  ;;  %v2032_v56 = vadd.f32 %v8018_v30, %v2031_v9  ;;  %v5799_v28 = vld [vmem:[%s9474_s0 + $0x254] sm:$0xf0]  ;;  %v4814_v61 = vld [vmem:[%s9474_s0 + $0x260] sm:$0xf] }
 0x260   :  { %v4807_v40 = vor.u32 %v5799_v28, %v4806_v21  ;;  %v5390_v9 = vld [vmem:[%s9474_s0 + $0x6e0] sm:$0xf] }
 0x261   :  { %6774 = vst [vmem:[%s9475_s3 + $0xd8] sm:$0xff] %v6166_v6   ;;  %v3547_v15 = vmul.f32 0.01, %v3122_v7  ;;  %2070 = vmatmul.bf16.gmra.mxu0 %v4799_v2  ;;  %2430 = vmatmul.bf16.gmra.mxu2 %v5375_v3  ;;  %v2765_v19 = vadd.f32 %v2764_v11, %v2032_v56  ;;  %v5946_v11 = vld [vmem:[%s9474_s0 + $0x6f4] sm:$0xf] }
 0x262   :  { %2803 = vmatmul.bf16.gmra.mxu1 %v4803_v10  ;;  %3168 = vmatmul.bf16.gmra.mxu3 %v5387_v4  ;;  %v5945_v10 = vld [vmem:[%s9474_s0 + $0x6e4] sm:$0xf0]  ;;  %v5800_v4 = vld [vmem:[%s9474_s0 + $0x264] sm:$0xf] }
 0x263   :  { %v3836_v12 = vmax.f32 %v3122_v7, %v3547_v15  ;;  %v3404_v22 = vmul.f32 0.01, %v2765_v19  ;;  %v5400_v15 = vld [vmem:[%s9474_s0 + $0x6f8] sm:$0xf0] }
 0x264   :  { %v2391_v13 = vpop.f32.mrf.mxu2 }
 0x265   :  { %v6526_v14 = vpack.c.bf16 %v3836_v12, %v3835_v18  ;;  %v3129_v20 = vpop.f32.mrf.mxu3  ;;  %v2392_v25 = vadd.f32 %v8018_v30, %v2391_v13  ;;  %v3693_v41 = vmax.f32 %v2765_v19, %v3404_v22  ;;  %v5391_v19 = vor.u32 %v5945_v10, %v5390_v9 }
 0x266   :  { %v2033_v24 = vpop.f32.mrf.mxu0 }
 0x267   :  { %6846 = vst [vmem:[%s9475_s3 + $0x318] sm:$0xff] %v6526_v14   ;;  %v2034_v26 = vadd.f32 %v8018_v30, %v2033_v24  ;;  %v2766_v16 = vpop.f32.mrf.mxu1  ;;  %v3125_v29 = vadd.f32 %v3124_v43, %v2392_v25  ;;  %v5395_v43 = vor.u32 %v5944_v35, %v5392_v36 }
 0x269   :  { %v2767_v23 = vadd.f32 %v2766_v16, %v2034_v26  ;;  %v3548_v44 = vmul.f32 0.01, %v3125_v29  ;;  %v4819_v26 = vor.u32 %v5800_v4, %v4816_v5 }
 0x26b   :  { %v3405_v31 = vmul.f32 0.01, %v2767_v23  ;;  %v3837_v57 = vmax.f32 %v3125_v29, %v3548_v44  ;;  %v4824_v44 = vld [vmem:[%s9474_s0 + $0x278] sm:$0xf0] }
 0x26c   :  { %v2393_v39 = vpop.f32.mrf.mxu2 }
 0x26d   :  { %v3694_v37 = vmax.f32 %v2767_v23, %v3405_v31  ;;  %v2394_v38 = vadd.f32 %v8018_v30, %v2393_v39  ;;  %v3131_v47 = vpop.f32.mrf.mxu3 }
 0x26e   :  { %v2036_v48 = vpop.f32.mrf.mxu0 }
 0x26f   :  { %v6171_v45 = vpack.c.bf16 %v3694_v37, %v3693_v41  ;;  %v3127_v46 = vadd.f32 %v3126_v8, %v2394_v38  ;;  %v2769_v50 = vpop.f32.mrf.mxu1  ;;  %v2037_v55 = vadd.f32 %v8018_v30, %v2036_v48  ;;  %v5801_v8 = vld [vmem:[%s9474_s0 + $0x264] sm:$0xf0]  ;;  %v4822_v37 = vld [vmem:[%s9474_s0 + $0x270] sm:$0xf] }
 0x270   :  { %v4815_v18 = vor.u32 %v5801_v8, %v4814_v61  ;;  %v5398_v48 = vld [vmem:[%s9474_s0 + $0x6f0] sm:$0xf] }
 0x271   :  { %6775 = vst [vmem:[%s9475_s3 + $0xe0] sm:$0xff] %v6171_v45   ;;  %v3549_v54 = vmul.f32 0.01, %v3127_v46  ;;  %2075 = vmatmul.bf16.gmra.mxu0 %v4807_v40  ;;  %2435 = vmatmul.bf16.gmra.mxu2 %v5383_v42  ;;  %v2770_v58 = vadd.f32 %v2769_v50, %v2037_v55  ;;  %v5948_v50 = vld [vmem:[%s9474_s0 + $0x704] sm:$0xf] }
 0x272   :  { %2808 = vmatmul.bf16.gmra.mxu1 %v4811_v49  ;;  %3173 = vmatmul.bf16.gmra.mxu3 %v5395_v43  ;;  %v5947_v49 = vld [vmem:[%s9474_s0 + $0x6f4] sm:$0xf0]  ;;  %v5802_v43 = vld [vmem:[%s9474_s0 + $0x274] sm:$0xf] }
 0x273   :  { %v3838_v51 = vmax.f32 %v3127_v46, %v3549_v54  ;;  %v3406_v62 = vmul.f32 0.01, %v2770_v58  ;;  %v5408_v54 = vld [vmem:[%s9474_s0 + $0x708] sm:$0xf0] }
 0x274   :  { %v2396_v52 = vpop.f32.mrf.mxu2 }
 0x275   :  { %v6531_v53 = vpack.c.bf16 %v3838_v51, %v3837_v57  ;;  %v3134_v59 = vpop.f32.mrf.mxu3  ;;  %v2397_v1 = vadd.f32 %v8018_v30, %v2396_v52  ;;  %v3695_v12 = vmax.f32 %v2770_v58, %v3406_v62  ;;  %v5399_v58 = vor.u32 %v5947_v49, %v5398_v48 }
 0x276   :  { %v2038_v63 = vpop.f32.mrf.mxu0 }
 0x277   :  { %6847 = vst [vmem:[%s9475_s3 + $0x320] sm:$0xff] %v6531_v53   ;;  %v2039_v2 = vadd.f32 %v8018_v30, %v2038_v63  ;;  %v2771_v60 = vpop.f32.mrf.mxu1  ;;  %v3130_v6 = vadd.f32 %v3129_v20, %v2397_v1  ;;  %v5403_v20 = vor.u32 %v5946_v11, %v5400_v15 }
 0x279   :  { %v2772_v3 = vadd.f32 %v2771_v60, %v2039_v2  ;;  %v3550_v16 = vmul.f32 0.01, %v3130_v6  ;;  %v4827_v2 = vor.u32 %v5802_v43, %v4824_v44 }
 0x27b   :  { %v3407_v7 = vmul.f32 0.01, %v2772_v3  ;;  %v3839_v33 = vmax.f32 %v3130_v6, %v3550_v16  ;;  %v4832_v16 = vld [vmem:[%s9474_s0 + $0x288] sm:$0xf0] }
 0x27c   :  { %v2398_v56 = vpop.f32.mrf.mxu2 }
 0x27d   :  { %v3696_v13 = vmax.f32 %v2772_v3, %v3407_v7  ;;  %v2399_v14 = vadd.f32 %v8018_v30, %v2398_v56  ;;  %v3136_v24 = vpop.f32.mrf.mxu3 }
 0x27e   :  { %v2041_v25 = vpop.f32.mrf.mxu0 }
 0x27f   :  { %v6176_v21 = vpack.c.bf16 %v3696_v13, %v3695_v12  ;;  %v3132_v22 = vadd.f32 %v3131_v47, %v2399_v14  ;;  %v2774_v23 = vpop.f32.mrf.mxu1  ;;  %v2042_v32 = vadd.f32 %v8018_v30, %v2041_v25  ;;  %v5803_v47 = vld [vmem:[%s9474_s0 + $0x274] sm:$0xf0]  ;;  %v4830_v13 = vld [vmem:[%s9474_s0 + $0x280] sm:$0xf] }
 0x280   :  { %v4823_v57 = vor.u32 %v5803_v47, %v4822_v37  ;;  %v5406_v25 = vld [vmem:[%s9474_s0 + $0x700] sm:$0xf] }
 0x281   :  { %6776 = vst [vmem:[%s9475_s3 + $0xe8] sm:$0xff] %v6176_v21   ;;  %v3551_v28 = vmul.f32 0.01, %v3132_v22  ;;  %2080 = vmatmul.bf16.gmra.mxu0 %v4815_v18  ;;  %2440 = vmatmul.bf16.gmra.mxu2 %v5391_v19  ;;  %v2775_v31 = vadd.f32 %v2774_v23, %v2042_v32  ;;  %v5950_v23 = vld [vmem:[%s9474_s0 + $0x714] sm:$0xf] }
 0x282   :  { %2813 = vmatmul.bf16.gmra.mxu1 %v4819_v26  ;;  %3178 = vmatmul.bf16.gmra.mxu3 %v5403_v20  ;;  %v5949_v26 = vld [vmem:[%s9474_s0 + $0x704] sm:$0xf0]  ;;  %v5804_v20 = vld [vmem:[%s9474_s0 + $0x284] sm:$0xf] }
 0x283   :  { %v3840_v27 = vmax.f32 %v3132_v22, %v3551_v28  ;;  %v3408_v38 = vmul.f32 0.01, %v2775_v31  ;;  %v5416_v28 = vld [vmem:[%s9474_s0 + $0x718] sm:$0xf0] }
 0x284   :  { %v2401_v34 = vpop.f32.mrf.mxu2 }
 0x285   :  { %v6536_v29 = vpack.c.bf16 %v3840_v27, %v3839_v33  ;;  %v3139_v35 = vpop.f32.mrf.mxu3  ;;  %v2402_v39 = vadd.f32 %v8018_v30, %v2401_v34  ;;  %v3697_v51 = vmax.f32 %v2775_v31, %v3408_v38  ;;  %v5407_v31 = vor.u32 %v5949_v26, %v5406_v25 }
 0x286   :  { %v2043_v36 = vpop.f32.mrf.mxu0 }
 0x287   :  { %6848 = vst [vmem:[%s9475_s3 + $0x328] sm:$0xff] %v6536_v29   ;;  %v2044_v40 = vadd.f32 %v8018_v30, %v2043_v36  ;;  %v2776_v41 = vpop.f32.mrf.mxu1  ;;  %v3135_v45 = vadd.f32 %v3134_v59, %v2402_v39  ;;  %v5411_v59 = vor.u32 %v5948_v50, %v5408_v54 }
 0x289   :  { %v2777_v42 = vadd.f32 %v2776_v41, %v2044_v40  ;;  %v3552_v60 = vmul.f32 0.01, %v3135_v45  ;;  %v4835_v40 = vor.u32 %v5804_v20, %v4832_v16 }
 0x28b   :  { %v3409_v46 = vmul.f32 0.01, %v2777_v42  ;;  %v3841_v10 = vmax.f32 %v3135_v45, %v3552_v60  ;;  %v4840_v60 = vld [vmem:[%s9474_s0 + $0x298] sm:$0xf0] }
 0x28c   :  { %v2403_v55 = vpop.f32.mrf.mxu2 }
 0x28d   :  { %v3698_v52 = vmax.f32 %v2777_v42, %v3409_v46  ;;  %v2404_v53 = vadd.f32 %v8018_v30, %v2403_v55  ;;  %v3141_v63 = vpop.f32.mrf.mxu3 }
 0x28e   :  { %v2046_v1 = vpop.f32.mrf.mxu0 }
 0x28f   :  { %v6181_v61 = vpack.c.bf16 %v3698_v52, %v3697_v51  ;;  %v3137_v62 = vadd.f32 %v3136_v24, %v2404_v53  ;;  %v2779_v3 = vpop.f32.mrf.mxu1  ;;  %v2047_v9 = vadd.f32 %v8018_v30, %v2046_v1  ;;  %v5805_v24 = vld [vmem:[%s9474_s0 + $0x284] sm:$0xf0]  ;;  %v4838_v52 = vld [vmem:[%s9474_s0 + $0x290] sm:$0xf] }
 0x290   :  { %v4831_v33 = vor.u32 %v5805_v24, %v4830_v13  ;;  %v5414_v1 = vld [vmem:[%s9474_s0 + $0x710] sm:$0xf] }
 0x291   :  { %6777 = vst [vmem:[%s9475_s3 + $0xf0] sm:$0xff] %v6181_v61   ;;  %v3553_v8 = vmul.f32 0.01, %v3137_v62  ;;  %2085 = vmatmul.bf16.gmra.mxu0 %v4823_v57  ;;  %2445 = vmatmul.bf16.gmra.mxu2 %v5399_v58  ;;  %v2780_v7 = vadd.f32 %v2779_v3, %v2047_v9  ;;  %v5952_v3 = vld [vmem:[%s9474_s0 + $0x724] sm:$0xf] }
 0x292   :  { %2818 = vmatmul.bf16.gmra.mxu1 %v4827_v2  ;;  %3183 = vmatmul.bf16.gmra.mxu3 %v5411_v59  ;;  %v5951_v2 = vld [vmem:[%s9474_s0 + $0x714] sm:$0xf0]  ;;  %v5806_v59 = vld [vmem:[%s9474_s0 + $0x294] sm:$0xf] }
 0x293   :  { %v3842_v4 = vmax.f32 %v3137_v62, %v3553_v8  ;;  %v3410_v14 = vmul.f32 0.01, %v2780_v7  ;;  %v5424_v8 = vld [vmem:[%s9474_s0 + $0x728] sm:$0xf0] }
 0x294   :  { %v2406_v5 = vpop.f32.mrf.mxu2 }
 0x295   :  { %v6541_v6 = vpack.c.bf16 %v3842_v4, %v3841_v10  ;;  %v3144_v11 = vpop.f32.mrf.mxu3  ;;  %v2407_v56 = vadd.f32 %v8018_v30, %v2406_v5  ;;  %v3699_v27 = vmax.f32 %v2780_v7, %v3410_v14  ;;  %v5415_v7 = vor.u32 %v5951_v2, %v5414_v1 }
 0x296   :  { %v2048_v15 = vpop.f32.mrf.mxu0 }
 0x297   :  { %6849 = vst [vmem:[%s9475_s3 + $0x330] sm:$0xff] %v6541_v6   ;;  %v2049_v18 = vadd.f32 %v8018_v30, %v2048_v15  ;;  %v2781_v12 = vpop.f32.mrf.mxu1  ;;  %v3140_v21 = vadd.f32 %v3139_v35, %v2407_v56  ;;  %v5419_v35 = vor.u32 %v5950_v23, %v5416_v28 }
 0x299   :  { %v2782_v19 = vadd.f32 %v2781_v12, %v2049_v18  ;;  %v3554_v41 = vmul.f32 0.01, %v3140_v21  ;;  %v4843_v18 = vor.u32 %v5806_v59, %v4840_v60 }
 0x29b   :  { %v3411_v22 = vmul.f32 0.01, %v2782_v19  ;;  %v3843_v49 = vmax.f32 %v3140_v21, %v3554_v41  ;;  %v4848_v41 = vld [vmem:[%s9474_s0 + $0x2a8] sm:$0xf0] }
 0x29c   :  { %v2408_v32 = vpop.f32.mrf.mxu2 }
 0x29d   :  { %v3700_v34 = vmax.f32 %v2782_v19, %v3411_v22  ;;  %v2409_v29 = vadd.f32 %v8018_v30, %v2408_v32  ;;  %v3146_v36 = vpop.f32.mrf.mxu3 }
 0x29e   :  { %v2051_v39 = vpop.f32.mrf.mxu0 }
 0x29f   :  { %v6186_v37 = vpack.c.bf16 %v3700_v34, %v3699_v27  ;;  %v3142_v38 = vadd.f32 %v3141_v63, %v2409_v29  ;;  %v2784_v42 = vpop.f32.mrf.mxu1  ;;  %v2052_v48 = vadd.f32 %v8018_v30, %v2051_v39  ;;  %v5807_v63 = vld [vmem:[%s9474_s0 + $0x294] sm:$0xf0]  ;;  %v4846_v34 = vld [vmem:[%s9474_s0 + $0x2a0] sm:$0xf] }
 0x2a0   :  { %v4839_v10 = vor.u32 %v5807_v63, %v4838_v52  ;;  %v5422_v39 = vld [vmem:[%s9474_s0 + $0x720] sm:$0xf] }
 0x2a1   :  { %6778 = vst [vmem:[%s9475_s3 + $0xf8] sm:$0xff] %v6186_v37   ;;  %v3555_v47 = vmul.f32 0.01, %v3142_v38  ;;  %2090 = vmatmul.bf16.gmra.mxu0 %v4831_v33  ;;  %2450 = vmatmul.bf16.gmra.mxu2 %v5407_v31  ;;  %v2785_v46 = vadd.f32 %v2784_v42, %v2052_v48  ;;  %v5954_v42 = vld [vmem:[%s9474_s0 + $0x734] sm:$0xf] }
 0x2a2   :  { %2823 = vmatmul.bf16.gmra.mxu1 %v4835_v40  ;;  %3188 = vmatmul.bf16.gmra.mxu3 %v5419_v35  ;;  %v5953_v40 = vld [vmem:[%s9474_s0 + $0x724] sm:$0xf0]  ;;  %v5808_v35 = vld [vmem:[%s9474_s0 + $0x2a4] sm:$0xf] }
 0x2a3   :  { %v3844_v43 = vmax.f32 %v3142_v38, %v3555_v47  ;;  %v3412_v53 = vmul.f32 0.01, %v2785_v46  ;;  %v5432_v47 = vld [vmem:[%s9474_s0 + $0x738] sm:$0xf0] }
 0x2a4   :  { %v2411_v44 = vpop.f32.mrf.mxu2 }
 0x2a5   :  { %v6546_v45 = vpack.c.bf16 %v3844_v43, %v3843_v49  ;;  %v3149_v50 = vpop.f32.mrf.mxu3  ;;  %v2412_v55 = vadd.f32 %v8018_v30, %v2411_v44  ;;  %v3701_v4 = vmax.f32 %v2785_v46, %v3412_v53  ;;  %v5423_v46 = vor.u32 %v5953_v40, %v5422_v39 }
 0x2a6   :  { %v2053_v54 = vpop.f32.mrf.mxu0 }
 0x2a7   :  { %6850 = vst [vmem:[%s9475_s3 + $0x338] sm:$0xff] %v6546_v45   ;;  %v2054_v57 = vadd.f32 %v8018_v30, %v2053_v54  ;;  %v2786_v51 = vpop.f32.mrf.mxu1  ;;  %v3145_v61 = vadd.f32 %v3144_v11, %v2412_v55  ;;  %v5427_v11 = vor.u32 %v5952_v3, %v5424_v8 }
 0x2a9   :  { %v2787_v58 = vadd.f32 %v2786_v51, %v2054_v57  ;;  %v3556_v12 = vmul.f32 0.01, %v3145_v61  ;;  %v4851_v57 = vor.u32 %v5808_v35, %v4848_v41 }
 0x2ab   :  { %v3413_v62 = vmul.f32 0.01, %v2787_v58  ;;  %v3845_v26 = vmax.f32 %v3145_v61, %v3556_v12  ;;  %v4856_v12 = vld [vmem:[%s9474_s0 + $0x2b8] sm:$0xf0] }
 0x2ac   :  { %v2413_v9 = vpop.f32.mrf.mxu2 }
 0x2ad   :  { %v3702_v5 = vmax.f32 %v2787_v58, %v3413_v62  ;;  %v2414_v6 = vadd.f32 %v8018_v30, %v2413_v9  ;;  %v3151_v15 = vpop.f32.mrf.mxu3 }
 0x2ae   :  { %v2056_v56 = vpop.f32.mrf.mxu0 }
 0x2af   :  { %v6191_v13 = vpack.c.bf16 %v3702_v5, %v3701_v4  ;;  %v3147_v14 = vadd.f32 %v3146_v36, %v2414_v6  ;;  %v2789_v19 = vpop.f32.mrf.mxu1  ;;  %v2057_v25 = vadd.f32 %v8018_v30, %v2056_v56  ;;  %v5809_v36 = vld [vmem:[%s9474_s0 + $0x2a4] sm:$0xf0]  ;;  %v4854_v5 = vld [vmem:[%s9474_s0 + $0x2b0] sm:$0xf] }
 0x2b0   :  { %v4847_v49 = vor.u32 %v5809_v36, %v4846_v34  ;;  %v5430_v56 = vld [vmem:[%s9474_s0 + $0x730] sm:$0xf] }
 0x2b1   :  { %6779 = vst [vmem:[%s9475_s3 + $0x100] sm:$0xff] %v6191_v13   ;;  %v3557_v24 = vmul.f32 0.01, %v3147_v14  ;;  %2095 = vmatmul.bf16.gmra.mxu0 %v4839_v10  ;;  %2455 = vmatmul.bf16.gmra.mxu2 %v5415_v7  ;;  %v2790_v22 = vadd.f32 %v2789_v19, %v2057_v25  ;;  %v5956_v19 = vld [vmem:[%s9474_s0 + $0x744] sm:$0xf] }
 0x2b2   :  { %2828 = vmatmul.bf16.gmra.mxu1 %v4843_v18  ;;  %3193 = vmatmul.bf16.gmra.mxu3 %v5427_v11  ;;  %v5955_v18 = vld [vmem:[%s9474_s0 + $0x734] sm:$0xf0]  ;;  %v5810_v11 = vld [vmem:[%s9474_s0 + $0x2b4] sm:$0xf] }
 0x2b3   :  { %v3846_v20 = vmax.f32 %v3147_v14, %v3557_v24  ;;  %v3414_v29 = vmul.f32 0.01, %v2790_v22  ;;  %v5440_v24 = vld [vmem:[%s9474_s0 + $0x748] sm:$0xf0] }
 0x2b4   :  { %v2416_v16 = vpop.f32.mrf.mxu2 }
 0x2b5   :  { %v6551_v21 = vpack.c.bf16 %v3846_v20, %v3845_v26  ;;  %v3154_v23 = vpop.f32.mrf.mxu3  ;;  %v2417_v32 = vadd.f32 %v8018_v30, %v2416_v16  ;;  %v3703_v43 = vmax.f32 %v2790_v22, %v3414_v29  ;;  %v5431_v22 = vor.u32 %v5955_v18, %v5430_v56 }
 0x2b6   :  { %v2058_v28 = vpop.f32.mrf.mxu0 }
 0x2b7   :  { %6851 = vst [vmem:[%s9475_s3 + $0x340] sm:$0xff] %v6551_v21   ;;  %v2059_v33 = vadd.f32 %v8018_v30, %v2058_v28  ;;  %v2791_v27 = vpop.f32.mrf.mxu1  ;;  %v3150_v37 = vadd.f32 %v3149_v50, %v2417_v32  ;;  %v5435_v50 = vor.u32 %v5954_v42, %v5432_v47 }
 0x2b9   :  { %v2792_v31 = vadd.f32 %v2791_v27, %v2059_v33  ;;  %v3558_v51 = vmul.f32 0.01, %v3150_v37  ;;  %v4859_v33 = vor.u32 %v5810_v11, %v4856_v12 }
 0x2bb   :  { %v3415_v38 = vmul.f32 0.01, %v2792_v31  ;;  %v3847_v2 = vmax.f32 %v3150_v37, %v3558_v51 }
 0x2bc   :  { %v2418_v48 = vpop.f32.mrf.mxu2 }
 0x2bd   :  { %v3704_v44 = vmax.f32 %v2792_v31, %v3415_v38  ;;  %v2419_v45 = vadd.f32 %v8018_v30, %v2418_v48  ;;  %v3156_v54 = vpop.f32.mrf.mxu3 }
 0x2be   :  { %v2061_v55 = vpop.f32.mrf.mxu0 }
 0x2bf   :  { %v6196_v52 = vpack.c.bf16 %v3704_v44, %v3703_v43  ;;  %v3152_v53 = vadd.f32 %v3151_v15, %v2419_v45  ;;  %v2794_v58 = vpop.f32.mrf.mxu1  ;;  %v2062_v1 = vadd.f32 %v8018_v30, %v2061_v55  ;;  %v5811_v15 = vld [vmem:[%s9474_s0 + $0x2b4] sm:$0xf0]  ;;  %v4862_v44 = vld [vmem:[%s9474_s0 + $0x2c0] sm:$0xf] }
 0x2c0   :  { %v4855_v26 = vor.u32 %v5811_v15, %v4854_v5  ;;  %v5438_v55 = vld [vmem:[%s9474_s0 + $0x740] sm:$0xf] }
 0x2c1   :  { %6780 = vst [vmem:[%s9475_s3 + $0x108] sm:$0xff] %v6196_v52   ;;  %v3559_v63 = vmul.f32 0.01, %v3152_v53  ;;  %2100 = vmatmul.bf16.gmra.mxu0 %v4847_v49  ;;  %2460 = vmatmul.bf16.gmra.mxu2 %v5423_v46  ;;  %v2795_v62 = vadd.f32 %v2794_v58, %v2062_v1  ;;  %v5448_v58 = vld [vmem:[%s9474_s0 + $0x758] sm:$0xf0] }
 0x2c2   :  { %2833 = vmatmul.bf16.gmra.mxu1 %v4851_v57  ;;  %3198 = vmatmul.bf16.gmra.mxu3 %v5435_v50  ;;  %v5957_v57 = vld [vmem:[%s9474_s0 + $0x744] sm:$0xf0]  ;;  %v4864_v50 = vld [vmem:[%s9474_s0 + $0x2c8] sm:$0xf0] }
 0x2c3   :  { %v3848_v59 = vmax.f32 %v3152_v53, %v3559_v63  ;;  %v3416_v6 = vmul.f32 0.01, %v2795_v62  ;;  %v5958_v53 = vld [vmem:[%s9474_s0 + $0x754] sm:$0xf] }
 0x2c4   :  { %v2421_v60 = vpop.f32.mrf.mxu2 }
 0x2c5   :  { %v6556_v61 = vpack.c.bf16 %v3848_v59, %v3847_v2  ;;  %v3159_v3 = vpop.f32.mrf.mxu3  ;;  %v2422_v9 = vadd.f32 %v8018_v30, %v2421_v60  ;;  %v3705_v20 = vmax.f32 %v2795_v62, %v3416_v6  ;;  %v8431_v60 = vld [vmem:[%s9473_s2] ss:$0 sm:$0xff]  ;;  %v5439_v62 = vor.u32 %v5957_v57, %v5438_v55 }
 0x2c6   :  { %v2063_v8 = vpop.f32.mrf.mxu0 }
 0x2c7   :  { %6852 = vst [vmem:[%s9475_s3 + $0x348] sm:$0xff] %v6556_v61   ;;  %v2064_v10 = vadd.f32 %v8018_v30, %v2063_v8  ;;  %v2796_v4 = vpop.f32.mrf.mxu1  ;;  %v3155_v13 = vadd.f32 %v3154_v23, %v2422_v9  ;;  %v5443_v23 = vor.u32 %v5956_v19, %v5440_v24 }
 0x2c9   :  { %v2797_v7 = vadd.f32 %v2796_v4, %v2064_v10  ;;  %v3560_v27 = vmul.f32 0.01, %v3155_v13  ;;  %v5451_v10 = vor.u32 %v5958_v53, %v5448_v58 }
 0x2cb   :  { %v3417_v14 = vmul.f32 0.01, %v2797_v7  ;;  %v3849_v40 = vmax.f32 %v3155_v13, %v3560_v27  ;;  %v4872_v27 = vld [vmem:[%s9474_s0 + $0x2d8] sm:$0xf0] }
 0x2cc   :  { %v2423_v25 = vpop.f32.mrf.mxu2 }
 0x2cd   :  { %v3706_v16 = vmax.f32 %v2797_v7, %v3417_v14  ;;  %v2424_v21 = vadd.f32 %v8018_v30, %v2423_v25  ;;  %v3161_v28 = vpop.f32.mrf.mxu3 }
 0x2ce   :  { %v2066_v32 = vpop.f32.mrf.mxu0 }
 0x2cf   :  { %v6201_v34 = vpack.c.bf16 %v3706_v16, %v3705_v20  ;;  %v3157_v29 = vadd.f32 %v3156_v54, %v2424_v21  ;;  %v2799_v31 = vpop.f32.mrf.mxu1  ;;  %v2067_v39 = vadd.f32 %v8018_v30, %v2066_v32  ;;  %v5813_v54 = vld [vmem:[%s9474_s0 + $0x2c4] sm:$0xf0]  ;;  %v4870_v16 = vld [vmem:[%s9474_s0 + $0x2d0] sm:$0xf] }
 0x2d0   :  { %v4863_v1 = vor.u32 %v5813_v54, %v4862_v44  ;;  %v5446_v32 = vld [vmem:[%s9474_s0 + $0x750] sm:$0xf] }
 0x2d1   :  { %6781 = vst [vmem:[%s9475_s3 + $0x110] sm:$0xff] %v6201_v34   ;;  %v3561_v36 = vmul.f32 0.01, %v3157_v29  ;;  %2105 = vmatmul.bf16.gmra.mxu0 %v4855_v26  ;;  %2465 = vmatmul.bf16.gmra.mxu2 %v5431_v22  ;;  %v2800_v38 = vadd.f32 %v2799_v31, %v2067_v39  ;;  %v5960_v31 = vld [vmem:[%s9474_s0 + $0x764] sm:$0xf] }
 0x2d2   :  { %2838 = vmatmul.bf16.gmra.mxu1 %v4859_v33  ;;  %3203 = vmatmul.bf16.gmra.mxu3 %v5443_v23  ;;  %v5959_v33 = vld [vmem:[%s9474_s0 + $0x754] sm:$0xf0]  ;;  %v5814_v23 = vld [vmem:[%s9474_s0 + $0x2d4] sm:$0xf] }
 0x2d3   :  { %v3850_v35 = vmax.f32 %v3157_v29, %v3561_v36  ;;  %v3418_v45 = vmul.f32 0.01, %v2800_v38  ;;  %v5456_v36 = vld [vmem:[%s9474_s0 + $0x768] sm:$0xf0] }
 0x2d4   :  { %v2426_v41 = vpop.f32.mrf.mxu2 }
 0x2d5   :  { %v6561_v37 = vpack.c.bf16 %v3850_v35, %v3849_v40  ;;  %v3164_v42 = vpop.f32.mrf.mxu3  ;;  %v2427_v48 = vadd.f32 %v8018_v30, %v2426_v41  ;;  %v3707_v2 = vmax.f32 %v2800_v38, %v3418_v45  ;;  %v5447_v38 = vor.u32 %v5959_v33, %v5446_v32 }
 0x2d6   :  { %v2068_v47 = vpop.f32.mrf.mxu0 }
 0x2d7   :  { %6853 = vst [vmem:[%s9475_s3 + $0x350] sm:$0xff] %v6561_v37   ;;  %v2069_v49 = vadd.f32 %v8018_v30, %v2068_v47  ;;  %v2801_v43 = vpop.f32.mrf.mxu1  ;;  %v5812_v30 = vld [vmem:[%s9474_s0 + $0x2c4] sm:$0xf]  ;;  %v3160_v51 = vadd.f32 %v3159_v3, %v2427_v48 }
 0x2d8   :  { %v4867_v9 = vor.u32 %v5812_v30, %v4864_v50 }
 0x2d9   :  { %v2802_v46 = vadd.f32 %v2801_v43, %v2069_v49  ;;  %v3562_v4 = vmul.f32 0.01, %v3160_v51  ;;  %v4875_v49 = vor.u32 %v5814_v23, %v4872_v27 }
 0x2db   :  { %v3419_v52 = vmul.f32 0.01, %v2802_v46  ;;  %v3851_v18 = vmax.f32 %v3160_v51, %v3562_v4  ;;  %v4880_v4 = vld [vmem:[%s9474_s0 + $0x2e8] sm:$0xf0] }
 0x2dc   :  { %v2428_v63 = vpop.f32.mrf.mxu2 }
 0x2dd   :  { %v3708_v59 = vmax.f32 %v2802_v46, %v3419_v52  ;;  %v2429_v61 = vadd.f32 %v8431_v60, %v2428_v63  ;;  %v3166_v3 = vpop.f32.mrf.mxu3 }
 0x2de   :  { %v2071_v8 = vpop.f32.mrf.mxu0 }
 0x2df   :  { %v6206_v5 = vpack.c.bf16 %v3708_v59, %v3707_v2  ;;  %v3162_v6 = vadd.f32 %v3161_v28, %v2429_v61  ;;  %v2804_v7 = vpop.f32.mrf.mxu1  ;;  %v2072_v56 = vadd.f32 %v8431_v60, %v2071_v8  ;;  %v5815_v28 = vld [vmem:[%s9474_s0 + $0x2d4] sm:$0xf0]  ;;  %v4878_v59 = vld [vmem:[%s9474_s0 + $0x2e0] sm:$0xf] }
 0x2e0   :  { %v4871_v40 = vor.u32 %v5815_v28, %v4870_v16  ;;  %v5454_v8 = vld [vmem:[%s9474_s0 + $0x760] sm:$0xf] }
 0x2e1   :  { %6782 = vst [vmem:[%s9475_s3 + $0x118] sm:$0xff] %v6206_v5   ;;  %v3563_v15 = vmul.f32 0.01, %v3162_v6  ;;  %2110 = vmatmul.bf16.gmra.mxu0 %v4863_v1  ;;  %2470 = vmatmul.bf16.gmra.mxu2 %v5439_v62  ;;  %v2805_v14 = vadd.f32 %v2804_v7, %v2072_v56  ;;  %v5962_v7 = vld [vmem:[%s9474_s0 + $0x774] sm:$0xf] }
 0x2e2   :  { %2843 = vmatmul.bf16.gmra.mxu1 %v4867_v9  ;;  %3208 = vmatmul.bf16.gmra.mxu3 %v5451_v10  ;;  %v5961_v9 = vld [vmem:[%s9474_s0 + $0x764] sm:$0xf0]  ;;  %v5816_v10 = vld [vmem:[%s9474_s0 + $0x2e4] sm:$0xf] }
 0x2e3   :  { %v3852_v11 = vmax.f32 %v3162_v6, %v3563_v15  ;;  %v3420_v21 = vmul.f32 0.01, %v2805_v14  ;;  %v5464_v15 = vld [vmem:[%s9474_s0 + $0x778] sm:$0xf0] }
 0x2e4   :  { %v2431_v12 = vpop.f32.mrf.mxu2 }
 0x2e5   :  { %v6566_v13 = vpack.c.bf16 %v3852_v11, %v3851_v18  ;;  %v3169_v19 = vpop.f32.mrf.mxu3  ;;  %v2432_v25 = vadd.f32 %v8431_v60, %v2431_v12  ;;  %v3709_v35 = vmax.f32 %v2805_v14, %v3420_v21  ;;  %v5455_v14 = vor.u32 %v5961_v9, %v5454_v8 }
 0x2e6   :  { %v2073_v24 = vpop.f32.mrf.mxu0 }
 0x2e7   :  { %6854 = vst [vmem:[%s9475_s3 + $0x358] sm:$0xff] %v6566_v13   ;;  %v2074_v26 = vadd.f32 %v8431_v60, %v2073_v24  ;;  %v2806_v20 = vpop.f32.mrf.mxu1  ;;  %v3165_v34 = vadd.f32 %v3164_v42, %v2432_v25  ;;  %v5459_v42 = vor.u32 %v5960_v31, %v5456_v36 }
 0x2e9   :  { %v2807_v22 = vadd.f32 %v2806_v20, %v2074_v26  ;;  %v3564_v43 = vmul.f32 0.01, %v3165_v34  ;;  %v4883_v26 = vor.u32 %v5816_v10, %v4880_v4 }
 0x2eb   :  { %v3421_v29 = vmul.f32 0.01, %v2807_v22  ;;  %v3853_v57 = vmax.f32 %v3165_v34, %v3564_v43  ;;  %v4888_v43 = vld [vmem:[%s9474_s0 + $0x2f8] sm:$0xf0] }
 0x2ec   :  { %v2433_v39 = vpop.f32.mrf.mxu2 }
 0x2ed   :  { %v3710_v41 = vmax.f32 %v2807_v22, %v3421_v29  ;;  %v2434_v37 = vadd.f32 %v8431_v60, %v2433_v39  ;;  %v3171_v47 = vpop.f32.mrf.mxu3 }
 0x2ee   :  { %v2076_v48 = vpop.f32.mrf.mxu0 }
 0x2ef   :  { %v6211_v44 = vpack.c.bf16 %v3710_v41, %v3709_v35  ;;  %v3167_v45 = vadd.f32 %v3166_v3, %v2434_v37  ;;  %v2809_v46 = vpop.f32.mrf.mxu1  ;;  %v2077_v55 = vadd.f32 %v8431_v60, %v2076_v48  ;;  %v5817_v3 = vld [vmem:[%s9474_s0 + $0x2e4] sm:$0xf0]  ;;  %v4886_v41 = vld [vmem:[%s9474_s0 + $0x2f0] sm:$0xf] }
 0x2f0   :  { %v4879_v18 = vor.u32 %v5817_v3, %v4878_v59  ;;  %v5462_v48 = vld [vmem:[%s9474_s0 + $0x770] sm:$0xf] }
 0x2f1   :  { %6783 = vst [vmem:[%s9475_s3 + $0x120] sm:$0xff] %v6211_v44   ;;  %v3565_v54 = vmul.f32 0.01, %v3167_v45  ;;  %2115 = vmatmul.bf16.gmra.mxu0 %v4871_v40  ;;  %2475 = vmatmul.bf16.gmra.mxu2 %v5447_v38  ;;  %v2810_v52 = vadd.f32 %v2809_v46, %v2077_v55  ;;  %v5964_v46 = vld [vmem:[%s9474_s0 + $0x784] sm:$0xf] }
 0x2f2   :  { %2848 = vmatmul.bf16.gmra.mxu1 %v4875_v49  ;;  %3213 = vmatmul.bf16.gmra.mxu3 %v5459_v42  ;;  %v5963_v49 = vld [vmem:[%s9474_s0 + $0x774] sm:$0xf0]  ;;  %v5818_v42 = vld [vmem:[%s9474_s0 + $0x2f4] sm:$0xf] }
 0x2f3   :  { %v3854_v30 = vmax.f32 %v3167_v45, %v3565_v54  ;;  %v3422_v61 = vmul.f32 0.01, %v2810_v52  ;;  %v5472_v54 = vld [vmem:[%s9474_s0 + $0x788] sm:$0xf0] }
 0x2f4   :  { %v2436_v50 = vpop.f32.mrf.mxu2 }
 0x2f5   :  { %v6571_v51 = vpack.c.bf16 %v3854_v30, %v3853_v57  ;;  %v3174_v53 = vpop.f32.mrf.mxu3  ;;  %v2437_v63 = vadd.f32 %v8431_v60, %v2436_v50  ;;  %v3711_v11 = vmax.f32 %v2810_v52, %v3422_v61  ;;  %v5463_v52 = vor.u32 %v5963_v49, %v5462_v48 }
 0x2f6   :  { %v2078_v58 = vpop.f32.mrf.mxu0 }
 0x2f7   :  { %6855 = vst [vmem:[%s9475_s3 + $0x360] sm:$0xff] %v6571_v51   ;;  %v2079_v1 = vadd.f32 %v8431_v60, %v2078_v58  ;;  %v2811_v2 = vpop.f32.mrf.mxu1  ;;  %v3170_v5 = vadd.f32 %v3169_v19, %v2437_v63  ;;  %v5467_v19 = vor.u32 %v5962_v7, %v5464_v15 }
 0x2f9   :  { %v2812_v62 = vadd.f32 %v2811_v2, %v2079_v1  ;;  %v3566_v20 = vmul.f32 0.01, %v3170_v5  ;;  %v4891_v1 = vor.u32 %v5818_v42, %v4888_v43 }
 0x2fb   :  { %v3423_v6 = vmul.f32 0.01, %v2812_v62  ;;  %v3855_v33 = vmax.f32 %v3170_v5, %v3566_v20  ;;  %v4896_v20 = vld [vmem:[%s9474_s0 + $0x308] sm:$0xf0] }
 0x2fc   :  { %v2438_v56 = vpop.f32.mrf.mxu2 }
 0x2fd   :  { %v3712_v12 = vmax.f32 %v2812_v62, %v3423_v6  ;;  %v2439_v13 = vadd.f32 %v8431_v60, %v2438_v56  ;;  %v3176_v24 = vpop.f32.mrf.mxu3 }
 0x2fe   :  { %v2081_v25 = vpop.f32.mrf.mxu0 }
 0x2ff   :  { %v6216_v16 = vpack.c.bf16 %v3712_v12, %v3711_v11  ;;  %v3172_v21 = vadd.f32 %v3171_v47, %v2439_v13  ;;  %v2814_v22 = vpop.f32.mrf.mxu1  ;;  %v2082_v32 = vadd.f32 %v8431_v60, %v2081_v25  ;;  %v5819_v47 = vld [vmem:[%s9474_s0 + $0x2f4] sm:$0xf0]  ;;  %v4894_v12 = vld [vmem:[%s9474_s0 + $0x300] sm:$0xf] }
 0x300   :  { %v4887_v57 = vor.u32 %v5819_v47, %v4886_v41  ;;  %v5470_v25 = vld [vmem:[%s9474_s0 + $0x780] sm:$0xf] }
 0x301   :  { %6784 = vst [vmem:[%s9475_s3 + $0x128] sm:$0xff] %v6216_v16   ;;  %v3567_v28 = vmul.f32 0.01, %v3172_v21  ;;  %2120 = vmatmul.bf16.gmra.mxu0 %v4879_v18  ;;  %2480 = vmatmul.bf16.gmra.mxu2 %v5455_v14  ;;  %v2815_v29 = vadd.f32 %v2814_v22, %v2082_v32  ;;  %v5966_v22 = vld [vmem:[%s9474_s0 + $0x794] sm:$0xf] }
 0x302   :  { %2853 = vmatmul.bf16.gmra.mxu1 %v4883_v26  ;;  %3218 = vmatmul.bf16.gmra.mxu3 %v5467_v19  ;;  %v5965_v26 = vld [vmem:[%s9474_s0 + $0x784] sm:$0xf0]  ;;  %v5820_v19 = vld [vmem:[%s9474_s0 + $0x304] sm:$0xf] }
 0x303   :  { %v3856_v23 = vmax.f32 %v3172_v21, %v3567_v28  ;;  %v3424_v37 = vmul.f32 0.01, %v2815_v29  ;;  %v5480_v28 = vld [vmem:[%s9474_s0 + $0x798] sm:$0xf0] }
 0x304   :  { %v2441_v27 = vpop.f32.mrf.mxu2 }
 0x305   :  { %v6576_v34 = vpack.c.bf16 %v3856_v23, %v3855_v33  ;;  %v3179_v31 = vpop.f32.mrf.mxu3  ;;  %v2442_v39 = vadd.f32 %v8431_v60, %v2441_v27  ;;  %v3713_v30 = vmax.f32 %v2815_v29, %v3424_v37  ;;  %v5471_v29 = vor.u32 %v5965_v26, %v5470_v25 }
 0x306   :  { %v2083_v36 = vpop.f32.mrf.mxu0 }
 0x307   :  { %6856 = vst [vmem:[%s9475_s3 + $0x368] sm:$0xff] %v6576_v34   ;;  %v2084_v40 = vadd.f32 %v8431_v60, %v2083_v36  ;;  %v2816_v35 = vpop.f32.mrf.mxu1  ;;  %v3175_v44 = vadd.f32 %v3174_v53, %v2442_v39  ;;  %v5475_v53 = vor.u32 %v5964_v46, %v5472_v54 }
 0x309   :  { %v2817_v38 = vadd.f32 %v2816_v35, %v2084_v40  ;;  %v3568_v2 = vmul.f32 0.01, %v3175_v44  ;;  %v4899_v40 = vor.u32 %v5820_v19, %v4896_v20 }
 0x30b   :  { %v3425_v45 = vmul.f32 0.01, %v2817_v38  ;;  %v3857_v9 = vmax.f32 %v3175_v44, %v3568_v2  ;;  %v4904_v2 = vld [vmem:[%s9474_s0 + $0x318] sm:$0xf0] }
 0x30c   :  { %v2443_v55 = vpop.f32.mrf.mxu2 }
 0x30d   :  { %v3714_v50 = vmax.f32 %v2817_v38, %v3425_v45  ;;  %v2444_v51 = vadd.f32 %v8431_v60, %v2443_v55  ;;  %v3181_v58 = vpop.f32.mrf.mxu3 }
 0x30e   :  { %v2086_v63 = vpop.f32.mrf.mxu0 }
 0x30f   :  { %v6221_v59 = vpack.c.bf16 %v3714_v50, %v3713_v30  ;;  %v3177_v61 = vadd.f32 %v3176_v24, %v2444_v51  ;;  %v2819_v62 = vpop.f32.mrf.mxu1  ;;  %v2087_v8 = vadd.f32 %v8431_v60, %v2086_v63  ;;  %v5821_v24 = vld [vmem:[%s9474_s0 + $0x304] sm:$0xf0]  ;;  %v4902_v50 = vld [vmem:[%s9474_s0 + $0x310] sm:$0xf] }
 0x310   :  { %v4895_v33 = vor.u32 %v5821_v24, %v4894_v12  ;;  %v5478_v63 = vld [vmem:[%s9474_s0 + $0x790] sm:$0xf] }
 0x311   :  { %6785 = vst [vmem:[%s9475_s3 + $0x130] sm:$0xff] %v6221_v59   ;;  %v3569_v3 = vmul.f32 0.01, %v3177_v61  ;;  %2125 = vmatmul.bf16.gmra.mxu0 %v4887_v57  ;;  %2485 = vmatmul.bf16.gmra.mxu2 %v5463_v52  ;;  %v2820_v6 = vadd.f32 %v2819_v62, %v2087_v8  ;;  %v5968_v62 = vld [vmem:[%s9474_s0 + $0x7a4] sm:$0xf] }
 0x312   :  { %2858 = vmatmul.bf16.gmra.mxu1 %v4891_v1  ;;  %3223 = vmatmul.bf16.gmra.mxu3 %v5475_v53  ;;  %v5967_v1 = vld [vmem:[%s9474_s0 + $0x794] sm:$0xf0]  ;;  %v5822_v53 = vld [vmem:[%s9474_s0 + $0x314] sm:$0xf] }
 0x313   :  { %v3858_v10 = vmax.f32 %v3177_v61, %v3569_v3  ;;  %v3426_v13 = vmul.f32 0.01, %v2820_v6  ;;  %v5488_v3 = vld [vmem:[%s9474_s0 + $0x7a8] sm:$0xf0] }
 0x314   :  { %v2446_v4 = vpop.f32.mrf.mxu2 }
 0x315   :  { %v6581_v5 = vpack.c.bf16 %v3858_v10, %v3857_v9  ;;  %v3184_v7 = vpop.f32.mrf.mxu3  ;;  %v2447_v56 = vadd.f32 %v8431_v60, %v2446_v4  ;;  %v3715_v23 = vmax.f32 %v2820_v6, %v3426_v13  ;;  %v5479_v6 = vor.u32 %v5967_v1, %v5478_v63 }
 0x316   :  { %v2088_v15 = vpop.f32.mrf.mxu0 }
 0x317   :  { %6857 = vst [vmem:[%s9475_s3 + $0x370] sm:$0xff] %v6581_v5   ;;  %v2089_v18 = vadd.f32 %v8431_v60, %v2088_v15  ;;  %v2821_v11 = vpop.f32.mrf.mxu1  ;;  %v3180_v16 = vadd.f32 %v3179_v31, %v2447_v56  ;;  %v5483_v31 = vor.u32 %v5966_v22, %v5480_v28 }
 0x319   :  { %v2822_v14 = vadd.f32 %v2821_v11, %v2089_v18  ;;  %v3570_v35 = vmul.f32 0.01, %v3180_v16  ;;  %v4907_v18 = vor.u32 %v5822_v53, %v4904_v2 }
 0x31b   :  { %v3427_v21 = vmul.f32 0.01, %v2822_v14  ;;  %v3859_v49 = vmax.f32 %v3180_v16, %v3570_v35  ;;  %v4912_v35 = vld [vmem:[%s9474_s0 + $0x328] sm:$0xf0] }
 0x31c   :  { %v2448_v32 = vpop.f32.mrf.mxu2 }
 0x31d   :  { %v3716_v27 = vmax.f32 %v2822_v14, %v3427_v21  ;;  %v2449_v34 = vadd.f32 %v8431_v60, %v2448_v32  ;;  %v3186_v36 = vpop.f32.mrf.mxu3 }
 0x31e   :  { %v2091_v39 = vpop.f32.mrf.mxu0 }
 0x31f   :  { %v6226_v41 = vpack.c.bf16 %v3716_v27, %v3715_v23  ;;  %v3182_v37 = vadd.f32 %v3181_v58, %v2449_v34  ;;  %v2824_v38 = vpop.f32.mrf.mxu1  ;;  %v2092_v48 = vadd.f32 %v8431_v60, %v2091_v39  ;;  %v5823_v58 = vld [vmem:[%s9474_s0 + $0x314] sm:$0xf0]  ;;  %v4910_v27 = vld [vmem:[%s9474_s0 + $0x320] sm:$0xf] }
 0x320   :  { %v4903_v9 = vor.u32 %v5823_v58, %v4902_v50  ;;  %v5486_v39 = vld [vmem:[%s9474_s0 + $0x7a0] sm:$0xf] }
 0x321   :  { %6786 = vst [vmem:[%s9475_s3 + $0x138] sm:$0xff] %v6226_v41   ;;  %v3571_v47 = vmul.f32 0.01, %v3182_v37  ;;  %2130 = vmatmul.bf16.gmra.mxu0 %v4895_v33  ;;  %2490 = vmatmul.bf16.gmra.mxu2 %v5471_v29  ;;  %v2825_v45 = vadd.f32 %v2824_v38, %v2092_v48  ;;  %v5970_v38 = vld [vmem:[%s9474_s0 + $0x7b4] sm:$0xf] }
 0x322   :  { %2863 = vmatmul.bf16.gmra.mxu1 %v4899_v40  ;;  %3228 = vmatmul.bf16.gmra.mxu3 %v5483_v31  ;;  %v5969_v40 = vld [vmem:[%s9474_s0 + $0x7a4] sm:$0xf0]  ;;  %v5824_v31 = vld [vmem:[%s9474_s0 + $0x324] sm:$0xf] }
 0x323   :  { %v3860_v42 = vmax.f32 %v3182_v37, %v3571_v47  ;;  %v3428_v51 = vmul.f32 0.01, %v2825_v45  ;;  %v5496_v47 = vld [vmem:[%s9474_s0 + $0x7b8] sm:$0xf0] }
 0x324   :  { %v2451_v43 = vpop.f32.mrf.mxu2 }
 0x325   :  { %v6586_v44 = vpack.c.bf16 %v3860_v42, %v3859_v49  ;;  %v3189_v46 = vpop.f32.mrf.mxu3  ;;  %v2452_v55 = vadd.f32 %v8431_v60, %v2451_v43  ;;  %v3717_v10 = vmax.f32 %v2825_v45, %v3428_v51  ;;  %v5487_v45 = vor.u32 %v5969_v40, %v5486_v39 }
 0x326   :  { %v2093_v54 = vpop.f32.mrf.mxu0 }
 0x327   :  { %6858 = vst [vmem:[%s9475_s3 + $0x378] sm:$0xff] %v6586_v44   ;;  %v2094_v57 = vadd.f32 %v8431_v60, %v2093_v54  ;;  %v2826_v30 = vpop.f32.mrf.mxu1  ;;  %v3185_v59 = vadd.f32 %v3184_v7, %v2452_v55  ;;  %v5491_v7 = vor.u32 %v5968_v62, %v5488_v3 }
 0x329   :  { %v2827_v52 = vadd.f32 %v2826_v30, %v2094_v57  ;;  %v3572_v11 = vmul.f32 0.01, %v3185_v59  ;;  %v4915_v57 = vor.u32 %v5824_v31, %v4912_v35 }
 0x32b   :  { %v3429_v61 = vmul.f32 0.01, %v2827_v52  ;;  %v3861_v26 = vmax.f32 %v3185_v59, %v3572_v11  ;;  %v4920_v11 = vld [vmem:[%s9474_s0 + $0x338] sm:$0xf0] }
 0x32c   :  { %v2453_v8 = vpop.f32.mrf.mxu2 }
 0x32d   :  { %v3718_v4 = vmax.f32 %v2827_v52, %v3429_v61  ;;  %v2454_v5 = vadd.f32 %v8431_v60, %v2453_v8  ;;  %v3191_v15 = vpop.f32.mrf.mxu3 }
 0x32e   :  { %v2096_v56 = vpop.f32.mrf.mxu0 }
 0x32f   :  { %v6231_v12 = vpack.c.bf16 %v3718_v4, %v3717_v10  ;;  %v3187_v13 = vadd.f32 %v3186_v36, %v2454_v5  ;;  %v2829_v14 = vpop.f32.mrf.mxu1  ;;  %v2097_v25 = vadd.f32 %v8431_v60, %v2096_v56  ;;  %v5825_v36 = vld [vmem:[%s9474_s0 + $0x324] sm:$0xf0]  ;;  %v4918_v4 = vld [vmem:[%s9474_s0 + $0x330] sm:$0xf] }
 0x330   :  { %v4911_v49 = vor.u32 %v5825_v36, %v4910_v27  ;;  %v5494_v56 = vld [vmem:[%s9474_s0 + $0x7b0] sm:$0xf] }
 0x331   :  { %6787 = vst [vmem:[%s9475_s3 + $0x140] sm:$0xff] %v6231_v12   ;;  %v3573_v24 = vmul.f32 0.01, %v3187_v13  ;;  %2135 = vmatmul.bf16.gmra.mxu0 %v4903_v9  ;;  %2495 = vmatmul.bf16.gmra.mxu2 %v5479_v6  ;;  %v2830_v21 = vadd.f32 %v2829_v14, %v2097_v25  ;;  %v5972_v14 = vld [vmem:[%s9474_s0 + $0x7c4] sm:$0xf] }
 0x332   :  { %2868 = vmatmul.bf16.gmra.mxu1 %v4907_v18  ;;  %3233 = vmatmul.bf16.gmra.mxu3 %v5491_v7  ;;  %v5971_v18 = vld [vmem:[%s9474_s0 + $0x7b4] sm:$0xf0]  ;;  %v5826_v7 = vld [vmem:[%s9474_s0 + $0x334] sm:$0xf] }
 0x333   :  { %v3862_v19 = vmax.f32 %v3187_v13, %v3573_v24  ;;  %v3430_v34 = vmul.f32 0.01, %v2830_v21  ;;  %v5504_v24 = vld [vmem:[%s9474_s0 + $0x7c8] sm:$0xf0] }
 0x334   :  { %v2456_v20 = vpop.f32.mrf.mxu2 }
 0x335   :  { %v6591_v16 = vpack.c.bf16 %v3862_v19, %v3861_v26  ;;  %v3194_v22 = vpop.f32.mrf.mxu3  ;;  %v2457_v32 = vadd.f32 %v8431_v60, %v2456_v20  ;;  %v3719_v42 = vmax.f32 %v2830_v21, %v3430_v34  ;;  %v5495_v21 = vor.u32 %v5971_v18, %v5494_v56 }
 0x336   :  { %v2098_v28 = vpop.f32.mrf.mxu0 }
 0x337   :  { %6859 = vst [vmem:[%s9475_s3 + $0x380] sm:$0xff] %v6591_v16   ;;  %v2099_v33 = vadd.f32 %v8431_v60, %v2098_v28  ;;  %v2831_v23 = vpop.f32.mrf.mxu1  ;;  %v3190_v41 = vadd.f32 %v3189_v46, %v2457_v32  ;;  %v5499_v46 = vor.u32 %v5970_v38, %v5496_v47 }
 0x339   :  { %v2832_v29 = vadd.f32 %v2831_v23, %v2099_v33  ;;  %v3574_v30 = vmul.f32 0.01, %v3190_v41  ;;  %v4923_v33 = vor.u32 %v5826_v7, %v4920_v11 }
 0x33b   :  { %v3431_v37 = vmul.f32 0.01, %v2832_v29  ;;  %v3863_v1 = vmax.f32 %v3190_v41, %v3574_v30  ;;  %v4928_v30 = vld [vmem:[%s9474_s0 + $0x348] sm:$0xf0] }
 0x33c   :  { %v2458_v48 = vpop.f32.mrf.mxu2 }
 0x33d   :  { %v3720_v43 = vmax.f32 %v2832_v29, %v3431_v37  ;;  %v2459_v44 = vadd.f32 %v8431_v60, %v2458_v48  ;;  %v3196_v54 = vpop.f32.mrf.mxu3 }
 0x33e   :  { %v2101_v55 = vpop.f32.mrf.mxu0 }
 0x33f   :  { %v6236_v50 = vpack.c.bf16 %v3720_v43, %v3719_v42  ;;  %v3192_v51 = vadd.f32 %v3191_v15, %v2459_v44  ;;  %v2834_v52 = vpop.f32.mrf.mxu1  ;;  %v2102_v63 = vadd.f32 %v8431_v60, %v2101_v55  ;;  %v5827_v15 = vld [vmem:[%s9474_s0 + $0x334] sm:$0xf0]  ;;  %v4926_v43 = vld [vmem:[%s9474_s0 + $0x340] sm:$0xf] }
 0x340   :  { %v4919_v26 = vor.u32 %v5827_v15, %v4918_v4  ;;  %v5502_v55 = vld [vmem:[%s9474_s0 + $0x7c0] sm:$0xf] }
 0x341   :  { %6788 = vst [vmem:[%s9475_s3 + $0x148] sm:$0xff] %v6236_v50   ;;  %v3575_v58 = vmul.f32 0.01, %v3192_v51  ;;  %2140 = vmatmul.bf16.gmra.mxu0 %v4911_v49  ;;  %2500 = vmatmul.bf16.gmra.mxu2 %v5487_v45  ;;  %v2835_v61 = vadd.f32 %v2834_v52, %v2102_v63  ;;  %v5974_v52 = vld [vmem:[%s9474_s0 + $0x7d4] sm:$0xf] }
 0x342   :  { %2873 = vmatmul.bf16.gmra.mxu1 %v4915_v57  ;;  %3238 = vmatmul.bf16.gmra.mxu3 %v5499_v46  ;;  %v5973_v57 = vld [vmem:[%s9474_s0 + $0x7c4] sm:$0xf0]  ;;  %v5828_v46 = vld [vmem:[%s9474_s0 + $0x344] sm:$0xf] }
 0x343   :  { %v3864_v53 = vmax.f32 %v3192_v51, %v3575_v58  ;;  %v3432_v5 = vmul.f32 0.01, %v2835_v61  ;;  %v5512_v58 = vld [vmem:[%s9474_s0 + $0x7d8] sm:$0xf0] }
 0x344   :  { %v2461_v2 = vpop.f32.mrf.mxu2 }
 0x345   :  { %v6596_v59 = vpack.c.bf16 %v3864_v53, %v3863_v1  ;;  %v3199_v62 = vpop.f32.mrf.mxu3  ;;  %v2462_v8 = vadd.f32 %v8431_v60, %v2461_v2  ;;  %v3721_v19 = vmax.f32 %v2835_v61, %v3432_v5  ;;  %v5503_v61 = vor.u32 %v5973_v57, %v5502_v55 }
 0x346   :  { %v2103_v3 = vpop.f32.mrf.mxu0 }
 0x347   :  { %6860 = vst [vmem:[%s9475_s3 + $0x388] sm:$0xff] %v6596_v59   ;;  %v2104_v9 = vadd.f32 %v8431_v60, %v2103_v3  ;;  %v2836_v10 = vpop.f32.mrf.mxu1  ;;  %v3195_v12 = vadd.f32 %v3194_v22, %v2462_v8  ;;  %v5507_v22 = vor.u32 %v5972_v14, %v5504_v24 }
 0x349   :  { %v2837_v6 = vadd.f32 %v2836_v10, %v2104_v9  ;;  %v3576_v23 = vmul.f32 0.01, %v3195_v12  ;;  %v4931_v9 = vor.u32 %v5828_v46, %v4928_v30 }
 0x34b   :  { %v3433_v13 = vmul.f32 0.01, %v2837_v6  ;;  %v3865_v40 = vmax.f32 %v3195_v12, %v3576_v23  ;;  %v4936_v23 = vld [vmem:[%s9474_s0 + $0x358] sm:$0xf0] }
 0x34c   :  { %v2463_v25 = vpop.f32.mrf.mxu2 }
 0x34d   :  { %v3722_v20 = vmax.f32 %v2837_v6, %v3433_v13  ;;  %v2464_v16 = vadd.f32 %v8431_v60, %v2463_v25  ;;  %v3201_v28 = vpop.f32.mrf.mxu3 }
 0x34e   :  { %v2106_v32 = vpop.f32.mrf.mxu0 }
 0x34f   :  { %v6241_v27 = vpack.c.bf16 %v3722_v20, %v3721_v19  ;;  %v3197_v34 = vadd.f32 %v3196_v54, %v2464_v16  ;;  %v2839_v29 = vpop.f32.mrf.mxu1  ;;  %v2107_v39 = vadd.f32 %v8431_v60, %v2106_v32  ;;  %v5829_v54 = vld [vmem:[%s9474_s0 + $0x344] sm:$0xf0]  ;;  %v4934_v20 = vld [vmem:[%s9474_s0 + $0x350] sm:$0xf] }
 0x350   :  { %v4927_v1 = vor.u32 %v5829_v54, %v4926_v43  ;;  %v5510_v32 = vld [vmem:[%s9474_s0 + $0x7d0] sm:$0xf] }
 0x351   :  { %6789 = vst [vmem:[%s9475_s3 + $0x150] sm:$0xff] %v6241_v27   ;;  %v3577_v36 = vmul.f32 0.01, %v3197_v34  ;;  %2145 = vmatmul.bf16.gmra.mxu0 %v4919_v26  ;;  %2505 = vmatmul.bf16.gmra.mxu2 %v5495_v21  ;;  %v2840_v37 = vadd.f32 %v2839_v29, %v2107_v39  ;;  %v5976_v29 = vld [vmem:[%s9474_s0 + $0x7e4] sm:$0xf] }
 0x352   :  { %2878 = vmatmul.bf16.gmra.mxu1 %v4923_v33  ;;  %3243 = vmatmul.bf16.gmra.mxu3 %v5507_v22  ;;  %v5975_v33 = vld [vmem:[%s9474_s0 + $0x7d4] sm:$0xf0]  ;;  %v5830_v22 = vld [vmem:[%s9474_s0 + $0x354] sm:$0xf] }
 0x353   :  { %v3866_v31 = vmax.f32 %v3197_v34, %v3577_v36  ;;  %v3434_v44 = vmul.f32 0.01, %v2840_v37  ;;  %v5520_v36 = vld [vmem:[%s9474_s0 + $0x7e8] sm:$0xf0] }
 0x354   :  { %v2466_v35 = vpop.f32.mrf.mxu2 }
 0x355   :  { %v6601_v41 = vpack.c.bf16 %v3866_v31, %v3865_v40  ;;  %v3204_v38 = vpop.f32.mrf.mxu3  ;;  %v2467_v48 = vadd.f32 %v8431_v60, %v2466_v35  ;;  %v3723_v53 = vmax.f32 %v2840_v37, %v3434_v44  ;;  %v5511_v37 = vor.u32 %v5975_v33, %v5510_v32 }
 0x356   :  { %v2108_v47 = vpop.f32.mrf.mxu0 }
 0x357   :  { %6861 = vst [vmem:[%s9475_s3 + $0x390] sm:$0xff] %v6601_v41   ;;  %v2109_v49 = vadd.f32 %v8431_v60, %v2108_v47  ;;  %v2841_v42 = vpop.f32.mrf.mxu1  ;;  %v3200_v50 = vadd.f32 %v3199_v62, %v2467_v48  ;;  %v5515_v62 = vor.u32 %v5974_v52, %v5512_v58 }
 0x359   :  { %v2842_v45 = vadd.f32 %v2841_v42, %v2109_v49  ;;  %v3578_v10 = vmul.f32 0.01, %v3200_v50  ;;  %v4939_v49 = vor.u32 %v5830_v22, %v4936_v23 }
 0x35b   :  { %v3435_v51 = vmul.f32 0.01, %v2842_v45  ;;  %v3867_v18 = vmax.f32 %v3200_v50, %v3578_v10  ;;  %v4944_v10 = vld [vmem:[%s9474_s0 + $0x368] sm:$0xf0] }
 0x35c   :  { %v2468_v63 = vpop.f32.mrf.mxu2 }
 0x35d   :  { %v3724_v2 = vmax.f32 %v2842_v45, %v3435_v51  ;;  %v2469_v59 = vadd.f32 %v8431_v60, %v2468_v63  ;;  %v3206_v3 = vpop.f32.mrf.mxu3 }
 0x35e   :  { %v2111_v8 = vpop.f32.mrf.mxu0 }
 0x35f   :  { %v6246_v4 = vpack.c.bf16 %v3724_v2, %v3723_v53  ;;  %v3202_v5 = vadd.f32 %v3201_v28, %v2469_v59  ;;  %v2844_v6 = vpop.f32.mrf.mxu1  ;;  %v2112_v56 = vadd.f32 %v8431_v60, %v2111_v8  ;;  %v5831_v28 = vld [vmem:[%s9474_s0 + $0x354] sm:$0xf0]  ;;  %v4942_v2 = vld [vmem:[%s9474_s0 + $0x360] sm:$0xf] }
 0x360   :  { %v4935_v40 = vor.u32 %v5831_v28, %v4934_v20  ;;  %v5518_v8 = vld [vmem:[%s9474_s0 + $0x7e0] sm:$0xf] }
 0x361   :  { %6790 = vst [vmem:[%s9475_s3 + $0x158] sm:$0xff] %v6246_v4   ;;  %v3579_v15 = vmul.f32 0.01, %v3202_v5  ;;  %2150 = vmatmul.bf16.gmra.mxu0 %v4927_v1  ;;  %2510 = vmatmul.bf16.gmra.mxu2 %v5503_v61  ;;  %v2845_v13 = vadd.f32 %v2844_v6, %v2112_v56  ;;  %v5978_v6 = vld [vmem:[%s9474_s0 + $0x7f4] sm:$0xf] }
 0x362   :  { %2883 = vmatmul.bf16.gmra.mxu1 %v4931_v9  ;;  %3248 = vmatmul.bf16.gmra.mxu3 %v5515_v62  ;;  %v5977_v9 = vld [vmem:[%s9474_s0 + $0x7e4] sm:$0xf0]  ;;  %v5832_v62 = vld [vmem:[%s9474_s0 + $0x364] sm:$0xf] }
 0x363   :  { %v3868_v7 = vmax.f32 %v3202_v5, %v3579_v15  ;;  %v3436_v16 = vmul.f32 0.01, %v2845_v13  ;;  %v5528_v15 = vld [vmem:[%s9474_s0 + $0x7f8] sm:$0xf0] }
 0x364   :  { %v2471_v11 = vpop.f32.mrf.mxu2 }
 0x365   :  { %v6606_v12 = vpack.c.bf16 %v3868_v7, %v3867_v18  ;;  %v3209_v14 = vpop.f32.mrf.mxu3  ;;  %v2472_v25 = vadd.f32 %v8431_v60, %v2471_v11  ;;  %v3725_v31 = vmax.f32 %v2845_v13, %v3436_v16  ;;  %v5519_v13 = vor.u32 %v5977_v9, %v5518_v8 }
 0x366   :  { %v2113_v24 = vpop.f32.mrf.mxu0 }
 0x367   :  { %6862 = vst [vmem:[%s9475_s3 + $0x398] sm:$0xff] %v6606_v12   ;;  %v2114_v26 = vadd.f32 %v8431_v60, %v2113_v24  ;;  %v2846_v19 = vpop.f32.mrf.mxu1  ;;  %v3205_v27 = vadd.f32 %v3204_v38, %v2472_v25  ;;  %v5523_v38 = vor.u32 %v5976_v29, %v5520_v36 }
 0x369   :  { %v2847_v21 = vadd.f32 %v2846_v19, %v2114_v26  ;;  %v3580_v42 = vmul.f32 0.01, %v3205_v27  ;;  %v4947_v26 = vor.u32 %v5832_v62, %v4944_v10 }
 0x36b   :  { %v3437_v34 = vmul.f32 0.01, %v2847_v21  ;;  %v3869_v57 = vmax.f32 %v3205_v27, %v3580_v42  ;;  %v4952_v42 = vld [vmem:[%s9474_s0 + $0x378] sm:$0xf0] }
 0x36c   :  { %v2473_v39 = vpop.f32.mrf.mxu2 }
 0x36d   :  { %v3726_v35 = vmax.f32 %v2847_v21, %v3437_v34  ;;  %v2474_v41 = vadd.f32 %v8431_v60, %v2473_v39  ;;  %v3211_v47 = vpop.f32.mrf.mxu3 }
 0x36e   :  { %v2116_v48 = vpop.f32.mrf.mxu0 }
 0x36f   :  { %v6251_v43 = vpack.c.bf16 %v3726_v35, %v3725_v31  ;;  %v3207_v44 = vadd.f32 %v3206_v3, %v2474_v41  ;;  %v2849_v45 = vpop.f32.mrf.mxu1  ;;  %v2117_v55 = vadd.f32 %v8431_v60, %v2116_v48  ;;  %v5833_v3 = vld [vmem:[%s9474_s0 + $0x364] sm:$0xf0]  ;;  %v4950_v35 = vld [vmem:[%s9474_s0 + $0x370] sm:$0xf] }
 0x370   :  { %v4943_v18 = vor.u32 %v5833_v3, %v4942_v2  ;;  %v5526_v48 = vld [vmem:[%s9474_s0 + $0x7f0] sm:$0xf] }
 0x371   :  { %6791 = vst [vmem:[%s9475_s3 + $0x160] sm:$0xff] %v6251_v43   ;;  %v3581_v54 = vmul.f32 0.01, %v3207_v44  ;;  %2155 = vmatmul.bf16.gmra.mxu0 %v4935_v40  ;;  %2515 = vmatmul.bf16.gmra.mxu2 %v5511_v37  ;;  %v2850_v51 = vadd.f32 %v2849_v45, %v2117_v55  ;;  %v5980_v45 = vld [vmem:[%s9474_s0 + $0x804] sm:$0xf] }
 0x372   :  { %2888 = vmatmul.bf16.gmra.mxu1 %v4939_v49  ;;  %3253 = vmatmul.bf16.gmra.mxu3 %v5523_v38  ;;  %v5979_v49 = vld [vmem:[%s9474_s0 + $0x7f4] sm:$0xf0]  ;;  %v5834_v38 = vld [vmem:[%s9474_s0 + $0x374] sm:$0xf] }
 0x373   :  { %v3870_v46 = vmax.f32 %v3207_v44, %v3581_v54  ;;  %v3438_v59 = vmul.f32 0.01, %v2850_v51  ;;  %v5536_v54 = vld [vmem:[%s9474_s0 + $0x808] sm:$0xf0] }
 0x374   :  { %v2476_v30 = vpop.f32.mrf.mxu2 }
 0x375   :  { %v6611_v50 = vpack.c.bf16 %v3870_v46, %v3869_v57  ;;  %v3214_v52 = vpop.f32.mrf.mxu3  ;;  %v2477_v63 = vadd.f32 %v8431_v60, %v2476_v30  ;;  %v3727_v7 = vmax.f32 %v2850_v51, %v3438_v59  ;;  %v5527_v51 = vor.u32 %v5979_v49, %v5526_v48 }
 0x376   :  { %v2118_v58 = vpop.f32.mrf.mxu0 }
 0x377   :  { %6863 = vst [vmem:[%s9475_s3 + $0x3a0] sm:$0xff] %v6611_v50   ;;  %v2119_v1 = vadd.f32 %v8431_v60, %v2118_v58  ;;  %v2851_v53 = vpop.f32.mrf.mxu1  ;;  %v3210_v4 = vadd.f32 %v3209_v14, %v2477_v63  ;;  %v5531_v14 = vor.u32 %v5978_v6, %v5528_v15 }
 0x379   :  { %v2852_v61 = vadd.f32 %v2851_v53, %v2119_v1  ;;  %v3582_v19 = vmul.f32 0.01, %v3210_v4  ;;  %v4955_v1 = vor.u32 %v5834_v38, %v4952_v42 }
 0x37b   :  { %v3439_v5 = vmul.f32 0.01, %v2852_v61  ;;  %v3871_v33 = vmax.f32 %v3210_v4, %v3582_v19 }
 0x37c   :  { %v2478_v56 = vpop.f32.mrf.mxu2 }
 0x37d   :  { %v3728_v11 = vmax.f32 %v2852_v61, %v3439_v5  ;;  %v2479_v12 = vadd.f32 %v8431_v60, %v2478_v56  ;;  %v3216_v24 = vpop.f32.mrf.mxu3 }
 0x37e   :  { %v2121_v25 = vpop.f32.mrf.mxu0 }
 0x37f   :  { %v6256_v20 = vpack.c.bf16 %v3728_v11, %v3727_v7  ;;  %v3212_v16 = vadd.f32 %v3211_v47, %v2479_v12  ;;  %v2854_v21 = vpop.f32.mrf.mxu1  ;;  %v2122_v32 = vadd.f32 %v8431_v60, %v2121_v25  ;;  %v5835_v47 = vld [vmem:[%s9474_s0 + $0x374] sm:$0xf0]  ;;  %v4958_v11 = vld [vmem:[%s9474_s0 + $0x380] sm:$0xf] }
 0x380   :  { %v4951_v57 = vor.u32 %v5835_v47, %v4950_v35  ;;  %v5534_v25 = vld [vmem:[%s9474_s0 + $0x800] sm:$0xf] }
 0x381   :  { %6792 = vst [vmem:[%s9475_s3 + $0x168] sm:$0xff] %v6256_v20   ;;  %v3583_v28 = vmul.f32 0.01, %v3212_v16  ;;  %2160 = vmatmul.bf16.gmra.mxu0 %v4943_v18  ;;  %2520 = vmatmul.bf16.gmra.mxu2 %v5519_v13  ;;  %v2855_v34 = vadd.f32 %v2854_v21, %v2122_v32  ;;  %v5544_v21 = vld [vmem:[%s9474_s0 + $0x818] sm:$0xf0] }
 0x382   :  { %2893 = vmatmul.bf16.gmra.mxu1 %v4947_v26  ;;  %3258 = vmatmul.bf16.gmra.mxu3 %v5531_v14  ;;  %v5981_v26 = vld [vmem:[%s9474_s0 + $0x804] sm:$0xf0]  ;;  %v4960_v14 = vld [vmem:[%s9474_s0 + $0x388] sm:$0xf0] }
 0x383   :  { %v3872_v22 = vmax.f32 %v3212_v16, %v3583_v28  ;;  %v3440_v41 = vmul.f32 0.01, %v2855_v34  ;;  %v5982_v16 = vld [vmem:[%s9474_s0 + $0x814] sm:$0xf] }
 0x384   :  { %v2481_v23 = vpop.f32.mrf.mxu2 }
 0x385   :  { %v6616_v27 = vpack.c.bf16 %v3872_v22, %v3871_v33  ;;  %v3219_v29 = vpop.f32.mrf.mxu3  ;;  %v2482_v39 = vadd.f32 %v8431_v60, %v2481_v23  ;;  %v3729_v46 = vmax.f32 %v2855_v34, %v3440_v41  ;;  %v8844_v23 = vld [vmem:[%s9473_s2] ss:$0 sm:$0xff]  ;;  %v5535_v34 = vor.u32 %v5981_v26, %v5534_v25 }
 0x386   :  { %v2123_v36 = vpop.f32.mrf.mxu0 }
 0x387   :  { %6864 = vst [vmem:[%s9475_s3 + $0x3a8] sm:$0xff] %v6616_v27   ;;  %v2124_v40 = vadd.f32 %v8431_v60, %v2123_v36  ;;  %v2856_v31 = vpop.f32.mrf.mxu1  ;;  %v3215_v43 = vadd.f32 %v3214_v52, %v2482_v39  ;;  %v5539_v52 = vor.u32 %v5980_v45, %v5536_v54 }
 0x389   :  { %v2857_v37 = vadd.f32 %v2856_v31, %v2124_v40  ;;  %v3584_v53 = vmul.f32 0.01, %v3215_v43  ;;  %v5547_v40 = vor.u32 %v5982_v16, %v5544_v21 }
 0x38b   :  { %v3441_v44 = vmul.f32 0.01, %v2857_v37  ;;  %v3873_v9 = vmax.f32 %v3215_v43, %v3584_v53  ;;  %v4968_v53 = vld [vmem:[%s9474_s0 + $0x398] sm:$0xf0] }
 0x38c   :  { %v2483_v55 = vpop.f32.mrf.mxu2 }
 0x38d   :  { %v3730_v30 = vmax.f32 %v2857_v37, %v3441_v44  ;;  %v2484_v50 = vadd.f32 %v8431_v60, %v2483_v55  ;;  %v3221_v58 = vpop.f32.mrf.mxu3 }
 0x38e   :  { %v2126_v63 = vpop.f32.mrf.mxu0 }
 0x38f   :  { %v6261_v2 = vpack.c.bf16 %v3730_v30, %v3729_v46  ;;  %v3217_v59 = vadd.f32 %v3216_v24, %v2484_v50  ;;  %v2859_v61 = vpop.f32.mrf.mxu1  ;;  %v2127_v8 = vadd.f32 %v8431_v60, %v2126_v63  ;;  %v5837_v24 = vld [vmem:[%s9474_s0 + $0x384] sm:$0xf0]  ;;  %v4966_v30 = vld [vmem:[%s9474_s0 + $0x390] sm:$0xf] }
 0x390   :  { %v4959_v32 = vor.u32 %v5837_v24, %v4958_v11  ;;  %v5542_v63 = vld [vmem:[%s9474_s0 + $0x810] sm:$0xf] }
 0x391   :  { %6793 = vst [vmem:[%s9475_s3 + $0x170] sm:$0xff] %v6261_v2   ;;  %v3585_v3 = vmul.f32 0.01, %v3217_v59  ;;  %2165 = vmatmul.bf16.gmra.mxu0 %v4951_v57  ;;  %2525 = vmatmul.bf16.gmra.mxu2 %v5527_v51  ;;  %v2860_v5 = vadd.f32 %v2859_v61, %v2127_v8  ;;  %v5984_v61 = vld [vmem:[%s9474_s0 + $0x824] sm:$0xf] }
 0x392   :  { %2898 = vmatmul.bf16.gmra.mxu1 %v4955_v1  ;;  %3263 = vmatmul.bf16.gmra.mxu3 %v5539_v52  ;;  %v5983_v1 = vld [vmem:[%s9474_s0 + $0x814] sm:$0xf0]  ;;  %v5838_v52 = vld [vmem:[%s9474_s0 + $0x394] sm:$0xf] }
 0x393   :  { %v3874_v62 = vmax.f32 %v3217_v59, %v3585_v3  ;;  %v3442_v12 = vmul.f32 0.01, %v2860_v5  ;;  %v5552_v3 = vld [vmem:[%s9474_s0 + $0x828] sm:$0xf0] }
 0x394   :  { %v2486_v10 = vpop.f32.mrf.mxu2 }
 0x395   :  { %v6621_v4 = vpack.c.bf16 %v3874_v62, %v3873_v9  ;;  %v3224_v6 = vpop.f32.mrf.mxu3  ;;  %v2487_v56 = vadd.f32 %v8431_v60, %v2486_v10  ;;  %v3731_v33 = vmax.f32 %v2860_v5, %v3442_v12  ;;  %v5543_v5 = vor.u32 %v5983_v1, %v5542_v63 }
 0x396   :  { %v2128_v15 = vpop.f32.mrf.mxu0 }
 0x397   :  { %6865 = vst [vmem:[%s9475_s3 + $0x3b0] sm:$0xff] %v6621_v4   ;;  %v2129_v18 = vadd.f32 %v8431_v60, %v2128_v15  ;;  %v2861_v7 = vpop.f32.mrf.mxu1  ;;  %v5836_v60 = vld [vmem:[%s9474_s0 + $0x384] sm:$0xf]  ;;  %v3220_v19 = vadd.f32 %v3219_v29, %v2487_v56 }
 0x398   :  { %v4963_v39 = vor.u32 %v5836_v60, %v4960_v14 }
 0x399   :  { %v2862_v13 = vadd.f32 %v2861_v7, %v2129_v18  ;;  %v3586_v31 = vmul.f32 0.01, %v3220_v19  ;;  %v4971_v18 = vor.u32 %v5838_v52, %v4968_v53 }
 0x39b   :  { %v3443_v20 = vmul.f32 0.01, %v2862_v13  ;;  %v3875_v49 = vmax.f32 %v3220_v19, %v3586_v31  ;;  %v4976_v31 = vld [vmem:[%s9474_s0 + $0x3a8] sm:$0xf0] }
 0x39c   :  { %v2488_v28 = vpop.f32.mrf.mxu2 }
 0x39d   :  { %v3732_v22 = vmax.f32 %v2862_v13, %v3443_v20  ;;  %v2489_v27 = vadd.f32 %v8844_v23, %v2488_v28  ;;  %v3226_v29 = vpop.f32.mrf.mxu3 }
 0x39e   :  { %v2131_v36 = vpop.f32.mrf.mxu0 }
 0x39f   :  { %v6266_v35 = vpack.c.bf16 %v3732_v22, %v3731_v33  ;;  %v3222_v41 = vadd.f32 %v3221_v58, %v2489_v27  ;;  %v2864_v37 = vpop.f32.mrf.mxu1  ;;  %v2132_v48 = vadd.f32 %v8844_v23, %v2131_v36  ;;  %v5839_v58 = vld [vmem:[%s9474_s0 + $0x394] sm:$0xf0]  ;;  %v4974_v22 = vld [vmem:[%s9474_s0 + $0x3a0] sm:$0xf] }
 0x3a0   :  { %v4967_v9 = vor.u32 %v5839_v58, %v4966_v30  ;;  %v5550_v36 = vld [vmem:[%s9474_s0 + $0x820] sm:$0xf] }
 0x3a1   :  { %6794 = vst [vmem:[%s9475_s3 + $0x178] sm:$0xff] %v6266_v35   ;;  %v3587_v47 = vmul.f32 0.01, %v3222_v41  ;;  %2170 = vmatmul.bf16.gmra.mxu0 %v4959_v32  ;;  %2530 = vmatmul.bf16.gmra.mxu2 %v5535_v34  ;;  %v2865_v44 = vadd.f32 %v2864_v37, %v2132_v48  ;;  %v5986_v37 = vld [vmem:[%s9474_s0 + $0x834] sm:$0xf] }
 0x3a2   :  { %2903 = vmatmul.bf16.gmra.mxu1 %v4963_v39  ;;  %3268 = vmatmul.bf16.gmra.mxu3 %v5547_v40  ;;  %v5985_v39 = vld [vmem:[%s9474_s0 + $0x824] sm:$0xf0]  ;;  %v5840_v40 = vld [vmem:[%s9474_s0 + $0x3a4] sm:$0xf] }
 0x3a3   :  { %v3876_v38 = vmax.f32 %v3222_v41, %v3587_v47  ;;  %v3444_v50 = vmul.f32 0.01, %v2865_v44  ;;  %v5560_v47 = vld [vmem:[%s9474_s0 + $0x838] sm:$0xf0] }
 0x3a4   :  { %v2491_v42 = vpop.f32.mrf.mxu2 }
 0x3a5   :  { %v6626_v43 = vpack.c.bf16 %v3876_v38, %v3875_v49  ;;  %v3229_v45 = vpop.f32.mrf.mxu3  ;;  %v2492_v55 = vadd.f32 %v8844_v23, %v2491_v42  ;;  %v3733_v62 = vmax.f32 %v2865_v44, %v3444_v50  ;;  %v5551_v44 = vor.u32 %v5985_v39, %v5550_v36 }
 0x3a6   :  { %v2133_v54 = vpop.f32.mrf.mxu0 }
 0x3a7   :  { %6866 = vst [vmem:[%s9475_s3 + $0x3b8] sm:$0xff] %v6626_v43   ;;  %v2134_v57 = vadd.f32 %v8844_v23, %v2133_v54  ;;  %v2866_v46 = vpop.f32.mrf.mxu1  ;;  %v3225_v2 = vadd.f32 %v3224_v6, %v2492_v55  ;;  %v5555_v6 = vor.u32 %v5984_v61, %v5552_v3 }
 0x3a9   :  { %v2867_v51 = vadd.f32 %v2866_v46, %v2134_v57  ;;  %v3588_v7 = vmul.f32 0.01, %v3225_v2  ;;  %v4979_v57 = vor.u32 %v5840_v40, %v4976_v31 }
 0x3ab   :  { %v3445_v59 = vmul.f32 0.01, %v2867_v51  ;;  %v3877_v26 = vmax.f32 %v3225_v2, %v3588_v7  ;;  %v4984_v7 = vld [vmem:[%s9474_s0 + $0x3b8] sm:$0xf0] }
 0x3ac   :  { %v2493_v8 = vpop.f32.mrf.mxu2 }
 0x3ad   :  { %v3734_v10 = vmax.f32 %v2867_v51, %v3445_v59  ;;  %v2494_v4 = vadd.f32 %v8844_v23, %v2493_v8  ;;  %v3231_v15 = vpop.f32.mrf.mxu3 }
 0x3ae   :  { %v2136_v56 = vpop.f32.mrf.mxu0 }
 0x3af   :  { %v6271_v11 = vpack.c.bf16 %v3734_v10, %v3733_v62  ;;  %v3227_v12 = vadd.f32 %v3226_v29, %v2494_v4  ;;  %v2869_v13 = vpop.f32.mrf.mxu1  ;;  %v2137_v25 = vadd.f32 %v8844_v23, %v2136_v56  ;;  %v5841_v29 = vld [vmem:[%s9474_s0 + $0x3a4] sm:$0xf0]  ;;  %v4982_v10 = vld [vmem:[%s9474_s0 + $0x3b0] sm:$0xf] }
 0x3b0   :  { %v4975_v49 = vor.u32 %v5841_v29, %v4974_v22  ;;  %v5558_v56 = vld [vmem:[%s9474_s0 + $0x830] sm:$0xf] }
 0x3b1   :  { %6795 = vst [vmem:[%s9475_s3 + $0x180] sm:$0xff] %v6271_v11   ;;  %v3589_v24 = vmul.f32 0.01, %v3227_v12  ;;  %2175 = vmatmul.bf16.gmra.mxu0 %v4967_v9  ;;  %2535 = vmatmul.bf16.gmra.mxu2 %v5543_v5  ;;  %v2870_v20 = vadd.f32 %v2869_v13, %v2137_v25  ;;  %v5988_v13 = vld [vmem:[%s9474_s0 + $0x844] sm:$0xf] }
 0x3b2   :  { %2908 = vmatmul.bf16.gmra.mxu1 %v4971_v18  ;;  %3273 = vmatmul.bf16.gmra.mxu3 %v5555_v6  ;;  %v5987_v18 = vld [vmem:[%s9474_s0 + $0x834] sm:$0xf0]  ;;  %v5842_v6 = vld [vmem:[%s9474_s0 + $0x3b4] sm:$0xf] }
 0x3b3   :  { %v3878_v60 = vmax.f32 %v3227_v12, %v3589_v24  ;;  %v3446_v27 = vmul.f32 0.01, %v2870_v20  ;;  %v5568_v24 = vld [vmem:[%s9474_s0 + $0x848] sm:$0xf0] }
 0x3b4   :  { %v2496_v14 = vpop.f32.mrf.mxu2 }
 0x3b5   :  { %v6631_v19 = vpack.c.bf16 %v3878_v60, %v3877_v26  ;;  %v3234_v16 = vpop.f32.mrf.mxu3  ;;  %v2497_v28 = vadd.f32 %v8844_v23, %v2496_v14  ;;  %v3735_v38 = vmax.f32 %v2870_v20, %v3446_v27  ;;  %v5559_v20 = vor.u32 %v5987_v18, %v5558_v56 }
 0x3b6   :  { %v2138_v21 = vpop.f32.mrf.mxu0 }
 0x3b7   :  { %6867 = vst [vmem:[%s9475_s3 + $0x3c0] sm:$0xff] %v6631_v19   ;;  %v2139_v32 = vadd.f32 %v8844_v23, %v2138_v21  ;;  %v2871_v33 = vpop.f32.mrf.mxu1  ;;  %v3230_v35 = vadd.f32 %v3229_v45, %v2497_v28  ;;  %v5563_v45 = vor.u32 %v5986_v37, %v5560_v47 }
 0x3b9   :  { %v2872_v34 = vadd.f32 %v2871_v33, %v2139_v32  ;;  %v3590_v46 = vmul.f32 0.01, %v3230_v35  ;;  %v4987_v32 = vor.u32 %v5842_v6, %v4984_v7 }
 0x3bb   :  { %v3447_v41 = vmul.f32 0.01, %v2872_v34  ;;  %v3879_v1 = vmax.f32 %v3230_v35, %v3590_v46  ;;  %v4992_v46 = vld [vmem:[%s9474_s0 + $0x3c8] sm:$0xf0] }
 0x3bc   :  { %v2498_v48 = vpop.f32.mrf.mxu2 }
 0x3bd   :  { %v3736_v42 = vmax.f32 %v2872_v34, %v3447_v41  ;;  %v2499_v43 = vadd.f32 %v8844_v23, %v2498_v48  ;;  %v3236_v54 = vpop.f32.mrf.mxu3 }
 0x3be   :  { %v2141_v55 = vpop.f32.mrf.mxu0 }
 0x3bf   :  { %v6276_v30 = vpack.c.bf16 %v3736_v42, %v3735_v38  ;;  %v3232_v50 = vadd.f32 %v3231_v15, %v2499_v43  ;;  %v2874_v51 = vpop.f32.mrf.mxu1  ;;  %v2142_v63 = vadd.f32 %v8844_v23, %v2141_v55  ;;  %v5843_v15 = vld [vmem:[%s9474_s0 + $0x3b4] sm:$0xf0]  ;;  %v4990_v42 = vld [vmem:[%s9474_s0 + $0x3c0] sm:$0xf] }
 0x3c0   :  { %v4983_v26 = vor.u32 %v5843_v15, %v4982_v10  ;;  %v5566_v55 = vld [vmem:[%s9474_s0 + $0x840] sm:$0xf] }
 0x3c1   :  { %6796 = vst [vmem:[%s9475_s3 + $0x188] sm:$0xff] %v6276_v30   ;;  %v3591_v58 = vmul.f32 0.01, %v3232_v50  ;;  %2180 = vmatmul.bf16.gmra.mxu0 %v4975_v49  ;;  %2540 = vmatmul.bf16.gmra.mxu2 %v5551_v44  ;;  %v2875_v59 = vadd.f32 %v2874_v51, %v2142_v63  ;;  %v5990_v51 = vld [vmem:[%s9474_s0 + $0x854] sm:$0xf] }
 0x3c2   :  { %2913 = vmatmul.bf16.gmra.mxu1 %v4979_v57  ;;  %3278 = vmatmul.bf16.gmra.mxu3 %v5563_v45  ;;  %v5989_v57 = vld [vmem:[%s9474_s0 + $0x844] sm:$0xf0]  ;;  %v5844_v45 = vld [vmem:[%s9474_s0 + $0x3c4] sm:$0xf] }
 0x3c3   :  { %v3880_v52 = vmax.f32 %v3232_v50, %v3591_v58  ;;  %v3448_v4 = vmul.f32 0.01, %v2875_v59  ;;  %v5576_v58 = vld [vmem:[%s9474_s0 + $0x858] sm:$0xf0] }
 0x3c4   :  { %v2501_v53 = vpop.f32.mrf.mxu2 }
 0x3c5   :  { %v6636_v2 = vpack.c.bf16 %v3880_v52, %v3879_v1  ;;  %v3239_v61 = vpop.f32.mrf.mxu3  ;;  %v2502_v8 = vadd.f32 %v8844_v23, %v2501_v53  ;;  %v3737_v60 = vmax.f32 %v2875_v59, %v3448_v4  ;;  %v5567_v59 = vor.u32 %v5989_v57, %v5566_v55 }
 0x3c6   :  { %v2143_v3 = vpop.f32.mrf.mxu0 }
 0x3c7   :  { %6868 = vst [vmem:[%s9475_s3 + $0x3c8] sm:$0xff] %v6636_v2   ;;  %v2144_v9 = vadd.f32 %v8844_v23, %v2143_v3  ;;  %v2876_v62 = vpop.f32.mrf.mxu1  ;;  %v3235_v11 = vadd.f32 %v3234_v16, %v2502_v8  ;;  %v5571_v16 = vor.u32 %v5988_v13, %v5568_v24 }
 0x3c9   :  { %v2877_v5 = vadd.f32 %v2876_v62, %v2144_v9  ;;  %v3592_v33 = vmul.f32 0.01, %v3235_v11  ;;  %v4995_v9 = vor.u32 %v5844_v45, %v4992_v46 }
 0x3cb   :  { %v3449_v12 = vmul.f32 0.01, %v2877_v5  ;;  %v3881_v39 = vmax.f32 %v3235_v11, %v3592_v33  ;;  %v5000_v33 = vld [vmem:[%s9474_s0 + $0x3d8] sm:$0xf0] }
 0x3cc   :  { %v2503_v25 = vpop.f32.mrf.mxu2 }
 0x3cd   :  { %v3738_v14 = vmax.f32 %v2877_v5, %v3449_v12  ;;  %v2504_v19 = vadd.f32 %v8844_v23, %v2503_v25  ;;  %v3241_v21 = vpop.f32.mrf.mxu3 }
 0x3ce   :  { %v2146_v28 = vpop.f32.mrf.mxu0 }
 0x3cf   :  { %v6281_v22 = vpack.c.bf16 %v3738_v14, %v3737_v60  ;;  %v3237_v27 = vadd.f32 %v3236_v54, %v2504_v19  ;;  %v2879_v34 = vpop.f32.mrf.mxu1  ;;  %v2147_v36 = vadd.f32 %v8844_v23, %v2146_v28  ;;  %v5845_v54 = vld [vmem:[%s9474_s0 + $0x3c4] sm:$0xf0]  ;;  %v4998_v14 = vld [vmem:[%s9474_s0 + $0x3d0] sm:$0xf] }
 0x3d0   :  { %v4991_v1 = vor.u32 %v5845_v54, %v4990_v42  ;;  %v5574_v28 = vld [vmem:[%s9474_s0 + $0x850] sm:$0xf] }
 0x3d1   :  { %6797 = vst [vmem:[%s9475_s3 + $0x190] sm:$0xff] %v6281_v22   ;;  %v3593_v29 = vmul.f32 0.01, %v3237_v27  ;;  %2185 = vmatmul.bf16.gmra.mxu0 %v4983_v26  ;;  %2545 = vmatmul.bf16.gmra.mxu2 %v5559_v20  ;;  %v2880_v41 = vadd.f32 %v2879_v34, %v2147_v36  ;;  %v5992_v34 = vld [vmem:[%s9474_s0 + $0x864] sm:$0xf] }
 0x3d2   :  { %2918 = vmatmul.bf16.gmra.mxu1 %v4987_v32  ;;  %3283 = vmatmul.bf16.gmra.mxu3 %v5571_v16  ;;  %v5991_v32 = vld [vmem:[%s9474_s0 + $0x854] sm:$0xf0]  ;;  %v5846_v16 = vld [vmem:[%s9474_s0 + $0x3d4] sm:$0xf] }
 0x3d3   :  { %v3882_v40 = vmax.f32 %v3237_v27, %v3593_v29  ;;  %v3450_v43 = vmul.f32 0.01, %v2880_v41  ;;  %v5584_v29 = vld [vmem:[%s9474_s0 + $0x868] sm:$0xf0] }
 0x3d4   :  { %v2506_v31 = vpop.f32.mrf.mxu2 }
 0x3d5   :  { %v6641_v35 = vpack.c.bf16 %v3882_v40, %v3881_v39  ;;  %v3244_v37 = vpop.f32.mrf.mxu3  ;;  %v2507_v48 = vadd.f32 %v8844_v23, %v2506_v31  ;;  %v3739_v52 = vmax.f32 %v2880_v41, %v3450_v43  ;;  %v5575_v41 = vor.u32 %v5991_v32, %v5574_v28 }
 0x3d6   :  { %v2148_v47 = vpop.f32.mrf.mxu0 }
 0x3d7   :  { %6869 = vst [vmem:[%s9475_s3 + $0x3d0] sm:$0xff] %v6641_v35   ;;  %v2149_v49 = vadd.f32 %v8844_v23, %v2148_v47  ;;  %v2881_v38 = vpop.f32.mrf.mxu1  ;;  %v3240_v30 = vadd.f32 %v3239_v61, %v2507_v48  ;;  %v5579_v61 = vor.u32 %v5990_v51, %v5576_v58 }
 0x3d9   :  { %v2882_v44 = vadd.f32 %v2881_v38, %v2149_v49  ;;  %v3594_v62 = vmul.f32 0.01, %v3240_v30  ;;  %v5003_v49 = vor.u32 %v5846_v16, %v5000_v33 }
 0x3db   :  { %v3451_v50 = vmul.f32 0.01, %v2882_v44  ;;  %v3883_v18 = vmax.f32 %v3240_v30, %v3594_v62  ;;  %v5008_v62 = vld [vmem:[%s9474_s0 + $0x3e8] sm:$0xf0] }
 0x3dc   :  { %v2508_v63 = vpop.f32.mrf.mxu2 }
 0x3dd   :  { %v3740_v53 = vmax.f32 %v2882_v44, %v3451_v50  ;;  %v2509_v2 = vadd.f32 %v8844_v23, %v2508_v63  ;;  %v3246_v3 = vpop.f32.mrf.mxu3 }
 0x3de   :  { %v2151_v8 = vpop.f32.mrf.mxu0 }
 0x3df   :  { %v6286_v10 = vpack.c.bf16 %v3740_v53, %v3739_v52  ;;  %v3242_v4 = vadd.f32 %v3241_v21, %v2509_v2  ;;  %v2884_v5 = vpop.f32.mrf.mxu1  ;;  %v2152_v56 = vadd.f32 %v8844_v23, %v2151_v8  ;;  %v5847_v21 = vld [vmem:[%s9474_s0 + $0x3d4] sm:$0xf0]  ;;  %v5006_v53 = vld [vmem:[%s9474_s0 + $0x3e0] sm:$0xf] }
 0x3e0   :  { %v4999_v39 = vor.u32 %v5847_v21, %v4998_v14  ;;  %v5582_v8 = vld [vmem:[%s9474_s0 + $0x860] sm:$0xf] }
 0x3e1   :  { %6798 = vst [vmem:[%s9475_s3 + $0x198] sm:$0xff] %v6286_v10   ;;  %v3595_v15 = vmul.f32 0.01, %v3242_v4  ;;  %2190 = vmatmul.bf16.gmra.mxu0 %v4991_v1  ;;  %2550 = vmatmul.bf16.gmra.mxu2 %v5567_v59  ;;  %v2885_v12 = vadd.f32 %v2884_v5, %v2152_v56  ;;  %v5994_v5 = vld [vmem:[%s9474_s0 + $0x874] sm:$0xf] }
 0x3e2   :  { %2923 = vmatmul.bf16.gmra.mxu1 %v4995_v9  ;;  %3288 = vmatmul.bf16.gmra.mxu3 %v5579_v61  ;;  %v5993_v9 = vld [vmem:[%s9474_s0 + $0x864] sm:$0xf0]  ;;  %v5848_v61 = vld [vmem:[%s9474_s0 + $0x3e4] sm:$0xf] }
 0x3e3   :  { %v3884_v6 = vmax.f32 %v3242_v4, %v3595_v15  ;;  %v3452_v19 = vmul.f32 0.01, %v2885_v12  ;;  %v5592_v15 = vld [vmem:[%s9474_s0 + $0x878] sm:$0xf0] }
 0x3e4   :  { %v2511_v7 = vpop.f32.mrf.mxu2 }
 0x3e5   :  { %v6646_v11 = vpack.c.bf16 %v3884_v6, %v3883_v18  ;;  %v3249_v13 = vpop.f32.mrf.mxu3  ;;  %v2512_v25 = vadd.f32 %v8844_v23, %v2511_v7  ;;  %v3741_v40 = vmax.f32 %v2885_v12, %v3452_v19  ;;  %v5583_v12 = vor.u32 %v5993_v9, %v5582_v8 }
 0x3e6   :  { %v2153_v24 = vpop.f32.mrf.mxu0 }
 0x3e7   :  { %6870 = vst [vmem:[%s9475_s3 + $0x3d8] sm:$0xff] %v6646_v11   ;;  %v2154_v26 = vadd.f32 %v8844_v23, %v2153_v24  ;;  %v2886_v60 = vpop.f32.mrf.mxu1  ;;  %v3245_v22 = vadd.f32 %v3244_v37, %v2512_v25  ;;  %v5587_v37 = vor.u32 %v5992_v34, %v5584_v29 }
 0x3e9   :  { %v2887_v20 = vadd.f32 %v2886_v60, %v2154_v26  ;;  %v3596_v38 = vmul.f32 0.01, %v3245_v22  ;;  %v5011_v26 = vor.u32 %v5848_v61, %v5008_v62 }
 0x3eb   :  { %v3453_v27 = vmul.f32 0.01, %v2887_v20  ;;  %v3885_v57 = vmax.f32 %v3245_v22, %v3596_v38  ;;  %v5016_v38 = vld [vmem:[%s9474_s0 + $0x3f8] sm:$0xf0] }
 0x3ec   :  { %v2513_v36 = vpop.f32.mrf.mxu2 }
 0x3ed   :  { %v3742_v31 = vmax.f32 %v2887_v20, %v3453_v27  ;;  %v2514_v35 = vadd.f32 %v8844_v23, %v2513_v36  ;;  %v3251_v47 = vpop.f32.mrf.mxu3 }
 0x3ee   :  { %v2156_v48 = vpop.f32.mrf.mxu0 }
 0x3ef   :  { %v6291_v42 = vpack.c.bf16 %v3742_v31, %v3741_v40  ;;  %v3247_v43 = vadd.f32 %v3246_v3, %v2514_v35  ;;  %v2889_v44 = vpop.f32.mrf.mxu1  ;;  %v2157_v55 = vadd.f32 %v8844_v23, %v2156_v48  ;;  %v5849_v3 = vld [vmem:[%s9474_s0 + $0x3e4] sm:$0xf0]  ;;  %v5014_v31 = vld [vmem:[%s9474_s0 + $0x3f0] sm:$0xf] }
 0x3f0   :  { %v5007_v18 = vor.u32 %v5849_v3, %v5006_v53  ;;  %v5590_v48 = vld [vmem:[%s9474_s0 + $0x870] sm:$0xf] }
 0x3f1   :  { %6799 = vst [vmem:[%s9475_s3 + $0x1a0] sm:$0xff] %v6291_v42   ;;  %v3597_v54 = vmul.f32 0.01, %v3247_v43  ;;  %2195 = vmatmul.bf16.gmra.mxu0 %v4999_v39  ;;  %2555 = vmatmul.bf16.gmra.mxu2 %v5575_v41  ;;  %v2890_v50 = vadd.f32 %v2889_v44, %v2157_v55  ;;  %v5996_v44 = vld [vmem:[%s9474_s0 + $0x884] sm:$0xf] }
 0x3f2   :  { %2928 = vmatmul.bf16.gmra.mxu1 %v5003_v49  ;;  %3293 = vmatmul.bf16.gmra.mxu3 %v5587_v37  ;;  %v5995_v49 = vld [vmem:[%s9474_s0 + $0x874] sm:$0xf0]  ;;  %v5850_v37 = vld [vmem:[%s9474_s0 + $0x3f4] sm:$0xf] }
 0x3f3   :  { %v3886_v45 = vmax.f32 %v3247_v43, %v3597_v54  ;;  %v3454_v2 = vmul.f32 0.01, %v2890_v50  ;;  %v5600_v54 = vld [vmem:[%s9474_s0 + $0x888] sm:$0xf0] }
 0x3f4   :  { %v2516_v46 = vpop.f32.mrf.mxu2 }
 0x3f5   :  { %v6651_v30 = vpack.c.bf16 %v3886_v45, %v3885_v57  ;;  %v3254_v51 = vpop.f32.mrf.mxu3  ;;  %v2517_v63 = vadd.f32 %v8844_v23, %v2516_v46  ;;  %v3743_v6 = vmax.f32 %v2890_v50, %v3454_v2  ;;  %v5591_v50 = vor.u32 %v5995_v49, %v5590_v48 }
 0x3f6   :  { %v2158_v58 = vpop.f32.mrf.mxu0 }
 0x3f7   :  { %6871 = vst [vmem:[%s9475_s3 + $0x3e0] sm:$0xff] %v6651_v30   ;;  %v2159_v1 = vadd.f32 %v8844_v23, %v2158_v58  ;;  %v2891_v52 = vpop.f32.mrf.mxu1  ;;  %v3250_v10 = vadd.f32 %v3249_v13, %v2517_v63  ;;  %v5595_v13 = vor.u32 %v5994_v5, %v5592_v15 }
 0x3f9   :  { %v2892_v59 = vadd.f32 %v2891_v52, %v2159_v1  ;;  %v3598_v60 = vmul.f32 0.01, %v3250_v10  ;;  %v5019_v1 = vor.u32 %v5850_v37, %v5016_v38 }
 0x3fb   :  { %v3455_v4 = vmul.f32 0.01, %v2892_v59  ;;  %v3887_v32 = vmax.f32 %v3250_v10, %v3598_v60  ;;  %v5024_v60 = vld [vmem:[%s9474_s0 + $0x408] sm:$0xf0] }
 0x3fc   :  { %v2518_v56 = vpop.f32.mrf.mxu2 }
 0x3fd   :  { %v3744_v7 = vmax.f32 %v2892_v59, %v3455_v4  ;;  %v2519_v11 = vadd.f32 %v8844_v23, %v2518_v56  ;;  %v3256_v24 = vpop.f32.mrf.mxu3 }
 0x3fe   :  { %v2161_v25 = vpop.f32.mrf.mxu0 }
 0x3ff   :  { %v6296_v14 = vpack.c.bf16 %v3744_v7, %v3743_v6  ;;  %v3252_v19 = vadd.f32 %v3251_v47, %v2519_v11  ;;  %v2894_v20 = vpop.f32.mrf.mxu1  ;;  %v2162_v28 = vadd.f32 %v8844_v23, %v2161_v25  ;;  %v5851_v47 = vld [vmem:[%s9474_s0 + $0x3f4] sm:$0xf0]  ;;  %v5022_v7 = vld [vmem:[%s9474_s0 + $0x400] sm:$0xf] }
 0x400   :  { %v5015_v57 = vor.u32 %v5851_v47, %v5014_v31  ;;  %v5598_v25 = vld [vmem:[%s9474_s0 + $0x880] sm:$0xf] }
 0x401   :  { %6800 = vst [vmem:[%s9475_s3 + $0x1a8] sm:$0xff] %v6296_v14   ;;  %v3599_v21 = vmul.f32 0.01, %v3252_v19  ;;  %2200 = vmatmul.bf16.gmra.mxu0 %v5007_v18  ;;  %2560 = vmatmul.bf16.gmra.mxu2 %v5583_v12  ;;  %v2895_v27 = vadd.f32 %v2894_v20, %v2162_v28  ;;  %v5998_v20 = vld [vmem:[%s9474_s0 + $0x894] sm:$0xf] }
 0x402   :  { %2933 = vmatmul.bf16.gmra.mxu1 %v5011_v26  ;;  %3298 = vmatmul.bf16.gmra.mxu3 %v5595_v13  ;;  %v5997_v26 = vld [vmem:[%s9474_s0 + $0x884] sm:$0xf0]  ;;  %v5852_v13 = vld [vmem:[%s9474_s0 + $0x404] sm:$0xf] }
 0x403   :  { %v3888_v16 = vmax.f32 %v3252_v19, %v3599_v21  ;;  %v3456_v35 = vmul.f32 0.01, %v2895_v27  ;;  %v5608_v21 = vld [vmem:[%s9474_s0 + $0x898] sm:$0xf0] }
 0x404   :  { %v2521_v33 = vpop.f32.mrf.mxu2 }
 0x405   :  { %v6656_v22 = vpack.c.bf16 %v3888_v16, %v3887_v32  ;;  %v3259_v34 = vpop.f32.mrf.mxu3  ;;  %v2522_v36 = vadd.f32 %v8844_v23, %v2521_v33  ;;  %v3745_v45 = vmax.f32 %v2895_v27, %v3456_v35  ;;  %v5599_v27 = vor.u32 %v5997_v26, %v5598_v25 }
 0x406   :  { %v2163_v29 = vpop.f32.mrf.mxu0 }
 0x407   :  { %6872 = vst [vmem:[%s9475_s3 + $0x3e8] sm:$0xff] %v6656_v22   ;;  %v2164_v39 = vadd.f32 %v8844_v23, %v2163_v29  ;;  %v2896_v40 = vpop.f32.mrf.mxu1  ;;  %v3255_v42 = vadd.f32 %v3254_v51, %v2522_v36  ;;  %v5603_v51 = vor.u32 %v5996_v44, %v5600_v54 }
 0x409   :  { %v2897_v41 = vadd.f32 %v2896_v40, %v2164_v39  ;;  %v3600_v52 = vmul.f32 0.01, %v3255_v42  ;;  %v5027_v39 = vor.u32 %v5852_v13, %v5024_v60 }
 0x40b   :  { %v3457_v43 = vmul.f32 0.01, %v2897_v41  ;;  %v3889_v9 = vmax.f32 %v3255_v42, %v3600_v52  ;;  %v5032_v52 = vld [vmem:[%s9474_s0 + $0x418] sm:$0xf0] }
 0x40c   :  { %v2523_v55 = vpop.f32.mrf.mxu2 }
 0x40d   :  { %v3746_v46 = vmax.f32 %v2897_v41, %v3457_v43  ;;  %v2524_v30 = vadd.f32 %v8844_v23, %v2523_v55  ;;  %v3261_v58 = vpop.f32.mrf.mxu3 }
 0x40e   :  { %v2166_v63 = vpop.f32.mrf.mxu0 }
 0x40f   :  { %v6301_v53 = vpack.c.bf16 %v3746_v46, %v3745_v45  ;;  %v3257_v2 = vadd.f32 %v3256_v24, %v2524_v30  ;;  %v2899_v59 = vpop.f32.mrf.mxu1  ;;  %v2167_v8 = vadd.f32 %v8844_v23, %v2166_v63  ;;  %v5853_v24 = vld [vmem:[%s9474_s0 + $0x404] sm:$0xf0]  ;;  %v5030_v46 = vld [vmem:[%s9474_s0 + $0x410] sm:$0xf] }
 0x410   :  { %v5023_v32 = vor.u32 %v5853_v24, %v5022_v7  ;;  %v5606_v63 = vld [vmem:[%s9474_s0 + $0x890] sm:$0xf] }
 0x411   :  { %6801 = vst [vmem:[%s9475_s3 + $0x1b0] sm:$0xff] %v6301_v53   ;;  %v3601_v3 = vmul.f32 0.01, %v3257_v2  ;;  %2205 = vmatmul.bf16.gmra.mxu0 %v5015_v57  ;;  %2565 = vmatmul.bf16.gmra.mxu2 %v5591_v50  ;;  %v2900_v4 = vadd.f32 %v2899_v59, %v2167_v8  ;;  %v6000_v59 = vld [vmem:[%s9474_s0 + $0x8a4] sm:$0xf] }
 0x412   :  { %2938 = vmatmul.bf16.gmra.mxu1 %v5019_v1  ;;  %3303 = vmatmul.bf16.gmra.mxu3 %v5603_v51  ;;  %v5999_v1 = vld [vmem:[%s9474_s0 + $0x894] sm:$0xf0]  ;;  %v5854_v51 = vld [vmem:[%s9474_s0 + $0x414] sm:$0xf] }
 0x413   :  { %v3890_v61 = vmax.f32 %v3257_v2, %v3601_v3  ;;  %v3458_v11 = vmul.f32 0.01, %v2900_v4  ;;  %v5616_v3 = vld [vmem:[%s9474_s0 + $0x8a8] sm:$0xf0] }
 0x414   :  { %v2526_v62 = vpop.f32.mrf.mxu2 }
 0x415   :  { %v6661_v10 = vpack.c.bf16 %v3890_v61, %v3889_v9  ;;  %v3264_v5 = vpop.f32.mrf.mxu3  ;;  %v2527_v56 = vadd.f32 %v8844_v23, %v2526_v62  ;;  %v3747_v16 = vmax.f32 %v2900_v4, %v3458_v11  ;;  %v5607_v4 = vor.u32 %v5999_v1, %v5606_v63 }
 0x416   :  { %v2168_v15 = vpop.f32.mrf.mxu0 }
 0x417   :  { %6873 = vst [vmem:[%s9475_s3 + $0x3f0] sm:$0xff] %v6661_v10   ;;  %v2169_v18 = vadd.f32 %v8844_v23, %v2168_v15  ;;  %v2901_v6 = vpop.f32.mrf.mxu1  ;;  %v3260_v14 = vadd.f32 %v3259_v34, %v2527_v56  ;;  %v5611_v34 = vor.u32 %v5998_v20, %v5608_v21 }
 0x419   :  { %v2902_v12 = vadd.f32 %v2901_v6, %v2169_v18  ;;  %v3602_v40 = vmul.f32 0.01, %v3260_v14  ;;  %v5035_v18 = vor.u32 %v5854_v51, %v5032_v52 }
 0x41b   :  { %v3459_v19 = vmul.f32 0.01, %v2902_v12  ;;  %v3891_v49 = vmax.f32 %v3260_v14, %v3602_v40  ;;  %v5040_v40 = vld [vmem:[%s9474_s0 + $0x428] sm:$0xf0] }
 0x41c   :  { %v2528_v28 = vpop.f32.mrf.mxu2 }
 0x41d   :  { %v3748_v33 = vmax.f32 %v2902_v12, %v3459_v19  ;;  %v2529_v22 = vadd.f32 %v8844_v23, %v2528_v28  ;;  %v3266_v29 = vpop.f32.mrf.mxu3 }
 0x41e   :  { %v2171_v36 = vpop.f32.mrf.mxu0 }
 0x41f   :  { %v6306_v31 = vpack.c.bf16 %v3748_v33, %v3747_v16  ;;  %v3262_v35 = vadd.f32 %v3261_v58, %v2529_v22  ;;  %v2904_v41 = vpop.f32.mrf.mxu1  ;;  %v2172_v48 = vadd.f32 %v8844_v23, %v2171_v36  ;;  %v5855_v58 = vld [vmem:[%s9474_s0 + $0x414] sm:$0xf0]  ;;  %v5038_v33 = vld [vmem:[%s9474_s0 + $0x420] sm:$0xf] }
 0x420   :  { %v5031_v9 = vor.u32 %v5855_v58, %v5030_v46  ;;  %v5614_v36 = vld [vmem:[%s9474_s0 + $0x8a0] sm:$0xf] }
 0x421   :  { %6802 = vst [vmem:[%s9475_s3 + $0x1b8] sm:$0xff] %v6306_v31   ;;  %v3603_v47 = vmul.f32 0.01, %v3262_v35  ;;  %2210 = vmatmul.bf16.gmra.mxu0 %v5023_v32  ;;  %2570 = vmatmul.bf16.gmra.mxu2 %v5599_v27  ;;  %v2905_v43 = vadd.f32 %v2904_v41, %v2172_v48  ;;  %v6002_v41 = vld [vmem:[%s9474_s0 + $0x8b4] sm:$0xf] }
 0x422   :  { %2943 = vmatmul.bf16.gmra.mxu1 %v5027_v39  ;;  %3308 = vmatmul.bf16.gmra.mxu3 %v5611_v34  ;;  %v6001_v39 = vld [vmem:[%s9474_s0 + $0x8a4] sm:$0xf0]  ;;  %v5856_v34 = vld [vmem:[%s9474_s0 + $0x424] sm:$0xf] }
 0x423   :  { %v3892_v37 = vmax.f32 %v3262_v35, %v3603_v47  ;;  %v3460_v30 = vmul.f32 0.01, %v2905_v43  ;;  %v5624_v47 = vld [vmem:[%s9474_s0 + $0x8b8] sm:$0xf0] }
 0x424   :  { %v2531_v38 = vpop.f32.mrf.mxu2 }
 0x425   :  { %v6666_v42 = vpack.c.bf16 %v3892_v37, %v3891_v49  ;;  %v3269_v44 = vpop.f32.mrf.mxu3  ;;  %v2532_v55 = vadd.f32 %v8844_v23, %v2531_v38  ;;  %v3749_v61 = vmax.f32 %v2905_v43, %v3460_v30  ;;  %v5615_v43 = vor.u32 %v6001_v39, %v5614_v36 }
 0x426   :  { %v2173_v54 = vpop.f32.mrf.mxu0 }
 0x427   :  { %6874 = vst [vmem:[%s9475_s3 + $0x3f8] sm:$0xff] %v6666_v42   ;;  %v2174_v57 = vadd.f32 %v8844_v23, %v2173_v54  ;;  %v2906_v45 = vpop.f32.mrf.mxu1  ;;  %v3265_v53 = vadd.f32 %v3264_v5, %v2532_v55  ;;  %v5619_v5 = vor.u32 %v6000_v59, %v5616_v3 }
 0x429   :  { %v2907_v50 = vadd.f32 %v2906_v45, %v2174_v57  ;;  %v3604_v6 = vmul.f32 0.01, %v3265_v53  ;;  %v5043_v57 = vor.u32 %v5856_v34, %v5040_v40 }
 0x42b   :  { %v3461_v2 = vmul.f32 0.01, %v2907_v50  ;;  %v3893_v26 = vmax.f32 %v3265_v53, %v3604_v6  ;;  %v5048_v6 = vld [vmem:[%s9474_s0 + $0x438] sm:$0xf0] }
 0x42c   :  { %v2533_v8 = vpop.f32.mrf.mxu2 }
 0x42d   :  { %v3750_v62 = vmax.f32 %v2907_v50, %v3461_v2  ;;  %v2534_v10 = vadd.f32 %v8844_v23, %v2533_v8  ;;  %v3271_v15 = vpop.f32.mrf.mxu3 }
 0x42e   :  { %v2176_v56 = vpop.f32.mrf.mxu0 }
 0x42f   :  { %v6311_v7 = vpack.c.bf16 %v3750_v62, %v3749_v61  ;;  %v3267_v11 = vadd.f32 %v3266_v29, %v2534_v10  ;;  %v2909_v12 = vpop.f32.mrf.mxu1  ;;  %v2177_v25 = vadd.f32 %v8844_v23, %v2176_v56  ;;  %v5857_v29 = vld [vmem:[%s9474_s0 + $0x424] sm:$0xf0]  ;;  %v5046_v62 = vld [vmem:[%s9474_s0 + $0x430] sm:$0xf] }
 0x430   :  { %v5039_v49 = vor.u32 %v5857_v29, %v5038_v33  ;;  %v5622_v56 = vld [vmem:[%s9474_s0 + $0x8b0] sm:$0xf] }
 0x431   :  { %6803 = vst [vmem:[%s9475_s3 + $0x1c0] sm:$0xff] %v6311_v7   ;;  %v3605_v24 = vmul.f32 0.01, %v3267_v11  ;;  %2215 = vmatmul.bf16.gmra.mxu0 %v5031_v9  ;;  %2575 = vmatmul.bf16.gmra.mxu2 %v5607_v4  ;;  %v2910_v19 = vadd.f32 %v2909_v12, %v2177_v25  ;;  %v6004_v12 = vld [vmem:[%s9474_s0 + $0x8c4] sm:$0xf] }
 0x432   :  { %2948 = vmatmul.bf16.gmra.mxu1 %v5035_v18  ;;  %3313 = vmatmul.bf16.gmra.mxu3 %v5619_v5  ;;  %v6003_v18 = vld [vmem:[%s9474_s0 + $0x8b4] sm:$0xf0]  ;;  %v5858_v5 = vld [vmem:[%s9474_s0 + $0x434] sm:$0xf] }
 0x433   :  { %v3894_v13 = vmax.f32 %v3267_v11, %v3605_v24  ;;  %v3462_v22 = vmul.f32 0.01, %v2910_v19  ;;  %v5632_v24 = vld [vmem:[%s9474_s0 + $0x8c8] sm:$0xf0] }
 0x434   :  { %v2536_v60 = vpop.f32.mrf.mxu2 }
 0x435   :  { %v6671_v14 = vpack.c.bf16 %v3894_v13, %v3893_v26  ;;  %v3274_v20 = vpop.f32.mrf.mxu3  ;;  %v2537_v28 = vadd.f32 %v8844_v23, %v2536_v60  ;;  %v3751_v37 = vmax.f32 %v2910_v19, %v3462_v22  ;;  %v5623_v19 = vor.u32 %v6003_v18, %v5622_v56 }
 0x436   :  { %v2178_v21 = vpop.f32.mrf.mxu0 }
 0x437   :  { %6875 = vst [vmem:[%s9475_s3 + $0x400] sm:$0xff] %v6671_v14   ;;  %v2179_v32 = vadd.f32 %v8844_v23, %v2178_v21  ;;  %v2911_v16 = vpop.f32.mrf.mxu1  ;;  %v3270_v31 = vadd.f32 %v3269_v44, %v2537_v28  ;;  %v5627_v44 = vor.u32 %v6002_v41, %v5624_v47 }
 0x439   :  { %v2912_v27 = vadd.f32 %v2911_v16, %v2179_v32  ;;  %v3606_v45 = vmul.f32 0.01, %v3270_v31  ;;  %v5051_v32 = vor.u32 %v5858_v5, %v5048_v6 }
 0x43b   :  { %v3463_v35 = vmul.f32 0.01, %v2912_v27  ;;  %v3895_v1 = vmax.f32 %v3270_v31, %v3606_v45 }
 0x43c   :  { %v2538_v48 = vpop.f32.mrf.mxu2 }
 0x43d   :  { %v3752_v38 = vmax.f32 %v2912_v27, %v3463_v35  ;;  %v2539_v42 = vadd.f32 %v8844_v23, %v2538_v48  ;;  %v3276_v54 = vpop.f32.mrf.mxu3 }
 0x43e   :  { %v2181_v55 = vpop.f32.mrf.mxu0 }
 0x43f   :  { %v6316_v46 = vpack.c.bf16 %v3752_v38, %v3751_v37  ;;  %v3272_v30 = vadd.f32 %v3271_v15, %v2539_v42  ;;  %v2914_v50 = vpop.f32.mrf.mxu1  ;;  %v2182_v63 = vadd.f32 %v8844_v23, %v2181_v55  ;;  %v5859_v15 = vld [vmem:[%s9474_s0 + $0x434] sm:$0xf0]  ;;  %v5054_v38 = vld [vmem:[%s9474_s0 + $0x440] sm:$0xf] }
 0x440   :  { %v5047_v26 = vor.u32 %v5859_v15, %v5046_v62  ;;  %v5630_v55 = vld [vmem:[%s9474_s0 + $0x8c0] sm:$0xf] }
 0x441   :  { %6804 = vst [vmem:[%s9475_s3 + $0x1c8] sm:$0xff] %v6316_v46   ;;  %v3607_v58 = vmul.f32 0.01, %v3272_v30  ;;  %2220 = vmatmul.bf16.gmra.mxu0 %v5039_v49  ;;  %2580 = vmatmul.bf16.gmra.mxu2 %v5615_v43  ;;  %v2915_v2 = vadd.f32 %v2914_v50, %v2182_v63  ;;  %v5640_v50 = vld [vmem:[%s9474_s0 + $0x8d8] sm:$0xf0] }
 0x442   :  { %2953 = vmatmul.bf16.gmra.mxu1 %v5043_v57  ;;  %3318 = vmatmul.bf16.gmra.mxu3 %v5627_v44  ;;  %v6005_v57 = vld [vmem:[%s9474_s0 + $0x8c4] sm:$0xf0]  ;;  %v5056_v44 = vld [vmem:[%s9474_s0 + $0x448] sm:$0xf0] }
 0x443   :  { %v3896_v51 = vmax.f32 %v3272_v30, %v3607_v58  ;;  %v3464_v10 = vmul.f32 0.01, %v2915_v2  ;;  %v6006_v30 = vld [vmem:[%s9474_s0 + $0x8d4] sm:$0xf] }
 0x444   :  { %v2541_v52 = vpop.f32.mrf.mxu2 }
 0x445   :  { %v6676_v53 = vpack.c.bf16 %v3896_v51, %v3895_v1  ;;  %v3279_v59 = vpop.f32.mrf.mxu3  ;;  %v2542_v8 = vadd.f32 %v8844_v23, %v2541_v52  ;;  %v3753_v13 = vmax.f32 %v2915_v2, %v3464_v10  ;;  %v9257_v52 = vld [vmem:[%s9473_s2] ss:$0 sm:$0xff]  ;;  %v5631_v2 = vor.u32 %v6005_v57, %v5630_v55 }
 0x446   :  { %v2183_v3 = vpop.f32.mrf.mxu0 }
 0x447   :  { %6876 = vst [vmem:[%s9475_s3 + $0x408] sm:$0xff] %v6676_v53   ;;  %v2184_v9 = vadd.f32 %v8844_v23, %v2183_v3  ;;  %v2916_v61 = vpop.f32.mrf.mxu1  ;;  %v3275_v7 = vadd.f32 %v3274_v20, %v2542_v8  ;;  %v5635_v20 = vor.u32 %v6004_v12, %v5632_v24 }
 0x449   :  { %v2917_v4 = vadd.f32 %v2916_v61, %v2184_v9  ;;  %v3608_v16 = vmul.f32 0.01, %v3275_v7  ;;  %v5643_v9 = vor.u32 %v6006_v30, %v5640_v50 }
 0x44b   :  { %v3465_v11 = vmul.f32 0.01, %v2917_v4  ;;  %v3897_v39 = vmax.f32 %v3275_v7, %v3608_v16  ;;  %v5064_v16 = vld [vmem:[%s9474_s0 + $0x458] sm:$0xf0] }
 0x44c   :  { %v2543_v25 = vpop.f32.mrf.mxu2 }
 0x44d   :  { %v3754_v60 = vmax.f32 %v2917_v4, %v3465_v11  ;;  %v2544_v14 = vadd.f32 %v8844_v23, %v2543_v25  ;;  %v3281_v21 = vpop.f32.mrf.mxu3 }
 0x44e   :  { %v2186_v28 = vpop.f32.mrf.mxu0 }
 0x44f   :  { %v6321_v33 = vpack.c.bf16 %v3754_v60, %v3753_v13  ;;  %v3277_v22 = vadd.f32 %v3276_v54, %v2544_v14  ;;  %v2919_v27 = vpop.f32.mrf.mxu1  ;;  %v2187_v36 = vadd.f32 %v8844_v23, %v2186_v28  ;;  %v5861_v54 = vld [vmem:[%s9474_s0 + $0x444] sm:$0xf0]  ;;  %v5062_v60 = vld [vmem:[%s9474_s0 + $0x450] sm:$0xf] }
 0x450   :  { %v5055_v63 = vor.u32 %v5861_v54, %v5054_v38  ;;  %v5638_v28 = vld [vmem:[%s9474_s0 + $0x8d0] sm:$0xf] }
 0x451   :  { %6805 = vst [vmem:[%s9475_s3 + $0x1d0] sm:$0xff] %v6321_v33   ;;  %v3609_v29 = vmul.f32 0.01, %v3277_v22  ;;  %2225 = vmatmul.bf16.gmra.mxu0 %v5047_v26  ;;  %2585 = vmatmul.bf16.gmra.mxu2 %v5623_v19  ;;  %v2920_v35 = vadd.f32 %v2919_v27, %v2187_v36  ;;  %v6008_v27 = vld [vmem:[%s9474_s0 + $0x8e4] sm:$0xf] }
 0x452   :  { %2958 = vmatmul.bf16.gmra.mxu1 %v5051_v32  ;;  %3323 = vmatmul.bf16.gmra.mxu3 %v5635_v20  ;;  %v6007_v32 = vld [vmem:[%s9474_s0 + $0x8d4] sm:$0xf0]  ;;  %v5862_v20 = vld [vmem:[%s9474_s0 + $0x454] sm:$0xf] }
 0x453   :  { %v3898_v34 = vmax.f32 %v3277_v22, %v3609_v29  ;;  %v3466_v42 = vmul.f32 0.01, %v2920_v35  ;;  %v5648_v29 = vld [vmem:[%s9474_s0 + $0x8e8] sm:$0xf0] }
 0x454   :  { %v2546_v40 = vpop.f32.mrf.mxu2 }
 0x455   :  { %v6681_v31 = vpack.c.bf16 %v3898_v34, %v3897_v39  ;;  %v3284_v41 = vpop.f32.mrf.mxu3  ;;  %v2547_v48 = vadd.f32 %v8844_v23, %v2546_v40  ;;  %v3755_v1 = vmax.f32 %v2920_v35, %v3466_v42  ;;  %v5639_v35 = vor.u32 %v6007_v32, %v5638_v28 }
 0x456   :  { %v2188_v47 = vpop.f32.mrf.mxu0 }
 0x457   :  { %6877 = vst [vmem:[%s9475_s3 + $0x410] sm:$0xff] %v6681_v31   ;;  %v2189_v49 = vadd.f32 %v8844_v23, %v2188_v47  ;;  %v2921_v37 = vpop.f32.mrf.mxu1  ;;  %v5860_v23 = vld [vmem:[%s9474_s0 + $0x444] sm:$0xf]  ;;  %v3280_v45 = vadd.f32 %v3279_v59, %v2547_v48 }
 0x458   :  { %v5059_v8 = vor.u32 %v5860_v23, %v5056_v44 }
 0x459   :  { %v2922_v43 = vadd.f32 %v2921_v37, %v2189_v49  ;;  %v3610_v61 = vmul.f32 0.01, %v3280_v45  ;;  %v5067_v49 = vor.u32 %v5862_v20, %v5064_v16 }
 0x45b   :  { %v3467_v46 = vmul.f32 0.01, %v2922_v43  ;;  %v3899_v18 = vmax.f32 %v3280_v45, %v3610_v61  ;;  %v5072_v61 = vld [vmem:[%s9474_s0 + $0x468] sm:$0xf0] }
 0x45c   :  { %v2548_v58 = vpop.f32.mrf.mxu2 }
 0x45d   :  { %v3756_v51 = vmax.f32 %v2922_v43, %v3467_v46  ;;  %v2549_v53 = vadd.f32 %v9257_v52, %v2548_v58  ;;  %v3286_v59 = vpop.f32.mrf.mxu3 }
 0x45e   :  { %v2191_v3 = vpop.f32.mrf.mxu0 }
 0x45f   :  { %v6326_v62 = vpack.c.bf16 %v3756_v51, %v3755_v1  ;;  %v3282_v10 = vadd.f32 %v3281_v21, %v2549_v53  ;;  %v2924_v4 = vpop.f32.mrf.mxu1  ;;  %v2192_v56 = vadd.f32 %v9257_v52, %v2191_v3  ;;  %v5863_v21 = vld [vmem:[%s9474_s0 + $0x454] sm:$0xf0]  ;;  %v5070_v51 = vld [vmem:[%s9474_s0 + $0x460] sm:$0xf] }
 0x460   :  { %v5063_v39 = vor.u32 %v5863_v21, %v5062_v60  ;;  %v5646_v3 = vld [vmem:[%s9474_s0 + $0x8e0] sm:$0xf] }
 0x461   :  { %6806 = vst [vmem:[%s9475_s3 + $0x1d8] sm:$0xff] %v6326_v62   ;;  %v3611_v15 = vmul.f32 0.01, %v3282_v10  ;;  %2230 = vmatmul.bf16.gmra.mxu0 %v5055_v63  ;;  %2590 = vmatmul.bf16.gmra.mxu2 %v5631_v2  ;;  %v2925_v11 = vadd.f32 %v2924_v4, %v2192_v56  ;;  %v6010_v4 = vld [vmem:[%s9474_s0 + $0x8f4] sm:$0xf] }
 0x462   :  { %2963 = vmatmul.bf16.gmra.mxu1 %v5059_v8  ;;  %3328 = vmatmul.bf16.gmra.mxu3 %v5643_v9  ;;  %v6009_v8 = vld [vmem:[%s9474_s0 + $0x8e4] sm:$0xf0]  ;;  %v5864_v9 = vld [vmem:[%s9474_s0 + $0x464] sm:$0xf] }
 0x463   :  { %v3900_v5 = vmax.f32 %v3282_v10, %v3611_v15  ;;  %v3468_v14 = vmul.f32 0.01, %v2925_v11  ;;  %v5656_v15 = vld [vmem:[%s9474_s0 + $0x8f8] sm:$0xf0] }
 0x464   :  { %v2551_v6 = vpop.f32.mrf.mxu2 }
 0x465   :  { %v6686_v7 = vpack.c.bf16 %v3900_v5, %v3899_v18  ;;  %v3289_v12 = vpop.f32.mrf.mxu3  ;;  %v2552_v25 = vadd.f32 %v9257_v52, %v2551_v6  ;;  %v3757_v34 = vmax.f32 %v2925_v11, %v3468_v14  ;;  %v5647_v11 = vor.u32 %v6009_v8, %v5646_v3 }
 0x466   :  { %v2193_v24 = vpop.f32.mrf.mxu0 }
 0x467   :  { %6878 = vst [vmem:[%s9475_s3 + $0x418] sm:$0xff] %v6686_v7   ;;  %v2194_v26 = vadd.f32 %v9257_v52, %v2193_v24  ;;  %v2926_v13 = vpop.f32.mrf.mxu1  ;;  %v3285_v33 = vadd.f32 %v3284_v41, %v2552_v25  ;;  %v5651_v41 = vor.u32 %v6008_v27, %v5648_v29 }
 0x469   :  { %v2927_v19 = vadd.f32 %v2926_v13, %v2194_v26  ;;  %v3612_v37 = vmul.f32 0.01, %v3285_v33  ;;  %v5075_v26 = vor.u32 %v5864_v9, %v5072_v61 }
 0x46b   :  { %v3469_v22 = vmul.f32 0.01, %v2927_v19  ;;  %v3901_v57 = vmax.f32 %v3285_v33, %v3612_v37 }
 0x46c   :  { %v2553_v36 = vpop.f32.mrf.mxu2 }
 0x46d   :  { %v3758_v40 = vmax.f32 %v2927_v19, %v3469_v22  ;;  %v2554_v31 = vadd.f32 %v9257_v52, %v2553_v36  ;;  %v3291_v47 = vpop.f32.mrf.mxu3 }
 0x46e   :  { %v2196_v48 = vpop.f32.mrf.mxu0 }
 0x46f   :  { %v6331_v38 = vpack.c.bf16 %v3758_v40, %v3757_v34  ;;  %v3287_v42 = vadd.f32 %v3286_v59, %v2554_v31  ;;  %v2929_v43 = vpop.f32.mrf.mxu1  ;;  %v2197_v55 = vadd.f32 %v9257_v52, %v2196_v48  ;;  %v5865_v59 = vld [vmem:[%s9474_s0 + $0x464] sm:$0xf0]  ;;  %v302_v40 = vld [vmem:[%s9474_s0 + $0x900] sm:$0xff]  ;;  %v5867_v48 = vld [vmem:[%s9474_s0 + $0x474] sm:$0xf0] }
 0x470   :  { %v5071_v18 = vor.u32 %v5865_v59, %v5070_v51  ;;  %v1205_v37 = vunpack.c.h.b16 %v302_v40 }
 0x471   :  { %6807 = vst [vmem:[%s9475_s3 + $0x1e0] sm:$0xff] %v6331_v38   ;;  %v3613_v54 = vmul.f32 0.01, %v3287_v42  ;;  %2235 = vmatmul.bf16.gmra.mxu0 %v5063_v39  ;;  %2595 = vmatmul.bf16.gmra.mxu2 %v5639_v35  ;;  %v2930_v46 = vadd.f32 %v2929_v43, %v2197_v55  ;;  %v5866_v43 = vld [vmem:[%s9474_s0 + $0x474] sm:$0xf] }
 0x472   :  { %2968 = vmatmul.bf16.gmra.mxu1 %v5067_v49  ;;  %3333 = vmatmul.bf16.gmra.mxu3 %v5651_v41  ;;  %v5654_v49 = vld [vmem:[%s9474_s0 + $0x8f0] sm:$0xf]  ;;  %v6011_v41 = vld [vmem:[%s9474_s0 + $0x8f4] sm:$0xf0] }
 0x473   :  { %v3902_v23 = vmax.f32 %v3287_v42, %v3613_v54  ;;  %v3470_v53 = vmul.f32 0.01, %v2930_v46  ;;  %v5080_v54 = vld [vmem:[%s9474_s0 + $0x478] sm:$0xf0] }
 0x474   :  { %v2556_v44 = vpop.f32.mrf.mxu2 }
 0x475   :  { %v6691_v45 = vpack.c.bf16 %v3902_v23, %v3901_v57  ;;  %v3294_v30 = vpop.f32.mrf.mxu3  ;;  %v2557_v58 = vadd.f32 %v9257_v52, %v2556_v44  ;;  %v3759_v5 = vmax.f32 %v2930_v46, %v3470_v53  ;;  %v5655_v46 = vor.u32 %v6011_v41, %v5654_v49 }
 0x476   :  { %v2198_v50 = vpop.f32.mrf.mxu0 }
 0x477   :  { %6879 = vst [vmem:[%s9475_s3 + $0x420] sm:$0xff] %v6691_v45   ;;  %v2199_v63 = vadd.f32 %v9257_v52, %v2198_v50  ;;  %v2931_v1 = vpop.f32.mrf.mxu1  ;;  %v3290_v62 = vadd.f32 %v3289_v12, %v2557_v58  ;;  %v5659_v12 = vor.u32 %v6010_v4, %v5656_v15 }
 0x479   :  { %v2932_v2 = vadd.f32 %v2931_v1, %v2199_v63  ;;  %v3614_v13 = vmul.f32 0.01, %v3290_v62  ;;  %v5083_v63 = vor.u32 %v5866_v43, %v5080_v54 }
 0x47b   :  { %v3471_v10 = vmul.f32 0.01, %v2932_v2  ;;  %v3903_v32 = vmax.f32 %v3290_v62, %v3614_v13 }
 0x47c   :  { %v2558_v56 = vpop.f32.mrf.mxu2 }
 0x47d   :  { %v3760_v6 = vmax.f32 %v2932_v2, %v3471_v10  ;;  %v2559_v7 = vadd.f32 %v9257_v52, %v2558_v56  ;;  %v3296_v24 = vpop.f32.mrf.mxu3 }
 0x47e   :  { %v2201_v25 = vpop.f32.mrf.mxu0 }
 0x47f   :  { %v6336_v60 = vpack.c.bf16 %v3760_v6, %v3759_v5  ;;  %v3292_v14 = vadd.f32 %v3291_v47, %v2559_v7  ;;  %v2934_v19 = vpop.f32.mrf.mxu1  ;;  %v2202_v28 = vadd.f32 %v9257_v52, %v2201_v25  ;;  %v5078_v47 = vld [vmem:[%s9474_s0 + $0x470] sm:$0xf] }
 0x480   :  { %v5079_v57 = vor.u32 %v5867_v48, %v5078_v47 }
 0x481   :  { %6808 = vst [vmem:[%s9475_s3 + $0x1e8] sm:$0xff] %v6336_v60   ;;  %v3615_v21 = vmul.f32 0.01, %v3292_v14  ;;  %2240 = vmatmul.bf16.gmra.mxu0 %v5071_v18  ;;  %2600 = vmatmul.bf16.gmra.mxu2 %v5647_v11  ;;  %v2935_v22 = vadd.f32 %v2934_v19, %v2202_v28  ;;  %v1204_v11 = vunpack.c.l.b16 %v302_v40 }
 0x482   :  { %2973 = vmatmul.bf16.gmra.mxu1 %v5075_v26  ;;  %3338 = vmatmul.bf16.gmra.mxu3 %v5659_v12  ;;  %v5868_v26 = vld [vmem:[%s9474_s0 + $0x484] sm:$0xf]  ;;  %v5088_v12 = vld [vmem:[%s9474_s0 + $0x488] sm:$0xf0] }
 0x483   :  { %v3904_v20 = vmax.f32 %v3292_v14, %v3615_v21  ;;  %v3472_v31 = vmul.f32 0.01, %v2935_v22  ;;  %v1494_v21 = vpack.c.b16 %v1204_v11, %v1204_v11 }
 0x484   :  { %v2561_v16 = vpop.f32.mrf.mxu2 }
 0x485   :  { %v6696_v33 = vpack.c.bf16 %v3904_v20, %v3903_v32  ;;  %v3299_v27 = vpop.f32.mrf.mxu3  ;;  %v2562_v36 = vadd.f32 %v9257_v52, %v2561_v16  ;;  %v3761_v23 = vmax.f32 %v2935_v22, %v3472_v31  ;;  %v5091_v20 = vor.u32 %v5868_v26, %v5088_v12 }
 0x486   :  { %v2203_v29 = vpop.f32.mrf.mxu0 }
 0x487   :  { %6880 = vst [vmem:[%s9475_s3 + $0x428] sm:$0xff] %v6696_v33   ;;  %v2204_v39 = vadd.f32 %v9257_v52, %v2203_v29  ;;  %v2936_v34 = vpop.f32.mrf.mxu1  ;;  %v3295_v38 = vadd.f32 %v3294_v30, %v2562_v36  ;;  %v1495_v30 = vpack.c.b16 %v1205_v37, %v1205_v37 }
 0x489   :  { %v2937_v35 = vadd.f32 %v2936_v34, %v2204_v39  ;;  %v3616_v1 = vmul.f32 0.01, %v3295_v38 }
 0x48b   :  { %v3473_v42 = vmul.f32 0.01, %v2937_v35  ;;  %v3905_v8 = vmax.f32 %v3295_v38, %v3616_v1 }
 0x48c   :  { %v2563_v55 = vpop.f32.mrf.mxu2 }
 0x48d   :  { %v3762_v44 = vmax.f32 %v2937_v35, %v3473_v42  ;;  %v2564_v45 = vadd.f32 %v9257_v52, %v2563_v55  ;;  %v3301_v50 = vpop.f32.mrf.mxu3 }
 0x48e   :  { %v2206_v58 = vpop.f32.mrf.mxu0 }
 0x48f   :  { %v6341_v51 = vpack.c.bf16 %v3762_v44, %v3761_v23  ;;  %v3297_v53 = vadd.f32 %v3296_v24, %v2564_v45  ;;  %v2939_v2 = vpop.f32.mrf.mxu1  ;;  %v2207_v3 = vadd.f32 %v9257_v52, %v2206_v58 }
 0x491   :  { %6809 = vst [vmem:[%s9475_s3 + $0x1f0] sm:$0xff] %v6341_v51   ;;  %v3617_v59 = vmul.f32 0.01, %v3297_v53  ;;  %2245 = vmatmul.bf16.gmra.mxu0 %v5079_v57  ;;  %2605 = vmatmul.bf16.gmra.mxu2 %v5655_v46  ;;  %v2940_v10 = vadd.f32 %v2939_v2, %v2207_v3 }
 0x492   :  { %2978 = vmatmul.bf16.gmra.mxu1 %v5083_v63  ;;  %3343 = vmatmul.bf16.gmra.mxu3 %v1495_v30 }
 0x493   :  { %v3906_v9 = vmax.f32 %v3297_v53, %v3617_v59  ;;  %v3474_v6 = vmul.f32 0.01, %v2940_v10 }
 0x494   :  { %v2566_v61 = vpop.f32.mrf.mxu2 }
 0x495   :  { %v6701_v62 = vpack.c.bf16 %v3906_v9, %v3905_v8  ;;  %v3304_v4 = vpop.f32.mrf.mxu3  ;;  %v2567_v56 = vadd.f32 %v9257_v52, %v2566_v61  ;;  %v3763_v60 = vmax.f32 %v2940_v10, %v3474_v6 }
 0x496   :  { %v2208_v15 = vpop.f32.mrf.mxu0 }
 0x497   :  { %6881 = vst [vmem:[%s9475_s3 + $0x430] sm:$0xff] %v6701_v62   ;;  %v2209_v18 = vadd.f32 %v9257_v52, %v2208_v15  ;;  %v2941_v5 = vpop.f32.mrf.mxu1  ;;  %v3300_v24 = vadd.f32 %v3299_v27, %v2567_v56 }
 0x499   :  { %v2942_v7 = vadd.f32 %v2941_v5, %v2209_v18  ;;  %v3618_v16 = vmul.f32 0.01, %v3300_v24 }
 0x49b   :  { %v3475_v25 = vmul.f32 0.01, %v2942_v7  ;;  %v3907_v39 = vmax.f32 %v3300_v24, %v3618_v16 }
 0x49c   :  { %v2568_v13 = vpop.f32.mrf.mxu2 }
 0x49d   :  { %v3764_v14 = vmax.f32 %v2942_v7, %v3475_v25  ;;  %v2569_v19 = vadd.f32 %v9257_v52, %v2568_v13  ;;  %v3306_v28 = vpop.f32.mrf.mxu3 }
 0x49e   :  { %v2211_v32 = vpop.f32.mrf.mxu0 }
 0x49f   :  { %v6346_v33 = vpack.c.bf16 %v3764_v14, %v3763_v60  ;;  %v3302_v22 = vadd.f32 %v3301_v50, %v2569_v19  ;;  %v2944_v27 = vpop.f32.mrf.mxu1  ;;  %v2212_v36 = vadd.f32 %v9257_v52, %v2211_v32 }
 0x4a1   :  { %6810 = vst [vmem:[%s9475_s3 + $0x1f8] sm:$0xff] %v6346_v33   ;;  %v3619_v29 = vmul.f32 0.01, %v3302_v22  ;;  %2610 = vmatmul.bf16.gmra.mxu2 %v1494_v21  ;;  %v2945_v35 = vadd.f32 %v2944_v27, %v2212_v36 }
 0x4a2   :  { %2983 = vmatmul.bf16.gmra.mxu1 %v5091_v20 }
 0x4a3   :  { %v3908_v34 = vmax.f32 %v3302_v22, %v3619_v29  ;;  %v3476_v38 = vmul.f32 0.01, %v2945_v35 }
 0x4a4   :  { %v2571_v40 = vpop.f32.mrf.mxu2 }
 0x4a5   :  { %v6706_v31 = vpack.c.bf16 %v3908_v34, %v3907_v39  ;;  %v3309_v47 = vpop.f32.mrf.mxu3  ;;  %v2572_v49 = vadd.f32 %v9257_v52, %v2571_v40  ;;  %v3765_v57 = vmax.f32 %v2945_v35, %v3476_v38 }
 0x4a6   :  { %v2213_v48 = vpop.f32.mrf.mxu0 }
 0x4a7   :  { %6882 = vst [vmem:[%s9475_s3 + $0x438] sm:$0xff] %v6706_v31   ;;  %v2214_v41 = vadd.f32 %v9257_v52, %v2213_v48  ;;  %v2946_v37 = vpop.f32.mrf.mxu1  ;;  %v3305_v43 = vadd.f32 %v3304_v4, %v2572_v49 }
 0x4a9   :  { %v2947_v42 = vadd.f32 %v2946_v37, %v2214_v41  ;;  %v3620_v50 = vmul.f32 0.01, %v3305_v43 }
 0x4ab   :  { %v3477_v54 = vmul.f32 0.01, %v2947_v42  ;;  %v3909_v53 = vmax.f32 %v3305_v43, %v3620_v50 }
 0x4ac   :  { %v2573_v55 = vpop.f32.mrf.mxu2 }
 0x4ad   :  { %v3766_v23 = vmax.f32 %v2947_v42, %v3477_v54  ;;  %v2574_v44 = vadd.f32 %v9257_v52, %v2573_v55  ;;  %v3311_v45 = vpop.f32.mrf.mxu3 }
 0x4ae   :  { %v2216_v46 = vpop.f32.mrf.mxu0 }
 0x4af   :  { %v6351_v58 = vpack.c.bf16 %v3766_v23, %v3765_v57  ;;  %v3307_v63 = vadd.f32 %v3306_v28, %v2574_v44  ;;  %v2949_v30 = vpop.f32.mrf.mxu1  ;;  %v2217_v51 = vadd.f32 %v9257_v52, %v2216_v46 }
 0x4b1   :  { %6811 = vst [vmem:[%s9475_s3 + $0x200] sm:$0xff] %v6351_v58   ;;  %v3621_v1 = vmul.f32 0.01, %v3307_v63  ;;  %v2950_v8 = vadd.f32 %v2949_v30, %v2217_v51 }
 0x4b3   :  { %v3910_v2 = vmax.f32 %v3307_v63, %v3621_v1  ;;  %v3478_v15 = vmul.f32 0.01, %v2950_v8 }
 0x4b4   :  { %v2576_v59 = vpop.f32.mrf.mxu2 }
 0x4b5   :  { %v6711_v3 = vpack.c.bf16 %v3910_v2, %v3909_v53  ;;  %v3314_v9 = vpop.f32.mrf.mxu3  ;;  %v2577_v62 = vadd.f32 %v9257_v52, %v2576_v59  ;;  %v3767_v7 = vmax.f32 %v2950_v8, %v3478_v15 }
 0x4b6   :  { %v2218_v61 = vpop.f32.mrf.mxu0 }
 0x4b7   :  { %6883 = vst [vmem:[%s9475_s3 + $0x440] sm:$0xff] %v6711_v3   ;;  %v2219_v10 = vadd.f32 %v9257_v52, %v2218_v61  ;;  %v2951_v4 = vpop.f32.mrf.mxu1  ;;  %v3310_v18 = vadd.f32 %v3309_v47, %v2577_v62 }
 0x4b9   :  { %v2952_v56 = vadd.f32 %v2951_v4, %v2219_v10  ;;  %v3622_v12 = vmul.f32 0.01, %v3310_v18 }
 0x4bb   :  { %v3479_v5 = vmul.f32 0.01, %v2952_v56  ;;  %v3911_v28 = vmax.f32 %v3310_v18, %v3622_v12 }
 0x4bc   :  { %v2578_v6 = vpop.f32.mrf.mxu2 }
 0x4bd   :  { %v3768_v11 = vmax.f32 %v2952_v56, %v3479_v5  ;;  %v2579_v24 = vadd.f32 %v9257_v52, %v2578_v6  ;;  %v3316_v25 = vpop.f32.mrf.mxu3 }
 0x4be   :  { %v2221_v26 = vpop.f32.mrf.mxu0 }
 0x4bf   :  { %v6356_v13 = vpack.c.bf16 %v3768_v11, %v3767_v7  ;;  %v3312_v60 = vadd.f32 %v3311_v45, %v2579_v24  ;;  %v2954_v14 = vpop.f32.mrf.mxu1  ;;  %v2222_v21 = vadd.f32 %v9257_v52, %v2221_v26 }
 0x4c1   :  { %6812 = vst [vmem:[%s9475_s3 + $0x208] sm:$0xff] %v6356_v13   ;;  %v3623_v19 = vmul.f32 0.01, %v3312_v60  ;;  %v2955_v33 = vadd.f32 %v2954_v14, %v2222_v21 }
 0x4c3   :  { %v3912_v32 = vmax.f32 %v3312_v60, %v3623_v19  ;;  %v3480_v34 = vmul.f32 0.01, %v2955_v33 }
 0x4c4   :  { %v2581_v20 = vpop.f32.mrf.mxu2 }
 0x4c5   :  { %v6716_v16 = vpack.c.bf16 %v3912_v32, %v3911_v28  ;;  %v3319_v22 = vpop.f32.mrf.mxu3  ;;  %v2582_v29 = vadd.f32 %v9257_v52, %v2581_v20  ;;  %v3769_v48 = vmax.f32 %v2955_v33, %v3480_v34 }
 0x4c6   :  { %v2223_v27 = vpop.f32.mrf.mxu0 }
 0x4c7   :  { %6884 = vst [vmem:[%s9475_s3 + $0x448] sm:$0xff] %v6716_v16   ;;  %v2224_v36 = vadd.f32 %v9257_v52, %v2223_v27  ;;  %v2956_v39 = vpop.f32.mrf.mxu1  ;;  %v3315_v31 = vadd.f32 %v3314_v9, %v2582_v29 }
 0x4c9   :  { %v2957_v40 = vadd.f32 %v2956_v39, %v2224_v36  ;;  %v3624_v42 = vmul.f32 0.01, %v3315_v31 }
 0x4cb   :  { %v3481_v35 = vmul.f32 0.01, %v2957_v40  ;;  %v3913_v44 = vmax.f32 %v3315_v31, %v3624_v42 }
 0x4cc   :  { %v2583_v47 = vpop.f32.mrf.mxu2 }
 0x4cd   :  { %v3770_v49 = vmax.f32 %v2957_v40, %v3481_v35  ;;  %v2584_v41 = vadd.f32 %v9257_v52, %v2583_v47  ;;  %v3321_v37 = vpop.f32.mrf.mxu3 }
 0x4ce   :  { %v2226_v38 = vpop.f32.mrf.mxu0 }
 0x4cf   :  { %v6361_v43 = vpack.c.bf16 %v3770_v49, %v3769_v48  ;;  %v3317_v54 = vadd.f32 %v3316_v25, %v2584_v41  ;;  %v2959_v55 = vpop.f32.mrf.mxu1  ;;  %v2227_v23 = vadd.f32 %v9257_v52, %v2226_v38 }
 0x4d1   :  { %6813 = vst [vmem:[%s9475_s3 + $0x210] sm:$0xff] %v6361_v43   ;;  %v3625_v57 = vmul.f32 0.01, %v3317_v54  ;;  %v2960_v58 = vadd.f32 %v2959_v55, %v2227_v23 }
 0x4d3   :  { %v3914_v45 = vmax.f32 %v3317_v54, %v3625_v57  ;;  %v3482_v2 = vmul.f32 0.01, %v2960_v58 }
 0x4d4   :  { %v2586_v46 = vpop.f32.mrf.mxu2 }
 0x4d5   :  { %v6721_v50 = vpack.c.bf16 %v3914_v45, %v3913_v44  ;;  %v3324_v63 = vpop.f32.mrf.mxu3  ;;  %v2587_v1 = vadd.f32 %v9257_v52, %v2586_v46  ;;  %v3771_v61 = vmax.f32 %v2960_v58, %v3482_v2 }
 0x4d6   :  { %v2228_v30 = vpop.f32.mrf.mxu0 }
 0x4d7   :  { %6885 = vst [vmem:[%s9475_s3 + $0x450] sm:$0xff] %v6721_v50   ;;  %v2229_v51 = vadd.f32 %v9257_v52, %v2228_v30  ;;  %v2961_v53 = vpop.f32.mrf.mxu1  ;;  %v3320_v3 = vadd.f32 %v3319_v22, %v2587_v1 }
 0x4d9   :  { %v2962_v59 = vadd.f32 %v2961_v53, %v2229_v51  ;;  %v3626_v56 = vmul.f32 0.01, %v3320_v3 }
 0x4db   :  { %v3483_v8 = vmul.f32 0.01, %v2962_v59  ;;  %v3915_v24 = vmax.f32 %v3320_v3, %v3626_v56 }
 0x4dc   :  { %v2588_v9 = vpop.f32.mrf.mxu2 }
 0x4dd   :  { %v3772_v62 = vmax.f32 %v2962_v59, %v3483_v8  ;;  %v2589_v10 = vadd.f32 %v9257_v52, %v2588_v9  ;;  %v3326_v4 = vpop.f32.mrf.mxu3 }
 0x4de   :  { %v2231_v15 = vpop.f32.mrf.mxu0 }
 0x4df   :  { %v6366_v18 = vpack.c.bf16 %v3772_v62, %v3771_v61  ;;  %v3322_v5 = vadd.f32 %v3321_v37, %v2589_v10  ;;  %v2964_v6 = vpop.f32.mrf.mxu1  ;;  %v2232_v11 = vadd.f32 %v9257_v52, %v2231_v15 }
 0x4e1   :  { %6814 = vst [vmem:[%s9475_s3 + $0x218] sm:$0xff] %v6366_v18   ;;  %v3627_v7 = vmul.f32 0.01, %v3322_v5  ;;  %v2965_v13 = vadd.f32 %v2964_v6, %v2232_v11 }
 0x4e3   :  { %v3916_v25 = vmax.f32 %v3322_v5, %v3627_v7  ;;  %v3484_v32 = vmul.f32 0.01, %v2965_v13 }
 0x4e4   :  { %v2591_v26 = vpop.f32.mrf.mxu2 }
 0x4e5   :  { %v6726_v12 = vpack.c.bf16 %v3916_v25, %v3915_v24  ;;  %v3329_v60 = vpop.f32.mrf.mxu3  ;;  %v2592_v19 = vadd.f32 %v9257_v52, %v2591_v26  ;;  %v3773_v27 = vmax.f32 %v2965_v13, %v3484_v32 }
 0x4e6   :  { %v2233_v14 = vpop.f32.mrf.mxu0 }
 0x4e7   :  { %6886 = vst [vmem:[%s9475_s3 + $0x458] sm:$0xff] %v6726_v12   ;;  %v2234_v21 = vadd.f32 %v9257_v52, %v2233_v14  ;;  %v2966_v28 = vpop.f32.mrf.mxu1  ;;  %v3325_v16 = vadd.f32 %v3324_v63, %v2592_v19 }
 0x4e9   :  { %v2967_v20 = vadd.f32 %v2966_v28, %v2234_v21  ;;  %v3628_v40 = vmul.f32 0.01, %v3325_v16 }
 0x4eb   :  { %v3485_v33 = vmul.f32 0.01, %v2967_v20  ;;  %v3917_v41 = vmax.f32 %v3325_v16, %v3628_v40 }
 0x4ec   :  { %v2593_v22 = vpop.f32.mrf.mxu2 }
 0x4ed   :  { %v3774_v29 = vmax.f32 %v2967_v20, %v3485_v33  ;;  %v2594_v36 = vadd.f32 %v9257_v52, %v2593_v22  ;;  %v3331_v39 = vpop.f32.mrf.mxu3 }
 0x4ee   :  { %v2236_v34 = vpop.f32.mrf.mxu0 }
 0x4ef   :  { %v6371_v31 = vpack.c.bf16 %v3774_v29, %v3773_v27  ;;  %v3327_v35 = vadd.f32 %v3326_v4, %v2594_v36  ;;  %v2969_v47 = vpop.f32.mrf.mxu1  ;;  %v2237_v49 = vadd.f32 %v9257_v52, %v2236_v34 }
 0x4f1   :  { %6815 = vst [vmem:[%s9475_s3 + $0x220] sm:$0xff] %v6371_v31   ;;  %v3629_v48 = vmul.f32 0.01, %v3327_v35  ;;  %v2970_v43 = vadd.f32 %v2969_v47, %v2237_v49 }
 0x4f3   :  { %v3918_v37 = vmax.f32 %v3327_v35, %v3629_v48  ;;  %v3486_v45 = vmul.f32 0.01, %v2970_v43 }
 0x4f4   :  { %v2596_v38 = vpop.f32.mrf.mxu2 }
 0x4f5   :  { %v6731_v42 = vpack.c.bf16 %v3918_v37, %v3917_v41  ;;  %v3334_v54 = vpop.f32.mrf.mxu3  ;;  %v2597_v57 = vadd.f32 %v9257_v52, %v2596_v38  ;;  %v3775_v30 = vmax.f32 %v2970_v43, %v3486_v45 }
 0x4f6   :  { %v2238_v55 = vpop.f32.mrf.mxu0 }
 0x4f7   :  { %6887 = vst [vmem:[%s9475_s3 + $0x460] sm:$0xff] %v6731_v42   ;;  %v2239_v23 = vadd.f32 %v9257_v52, %v2238_v55  ;;  %v2971_v44 = vpop.f32.mrf.mxu1  ;;  %v3330_v50 = vadd.f32 %v3329_v60, %v2597_v57 }
 0x4f9   :  { %v2972_v46 = vadd.f32 %v2971_v44, %v2239_v23  ;;  %v3630_v59 = vmul.f32 0.01, %v3330_v50 }
 0x4fb   :  { %v3487_v58 = vmul.f32 0.01, %v2972_v46  ;;  %v3919_v10 = vmax.f32 %v3330_v50, %v3630_v59 }
 0x4fc   :  { %v2598_v63 = vpop.f32.mrf.mxu2 }
 0x4fd   :  { %v3776_v1 = vmax.f32 %v2972_v46, %v3487_v58  ;;  %v2599_v51 = vadd.f32 %v9257_v52, %v2598_v63  ;;  %v3336_v53 = vpop.f32.mrf.mxu3 }
 0x4fe   :  { %v2241_v2 = vpop.f32.mrf.mxu0 }
 0x4ff   :  { %v6376_v3 = vpack.c.bf16 %v3776_v1, %v3775_v30  ;;  %v3332_v8 = vadd.f32 %v3331_v39, %v2599_v51  ;;  %v2974_v9 = vpop.f32.mrf.mxu1  ;;  %v2242_v62 = vadd.f32 %v9257_v52, %v2241_v2  ;;  %v2252_v30 = vadd.f32 %v9257_v52, %v7203_v0 }
 0x501   :  { %6816 = vst [vmem:[%s9475_s3 + $0x228] sm:$0xff] %v6376_v3   ;;  %v3631_v61 = vmul.f32 0.01, %v3332_v8  ;;  %v2975_v18 = vadd.f32 %v2974_v9, %v2242_v62 }
 0x503   :  { %v3920_v4 = vmax.f32 %v3332_v8, %v3631_v61  ;;  %v3488_v25 = vmul.f32 0.01, %v2975_v18  ;;  %v2254_v8 = vadd.f32 %v9257_v52, %v7230_v17 }
 0x504   :  { %v2601_v15 = vpop.f32.mrf.mxu2 }
 0x505   :  { %v6736_v56 = vpack.c.bf16 %v3920_v4, %v3919_v10  ;;  %v3339_v5 = vpop.f32.mrf.mxu3  ;;  %v2602_v7 = vadd.f32 %v9257_v52, %v2601_v15  ;;  %v3777_v14 = vmax.f32 %v2975_v18, %v3488_v25 }
 0x506   :  { %v2243_v6 = vpop.f32.mrf.mxu0 }
 0x507   :  { %6888 = vst [vmem:[%s9475_s3 + $0x468] sm:$0xff] %v6736_v56   ;;  %v2244_v11 = vadd.f32 %v9257_v52, %v2243_v6  ;;  %v2976_v24 = vpop.f32.mrf.mxu1  ;;  %v3335_v12 = vadd.f32 %v3334_v54, %v2602_v7 }
 0x509   :  { %v2977_v26 = vadd.f32 %v2976_v24, %v2244_v11  ;;  %v3632_v20 = vmul.f32 0.01, %v3335_v12 }
 0x50b   :  { %v3489_v13 = vmul.f32 0.01, %v2977_v26  ;;  %v3921_v36 = vmax.f32 %v3335_v12, %v3632_v20 }
 0x50c   :  { %v2603_v60 = vpop.f32.mrf.mxu2 }
 0x50d   :  { %v3778_v19 = vmax.f32 %v2977_v26, %v3489_v13  ;;  %v2604_v21 = vadd.f32 %v9257_v52, %v2603_v60  ;;  %v3341_v28 = vpop.f32.mrf.mxu3 }
 0x50e   :  { %v2246_v32 = vpop.f32.mrf.mxu0 }
 0x50f   :  { %v6381_v16 = vpack.c.bf16 %v3778_v19, %v3777_v14  ;;  %v3337_v33 = vadd.f32 %v3336_v53, %v2604_v21  ;;  %v2979_v22 = vpop.f32.mrf.mxu1  ;;  %v2247_v29 = vadd.f32 %v9257_v52, %v2246_v32 }
 0x511   :  { %6817 = vst [vmem:[%s9475_s3 + $0x230] sm:$0xff] %v6381_v16   ;;  %v3633_v27 = vmul.f32 0.01, %v3337_v33  ;;  %v2980_v31 = vadd.f32 %v2979_v22, %v2247_v29 }
 0x513   :  { %v3922_v39 = vmax.f32 %v3337_v33, %v3633_v27  ;;  %v3490_v37 = vmul.f32 0.01, %v2980_v31 }
 0x514   :  { %v2606_v34 = vpop.f32.mrf.mxu2 }
 0x515   :  { %v6741_v40 = vpack.c.bf16 %v3922_v39, %v3921_v36  ;;  %v3344_v35 = vpop.f32.mrf.mxu3  ;;  %v2607_v48 = vadd.f32 %v9257_v52, %v2606_v34  ;;  %v3779_v55 = vmax.f32 %v2980_v31, %v3490_v37 }
 0x516   :  { %v2248_v47 = vpop.f32.mrf.mxu0 }
 0x517   :  { %6889 = vst [vmem:[%s9475_s3 + $0x470] sm:$0xff] %v6741_v40   ;;  %v2249_v49 = vadd.f32 %v9257_v52, %v2248_v47  ;;  %v2981_v41 = vpop.f32.mrf.mxu1  ;;  %v3340_v42 = vadd.f32 %v3339_v5, %v2607_v48 }
 0x519   :  { %v2982_v38 = vadd.f32 %v2981_v41, %v2249_v49  ;;  %v3634_v45 = vmul.f32 0.01, %v3340_v42 }
 0x51b   :  { %v3491_v43 = vmul.f32 0.01, %v2982_v38  ;;  %v3923_v1 = vmax.f32 %v3340_v42, %v3634_v45 }
 0x51c   :  { %v2608_v54 = vpop.f32.mrf.mxu2 }
 0x51d   :  { %v3780_v57 = vmax.f32 %v2982_v38, %v3491_v43  ;;  %v2609_v23 = vadd.f32 %v9257_v52, %v2608_v54  ;;  %v3346_v44 = vpop.f32.mrf.mxu3 }
 0x51f   :  { %v6386_v46 = vpack.c.bf16 %v3780_v57, %v3779_v55  ;;  %v3342_v50 = vadd.f32 %v3341_v28, %v2609_v23  ;;  %v2984_v58 = vpop.f32.mrf.mxu1 }
 0x520   :  { %v2985_v53 = vadd.f32 %v2984_v58, %v2252_v30 }
 0x521   :  { %6818 = vst [vmem:[%s9475_s3 + $0x238] sm:$0xff] %v6386_v46   ;;  %v3635_v63 = vmul.f32 0.01, %v3342_v50 }
 0x522   :  { %v3492_v62 = vmul.f32 0.01, %v2985_v53 }
 0x523   :  { %v3924_v51 = vmax.f32 %v3342_v50, %v3635_v63 }
 0x524   :  { %v2611_v2 = vpop.f32.mrf.mxu2  ;;  %v3781_v56 = vmax.f32 %v2985_v53, %v3492_v62 }
 0x525   :  { %v6746_v59 = vpack.c.bf16 %v3924_v51, %v3923_v1  ;;  %v2612_v3 = vadd.f32 %v9257_v52, %v2611_v2 }
 0x527   :  { %6890 = vst [vmem:[%s9475_s3 + $0x478] sm:$0xff] %v6746_v59   ;;  %v3345_v9 = vadd.f32 %v3344_v35, %v2612_v3  ;;  %v2986_v61 = vpop.f32.mrf.mxu1 }
 0x528   :  { %v2987_v10 = vadd.f32 %v2986_v61, %v2254_v8 }
 0x529   :  { %v3636_v4 = vmul.f32 0.01, %v3345_v9 }
 0x52a   :  { %v3493_v0 = vmul.f32 0.01, %v2987_v10 }
 0x52b   :  { %v3925_v15 = vmax.f32 %v3345_v9, %v3636_v4 }
 0x52c   :  { %v3782_v18 = vmax.f32 %v2987_v10, %v3493_v0  ;;  %v2613_v5 = vpop.f32.mrf.mxu2 }
 0x52d   :  { %v4214_v6 = vpack.c.bf16 %v3925_v15, %v3925_v15 }
 0x52e   :  { %v6391_v7 = vpack.c.bf16 %v3782_v18, %v3781_v56 }
 0x52f   :  { %4503 = vst [vmem:[%s9475_s3 + $0x480] sm:$0xf] %v4214_v6 }
 0x530   :  { %6819 = vst [vmem:[%s9475_s3 + $0x240] sm:$0xff] %v6391_v7  }

// kernel: conv_forward.3
= control target key start
LH: loop header
LB: loop body
LE: loop exit
PB: predicated region body
PF: predicated region fallthrough
CT: control target
= control target key end

     0   :  { %15 = vsyncpa [#allocation5], 0  ;;  %s12122_s0 = inlined_call_operand.vmem [shape: bf16[128,2304], index: 0, kind: input, shape index: {}]   ;;  %s12123_s1 = inlined_call_operand.vmem [shape: bf16[2304,128], index: 1, kind: input, shape index: {}]   ;;  %s12124_s2 = inlined_call_operand.vmem [shape: f32[1,128], index: 2, kind: input, shape index: {}]   ;;  %s12125_s3 = inlined_call_operand.vmem [shape: bf16[384,128], index: 3, kind: input, shape index: {}]   ;;  %s12126_s4 = inlined_call_operand.vmem [shape: bf16[2048,128], index: 4, kind: input, shape index: {}]   ;;  %s12127_s5 = inlined_call_operand.vmem [shape: f32[1,128], index: 5, kind: input, shape index: {}]   ;;  %s12128_s6 = inlined_call_operand.vmem [shape: bf16[1152,256], index: 6, kind: input, shape index: {}]   ;;  %s12129_s7 = inlined_call_operand.vmem [shape: f32[1,256], index: 7, kind: input, shape index: {}]   ;;  %s12130_s8 = inlined_call_operand.vmem [shape: bf16[256,6], index: 8, kind: input, shape index: {}]   ;;  %s12131_s9 = inlined_call_operand.vmem [shape: f32[1,6], index: 9, kind: input, shape index: {}]   ;;  %s12132_s10 = inlined_call_operand.hbm [shape: f32[2,6], index: 10, kind: output, shape index: {}]  }
   0x1   :  { %v44_v0 = vld [vmem:[%s12128_s6] sm:$0xff]  ;;  %v46_v1 = vld [vmem:[%s12128_s6 + $0x8] sm:$0xff]  ;;  %v48_v2 = vld [vmem:[%s12128_s6 + $0x10] sm:$0xff] }
   0x2   :  { %45 = vst [vmem:[#allocation2] sm:$0xff] %v44_v0  ;;  %v50_v3 = vld [vmem:[%s12128_s6 + $0x18] sm:$0xff]  ;;  %v52_v4 = vld [vmem:[%s12128_s6 + $0x20] sm:$0xff]  ;;  %v54_v5 = vld [vmem:[%s12128_s6 + $0x28] sm:$0xff] }
   0x3   :  { %47 = vst [vmem:[#allocation2 + $0x8] sm:$0xff] %v46_v1  ;;  %v56_v6 = vld [vmem:[%s12128_s6 + $0x30] sm:$0xff]  ;;  %v58_v7 = vld [vmem:[%s12128_s6 + $0x38] sm:$0xff]  ;;  %v60_v8 = vld [vmem:[%s12128_s6 + $0x40] sm:$0xff] }
   0x4   :  { %49 = vst [vmem:[#allocation2 + $0x10] sm:$0xff] %v48_v2  ;;  %v62_v9 = vld [vmem:[%s12128_s6 + $0x48] sm:$0xff]  ;;  %v64_v10 = vld [vmem:[%s12128_s6 + $0x50] sm:$0xff]  ;;  %v66_v11 = vld [vmem:[%s12128_s6 + $0x58] sm:$0xff] }
   0x5   :  { %51 = vst [vmem:[#allocation2 + $0x18] sm:$0xff] %v50_v3  ;;  %v68_v12 = vld [vmem:[%s12128_s6 + $0x60] sm:$0xff]  ;;  %v70_v13 = vld [vmem:[%s12128_s6 + $0x68] sm:$0xff]  ;;  %v72_v14 = vld [vmem:[%s12128_s6 + $0x70] sm:$0xff] }
   0x6   :  { %53 = vst [vmem:[#allocation2 + $0x20] sm:$0xff] %v52_v4  ;;  %v74_v15 = vld [vmem:[%s12128_s6 + $0x78] sm:$0xff]  ;;  %v76_v16 = vld [vmem:[%s12128_s6 + $0x80] sm:$0xff]  ;;  %v78_v17 = vld [vmem:[%s12128_s6 + $0x88] sm:$0xff] }
   0x7   :  { %55 = vst [vmem:[#allocation2 + $0x28] sm:$0xff] %v54_v5  ;;  %v80_v18 = vld [vmem:[%s12128_s6 + $0x90] sm:$0xff]  ;;  %v82_v19 = vld [vmem:[%s12128_s6 + $0x98] sm:$0xff]  ;;  %v84_v20 = vld [vmem:[%s12128_s6 + $0xa0] sm:$0xff] }
   0x8   :  { %57 = vst [vmem:[#allocation2 + $0x30] sm:$0xff] %v56_v6  ;;  %v86_v21 = vld [vmem:[%s12128_s6 + $0xa8] sm:$0xff]  ;;  %v88_v22 = vld [vmem:[%s12128_s6 + $0xb0] sm:$0xff]  ;;  %v90_v23 = vld [vmem:[%s12128_s6 + $0xb8] sm:$0xff] }
   0x9   :  { %59 = vst [vmem:[#allocation2 + $0x38] sm:$0xff] %v58_v7  ;;  %v92_v24 = vld [vmem:[%s12128_s6 + $0xc0] sm:$0xff]  ;;  %v94_v25 = vld [vmem:[%s12128_s6 + $0xc8] sm:$0xff]  ;;  %v96_v26 = vld [vmem:[%s12128_s6 + $0xd0] sm:$0xff] }
   0xa   :  { %61 = vst [vmem:[#allocation2 + $0x40] sm:$0xff] %v60_v8  ;;  %v98_v27 = vld [vmem:[%s12128_s6 + $0xd8] sm:$0xff]  ;;  %v100_v28 = vld [vmem:[%s12128_s6 + $0xe0] sm:$0xff]  ;;  %v102_v29 = vld [vmem:[%s12128_s6 + $0xe8] sm:$0xff] }
   0xb   :  { %63 = vst [vmem:[#allocation2 + $0x48] sm:$0xff] %v62_v9  ;;  %v104_v30 = vld [vmem:[%s12128_s6 + $0xf0] sm:$0xff]  ;;  %v106_v31 = vld [vmem:[%s12128_s6 + $0xf8] sm:$0xff]  ;;  %v108_v32 = vld [vmem:[%s12128_s6 + $0x100] sm:$0xff] }
   0xc   :  { %65 = vst [vmem:[#allocation2 + $0x50] sm:$0xff] %v64_v10  ;;  %v110_v33 = vld [vmem:[%s12128_s6 + $0x108] sm:$0xff]  ;;  %v112_v34 = vld [vmem:[%s12128_s6 + $0x110] sm:$0xff]  ;;  %v114_v35 = vld [vmem:[%s12128_s6 + $0x118] sm:$0xff] }
   0xd   :  { %67 = vst [vmem:[#allocation2 + $0x58] sm:$0xff] %v66_v11  ;;  %v116_v36 = vld [vmem:[%s12128_s6 + $0x120] sm:$0xff]  ;;  %v118_v37 = vld [vmem:[%s12128_s6 + $0x128] sm:$0xff]  ;;  %v120_v38 = vld [vmem:[%s12128_s6 + $0x130] sm:$0xff] }
   0xe   :  { %69 = vst [vmem:[#allocation2 + $0x60] sm:$0xff] %v68_v12  ;;  %v122_v39 = vld [vmem:[%s12128_s6 + $0x138] sm:$0xff]  ;;  %v124_v40 = vld [vmem:[%s12128_s6 + $0x140] sm:$0xff]  ;;  %v126_v41 = vld [vmem:[%s12128_s6 + $0x148] sm:$0xff] }
   0xf   :  { %71 = vst [vmem:[#allocation2 + $0x68] sm:$0xff] %v70_v13  ;;  %v128_v42 = vld [vmem:[%s12128_s6 + $0x150] sm:$0xff]  ;;  %v130_v43 = vld [vmem:[%s12128_s6 + $0x158] sm:$0xff]  ;;  %v132_v44 = vld [vmem:[%s12128_s6 + $0x160] sm:$0xff] }
  0x10   :  { %73 = vst [vmem:[#allocation2 + $0x70] sm:$0xff] %v72_v14  ;;  %v134_v45 = vld [vmem:[%s12128_s6 + $0x168] sm:$0xff]  ;;  %v136_v46 = vld [vmem:[%s12128_s6 + $0x170] sm:$0xff]  ;;  %v138_v47 = vld [vmem:[%s12128_s6 + $0x178] sm:$0xff] }
  0x11   :  { %75 = vst [vmem:[#allocation2 + $0x78] sm:$0xff] %v74_v15  ;;  %v140_v48 = vld [vmem:[%s12128_s6 + $0x180] sm:$0xff]  ;;  %v142_v49 = vld [vmem:[%s12128_s6 + $0x188] sm:$0xff]  ;;  %v144_v50 = vld [vmem:[%s12128_s6 + $0x190] sm:$0xff] }
  0x12   :  { %77 = vst [vmem:[#allocation2 + $0x80] sm:$0xff] %v76_v16  ;;  %v146_v51 = vld [vmem:[%s12128_s6 + $0x198] sm:$0xff]  ;;  %v148_v52 = vld [vmem:[%s12128_s6 + $0x1a0] sm:$0xff]  ;;  %v150_v53 = vld [vmem:[%s12128_s6 + $0x1a8] sm:$0xff] }
  0x13   :  { %79 = vst [vmem:[#allocation2 + $0x88] sm:$0xff] %v78_v17  ;;  %v152_v54 = vld [vmem:[%s12128_s6 + $0x1b0] sm:$0xff]  ;;  %v154_v55 = vld [vmem:[%s12128_s6 + $0x1b8] sm:$0xff]  ;;  %v156_v56 = vld [vmem:[%s12128_s6 + $0x1c0] sm:$0xff] }
  0x14   :  { %81 = vst [vmem:[#allocation2 + $0x90] sm:$0xff] %v80_v18  ;;  %v158_v57 = vld [vmem:[%s12128_s6 + $0x1c8] sm:$0xff]  ;;  %v160_v58 = vld [vmem:[%s12128_s6 + $0x1d0] sm:$0xff]  ;;  %v162_v59 = vld [vmem:[%s12128_s6 + $0x1d8] sm:$0xff] }
  0x15   :  { %83 = vst [vmem:[#allocation2 + $0x98] sm:$0xff] %v82_v19  ;;  %v164_v60 = vld [vmem:[%s12128_s6 + $0x1e0] sm:$0xff]  ;;  %v166_v61 = vld [vmem:[%s12128_s6 + $0x1e8] sm:$0xff]  ;;  %v168_v62 = vld [vmem:[%s12128_s6 + $0x1f0] sm:$0xff] }
  0x16   :  { %85 = vst [vmem:[#allocation2 + $0xa0] sm:$0xff] %v84_v20  ;;  %v170_v63 = vld [vmem:[%s12128_s6 + $0x1f8] sm:$0xff]  ;;  %v172_v0 = vld [vmem:[%s12128_s6 + $0x200] sm:$0xff]  ;;  %v174_v1 = vld [vmem:[%s12128_s6 + $0x208] sm:$0xff] }
  0x17   :  { %87 = vst [vmem:[#allocation2 + $0xa8] sm:$0xff] %v86_v21  ;;  %v176_v2 = vld [vmem:[%s12128_s6 + $0x210] sm:$0xff]  ;;  %v178_v3 = vld [vmem:[%s12128_s6 + $0x218] sm:$0xff]  ;;  %v180_v4 = vld [vmem:[%s12128_s6 + $0x220] sm:$0xff] }
  0x18   :  { %89 = vst [vmem:[#allocation2 + $0xb0] sm:$0xff] %v88_v22  ;;  %v182_v5 = vld [vmem:[%s12128_s6 + $0x228] sm:$0xff]  ;;  %v184_v6 = vld [vmem:[%s12128_s6 + $0x230] sm:$0xff]  ;;  %v186_v7 = vld [vmem:[%s12128_s6 + $0x238] sm:$0xff] }
  0x19   :  { %91 = vst [vmem:[#allocation2 + $0xb8] sm:$0xff] %v90_v23  ;;  %v188_v8 = vld [vmem:[%s12128_s6 + $0x240] sm:$0xff]  ;;  %v190_v9 = vld [vmem:[%s12128_s6 + $0x248] sm:$0xff]  ;;  %v192_v10 = vld [vmem:[%s12128_s6 + $0x250] sm:$0xff] }
  0x1a   :  { %93 = vst [vmem:[#allocation2 + $0xc0] sm:$0xff] %v92_v24  ;;  %v194_v11 = vld [vmem:[%s12128_s6 + $0x258] sm:$0xff]  ;;  %v196_v12 = vld [vmem:[%s12128_s6 + $0x260] sm:$0xff]  ;;  %v198_v13 = vld [vmem:[%s12128_s6 + $0x268] sm:$0xff] }
  0x1b   :  { %95 = vst [vmem:[#allocation2 + $0xc8] sm:$0xff] %v94_v25  ;;  %v200_v14 = vld [vmem:[%s12128_s6 + $0x270] sm:$0xff]  ;;  %v202_v15 = vld [vmem:[%s12128_s6 + $0x278] sm:$0xff]  ;;  %v204_v16 = vld [vmem:[%s12128_s6 + $0x280] sm:$0xff] }
  0x1c   :  { %97 = vst [vmem:[#allocation2 + $0xd0] sm:$0xff] %v96_v26  ;;  %v206_v17 = vld [vmem:[%s12128_s6 + $0x288] sm:$0xff]  ;;  %v208_v18 = vld [vmem:[%s12128_s6 + $0x290] sm:$0xff]  ;;  %v210_v19 = vld [vmem:[%s12128_s6 + $0x298] sm:$0xff] }
  0x1d   :  { %99 = vst [vmem:[#allocation2 + $0xd8] sm:$0xff] %v98_v27  ;;  %v212_v20 = vld [vmem:[%s12128_s6 + $0x2a0] sm:$0xff]  ;;  %v214_v21 = vld [vmem:[%s12128_s6 + $0x2a8] sm:$0xff]  ;;  %v216_v22 = vld [vmem:[%s12128_s6 + $0x2b0] sm:$0xff] }
  0x1e   :  { %101 = vst [vmem:[#allocation2 + $0xe0] sm:$0xff] %v100_v28  ;;  %v218_v23 = vld [vmem:[%s12128_s6 + $0x2b8] sm:$0xff]  ;;  %v220_v24 = vld [vmem:[%s12128_s6 + $0x2c0] sm:$0xff]  ;;  %v222_v25 = vld [vmem:[%s12128_s6 + $0x2c8] sm:$0xff] }
  0x1f   :  { %103 = vst [vmem:[#allocation2 + $0xe8] sm:$0xff] %v102_v29  ;;  %v224_v26 = vld [vmem:[%s12128_s6 + $0x2d0] sm:$0xff]  ;;  %v226_v27 = vld [vmem:[%s12128_s6 + $0x2d8] sm:$0xff]  ;;  %v228_v28 = vld [vmem:[%s12128_s6 + $0x2e0] sm:$0xff] }
  0x20   :  { %105 = vst [vmem:[#allocation2 + $0xf0] sm:$0xff] %v104_v30  ;;  %v230_v29 = vld [vmem:[%s12128_s6 + $0x2e8] sm:$0xff]  ;;  %v232_v30 = vld [vmem:[%s12128_s6 + $0x2f0] sm:$0xff] }
  0x21   :  { %107 = vst [vmem:[#allocation2 + $0xf8] sm:$0xff] %v106_v31  ;;  %v234_v31 = vld [vmem:[%s12128_s6 + $0x2f8] sm:$0xff] }
  0x22   :  { %109 = vst [vmem:[#allocation2 + $0x100] sm:$0xff] %v108_v32  ;;  %v236_v32 = vld [vmem:[%s12128_s6 + $0x300] sm:$0xff] }
  0x23   :  { %111 = vst [vmem:[#allocation2 + $0x108] sm:$0xff] %v110_v33  ;;  %v238_v33 = vld [vmem:[%s12128_s6 + $0x308] sm:$0xff] }
  0x24   :  { %113 = vst [vmem:[#allocation2 + $0x110] sm:$0xff] %v112_v34  ;;  %v240_v34 = vld [vmem:[%s12128_s6 + $0x310] sm:$0xff] }
  0x25   :  { %115 = vst [vmem:[#allocation2 + $0x118] sm:$0xff] %v114_v35  ;;  %v242_v35 = vld [vmem:[%s12128_s6 + $0x318] sm:$0xff] }
  0x26   :  { %117 = vst [vmem:[#allocation2 + $0x120] sm:$0xff] %v116_v36  ;;  %v244_v36 = vld [vmem:[%s12128_s6 + $0x320] sm:$0xff] }
  0x27   :  { %119 = vst [vmem:[#allocation2 + $0x128] sm:$0xff] %v118_v37  ;;  %v246_v37 = vld [vmem:[%s12128_s6 + $0x328] sm:$0xff] }
  0x28   :  { %121 = vst [vmem:[#allocation2 + $0x130] sm:$0xff] %v120_v38  ;;  %v248_v38 = vld [vmem:[%s12128_s6 + $0x330] sm:$0xff] }
  0x29   :  { %123 = vst [vmem:[#allocation2 + $0x138] sm:$0xff] %v122_v39  ;;  %v250_v39 = vld [vmem:[%s12128_s6 + $0x338] sm:$0xff] }
  0x2a   :  { %125 = vst [vmem:[#allocation2 + $0x140] sm:$0xff] %v124_v40  ;;  %v252_v40 = vld [vmem:[%s12128_s6 + $0x340] sm:$0xff] }
  0x2b   :  { %127 = vst [vmem:[#allocation2 + $0x148] sm:$0xff] %v126_v41  ;;  %v254_v41 = vld [vmem:[%s12128_s6 + $0x348] sm:$0xff] }
  0x2c   :  { %129 = vst [vmem:[#allocation2 + $0x150] sm:$0xff] %v128_v42  ;;  %v256_v42 = vld [vmem:[%s12128_s6 + $0x350] sm:$0xff] }
  0x2d   :  { %131 = vst [vmem:[#allocation2 + $0x158] sm:$0xff] %v130_v43  ;;  %v258_v43 = vld [vmem:[%s12128_s6 + $0x358] sm:$0xff] }
  0x2e   :  { %133 = vst [vmem:[#allocation2 + $0x160] sm:$0xff] %v132_v44  ;;  %v260_v44 = vld [vmem:[%s12128_s6 + $0x360] sm:$0xff] }
  0x2f   :  { %135 = vst [vmem:[#allocation2 + $0x168] sm:$0xff] %v134_v45  ;;  %v262_v45 = vld [vmem:[%s12128_s6 + $0x368] sm:$0xff] }
  0x30   :  { %137 = vst [vmem:[#allocation2 + $0x170] sm:$0xff] %v136_v46  ;;  %v264_v46 = vld [vmem:[%s12128_s6 + $0x370] sm:$0xff] }
  0x31   :  { %139 = vst [vmem:[#allocation2 + $0x178] sm:$0xff] %v138_v47  ;;  %v266_v47 = vld [vmem:[%s12128_s6 + $0x378] sm:$0xff] }
  0x32   :  { %141 = vst [vmem:[#allocation2 + $0x180] sm:$0xff] %v140_v48  ;;  %v268_v48 = vld [vmem:[%s12128_s6 + $0x380] sm:$0xff] }
  0x33   :  { %143 = vst [vmem:[#allocation2 + $0x188] sm:$0xff] %v142_v49  ;;  %v270_v49 = vld [vmem:[%s12128_s6 + $0x388] sm:$0xff] }
  0x34   :  { %145 = vst [vmem:[#allocation2 + $0x190] sm:$0xff] %v144_v50  ;;  %v272_v50 = vld [vmem:[%s12128_s6 + $0x390] sm:$0xff] }
  0x35   :  { %147 = vst [vmem:[#allocation2 + $0x198] sm:$0xff] %v146_v51  ;;  %v274_v51 = vld [vmem:[%s12128_s6 + $0x398] sm:$0xff] }
  0x36   :  { %149 = vst [vmem:[#allocation2 + $0x1a0] sm:$0xff] %v148_v52  ;;  %v276_v52 = vld [vmem:[%s12128_s6 + $0x3a0] sm:$0xff] }
  0x37   :  { %151 = vst [vmem:[#allocation2 + $0x1a8] sm:$0xff] %v150_v53  ;;  %v278_v53 = vld [vmem:[%s12128_s6 + $0x3a8] sm:$0xff] }
  0x38   :  { %153 = vst [vmem:[#allocation2 + $0x1b0] sm:$0xff] %v152_v54  ;;  %v280_v54 = vld [vmem:[%s12128_s6 + $0x3b0] sm:$0xff] }
  0x39   :  { %155 = vst [vmem:[#allocation2 + $0x1b8] sm:$0xff] %v154_v55  ;;  %v282_v55 = vld [vmem:[%s12128_s6 + $0x3b8] sm:$0xff] }
  0x3a   :  { %157 = vst [vmem:[#allocation2 + $0x1c0] sm:$0xff] %v156_v56  ;;  %v284_v56 = vld [vmem:[%s12128_s6 + $0x3c0] sm:$0xff] }
  0x3b   :  { %159 = vst [vmem:[#allocation2 + $0x1c8] sm:$0xff] %v158_v57  ;;  %v286_v57 = vld [vmem:[%s12128_s6 + $0x3c8] sm:$0xff] }
  0x3c   :  { %161 = vst [vmem:[#allocation2 + $0x1d0] sm:$0xff] %v160_v58  ;;  %v288_v58 = vld [vmem:[%s12128_s6 + $0x3d0] sm:$0xff] }
  0x3d   :  { %163 = vst [vmem:[#allocation2 + $0x1d8] sm:$0xff] %v162_v59  ;;  %v290_v59 = vld [vmem:[%s12128_s6 + $0x3d8] sm:$0xff] }
  0x3e   :  { %165 = vst [vmem:[#allocation2 + $0x1e0] sm:$0xff] %v164_v60  ;;  %v292_v60 = vld [vmem:[%s12128_s6 + $0x3e0] sm:$0xff] }
  0x3f   :  { %167 = vst [vmem:[#allocation2 + $0x1e8] sm:$0xff] %v166_v61  ;;  %v294_v61 = vld [vmem:[%s12128_s6 + $0x3e8] sm:$0xff] }
  0x40   :  { %169 = vst [vmem:[#allocation2 + $0x1f0] sm:$0xff] %v168_v62  ;;  %v296_v62 = vld [vmem:[%s12128_s6 + $0x3f0] sm:$0xff] }
  0x41   :  { %171 = vst [vmem:[#allocation2 + $0x1f8] sm:$0xff] %v170_v63  ;;  %v298_v63 = vld [vmem:[%s12128_s6 + $0x3f8] sm:$0xff] }
  0x42   :  { %173 = vst [vmem:[#allocation2 + $0x200] sm:$0xff] %v172_v0  ;;  %v300_v0 = vld [vmem:[%s12128_s6 + $0x400] sm:$0xff] }
  0x43   :  { %175 = vst [vmem:[#allocation2 + $0x208] sm:$0xff] %v174_v1  ;;  %v302_v1 = vld [vmem:[%s12128_s6 + $0x408] sm:$0xff] }
  0x44   :  { %177 = vst [vmem:[#allocation2 + $0x210] sm:$0xff] %v176_v2  ;;  %v304_v2 = vld [vmem:[%s12128_s6 + $0x410] sm:$0xff] }
  0x45   :  { %179 = vst [vmem:[#allocation2 + $0x218] sm:$0xff] %v178_v3  ;;  %v306_v3 = vld [vmem:[%s12128_s6 + $0x418] sm:$0xff] }
  0x46   :  { %181 = vst [vmem:[#allocation2 + $0x220] sm:$0xff] %v180_v4  ;;  %v308_v4 = vld [vmem:[%s12128_s6 + $0x420] sm:$0xff] }
  0x47   :  { %183 = vst [vmem:[#allocation2 + $0x228] sm:$0xff] %v182_v5  ;;  %v310_v5 = vld [vmem:[%s12128_s6 + $0x428] sm:$0xff] }
  0x48   :  { %185 = vst [vmem:[#allocation2 + $0x230] sm:$0xff] %v184_v6  ;;  %v312_v6 = vld [vmem:[%s12128_s6 + $0x430] sm:$0xff] }
  0x49   :  { %187 = vst [vmem:[#allocation2 + $0x238] sm:$0xff] %v186_v7  ;;  %v314_v7 = vld [vmem:[%s12128_s6 + $0x438] sm:$0xff] }
  0x4a   :  { %189 = vst [vmem:[#allocation2 + $0x240] sm:$0xff] %v188_v8  ;;  %v316_v8 = vld [vmem:[%s12128_s6 + $0x440] sm:$0xff] }
  0x4b   :  { %191 = vst [vmem:[#allocation2 + $0x248] sm:$0xff] %v190_v9  ;;  %v318_v9 = vld [vmem:[%s12128_s6 + $0x448] sm:$0xff] }
  0x4c   :  { %193 = vst [vmem:[#allocation2 + $0x250] sm:$0xff] %v192_v10  ;;  %v320_v10 = vld [vmem:[%s12128_s6 + $0x450] sm:$0xff] }
  0x4d   :  { %195 = vst [vmem:[#allocation2 + $0x258] sm:$0xff] %v194_v11  ;;  %v322_v11 = vld [vmem:[%s12128_s6 + $0x458] sm:$0xff] }
  0x4e   :  { %197 = vst [vmem:[#allocation2 + $0x260] sm:$0xff] %v196_v12  ;;  %v324_v12 = vld [vmem:[%s12128_s6 + $0x460] sm:$0xff] }
  0x4f   :  { %199 = vst [vmem:[#allocation2 + $0x268] sm:$0xff] %v198_v13  ;;  %v326_v13 = vld [vmem:[%s12128_s6 + $0x468] sm:$0xff] }
  0x50   :  { %201 = vst [vmem:[#allocation2 + $0x270] sm:$0xff] %v200_v14  ;;  %v328_v14 = vld [vmem:[%s12128_s6 + $0x470] sm:$0xff] }
  0x51   :  { %203 = vst [vmem:[#allocation2 + $0x278] sm:$0xff] %v202_v15  ;;  %v330_v15 = vld [vmem:[%s12128_s6 + $0x478] sm:$0xff] }
  0x52   :  { %205 = vst [vmem:[#allocation2 + $0x280] sm:$0xff] %v204_v16 }
  0x53   :  { %207 = vst [vmem:[#allocation2 + $0x288] sm:$0xff] %v206_v17 }
  0x54   :  { %209 = vst [vmem:[#allocation2 + $0x290] sm:$0xff] %v208_v18 }
  0x55   :  { %211 = vst [vmem:[#allocation2 + $0x298] sm:$0xff] %v210_v19 }
  0x56   :  { %213 = vst [vmem:[#allocation2 + $0x2a0] sm:$0xff] %v212_v20 }
  0x57   :  { %215 = vst [vmem:[#allocation2 + $0x2a8] sm:$0xff] %v214_v21 }
  0x58   :  { %217 = vst [vmem:[#allocation2 + $0x2b0] sm:$0xff] %v216_v22 }
  0x59   :  { %219 = vst [vmem:[#allocation2 + $0x2b8] sm:$0xff] %v218_v23 }
  0x5a   :  { %221 = vst [vmem:[#allocation2 + $0x2c0] sm:$0xff] %v220_v24 }
  0x5b   :  { %223 = vst [vmem:[#allocation2 + $0x2c8] sm:$0xff] %v222_v25 }
  0x5c   :  { %225 = vst [vmem:[#allocation2 + $0x2d0] sm:$0xff] %v224_v26 }
  0x5d   :  { %227 = vst [vmem:[#allocation2 + $0x2d8] sm:$0xff] %v226_v27 }
  0x5e   :  { %229 = vst [vmem:[#allocation2 + $0x2e0] sm:$0xff] %v228_v28 }
  0x5f   :  { %231 = vst [vmem:[#allocation2 + $0x2e8] sm:$0xff] %v230_v29 }
  0x60   :  { %233 = vst [vmem:[#allocation2 + $0x2f0] sm:$0xff] %v232_v30 }
  0x61   :  { %235 = vst [vmem:[#allocation2 + $0x2f8] sm:$0xff] %v234_v31 }
  0x62   :  { %237 = vst [vmem:[#allocation2 + $0x300] sm:$0xff] %v236_v32 }
  0x63   :  { %239 = vst [vmem:[#allocation2 + $0x308] sm:$0xff] %v238_v33 }
  0x64   :  { %241 = vst [vmem:[#allocation2 + $0x310] sm:$0xff] %v240_v34 }
  0x65   :  { %243 = vst [vmem:[#allocation2 + $0x318] sm:$0xff] %v242_v35 }
  0x66   :  { %245 = vst [vmem:[#allocation2 + $0x320] sm:$0xff] %v244_v36 }
  0x67   :  { %247 = vst [vmem:[#allocation2 + $0x328] sm:$0xff] %v246_v37 }
  0x68   :  { %249 = vst [vmem:[#allocation2 + $0x330] sm:$0xff] %v248_v38 }
  0x69   :  { %251 = vst [vmem:[#allocation2 + $0x338] sm:$0xff] %v250_v39 }
  0x6a   :  { %253 = vst [vmem:[#allocation2 + $0x340] sm:$0xff] %v252_v40 }
  0x6b   :  { %255 = vst [vmem:[#allocation2 + $0x348] sm:$0xff] %v254_v41 }
  0x6c   :  { %257 = vst [vmem:[#allocation2 + $0x350] sm:$0xff] %v256_v42 }
  0x6d   :  { %259 = vst [vmem:[#allocation2 + $0x358] sm:$0xff] %v258_v43 }
  0x6e   :  { %261 = vst [vmem:[#allocation2 + $0x360] sm:$0xff] %v260_v44 }
  0x6f   :  { %263 = vst [vmem:[#allocation2 + $0x368] sm:$0xff] %v262_v45 }
  0x70   :  { %265 = vst [vmem:[#allocation2 + $0x370] sm:$0xff] %v264_v46 }
  0x71   :  { %267 = vst [vmem:[#allocation2 + $0x378] sm:$0xff] %v266_v47 }
  0x72   :  { %269 = vst [vmem:[#allocation2 + $0x380] sm:$0xff] %v268_v48 }
  0x73   :  { %271 = vst [vmem:[#allocation2 + $0x388] sm:$0xff] %v270_v49 }
  0x74   :  { %273 = vst [vmem:[#allocation2 + $0x390] sm:$0xff] %v272_v50 }
  0x75   :  { %275 = vst [vmem:[#allocation2 + $0x398] sm:$0xff] %v274_v51 }
  0x76   :  { %277 = vst [vmem:[#allocation2 + $0x3a0] sm:$0xff] %v276_v52 }
  0x77   :  { %279 = vst [vmem:[#allocation2 + $0x3a8] sm:$0xff] %v278_v53 }
  0x78   :  { %281 = vst [vmem:[#allocation2 + $0x3b0] sm:$0xff] %v280_v54 }
  0x79   :  { %283 = vst [vmem:[#allocation2 + $0x3b8] sm:$0xff] %v282_v55 }
  0x7a   :  { %285 = vst [vmem:[#allocation2 + $0x3c0] sm:$0xff] %v284_v56 }
  0x7b   :  { %287 = vst [vmem:[#allocation2 + $0x3c8] sm:$0xff] %v286_v57 }
  0x7c   :  { %289 = vst [vmem:[#allocation2 + $0x3d0] sm:$0xff] %v288_v58 }
  0x7d   :  { %291 = vst [vmem:[#allocation2 + $0x3d8] sm:$0xff] %v290_v59 }
  0x7e   :  { %293 = vst [vmem:[#allocation2 + $0x3e0] sm:$0xff] %v292_v60 }
  0x7f   :  { %295 = vst [vmem:[#allocation2 + $0x3e8] sm:$0xff] %v294_v61 }
  0x80   :  { %297 = vst [vmem:[#allocation2 + $0x3f0] sm:$0xff] %v296_v62 }
  0x81   :  { %299 = vst [vmem:[#allocation2 + $0x3f8] sm:$0xff] %v298_v63 }
  0x82   :  { %301 = vst [vmem:[#allocation2 + $0x400] sm:$0xff] %v300_v0 }
  0x83   :  { %303 = vst [vmem:[#allocation2 + $0x408] sm:$0xff] %v302_v1 }
  0x84   :  { %305 = vst [vmem:[#allocation2 + $0x410] sm:$0xff] %v304_v2 }
  0x85   :  { %307 = vst [vmem:[#allocation2 + $0x418] sm:$0xff] %v306_v3 }
  0x86   :  { %309 = vst [vmem:[#allocation2 + $0x420] sm:$0xff] %v308_v4 }
  0x87   :  { %311 = vst [vmem:[#allocation2 + $0x428] sm:$0xff] %v310_v5 }
  0x88   :  { %313 = vst [vmem:[#allocation2 + $0x430] sm:$0xff] %v312_v6 }
  0x89   :  { %315 = vst [vmem:[#allocation2 + $0x438] sm:$0xff] %v314_v7 }
  0x8a   :  { %317 = vst [vmem:[#allocation2 + $0x440] sm:$0xff] %v316_v8 }
  0x8b   :  { %319 = vst [vmem:[#allocation2 + $0x448] sm:$0xff] %v318_v9 }
  0x8c   :  { %321 = vst [vmem:[#allocation2 + $0x450] sm:$0xff] %v320_v10 }
  0x8d   :  { %323 = vst [vmem:[#allocation2 + $0x458] sm:$0xff] %v322_v11 }
  0x8e   :  { %325 = vst [vmem:[#allocation2 + $0x460] sm:$0xff] %v324_v12 }
  0x8f   :  { %327 = vst [vmem:[#allocation2 + $0x468] sm:$0xff] %v326_v13 }
  0x90   :  { %329 = vst [vmem:[#allocation2 + $0x470] sm:$0xff] %v328_v14 }
  0x91   :  { %331 = vst [vmem:[#allocation2 + $0x478] sm:$0xff] %v330_v15 }
  0x92   :  { %337 = vsyncadd [#allocation3], 18432  ;;  %v9006_v16 = vld [vmem:[%s12123_s1 + $0x38] sm:$0xff]  ;;  %v9005_v20 = vld [vmem:[%s12123_s1 + $0x30] sm:$0xff] }
  0x93   :  { %v9014_v17 = vld [vmem:[%s12123_s1 + $0x78] sm:$0xff]  ;;  %2358 = vmatpush.bf16.msra.mxu0 %v9006_v16  ;;  %v9013_v21 = vld [vmem:[%s12123_s1 + $0x70] sm:$0xff]  ;;  %v9004_v24 = vld [vmem:[%s12123_s1 + $0x28] sm:$0xff] }
  0x94   :  { %v9022_v18 = vld [vmem:[%s12123_s1 + $0xb8] sm:$0xff]  ;;  %2407 = vmatpush.bf16.msra.mxu1 %v9014_v17  ;;  %v9021_v22 = vld [vmem:[%s12123_s1 + $0xb0] sm:$0xff]  ;;  %v9012_v25 = vld [vmem:[%s12123_s1 + $0x68] sm:$0xff] }
  0x95   :  { %v9030_v19 = vld [vmem:[%s12123_s1 + $0xf8] sm:$0xff]  ;;  %2456 = vmatpush.bf16.msra.mxu2 %v9022_v18  ;;  %v9029_v23 = vld [vmem:[%s12123_s1 + $0xf0] sm:$0xff]  ;;  %v9020_v26 = vld [vmem:[%s12123_s1 + $0xa8] sm:$0xff] }
  0x96   :  { %2505 = vmatpush.bf16.msra.mxu3 %v9030_v19  ;;  %v9028_v27 = vld [vmem:[%s12123_s1 + $0xe8] sm:$0xff]  ;;  %v9003_v28 = vld [vmem:[%s12123_s1 + $0x20] sm:$0xff]  ;;  %v9002_v32 = vld [vmem:[%s12123_s1 + $0x18] sm:$0xff] }
  0x97   :  { %2359 = vmatpush.bf16.msra.mxu0 %v9005_v20  ;;  %v9011_v29 = vld [vmem:[%s12123_s1 + $0x60] sm:$0xff]  ;;  %v9010_v33 = vld [vmem:[%s12123_s1 + $0x58] sm:$0xff]  ;;  %v9001_v36 = vld [vmem:[%s12123_s1 + $0x10] sm:$0xff] }
  0x98   :  { %2408 = vmatpush.bf16.msra.mxu1 %v9013_v21  ;;  %v9019_v30 = vld [vmem:[%s12123_s1 + $0xa0] sm:$0xff]  ;;  %v9018_v34 = vld [vmem:[%s12123_s1 + $0x98] sm:$0xff]  ;;  %v9009_v37 = vld [vmem:[%s12123_s1 + $0x50] sm:$0xff] }
  0x99   :  { %2457 = vmatpush.bf16.msra.mxu2 %v9021_v22  ;;  %v9027_v31 = vld [vmem:[%s12123_s1 + $0xe0] sm:$0xff]  ;;  %v9026_v35 = vld [vmem:[%s12123_s1 + $0xd8] sm:$0xff]  ;;  %v9017_v38 = vld [vmem:[%s12123_s1 + $0x90] sm:$0xff] }
  0x9a   :  { %2506 = vmatpush.bf16.msra.mxu3 %v9029_v23  ;;  %v9025_v39 = vld [vmem:[%s12123_s1 + $0xd0] sm:$0xff]  ;;  %v9000_v40 = vld [vmem:[%s12123_s1 + $0x8] sm:$0xff]  ;;  %v8999_v44 = vld [vmem:[%s12123_s1] sm:$0xff] }
  0x9b   :  { %2360 = vmatpush.bf16.msra.mxu0 %v9004_v24  ;;  %v9008_v41 = vld [vmem:[%s12123_s1 + $0x48] sm:$0xff]  ;;  %v9007_v45 = vld [vmem:[%s12123_s1 + $0x40] sm:$0xff]  ;;  %v8865_v53 = vld [vmem:[%s12122_s0 + $0x4c] sm:$0xf0] }
  0x9c   :  { %2409 = vmatpush.bf16.msra.mxu1 %v9012_v25  ;;  %v9016_v42 = vld [vmem:[%s12123_s1 + $0x88] sm:$0xff]  ;;  %v9015_v46 = vld [vmem:[%s12123_s1 + $0x80] sm:$0xff]  ;;  %v6466_v55 = vld [vmem:[%s12122_s0 + $0x50] sm:$0xf0] }
  0x9d   :  { %2458 = vmatpush.bf16.msra.mxu2 %v9020_v26  ;;  %v9024_v43 = vld [vmem:[%s12123_s1 + $0xc8] sm:$0xff]  ;;  %v9023_v47 = vld [vmem:[%s12123_s1 + $0xc0] sm:$0xff]  ;;  %v6528_v60 = vld [vmem:[%s12122_s0 + $0x90] sm:$0xf] }
  0x9e   :  { %2507 = vmatpush.bf16.msra.mxu3 %v9028_v27  ;;  %v6456_v48 = vld [vmem:[%s12122_s0] sm:$0xf]  ;;  %v8864_v49 = vld [vmem:[%s12122_s0 + $0x44] sm:$0xf0]  ;;  %v8855_v50 = vld [vmem:[%s12122_s0 + $0x4] sm:$0xf] }
  0x9f   :  { %2361 = vmatpush.bf16.msra.mxu0 %v9003_v28  ;;  %v6458_v51 = vld [vmem:[%s12122_s0 + $0x48] sm:$0xf0]  ;;  %v6464_v52 = vld [vmem:[%s12122_s0 + $0x8] sm:$0xf]  ;;  %v6457_v56 = vor.u32 %v8864_v49, %v6456_v48  ;;  %v8882_v61 = vld [vmem:[%s12122_s0 + $0xd4] sm:$0xf0] }
  0xa0   :  { %2410 = vmatpush.bf16.msra.mxu1 %v9011_v29  ;;  %v8856_v54 = vld [vmem:[%s12122_s0 + $0xc] sm:$0xf]  ;;  %v6461_v57 = vor.u32 %v8855_v50, %v6458_v51  ;;  %v6465_v58 = vor.u32 %v8865_v53, %v6464_v52  ;;  %v8873_v62 = vld [vmem:[%s12122_s0 + $0x94] sm:$0xf]  ;;  %v6530_v63 = vld [vmem:[%s12122_s0 + $0xd8] sm:$0xf0]  ;;  %v6529_v4 = vor.u32 %v8882_v61, %v6528_v60 }
  0xa1   :  { %2459 = vmatpush.bf16.msra.mxu2 %v9019_v30  ;;  %v6469_v59 = vor.u32 %v8856_v54, %v6466_v55  ;;  %v6536_v0 = vld [vmem:[%s12122_s0 + $0x98] sm:$0xf]  ;;  %v8883_v1 = vld [vmem:[%s12122_s0 + $0xdc] sm:$0xf0]  ;;  %v8874_v2 = vld [vmem:[%s12122_s0 + $0x9c] sm:$0xf]  ;;  %v6533_v5 = vor.u32 %v8873_v62, %v6530_v63 }
  0xa2   :  { %2508 = vmatpush.bf16.msra.mxu3 %v9027_v31  ;;  %v6538_v3 = vld [vmem:[%s12122_s0 + $0xe0] sm:$0xf0]  ;;  %v6537_v6 = vor.u32 %v8883_v1, %v6536_v0  ;;  %v6600_v8 = vld [vmem:[%s12122_s0 + $0x120] sm:$0xf]  ;;  %v8900_v9 = vld [vmem:[%s12122_s0 + $0x164] sm:$0xf0] }
  0xa3   :  { %2362 = vmatpush.bf16.msra.mxu0 %v9002_v32  ;;  %v6541_v7 = vor.u32 %v8874_v2, %v6538_v3  ;;  %v8891_v10 = vld [vmem:[%s12122_s0 + $0x124] sm:$0xf]  ;;  %v6602_v11 = vld [vmem:[%s12122_s0 + $0x168] sm:$0xf0]  ;;  %v6608_v12 = vld [vmem:[%s12122_s0 + $0x128] sm:$0xf]  ;;  %v6601_v16 = vor.u32 %v8900_v9, %v6600_v8 }
  0xa4   :  { %2411 = vmatpush.bf16.msra.mxu1 %v9010_v33  ;;  %v8901_v13 = vld [vmem:[%s12122_s0 + $0x16c] sm:$0xf0]  ;;  %v8892_v14 = vld [vmem:[%s12122_s0 + $0x12c] sm:$0xf]  ;;  %v6610_v15 = vld [vmem:[%s12122_s0 + $0x170] sm:$0xf0]  ;;  %v6605_v17 = vor.u32 %v8891_v10, %v6602_v11 }
  0xa5   :  { %2460 = vmatpush.bf16.msra.mxu2 %v9018_v34  ;;  %v6609_v18 = vor.u32 %v8901_v13, %v6608_v12  ;;  %v6613_v19 = vor.u32 %v8892_v14, %v6610_v15  ;;  %v6672_v20 = vld [vmem:[%s12122_s0 + $0x1b0] sm:$0xf]  ;;  %v8918_v21 = vld [vmem:[%s12122_s0 + $0x1f4] sm:$0xf0]  ;;  %v8909_v22 = vld [vmem:[%s12122_s0 + $0x1b4] sm:$0xf] }
  0xa6   :  { %2509 = vmatpush.bf16.msra.mxu3 %v9026_v35  ;;  %v6674_v23 = vld [vmem:[%s12122_s0 + $0x1f8] sm:$0xf0]  ;;  %v6680_v24 = vld [vmem:[%s12122_s0 + $0x1b8] sm:$0xf]  ;;  %v8919_v25 = vld [vmem:[%s12122_s0 + $0x1fc] sm:$0xf0]  ;;  %v6673_v28 = vor.u32 %v8918_v21, %v6672_v20 }
  0xa7   :  { %2363 = vmatpush.bf16.msra.mxu0 %v9001_v36  ;;  %v8910_v26 = vld [vmem:[%s12122_s0 + $0x1bc] sm:$0xf]  ;;  %v6682_v27 = vld [vmem:[%s12122_s0 + $0x200] sm:$0xf0]  ;;  %v6677_v29 = vor.u32 %v8909_v22, %v6674_v23  ;;  %v6681_v30 = vor.u32 %v8919_v25, %v6680_v24  ;;  %v6744_v32 = vld [vmem:[%s12122_s0 + $0x240] sm:$0xf] }
  0xa8   :  { %2412 = vmatpush.bf16.msra.mxu1 %v9009_v37  ;;  %v6685_v31 = vor.u32 %v8910_v26, %v6682_v27  ;;  %v8936_v33 = vld [vmem:[%s12122_s0 + $0x284] sm:$0xf0]  ;;  %v8927_v34 = vld [vmem:[%s12122_s0 + $0x244] sm:$0xf]  ;;  %v6746_v35 = vld [vmem:[%s12122_s0 + $0x288] sm:$0xf0] }
  0xa9   :  { %2461 = vmatpush.bf16.msra.mxu2 %v9017_v38  ;;  %v6752_v36 = vld [vmem:[%s12122_s0 + $0x248] sm:$0xf]  ;;  %v8937_v37 = vld [vmem:[%s12122_s0 + $0x28c] sm:$0xf0]  ;;  %v8928_v38 = vld [vmem:[%s12122_s0 + $0x24c] sm:$0xf] }
  0xaa   :  { %2510 = vmatpush.bf16.msra.mxu3 %v9025_v39  ;;  %v6754_v39 = vld [vmem:[%s12122_s0 + $0x290] sm:$0xf0]  ;;  %v9036_v52 = vld [vmem:[%s12123_s1 + $0x128] sm:$0xff]  ;;  %v6816_v54 = vld [vmem:[%s12122_s0 + $0x2d0] sm:$0xf] }
  0xab   :  { %2364 = vmatpush.bf16.msra.mxu0 %v9000_v40  ;;  %v6745_v40 = vor.u32 %v8936_v33, %v6744_v32  ;;  %v9037_v48 = vld [vmem:[%s12123_s1 + $0x130] sm:$0xff]  ;;  %v9044_v53 = vld [vmem:[%s12123_s1 + $0x168] sm:$0xff]  ;;  %v6824_v60 = vld [vmem:[%s12122_s0 + $0x2d8] sm:$0xf] }
  0xac   :  { %2413 = vmatpush.bf16.msra.mxu1 %v9008_v41  ;;  %v6749_v41 = vor.u32 %v8927_v34, %v6746_v35  ;;  %v9045_v49 = vld [vmem:[%s12123_s1 + $0x170] sm:$0xff]  ;;  %v9052_v55 = vld [vmem:[%s12123_s1 + $0x1a8] sm:$0xff]  ;;  %v8955_v61 = vld [vmem:[%s12122_s0 + $0x31c] sm:$0xf0] }
  0xad   :  { %2462 = vmatpush.bf16.msra.mxu2 %v9016_v42  ;;  %v6753_v42 = vor.u32 %v8937_v37, %v6752_v36  ;;  %v9053_v50 = vld [vmem:[%s12123_s1 + $0x1b0] sm:$0xff]  ;;  %v8946_v62 = vld [vmem:[%s12122_s0 + $0x2dc] sm:$0xf]  ;;  %v6826_v63 = vld [vmem:[%s12122_s0 + $0x320] sm:$0xf0] }
  0xae   :  { %2511 = vmatpush.bf16.msra.mxu3 %v9024_v43  ;;  %v6757_v43 = vor.u32 %v8928_v38, %v6754_v39  ;;  %v9061_v51 = vld [vmem:[%s12123_s1 + $0x1f0] sm:$0xff]  ;;  %v9035_v0 = vld [vmem:[%s12123_s1 + $0x120] sm:$0xff]  ;;  %v9034_v8 = vld [vmem:[%s12123_s1 + $0x118] sm:$0xff] }
  0xaf   :  { %2365 = vmatpush.bf16.msra.mxu0 %v8999_v44  ;;  %v9038_v44 = vld [vmem:[%s12123_s1 + $0x138] sm:$0xff]  ;;  %v9043_v1 = vld [vmem:[%s12123_s1 + $0x160] sm:$0xff]  ;;  %v9033_v12 = vld [vmem:[%s12123_s1 + $0x110] sm:$0xff] }
  0xb0   :  { %2414 = vmatpush.bf16.msra.mxu1 %v9007_v45  ;;  %v9046_v45 = vld [vmem:[%s12123_s1 + $0x178] sm:$0xff]  ;;  %v9051_v2 = vld [vmem:[%s12123_s1 + $0x1a0] sm:$0xff]  ;;  %v9041_v13 = vld [vmem:[%s12123_s1 + $0x150] sm:$0xff] }
  0xb1   :  { %2463 = vmatpush.bf16.msra.mxu2 %v9015_v46  ;;  %v9054_v46 = vld [vmem:[%s12123_s1 + $0x1b8] sm:$0xff]  ;;  %v9059_v3 = vld [vmem:[%s12123_s1 + $0x1e0] sm:$0xff]  ;;  %v9049_v14 = vld [vmem:[%s12123_s1 + $0x190] sm:$0xff] }
  0xb2   :  { %2512 = vmatpush.bf16.msra.mxu3 %v9023_v47  ;;  %2366 = vmatmul.bf16.vlgmr.msra.gmra.mxu0 %v6457_v56  ;;  %v9062_v47 = vld [vmem:[%s12123_s1 + $0x1f8] sm:$0xff]  ;;  %v9060_v56 = vld [vmem:[%s12123_s1 + $0x1e8] sm:$0xff]  ;;  %v9057_v15 = vld [vmem:[%s12123_s1 + $0x1d0] sm:$0xff] }
  0xb3   :  { %2415 = vmatmul.bf16.vlgmr.msra.gmra.mxu1 %v6461_v57  ;;  %2554 = vmatpush.bf16.msrb.mxu0 %v9038_v44  ;;  %v8954_v57 = vld [vmem:[%s12122_s0 + $0x314] sm:$0xf0]  ;;  %v6888_v20 = vld [vmem:[%s12122_s0 + $0x360] sm:$0xf]  ;;  %v8972_v21 = vld [vmem:[%s12122_s0 + $0x3a4] sm:$0xf0] }
  0xb4   :  { %2464 = vmatmul.bf16.vlgmr.msra.gmra.mxu2 %v6465_v58  ;;  %2603 = vmatpush.bf16.msrb.mxu1 %v9046_v45  ;;  %v8945_v58 = vld [vmem:[%s12122_s0 + $0x2d4] sm:$0xf]  ;;  %v9042_v9 = vld [vmem:[%s12123_s1 + $0x158] sm:$0xff]  ;;  %v8963_v22 = vld [vmem:[%s12122_s0 + $0x364] sm:$0xf] }
  0xb5   :  { %2513 = vmatmul.bf16.vlgmr.msra.gmra.mxu3 %v6469_v59  ;;  %2652 = vmatpush.bf16.msrb.mxu2 %v9054_v46  ;;  %v6818_v59 = vld [vmem:[%s12122_s0 + $0x318] sm:$0xf0]  ;;  %v6890_v23 = vld [vmem:[%s12122_s0 + $0x3a8] sm:$0xf0]  ;;  %v6896_v24 = vld [vmem:[%s12122_s0 + $0x368] sm:$0xf] }
  0xb6   :  { %2701 = vmatpush.bf16.msrb.mxu3 %v9062_v47  ;;  %v9050_v10 = vld [vmem:[%s12123_s1 + $0x198] sm:$0xff]  ;;  %v8973_v25 = vld [vmem:[%s12122_s0 + $0x3ac] sm:$0xf0]  ;;  %v8964_v26 = vld [vmem:[%s12122_s0 + $0x36c] sm:$0xf] }
  0xb7   :  { %2555 = vmatpush.bf16.msrb.mxu0 %v9037_v48  ;;  %v9058_v11 = vld [vmem:[%s12123_s1 + $0x1d8] sm:$0xff]  ;;  %v6898_v27 = vld [vmem:[%s12122_s0 + $0x3b0] sm:$0xf0]  ;;  %v9047_v32 = vld [vmem:[%s12123_s1 + $0x180] sm:$0xff]  ;;  %v6897_v33 = vor.u32 %v8973_v25, %v6896_v24 }
  0xb8   :  { %2604 = vmatpush.bf16.msrb.mxu1 %v9045_v49  ;;  %v6901_v34 = vor.u32 %v8964_v26, %v6898_v27  ;;  %v9055_v35 = vld [vmem:[%s12123_s1 + $0x1c0] sm:$0xff]  ;;  %v6960_v36 = vld [vmem:[%s12122_s0 + $0x3f0] sm:$0xf]  ;;  %v8990_v37 = vld [vmem:[%s12122_s0 + $0x434] sm:$0xf0] }
  0xb9   :  { %2653 = vmatpush.bf16.msrb.mxu2 %v9053_v50  ;;  %v8981_v38 = vld [vmem:[%s12122_s0 + $0x3f4] sm:$0xf]  ;;  %v6962_v39 = vld [vmem:[%s12122_s0 + $0x438] sm:$0xf0]  ;;  %v6961_v44 = vor.u32 %v8990_v37, %v6960_v36  ;;  %v10362_v48 = vld [vmem:[%s12124_s2] ss:$0 sm:$0xff] }
  0xba   :  { %2702 = vmatpush.bf16.msrb.mxu3 %v9061_v51  ;;  %v6965_v45 = vor.u32 %v8981_v38, %v6962_v39  ;;  %v6472_v49 = vld [vmem:[%s12122_s0 + $0x10] sm:$0xf]  ;;  %v8866_v50 = vld [vmem:[%s12122_s0 + $0x54] sm:$0xf0]  ;;  %v8857_v51 = vld [vmem:[%s12122_s0 + $0x14] sm:$0xf] }
  0xbb   :  { %2556 = vmatpush.bf16.msrb.mxu0 %v9036_v52  ;;  %v6474_v52 = vld [vmem:[%s12122_s0 + $0x58] sm:$0xf0]  ;;  %v6616_v37 = vld [vmem:[%s12122_s0 + $0x130] sm:$0xf]  ;;  %v8902_v38 = vld [vmem:[%s12122_s0 + $0x174] sm:$0xf0] }
  0xbc   :  { %2605 = vmatpush.bf16.msrb.mxu1 %v9044_v53  ;;  %v6480_v53 = vld [vmem:[%s12122_s0 + $0x18] sm:$0xf]  ;;  %v8893_v39 = vld [vmem:[%s12122_s0 + $0x134] sm:$0xf] }
  0xbd   :  { %2654 = vmatpush.bf16.msrb.mxu2 %v9052_v55  ;;  %v8858_v55 = vld [vmem:[%s12122_s0 + $0x1c] sm:$0xf] }
  0xbe   :  { %2703 = vmatpush.bf16.msrb.mxu3 %v9060_v56  ;;  %v6482_v56 = vld [vmem:[%s12122_s0 + $0x60] sm:$0xf0] }
  0xbf   :  { %2557 = vmatpush.bf16.msrb.mxu0 %v9035_v0 }
  0xc0   :  { %2606 = vmatpush.bf16.msrb.mxu1 %v9043_v1 }
  0xc1   :  { %2655 = vmatpush.bf16.msrb.mxu2 %v9051_v2 }
  0xc2   :  { %2371 = vmatmul.bf16.gmra.mxu0 %v6529_v4  ;;  %v6817_v4 = vor.u32 %v8954_v57, %v6816_v54  ;;  %2704 = vmatpush.bf16.msrb.mxu3 %v9059_v3  ;;  %v8867_v54 = vld [vmem:[%s12122_s0 + $0x5c] sm:$0xf0]  ;;  %v6473_v57 = vor.u32 %v8866_v50, %v6472_v49 }
  0xc3   :  { %2420 = vmatmul.bf16.gmra.mxu1 %v6533_v5  ;;  %v6821_v5 = vor.u32 %v8945_v58, %v6818_v59  ;;  %2558 = vmatpush.bf16.msrb.mxu0 %v9034_v8  ;;  %v6477_v58 = vor.u32 %v8857_v51, %v6474_v52 }
  0xc4   :  { %2469 = vmatmul.bf16.gmra.mxu2 %v6537_v6  ;;  %v6825_v6 = vor.u32 %v8955_v61, %v6824_v60  ;;  %2607 = vmatpush.bf16.msrb.mxu1 %v9042_v9  ;;  %v6481_v61 = vor.u32 %v8867_v54, %v6480_v53  ;;  %v6544_v9 = vld [vmem:[%s12122_s0 + $0xa0] sm:$0xf] }
  0xc5   :  { %2518 = vmatmul.bf16.gmra.mxu3 %v6541_v7  ;;  %v6829_v7 = vor.u32 %v8946_v62, %v6826_v63  ;;  %2656 = vmatpush.bf16.msrb.mxu2 %v9050_v10  ;;  %v6485_v62 = vor.u32 %v8858_v55, %v6482_v56  ;;  %v8884_v10 = vld [vmem:[%s12122_s0 + $0xe4] sm:$0xf0] }
  0xc6   :  { %2705 = vmatpush.bf16.msrb.mxu3 %v9058_v11  ;;  %v8875_v11 = vld [vmem:[%s12122_s0 + $0xa4] sm:$0xf] }
  0xc7   :  { %2559 = vmatpush.bf16.msrb.mxu0 %v9033_v12  ;;  %v6546_v12 = vld [vmem:[%s12122_s0 + $0xe8] sm:$0xf0] }
  0xc8   :  { %2608 = vmatpush.bf16.msrb.mxu1 %v9041_v13  ;;  %v6552_v13 = vld [vmem:[%s12122_s0 + $0xa8] sm:$0xf] }
  0xc9   :  { %2657 = vmatpush.bf16.msrb.mxu2 %v9049_v14  ;;  %v8885_v14 = vld [vmem:[%s12122_s0 + $0xec] sm:$0xf0] }
  0xca   :  { %2706 = vmatpush.bf16.msrb.mxu3 %v9057_v15  ;;  %v8876_v15 = vld [vmem:[%s12122_s0 + $0xac] sm:$0xf]  ;;  %v6553_v24 = vor.u32 %v8885_v14, %v6552_v13 }
  0xd2   :  { %2376 = vmatmul.bf16.gmra.mxu0 %v6601_v16  ;;  %v9032_v16 = vld [vmem:[%s12123_s1 + $0x108] sm:$0xff] }
  0xd3   :  { %2425 = vmatmul.bf16.gmra.mxu1 %v6605_v17  ;;  %v9040_v17 = vld [vmem:[%s12123_s1 + $0x148] sm:$0xff]  ;;  %2560 = vmatpush.bf16.msrb.mxu0 %v9032_v16  ;;  %v6554_v16 = vld [vmem:[%s12122_s0 + $0xf0] sm:$0xf0] }
  0xd4   :  { %2474 = vmatmul.bf16.gmra.mxu2 %v6609_v18  ;;  %v9048_v18 = vld [vmem:[%s12123_s1 + $0x188] sm:$0xff]  ;;  %2609 = vmatpush.bf16.msrb.mxu1 %v9040_v17  ;;  %v6557_v25 = vor.u32 %v8876_v15, %v6554_v16 }
  0xd5   :  { %2523 = vmatmul.bf16.gmra.mxu3 %v6613_v19  ;;  %v9056_v19 = vld [vmem:[%s12123_s1 + $0x1c8] sm:$0xff]  ;;  %2658 = vmatpush.bf16.msrb.mxu2 %v9048_v18 }
  0xd6   :  { %2707 = vmatpush.bf16.msrb.mxu3 %v9056_v19  ;;  %v6545_v19 = vor.u32 %v8884_v10, %v6544_v9  ;;  %v8912_v9 = vld [vmem:[%s12122_s0 + $0x1cc] sm:$0xf]  ;;  %v6698_v10 = vld [vmem:[%s12122_s0 + $0x210] sm:$0xf0] }
  0xd9   :  { %2659 = vmatpush.bf16.msrb.mxu2 %v9047_v32 }
  0xda   :  { %2708 = vmatpush.bf16.msrb.mxu3 %v9055_v35 }
  0xe2   :  { %2381 = vmatmul.bf16.gmra.mxu0 %v6673_v28  ;;  %v6889_v28 = vor.u32 %v8972_v21, %v6888_v20  ;;  %v6549_v20 = vor.u32 %v8875_v11, %v6546_v12 }
  0xe3   :  { %2430 = vmatmul.bf16.gmra.mxu1 %v6677_v29  ;;  %v6893_v29 = vor.u32 %v8963_v22, %v6890_v23 }
  0xe4   :  { %2479 = vmatmul.bf16.gmra.mxu2 %v6681_v30  ;;  %v9031_v30 = vld [vmem:[%s12123_s1 + $0x100] sm:$0xff] }
  0xe5   :  { %2528 = vmatmul.bf16.gmra.mxu3 %v6685_v31  ;;  %v9039_v31 = vld [vmem:[%s12123_s1 + $0x140] sm:$0xff]  ;;  %2561 = vmatpush.bf16.msrb.mxu0 %v9031_v30 }
  0xe6   :  { %2610 = vmatpush.bf16.msrb.mxu1 %v9039_v31 }
  0xf2   :  { %2386 = vmatmul.bf16.gmra.mxu0 %v6745_v40  ;;  %v6968_v40 = vld [vmem:[%s12122_s0 + $0x3f8] sm:$0xf] }
  0xf3   :  { %2435 = vmatmul.bf16.gmra.mxu1 %v6749_v41  ;;  %v8991_v41 = vld [vmem:[%s12122_s0 + $0x43c] sm:$0xf0] }
  0xf4   :  { %2484 = vmatmul.bf16.gmra.mxu2 %v6753_v42  ;;  %v8982_v42 = vld [vmem:[%s12122_s0 + $0x3fc] sm:$0xf]  ;;  %v6969_v46 = vor.u32 %v8991_v41, %v6968_v40  ;;  %v6624_v41 = vld [vmem:[%s12122_s0 + $0x138] sm:$0xf] }
  0xf5   :  { %2533 = vmatmul.bf16.gmra.mxu3 %v6757_v43  ;;  %v6970_v43 = vld [vmem:[%s12122_s0 + $0x440] sm:$0xf0]  ;;  %v6618_v40 = vld [vmem:[%s12122_s0 + $0x178] sm:$0xf0] }
  0xf6   :  { %v6973_v47 = vor.u32 %v8982_v42, %v6970_v43  ;;  %v8903_v42 = vld [vmem:[%s12122_s0 + $0x17c] sm:$0xf0]  ;;  %v8894_v43 = vld [vmem:[%s12122_s0 + $0x13c] sm:$0xf]  ;;  %v6621_v49 = vor.u32 %v8893_v39, %v6618_v40  ;;  %v6770_v40 = vld [vmem:[%s12122_s0 + $0x2a0] sm:$0xf0] }
  0xf7   :  { %v6625_v53 = vor.u32 %v8903_v42, %v6624_v41  ;;  %v8930_v39 = vld [vmem:[%s12122_s0 + $0x25c] sm:$0xf] }
 0x102   :  { %2391 = vmatmul.bf16.gmra.mxu0 %v6817_v4 }
 0x103   :  { %2440 = vmatmul.bf16.gmra.mxu1 %v6821_v5 }
 0x104   :  { %2489 = vmatmul.bf16.gmra.mxu2 %v6825_v6 }
 0x105   :  { %2538 = vmatmul.bf16.gmra.mxu3 %v6829_v7 }
 0x112   :  { %2396 = vmatmul.bf16.gmra.mxu0 %v6889_v28 }
 0x113   :  { %2445 = vmatmul.bf16.gmra.mxu1 %v6893_v29 }
 0x114   :  { %2494 = vmatmul.bf16.gmra.mxu2 %v6897_v33 }
 0x115   :  { %2543 = vmatmul.bf16.gmra.mxu3 %v6901_v34 }
 0x122   :  { %2401 = vmatmul.bf16.gmra.mxu0 %v6961_v44  ;;  %v6626_v44 = vld [vmem:[%s12122_s0 + $0x180] sm:$0xf0] }
 0x123   :  { %2450 = vmatmul.bf16.gmra.mxu1 %v6965_v45  ;;  %v6629_v54 = vor.u32 %v8894_v43, %v6626_v44 }
 0x124   :  { %2499 = vmatmul.bf16.gmra.mxu2 %v6969_v46 }
 0x125   :  { %2548 = vmatmul.bf16.gmra.mxu3 %v6973_v47  ;;  %v6617_v47 = vor.u32 %v8902_v38, %v6616_v37  ;;  %v6768_v37 = vld [vmem:[%s12122_s0 + $0x258] sm:$0xf]  ;;  %v8939_v38 = vld [vmem:[%s12122_s0 + $0x29c] sm:$0xf0] }
 0x12f   :  { %v2367_v59 = vpop.f32.mrf.mxu0 }
 0x130   :  { %v2416_v60 = vpop.f32.mrf.mxu1  ;;  %v2368_v63 = vadd.f32 %v10362_v48, %v2367_v59 }
 0x132   :  { %v2417_v0 = vadd.f32 %v2416_v60, %v2368_v63  ;;  %2562 = vmatmul.bf16.vlgmr.msrb.gmra.mxu0 %v6473_v57 }
 0x133   :  { %2611 = vmatmul.bf16.vlgmr.msrb.gmra.mxu1 %v6477_v58 }
 0x134   :  { %2660 = vmatmul.bf16.vlgmr.msrb.gmra.mxu2 %v6481_v61 }
 0x135   :  { %2709 = vmatmul.bf16.vlgmr.msrb.gmra.mxu3 %v6485_v62 }
 0x137   :  { %v2465_v1 = vpop.f32.mrf.mxu2  ;;  %v2369_v4 = vpop.f32.mrf.mxu0 }
 0x138   :  { %v2514_v2 = vpop.f32.mrf.mxu3  ;;  %v2466_v3 = vadd.f32 %v2465_v1, %v2417_v0  ;;  %v2418_v5 = vpop.f32.mrf.mxu1  ;;  %v2370_v6 = vadd.f32 %v10362_v48, %v2369_v4  ;;  %v8911_v4 = vld [vmem:[%s12122_s0 + $0x1c4] sm:$0xf] }
 0x13a   :  { %v10390_v7 = vadd.f32 %v2514_v2, %v2466_v3  ;;  %v2419_v8 = vadd.f32 %v2418_v5, %v2370_v6  ;;  %v6688_v2 = vld [vmem:[%s12122_s0 + $0x1c0] sm:$0xf]  ;;  %v8920_v3 = vld [vmem:[%s12122_s0 + $0x204] sm:$0xf0]  ;;  %v6690_v5 = vld [vmem:[%s12122_s0 + $0x208] sm:$0xf0] }
 0x13b   :  { %v6696_v6 = vld [vmem:[%s12122_s0 + $0x1c8] sm:$0xf]  ;;  %v6689_v13 = vor.u32 %v8920_v3, %v6688_v2  ;;  %v6693_v14 = vor.u32 %v8911_v4, %v6690_v5  ;;  %v9093_v5 = vld [vmem:[%s12123_s1 + $0x2f0] sm:$0xff] }
 0x13f   :  { %v2467_v17 = vpop.f32.mrf.mxu2  ;;  %v2372_v22 = vpop.f32.mrf.mxu0 }
 0x140   :  { %v2516_v18 = vpop.f32.mrf.mxu3  ;;  %v2468_v21 = vadd.f32 %v2467_v17, %v2419_v8  ;;  %v2421_v23 = vpop.f32.mrf.mxu1  ;;  %v2373_v26 = vadd.f32 %v10362_v48, %v2372_v22  ;;  %v8921_v8 = vld [vmem:[%s12122_s0 + $0x20c] sm:$0xf0] }
 0x142   :  { %v10417_v27 = vadd.f32 %v2516_v18, %v2468_v21  ;;  %v2422_v28 = vadd.f32 %v2421_v23, %v2373_v26  ;;  %2567 = vmatmul.bf16.gmra.mxu0 %v6545_v19  ;;  %v6697_v18 = vor.u32 %v8921_v8, %v6696_v6  ;;  %v6701_v19 = vor.u32 %v8912_v9, %v6698_v10  ;;  %v6832_v8 = vld [vmem:[%s12122_s0 + $0x2e0] sm:$0xf]  ;;  %v8956_v9 = vld [vmem:[%s12122_s0 + $0x324] sm:$0xf0]  ;;  %v8947_v10 = vld [vmem:[%s12122_s0 + $0x2e4] sm:$0xf] }
 0x143   :  { %2616 = vmatmul.bf16.gmra.mxu1 %v6549_v20 }
 0x144   :  { %2665 = vmatmul.bf16.gmra.mxu2 %v6553_v24 }
 0x145   :  { %2714 = vmatmul.bf16.gmra.mxu3 %v6557_v25 }
 0x147   :  { %v2470_v29 = vpop.f32.mrf.mxu2  ;;  %v2374_v32 = vpop.f32.mrf.mxu0 }
 0x148   :  { %v2519_v30 = vpop.f32.mrf.mxu3  ;;  %v2471_v31 = vadd.f32 %v2470_v29, %v2422_v28  ;;  %v2423_v33 = vpop.f32.mrf.mxu1  ;;  %v2375_v34 = vadd.f32 %v10362_v48, %v2374_v32  ;;  %v6760_v32 = vld [vmem:[%s12122_s0 + $0x250] sm:$0xf] }
 0x14a   :  { %v10420_v35 = vadd.f32 %v2519_v30, %v2471_v31  ;;  %v2424_v36 = vadd.f32 %v2423_v33, %v2375_v34  ;;  %v8938_v33 = vld [vmem:[%s12122_s0 + $0x294] sm:$0xf0]  ;;  %v8929_v34 = vld [vmem:[%s12122_s0 + $0x254] sm:$0xf] }
 0x14b   :  { %v6761_v43 = vor.u32 %v8938_v33, %v6760_v32 }
 0x14f   :  { %v2472_v45 = vpop.f32.mrf.mxu2  ;;  %v2377_v51 = vpop.f32.mrf.mxu0 }
 0x150   :  { %v2521_v46 = vpop.f32.mrf.mxu3  ;;  %v2473_v50 = vadd.f32 %v2472_v45, %v2424_v36  ;;  %v2426_v52 = vpop.f32.mrf.mxu1  ;;  %v2378_v55 = vadd.f32 %v10362_v48, %v2377_v51  ;;  %v6762_v36 = vld [vmem:[%s12122_s0 + $0x298] sm:$0xf0] }
 0x151   :  { %v6765_v44 = vor.u32 %v8929_v34, %v6762_v36 }
 0x152   :  { %v10447_v56 = vadd.f32 %v2521_v46, %v2473_v50  ;;  %v2427_v57 = vadd.f32 %v2426_v52, %v2378_v55  ;;  %2572 = vmatmul.bf16.gmra.mxu0 %v6617_v47  ;;  %v6773_v50 = vor.u32 %v8930_v39, %v6770_v40  ;;  %v9078_v55 = vld [vmem:[%s12123_s1 + $0x278] sm:$0xff] }
 0x153   :  { %2621 = vmatmul.bf16.gmra.mxu1 %v6621_v49  ;;  %v6769_v49 = vor.u32 %v8939_v38, %v6768_v37  ;;  %v9091_v38 = vld [vmem:[%s12123_s1 + $0x2e0] sm:$0xff] }
 0x154   :  { %2670 = vmatmul.bf16.gmra.mxu2 %v6625_v53  ;;  %2799 = vmatpush.bf16.msra.mxu1 %v9078_v55 }
 0x155   :  { %2719 = vmatmul.bf16.gmra.mxu3 %v6629_v54  ;;  %v9070_v54 = vld [vmem:[%s12123_s1 + $0x238] sm:$0xff] }
 0x156   :  { %2750 = vmatpush.bf16.msra.mxu0 %v9070_v54 }
 0x157   :  { %v2475_v58 = vpop.f32.mrf.mxu2  ;;  %v2379_v61 = vpop.f32.mrf.mxu0 }
 0x158   :  { %v2524_v59 = vpop.f32.mrf.mxu3  ;;  %v2476_v60 = vadd.f32 %v2475_v58, %v2427_v57  ;;  %v2428_v62 = vpop.f32.mrf.mxu1  ;;  %v2380_v63 = vadd.f32 %v10362_v48, %v2379_v61  ;;  %v9086_v57 = vld [vmem:[%s12123_s1 + $0x2b8] sm:$0xff]  ;;  %v9069_v61 = vld [vmem:[%s12123_s1 + $0x230] sm:$0xff] }
 0x159   :  { %v9094_v58 = vld [vmem:[%s12123_s1 + $0x2f8] sm:$0xff]  ;;  %2848 = vmatpush.bf16.msra.mxu2 %v9086_v57  ;;  %v9089_v57 = vld [vmem:[%s12123_s1 + $0x2d0] sm:$0xff] }
 0x15a   :  { %v10450_v0 = vadd.f32 %v2524_v59, %v2476_v60  ;;  %v2429_v1 = vadd.f32 %v2428_v62, %v2380_v63  ;;  %2897 = vmatpush.bf16.msra.mxu3 %v9094_v58  ;;  %v9077_v62 = vld [vmem:[%s12123_s1 + $0x270] sm:$0xff]  ;;  %2751 = vmatpush.bf16.msra.mxu0 %v9069_v61 }
 0x15b   :  { %v9085_v63 = vld [vmem:[%s12123_s1 + $0x2b0] sm:$0xff]  ;;  %2800 = vmatpush.bf16.msra.mxu1 %v9077_v62 }
 0x15c   :  { %v8965_v61 = vld [vmem:[%s12122_s0 + $0x374] sm:$0xf] }
 0x15d   :  { %2849 = vmatpush.bf16.msra.mxu2 %v9085_v63  ;;  %v9064_v63 = vld [vmem:[%s12123_s1 + $0x208] sm:$0xff] }
 0x15e   :  { %2898 = vmatpush.bf16.msra.mxu3 %v9093_v5  ;;  %v8975_v5 = vld [vmem:[%s12122_s0 + $0x3bc] sm:$0xf0] }
 0x15f   :  { %v2477_v11 = vpop.f32.mrf.mxu2  ;;  %v2382_v16 = vpop.f32.mrf.mxu0 }
 0x160   :  { %v2526_v12 = vpop.f32.mrf.mxu3  ;;  %v2478_v15 = vadd.f32 %v2477_v11, %v2429_v1  ;;  %v2431_v17 = vpop.f32.mrf.mxu1  ;;  %v2383_v20 = vadd.f32 %v10362_v48, %v2382_v16  ;;  %v6840_v16 = vld [vmem:[%s12122_s0 + $0x2e8] sm:$0xf] }
 0x162   :  { %v10477_v21 = vadd.f32 %v2526_v12, %v2478_v15  ;;  %v2432_v22 = vadd.f32 %v2431_v17, %v2383_v20  ;;  %2577 = vmatmul.bf16.gmra.mxu0 %v6689_v13  ;;  %v9068_v12 = vld [vmem:[%s12123_s1 + $0x228] sm:$0xff]  ;;  %v8957_v17 = vld [vmem:[%s12122_s0 + $0x32c] sm:$0xf0] }
 0x163   :  { %2626 = vmatmul.bf16.gmra.mxu1 %v6693_v14  ;;  %v9076_v13 = vld [vmem:[%s12123_s1 + $0x268] sm:$0xff]  ;;  %2752 = vmatpush.bf16.msra.mxu0 %v9068_v12  ;;  %v6841_v34 = vor.u32 %v8957_v17, %v6840_v16  ;;  %v9071_v16 = vld [vmem:[%s12123_s1 + $0x240] sm:$0xff] }
 0x164   :  { %2675 = vmatmul.bf16.gmra.mxu2 %v6697_v18  ;;  %v9084_v14 = vld [vmem:[%s12123_s1 + $0x2a8] sm:$0xff]  ;;  %2801 = vmatpush.bf16.msra.mxu1 %v9076_v13  ;;  %v9079_v17 = vld [vmem:[%s12123_s1 + $0x280] sm:$0xff] }
 0x165   :  { %2724 = vmatmul.bf16.gmra.mxu3 %v6701_v19  ;;  %v6834_v15 = vld [vmem:[%s12122_s0 + $0x328] sm:$0xf0]  ;;  %v6842_v19 = vld [vmem:[%s12122_s0 + $0x330] sm:$0xf0]  ;;  %2850 = vmatpush.bf16.msra.mxu2 %v9084_v14 }
 0x166   :  { %v8948_v18 = vld [vmem:[%s12122_s0 + $0x2ec] sm:$0xf] }
 0x167   :  { %v2480_v23 = vpop.f32.mrf.mxu2  ;;  %v2384_v26 = vpop.f32.mrf.mxu0  ;;  %v9092_v20 = vld [vmem:[%s12123_s1 + $0x2e8] sm:$0xff]  ;;  %v6845_v36 = vor.u32 %v8948_v18, %v6842_v19 }
 0x168   :  { %v2529_v24 = vpop.f32.mrf.mxu3  ;;  %v2481_v25 = vadd.f32 %v2480_v23, %v2432_v22  ;;  %v2433_v28 = vpop.f32.mrf.mxu1  ;;  %v2385_v29 = vadd.f32 %v10362_v48, %v2384_v26  ;;  %2899 = vmatpush.bf16.msra.mxu3 %v9092_v20  ;;  %v9067_v26 = vld [vmem:[%s12123_s1 + $0x220] sm:$0xff] }
 0x169   :  { %2753 = vmatpush.bf16.msra.mxu0 %v9067_v26 }
 0x16a   :  { %v10480_v30 = vadd.f32 %v2529_v24, %v2481_v25  ;;  %v2434_v31 = vadd.f32 %v2433_v28, %v2385_v29  ;;  %v6833_v24 = vor.u32 %v8956_v9, %v6832_v8  ;;  %v6837_v25 = vor.u32 %v8947_v10, %v6834_v15  ;;  %v9075_v28 = vld [vmem:[%s12123_s1 + $0x260] sm:$0xff]  ;;  %v8966_v8 = vld [vmem:[%s12122_s0 + $0x37c] sm:$0xf]  ;;  %v9088_v10 = vld [vmem:[%s12123_s1 + $0x2c8] sm:$0xff] }
 0x16b   :  { %v9083_v29 = vld [vmem:[%s12123_s1 + $0x2a0] sm:$0xff]  ;;  %2802 = vmatpush.bf16.msra.mxu1 %v9075_v28 }
 0x16c   :  { %2851 = vmatpush.bf16.msra.mxu2 %v9083_v29  ;;  %2900 = vmatpush.bf16.msra.mxu3 %v9091_v38  ;;  %v6914_v9 = vld [vmem:[%s12122_s0 + $0x3c0] sm:$0xf0] }
 0x16d   :  { %v9063_v15 = vld [vmem:[%s12123_s1 + $0x200] sm:$0xff] }
 0x16f   :  { %v2482_v41 = vpop.f32.mrf.mxu2  ;;  %v2387_v46 = vpop.f32.mrf.mxu0 }
 0x170   :  { %v2531_v42 = vpop.f32.mrf.mxu3  ;;  %v2483_v45 = vadd.f32 %v2482_v41, %v2434_v31  ;;  %v2436_v47 = vpop.f32.mrf.mxu1  ;;  %v2388_v51 = vadd.f32 %v10362_v48, %v2387_v46  ;;  %v9066_v41 = vld [vmem:[%s12123_s1 + $0x218] sm:$0xff] }
 0x171   :  { %2754 = vmatpush.bf16.msra.mxu0 %v9066_v41  ;;  %v8992_v41 = vld [vmem:[%s12122_s0 + $0x444] sm:$0xf0] }
 0x172   :  { %v10507_v52 = vadd.f32 %v2531_v42, %v2483_v45  ;;  %v2437_v53 = vadd.f32 %v2436_v47, %v2388_v51  ;;  %2582 = vmatmul.bf16.gmra.mxu0 %v6761_v43  ;;  %v9074_v42 = vld [vmem:[%s12123_s1 + $0x258] sm:$0xff]  ;;  %v9065_v47 = vld [vmem:[%s12123_s1 + $0x210] sm:$0xff] }
 0x173   :  { %2631 = vmatmul.bf16.gmra.mxu1 %v6765_v44  ;;  %v9082_v43 = vld [vmem:[%s12123_s1 + $0x298] sm:$0xff] }
 0x174   :  { %2680 = vmatmul.bf16.gmra.mxu2 %v6769_v49  ;;  %v9090_v44 = vld [vmem:[%s12123_s1 + $0x2d8] sm:$0xff]  ;;  %2803 = vmatpush.bf16.msra.mxu1 %v9074_v42  ;;  %v9073_v49 = vld [vmem:[%s12123_s1 + $0x250] sm:$0xff]  ;;  %v8983_v42 = vld [vmem:[%s12122_s0 + $0x404] sm:$0xf] }
 0x175   :  { %2729 = vmatmul.bf16.gmra.mxu3 %v6773_v50  ;;  %2852 = vmatpush.bf16.msra.mxu2 %v9082_v43  ;;  %v9081_v50 = vld [vmem:[%s12123_s1 + $0x290] sm:$0xff]  ;;  %v6978_v43 = vld [vmem:[%s12122_s0 + $0x448] sm:$0xf0] }
 0x176   :  { %2901 = vmatpush.bf16.msra.mxu3 %v9090_v44  ;;  %2755 = vmatpush.bf16.msra.mxu0 %v9065_v47  ;;  %v6984_v44 = vld [vmem:[%s12122_s0 + $0x408] sm:$0xf]  ;;  %v6986_v47 = vld [vmem:[%s12122_s0 + $0x450] sm:$0xf0] }
 0x177   :  { %v2485_v59 = vpop.f32.mrf.mxu2  ;;  %v2389_v2 = vpop.f32.mrf.mxu0 }
 0x178   :  { %v2534_v60 = vpop.f32.mrf.mxu3  ;;  %v2486_v1 = vadd.f32 %v2485_v59, %v2437_v53  ;;  %v2438_v3 = vpop.f32.mrf.mxu1  ;;  %v2390_v4 = vadd.f32 %v10362_v48, %v2389_v2  ;;  %v6904_v59 = vld [vmem:[%s12122_s0 + $0x370] sm:$0xf]  ;;  %2804 = vmatpush.bf16.msra.mxu1 %v9073_v49  ;;  %v9080_v2 = vld [vmem:[%s12123_s1 + $0x288] sm:$0xff] }
 0x179   :  { %2853 = vmatpush.bf16.msra.mxu2 %v9081_v50 }
 0x17a   :  { %v10534_v6 = vadd.f32 %v2534_v60, %v2486_v1  ;;  %v2439_v11 = vadd.f32 %v2438_v3, %v2390_v4  ;;  %v8974_v60 = vld [vmem:[%s12122_s0 + $0x3b4] sm:$0xf0]  ;;  %v9072_v1 = vld [vmem:[%s12123_s1 + $0x248] sm:$0xff]  ;;  %v6906_v3 = vld [vmem:[%s12122_s0 + $0x3b8] sm:$0xf0]  ;;  %2902 = vmatpush.bf16.msra.mxu3 %v9089_v57  ;;  %2756 = vmatpush.bf16.msra.mxu0 %v9064_v63 }
 0x17b   :  { %v6912_v4 = vld [vmem:[%s12122_s0 + $0x378] sm:$0xf]  ;;  %v6905_v13 = vor.u32 %v8974_v60, %v6904_v59  ;;  %v6909_v14 = vor.u32 %v8965_v61, %v6906_v3 }
 0x17c   :  { %2805 = vmatpush.bf16.msra.mxu1 %v9072_v1 }
 0x17d   :  { %2854 = vmatpush.bf16.msra.mxu2 %v9080_v2 }
 0x17e   :  { %2903 = vmatpush.bf16.msra.mxu3 %v9088_v10  ;;  %2757 = vmatpush.bf16.msra.mxu0 %v9063_v15  ;;  %v8869_v15 = vld [vmem:[%s12122_s0 + $0x6c] sm:$0xf0] }
 0x17f   :  { %v2487_v22 = vpop.f32.mrf.mxu2  ;;  %v2392_v32 = vpop.f32.mrf.mxu0 }
 0x180   :  { %v2536_v23 = vpop.f32.mrf.mxu3  ;;  %v2488_v31 = vadd.f32 %v2487_v22, %v2439_v11  ;;  %v2441_v33 = vpop.f32.mrf.mxu1  ;;  %v2393_v37 = vadd.f32 %v10362_v48, %v2392_v32  ;;  %v6913_v22 = vor.u32 %v8975_v5, %v6912_v4  ;;  %2806 = vmatpush.bf16.msra.mxu1 %v9071_v16  ;;  %v8860_v16 = vld [vmem:[%s12122_s0 + $0x2c] sm:$0xf] }
 0x181   :  { %2855 = vmatpush.bf16.msra.mxu2 %v9079_v17  ;;  %v6498_v17 = vld [vmem:[%s12122_s0 + $0x70] sm:$0xf0] }
 0x182   :  { %v10585_v39 = vadd.f32 %v2536_v23, %v2488_v31  ;;  %v2442_v40 = vadd.f32 %v2441_v33, %v2393_v37  ;;  %2587 = vmatmul.bf16.gmra.mxu0 %v6833_v24  ;;  %v6917_v23 = vor.u32 %v8966_v8, %v6914_v9 }
 0x183   :  { %2636 = vmatmul.bf16.gmra.mxu1 %v6837_v25  ;;  %v9087_v25 = vld [vmem:[%s12123_s1 + $0x2c0] sm:$0xff] }
 0x184   :  { %2685 = vmatmul.bf16.gmra.mxu2 %v6841_v34  ;;  %2904 = vmatpush.bf16.msra.mxu3 %v9087_v25 }
 0x185   :  { %2734 = vmatmul.bf16.gmra.mxu3 %v6845_v36 }
 0x187   :  { %v2490_v45 = vpop.f32.mrf.mxu2  ;;  %v2394_v53 = vpop.f32.mrf.mxu0 }
 0x188   :  { %v2539_v46 = vpop.f32.mrf.mxu3  ;;  %v2491_v51 = vadd.f32 %v2490_v45, %v2442_v40  ;;  %v2443_v54 = vpop.f32.mrf.mxu1  ;;  %v2395_v55 = vadd.f32 %v10362_v48, %v2394_v53  ;;  %v6976_v40 = vld [vmem:[%s12122_s0 + $0x400] sm:$0xf]  ;;  %v8993_v45 = vld [vmem:[%s12122_s0 + $0x44c] sm:$0xf0]  ;;  %v6981_v53 = vor.u32 %v8983_v42, %v6978_v43 }
 0x189   :  { %v6985_v59 = vor.u32 %v8993_v45, %v6984_v44  ;;  %v8886_v45 = vld [vmem:[%s12122_s0 + $0xf4] sm:$0xf0] }
 0x18a   :  { %v10612_v58 = vadd.f32 %v2539_v46, %v2491_v51  ;;  %v2444_v62 = vadd.f32 %v2443_v54, %v2395_v55  ;;  %v8984_v46 = vld [vmem:[%s12122_s0 + $0x40c] sm:$0xf]  ;;  %v6977_v51 = vor.u32 %v8992_v41, %v6976_v40 }
 0x18b   :  { %v6989_v60 = vor.u32 %v8984_v46, %v6986_v47  ;;  %v8877_v46 = vld [vmem:[%s12122_s0 + $0xb4] sm:$0xf]  ;;  %v6562_v47 = vld [vmem:[%s12122_s0 + $0xf8] sm:$0xf0] }
 0x18f   :  { %v2492_v11 = vpop.f32.mrf.mxu2  ;;  %v2397_v19 = vpop.f32.mrf.mxu0 }
 0x190   :  { %v2541_v12 = vpop.f32.mrf.mxu3  ;;  %v2493_v18 = vadd.f32 %v2492_v11, %v2444_v62  ;;  %v2446_v20 = vpop.f32.mrf.mxu1  ;;  %v2398_v24 = vadd.f32 %v10362_v48, %v2397_v19  ;;  %v6488_v11 = vld [vmem:[%s12122_s0 + $0x20] sm:$0xf] }
 0x192   :  { %v10663_v26 = vadd.f32 %v2541_v12, %v2493_v18  ;;  %v2447_v28 = vadd.f32 %v2446_v20, %v2398_v24  ;;  %2592 = vmatmul.bf16.gmra.mxu0 %v6905_v13  ;;  %v8868_v12 = vld [vmem:[%s12122_s0 + $0x64] sm:$0xf0]  ;;  %v8859_v13 = vld [vmem:[%s12122_s0 + $0x24] sm:$0xf] }
 0x193   :  { %2641 = vmatmul.bf16.gmra.mxu1 %v6909_v14  ;;  %v6490_v14 = vld [vmem:[%s12122_s0 + $0x68] sm:$0xf0]  ;;  %v6489_v20 = vor.u32 %v8868_v12, %v6488_v11 }
 0x194   :  { %2690 = vmatmul.bf16.gmra.mxu2 %v6913_v22  ;;  %v6493_v22 = vor.u32 %v8859_v13, %v6490_v14 }
 0x195   :  { %2739 = vmatmul.bf16.gmra.mxu3 %v6917_v23 }
 0x197   :  { %v2495_v29 = vpop.f32.mrf.mxu2  ;;  %v2399_v33 = vpop.f32.mrf.mxu0 }
 0x198   :  { %v2544_v31 = vpop.f32.mrf.mxu3  ;;  %v2496_v32 = vadd.f32 %v2495_v29, %v2447_v28  ;;  %v2448_v34 = vpop.f32.mrf.mxu1  ;;  %v2400_v36 = vadd.f32 %v10362_v48, %v2399_v33  ;;  %v6501_v29 = vor.u32 %v8860_v16, %v6498_v17  ;;  %v8895_v16 = vld [vmem:[%s12122_s0 + $0x144] sm:$0xf]  ;;  %v6634_v17 = vld [vmem:[%s12122_s0 + $0x188] sm:$0xf0] }
 0x19a   :  { %v10666_v37 = vadd.f32 %v2544_v31, %v2496_v32  ;;  %v2449_v38 = vadd.f32 %v2448_v34, %v2400_v36 }
 0x19f   :  { %v2497_v49 = vpop.f32.mrf.mxu2  ;;  %v2402_v55 = vpop.f32.mrf.mxu0 }
 0x1a0   :  { %v2546_v50 = vpop.f32.mrf.mxu3  ;;  %v2498_v54 = vadd.f32 %v2497_v49, %v2449_v38  ;;  %v2451_v57 = vpop.f32.mrf.mxu1  ;;  %v2403_v61 = vadd.f32 %v10362_v48, %v2402_v55  ;;  %v8887_v49 = vld [vmem:[%s12122_s0 + $0xfc] sm:$0xf0] }
 0x1a2   :  { %v10693_v62 = vadd.f32 %v2546_v50, %v2498_v54  ;;  %v2452_v63 = vadd.f32 %v2451_v57, %v2403_v61  ;;  %2597 = vmatmul.bf16.gmra.mxu0 %v6977_v51  ;;  %v8878_v50 = vld [vmem:[%s12122_s0 + $0xbc] sm:$0xf]  ;;  %v6570_v51 = vld [vmem:[%s12122_s0 + $0x100] sm:$0xf0]  ;;  %v6565_v57 = vor.u32 %v8877_v46, %v6562_v47 }
 0x1a3   :  { %2646 = vmatmul.bf16.gmra.mxu1 %v6981_v53 }
 0x1a4   :  { %2695 = vmatmul.bf16.gmra.mxu2 %v6985_v59 }
 0x1a5   :  { %2744 = vmatmul.bf16.gmra.mxu3 %v6989_v60 }
 0x1a7   :  { %v2500_v1 = vpop.f32.mrf.mxu2  ;;  %v2404_v4 = vpop.f32.mrf.mxu0 }
 0x1a8   :  { %v2549_v2 = vpop.f32.mrf.mxu3  ;;  %v2501_v3 = vadd.f32 %v2500_v1, %v2452_v63  ;;  %v2453_v5 = vpop.f32.mrf.mxu1  ;;  %v2405_v8 = vadd.f32 %v10362_v48, %v2404_v4  ;;  %v6496_v48 = vld [vmem:[%s12122_s0 + $0x28] sm:$0xf]  ;;  %v6573_v1 = vor.u32 %v8878_v50, %v6570_v51  ;;  %v8913_v50 = vld [vmem:[%s12122_s0 + $0x1d4] sm:$0xf]  ;;  %v6706_v51 = vld [vmem:[%s12122_s0 + $0x218] sm:$0xf0] }
 0x1a9   :  { %v6497_v28 = vor.u32 %v8869_v15, %v6496_v48  ;;  %v8904_v15 = vld [vmem:[%s12122_s0 + $0x184] sm:$0xf0] }
 0x1aa   :  { %v10696_v9 = vadd.f32 %v2549_v2, %v2501_v3  ;;  %v2454_v10 = vadd.f32 %v2453_v5, %v2405_v8 }
 0x1af   :  { %v2502_v18 = vpop.f32.mrf.mxu2  ;;  %v2563_v24 = vpop.f32.mrf.mxu0 }
 0x1b0   :  { %v2551_v19 = vpop.f32.mrf.mxu3  ;;  %v2503_v23 = vadd.f32 %v2502_v18, %v2454_v10  ;;  %v2612_v25 = vpop.f32.mrf.mxu1  ;;  %v2564_v31 = vadd.f32 %v2563_v24, %v10390_v7  ;;  %v6560_v7 = vld [vmem:[%s12122_s0 + $0xb0] sm:$0xf] }
 0x1b1   :  { %v6561_v55 = vor.u32 %v8886_v45, %v6560_v7  ;;  %v8905_v18 = vld [vmem:[%s12122_s0 + $0x18c] sm:$0xf0] }
 0x1b2   :  { %v10723_v32 = vadd.f32 %v2551_v19, %v2503_v23  ;;  %v2613_v33 = vadd.f32 %v2612_v25, %v2564_v31  ;;  %2758 = vmatmul.bf16.vlgmr.msra.gmra.mxu0 %v6489_v20  ;;  %v8896_v19 = vld [vmem:[%s12122_s0 + $0x14c] sm:$0xf]  ;;  %v6642_v20 = vld [vmem:[%s12122_s0 + $0x190] sm:$0xf0]  ;;  %v6637_v25 = vor.u32 %v8895_v16, %v6634_v17 }
 0x1b3   :  { %2807 = vmatmul.bf16.vlgmr.msra.gmra.mxu1 %v6493_v22 }
 0x1b4   :  { %2856 = vmatmul.bf16.vlgmr.msra.gmra.mxu2 %v6497_v28 }
 0x1b5   :  { %2905 = vmatmul.bf16.vlgmr.msra.gmra.mxu3 %v6501_v29 }
 0x1b7   :  { %v2661_v34 = vpop.f32.mrf.mxu2  ;;  %v2565_v40 = vpop.f32.mrf.mxu0 }
 0x1b8   :  { %v2710_v36 = vpop.f32.mrf.mxu3  ;;  %v2662_v38 = vadd.f32 %v2661_v34, %v2613_v33  ;;  %v2614_v41 = vpop.f32.mrf.mxu1  ;;  %v2566_v42 = vadd.f32 %v2565_v40, %v10417_v27  ;;  %v6568_v27 = vld [vmem:[%s12122_s0 + $0xb8] sm:$0xf]  ;;  %v6645_v34 = vor.u32 %v8896_v19, %v6642_v20  ;;  %v8931_v19 = vld [vmem:[%s12122_s0 + $0x264] sm:$0xf]  ;;  %v6778_v20 = vld [vmem:[%s12122_s0 + $0x2a8] sm:$0xf0] }
 0x1b9   :  { %v6569_v63 = vor.u32 %v8887_v49, %v6568_v27  ;;  %v8922_v49 = vld [vmem:[%s12122_s0 + $0x214] sm:$0xf0] }
 0x1ba   :  { %v10726_v43 = vadd.f32 %v2710_v36, %v2662_v38  ;;  %v2615_v44 = vadd.f32 %v2614_v41, %v2566_v42 }
 0x1bf   :  { %v2663_v53 = vpop.f32.mrf.mxu2  ;;  %v2568_v60 = vpop.f32.mrf.mxu0 }
 0x1c0   :  { %v2712_v54 = vpop.f32.mrf.mxu3  ;;  %v2664_v59 = vadd.f32 %v2663_v53, %v2615_v44  ;;  %v2617_v61 = vpop.f32.mrf.mxu1  ;;  %v2569_v2 = vadd.f32 %v2568_v60, %v10420_v35  ;;  %v6632_v35 = vld [vmem:[%s12122_s0 + $0x140] sm:$0xf] }
 0x1c1   :  { %v6633_v24 = vor.u32 %v8904_v15, %v6632_v35  ;;  %v8923_v53 = vld [vmem:[%s12122_s0 + $0x21c] sm:$0xf0] }
 0x1c2   :  { %v10753_v3 = vadd.f32 %v2712_v54, %v2664_v59  ;;  %v2618_v4 = vadd.f32 %v2617_v61, %v2569_v2  ;;  %2763 = vmatmul.bf16.gmra.mxu0 %v6561_v55  ;;  %v8914_v54 = vld [vmem:[%s12122_s0 + $0x1dc] sm:$0xf]  ;;  %v6714_v55 = vld [vmem:[%s12122_s0 + $0x220] sm:$0xf0]  ;;  %v6709_v61 = vor.u32 %v8913_v50, %v6706_v51  ;;  %v9101_v50 = vld [vmem:[%s12123_s1 + $0x330] sm:$0xff] }
 0x1c3   :  { %2812 = vmatmul.bf16.gmra.mxu1 %v6565_v57  ;;  %v9109_v51 = vld [vmem:[%s12123_s1 + $0x370] sm:$0xff] }
 0x1c4   :  { %2861 = vmatmul.bf16.gmra.mxu2 %v6569_v63 }
 0x1c5   :  { %2910 = vmatmul.bf16.gmra.mxu3 %v6573_v1 }
 0x1c7   :  { %v2666_v5 = vpop.f32.mrf.mxu2  ;;  %v2570_v11 = vpop.f32.mrf.mxu0 }
 0x1c8   :  { %v2715_v8 = vpop.f32.mrf.mxu3  ;;  %v2667_v10 = vadd.f32 %v2666_v5, %v2618_v4  ;;  %v2619_v12 = vpop.f32.mrf.mxu1  ;;  %v2571_v13 = vadd.f32 %v2570_v11, %v10447_v56  ;;  %v6640_v56 = vld [vmem:[%s12122_s0 + $0x148] sm:$0xf]  ;;  %v6717_v5 = vor.u32 %v8914_v54, %v6714_v55 }
 0x1c9   :  { %v6641_v33 = vor.u32 %v8905_v18, %v6640_v56  ;;  %v8940_v18 = vld [vmem:[%s12122_s0 + $0x2a4] sm:$0xf0] }
 0x1ca   :  { %v10756_v14 = vadd.f32 %v2715_v8, %v2667_v10  ;;  %v2620_v48 = vadd.f32 %v2619_v12, %v2571_v13 }
 0x1cf   :  { %v2668_v22 = vpop.f32.mrf.mxu2  ;;  %v2573_v29 = vpop.f32.mrf.mxu0 }
 0x1d0   :  { %v2717_v23 = vpop.f32.mrf.mxu3  ;;  %v2669_v28 = vadd.f32 %v2668_v22, %v2620_v48  ;;  %v2622_v31 = vpop.f32.mrf.mxu1  ;;  %v2574_v36 = vadd.f32 %v2573_v29, %v10450_v0  ;;  %v6704_v0 = vld [vmem:[%s12122_s0 + $0x1d0] sm:$0xf] }
 0x1d1   :  { %v6705_v60 = vor.u32 %v8922_v49, %v6704_v0  ;;  %v8941_v22 = vld [vmem:[%s12122_s0 + $0x2ac] sm:$0xf0] }
 0x1d2   :  { %v10783_v38 = vadd.f32 %v2717_v23, %v2669_v28  ;;  %v2623_v40 = vadd.f32 %v2622_v31, %v2574_v36  ;;  %2768 = vmatmul.bf16.gmra.mxu0 %v6633_v24  ;;  %v8932_v23 = vld [vmem:[%s12122_s0 + $0x26c] sm:$0xf]  ;;  %v6786_v24 = vld [vmem:[%s12122_s0 + $0x2b0] sm:$0xf0]  ;;  %v6781_v31 = vor.u32 %v8931_v19, %v6778_v20  ;;  %v9107_v19 = vld [vmem:[%s12123_s1 + $0x360] sm:$0xff] }
 0x1d3   :  { %2817 = vmatmul.bf16.gmra.mxu1 %v6637_v25  ;;  %v9115_v20 = vld [vmem:[%s12123_s1 + $0x3a0] sm:$0xff] }
 0x1d4   :  { %2866 = vmatmul.bf16.gmra.mxu2 %v6641_v33 }
 0x1d5   :  { %2915 = vmatmul.bf16.gmra.mxu3 %v6645_v34 }
 0x1d7   :  { %v2671_v41 = vpop.f32.mrf.mxu2  ;;  %v2575_v7 = vpop.f32.mrf.mxu0 }
 0x1d8   :  { %v2720_v42 = vpop.f32.mrf.mxu3  ;;  %v2672_v44 = vadd.f32 %v2671_v41, %v2623_v40  ;;  %v2624_v45 = vpop.f32.mrf.mxu1  ;;  %v2576_v46 = vadd.f32 %v2575_v7, %v10477_v21  ;;  %v6712_v21 = vld [vmem:[%s12122_s0 + $0x1d8] sm:$0xf]  ;;  %v6789_v41 = vor.u32 %v8932_v23, %v6786_v24 }
 0x1d9   :  { %v6713_v4 = vor.u32 %v8923_v53, %v6712_v21  ;;  %v9117_v21 = vld [vmem:[%s12123_s1 + $0x3b0] sm:$0xff] }
 0x1da   :  { %v10786_v47 = vadd.f32 %v2720_v42, %v2672_v44  ;;  %v2625_v27 = vadd.f32 %v2624_v45, %v2576_v46  ;;  %v9102_v45 = vld [vmem:[%s12123_s1 + $0x338] sm:$0xff] }
 0x1db   :  { %v9110_v46 = vld [vmem:[%s12123_s1 + $0x378] sm:$0xff]  ;;  %2946 = vmatpush.bf16.msrb.mxu0 %v9102_v45  ;;  %v9105_v45 = vld [vmem:[%s12123_s1 + $0x350] sm:$0xff] }
 0x1dc   :  { %2995 = vmatpush.bf16.msrb.mxu1 %v9110_v46  ;;  %v9113_v46 = vld [vmem:[%s12123_s1 + $0x390] sm:$0xff] }
 0x1df   :  { %v2673_v57 = vpop.f32.mrf.mxu2  ;;  %v2578_v1 = vpop.f32.mrf.mxu0  ;;  %2947 = vmatpush.bf16.msrb.mxu0 %v9101_v50  ;;  %v9121_v50 = vld [vmem:[%s12123_s1 + $0x3d0] sm:$0xff] }
 0x1e0   :  { %v2722_v59 = vpop.f32.mrf.mxu3  ;;  %v2674_v63 = vadd.f32 %v2673_v57, %v2625_v27  ;;  %v2627_v2 = vpop.f32.mrf.mxu1  ;;  %v2579_v8 = vadd.f32 %v2578_v1, %v10480_v30  ;;  %v6776_v30 = vld [vmem:[%s12122_s0 + $0x260] sm:$0xf]  ;;  %v9118_v27 = vld [vmem:[%s12123_s1 + $0x3b8] sm:$0xff]  ;;  %2996 = vmatpush.bf16.msrb.mxu1 %v9109_v51 }
 0x1e1   :  { %v6777_v29 = vor.u32 %v8940_v18, %v6776_v30  ;;  %3044 = vmatpush.bf16.msrb.mxu2 %v9118_v27  ;;  %v9099_v18 = vld [vmem:[%s12123_s1 + $0x320] sm:$0xff] }
 0x1e2   :  { %v10813_v10 = vadd.f32 %v2722_v59, %v2674_v63  ;;  %v2628_v11 = vadd.f32 %v2627_v2, %v2579_v8  ;;  %2773 = vmatmul.bf16.gmra.mxu0 %v6705_v60  ;;  %v9125_v59 = vld [vmem:[%s12123_s1 + $0x3f0] sm:$0xff]  ;;  %v8958_v63 = vld [vmem:[%s12122_s0 + $0x334] sm:$0xf0]  ;;  %v9100_v2 = vld [vmem:[%s12123_s1 + $0x328] sm:$0xff] }
 0x1e3   :  { %2822 = vmatmul.bf16.gmra.mxu1 %v6709_v61  ;;  %v6848_v61 = vld [vmem:[%s12122_s0 + $0x2f0] sm:$0xf]  ;;  %v6850_v8 = vld [vmem:[%s12122_s0 + $0x338] sm:$0xf0]  ;;  %2948 = vmatpush.bf16.msrb.mxu0 %v9100_v2  ;;  %v6930_v2 = vld [vmem:[%s12122_s0 + $0x3d0] sm:$0xf0] }
 0x1e4   :  { %2871 = vmatmul.bf16.gmra.mxu2 %v6713_v4  ;;  %v9108_v4 = vld [vmem:[%s12123_s1 + $0x368] sm:$0xff] }
 0x1e5   :  { %2920 = vmatmul.bf16.gmra.mxu3 %v6717_v5  ;;  %3045 = vmatpush.bf16.msrb.mxu2 %v9117_v21  ;;  %v9116_v5 = vld [vmem:[%s12123_s1 + $0x3a8] sm:$0xff]  ;;  %v6920_v21 = vld [vmem:[%s12122_s0 + $0x380] sm:$0xf] }
 0x1e6   :  { %2997 = vmatpush.bf16.msrb.mxu1 %v9108_v4  ;;  %v9120_v4 = vld [vmem:[%s12123_s1 + $0x3c8] sm:$0xff] }
 0x1e7   :  { %v2676_v12 = vpop.f32.mrf.mxu2  ;;  %v2580_v35 = vpop.f32.mrf.mxu0  ;;  %2949 = vmatpush.bf16.msrb.mxu0 %v9099_v18 }
 0x1e8   :  { %v2725_v13 = vpop.f32.mrf.mxu3  ;;  %v2677_v48 = vadd.f32 %v2676_v12, %v2628_v11  ;;  %v2629_v15 = vpop.f32.mrf.mxu1  ;;  %v2581_v16 = vadd.f32 %v2580_v35, %v10507_v52  ;;  %v6784_v52 = vld [vmem:[%s12122_s0 + $0x268] sm:$0xf]  ;;  %v6856_v11 = vld [vmem:[%s12122_s0 + $0x2f8] sm:$0xf]  ;;  %v8959_v12 = vld [vmem:[%s12122_s0 + $0x33c] sm:$0xf0] }
 0x1e9   :  { %v6785_v40 = vor.u32 %v8941_v22, %v6784_v52  ;;  %v9124_v35 = vld [vmem:[%s12123_s1 + $0x3e8] sm:$0xff]  ;;  %3046 = vmatpush.bf16.msrb.mxu2 %v9116_v5  ;;  %v6857_v24 = vor.u32 %v8959_v12, %v6856_v11 }
 0x1ea   :  { %v10816_v17 = vadd.f32 %v2725_v13, %v2677_v48  ;;  %v2630_v56 = vadd.f32 %v2629_v15, %v2581_v16  ;;  %v8950_v13 = vld [vmem:[%s12122_s0 + $0x2fc] sm:$0xf]  ;;  %v6858_v48 = vld [vmem:[%s12122_s0 + $0x340] sm:$0xf0]  ;;  %2998 = vmatpush.bf16.msrb.mxu1 %v9107_v19 }
 0x1ed   :  { %3047 = vmatpush.bf16.msrb.mxu2 %v9115_v20  ;;  %v9119_v20 = vld [vmem:[%s12123_s1 + $0x3c0] sm:$0xff] }
 0x1ef   :  { %v2678_v25 = vpop.f32.mrf.mxu2  ;;  %v2583_v34 = vpop.f32.mrf.mxu0 }
 0x1f0   :  { %v2727_v28 = vpop.f32.mrf.mxu3  ;;  %v2679_v33 = vadd.f32 %v2678_v25, %v2630_v56  ;;  %v2632_v36 = vpop.f32.mrf.mxu1  ;;  %v2584_v42 = vadd.f32 %v2583_v34, %v10534_v6  ;;  %v9126_v6 = vld [vmem:[%s12123_s1 + $0x3f8] sm:$0xff]  ;;  %v6849_v56 = vor.u32 %v8958_v63, %v6848_v61  ;;  %v6861_v25 = vor.u32 %v8950_v13, %v6858_v48  ;;  %v6922_v61 = vld [vmem:[%s12122_s0 + $0x3c8] sm:$0xf0]  ;;  %v6928_v63 = vld [vmem:[%s12122_s0 + $0x388] sm:$0xf] }
 0x1f1   :  { %3093 = vmatpush.bf16.msrb.mxu3 %v9126_v6  ;;  %v9098_v34 = vld [vmem:[%s12123_s1 + $0x318] sm:$0xff]  ;;  %v9095_v13 = vld [vmem:[%s12123_s1 + $0x300] sm:$0xff] }
 0x1f2   :  { %v10843_v44 = vadd.f32 %v2727_v28, %v2679_v33  ;;  %v2633_v7 = vadd.f32 %v2632_v36, %v2584_v42  ;;  %2778 = vmatmul.bf16.gmra.mxu0 %v6777_v29  ;;  %v9123_v29 = vld [vmem:[%s12123_s1 + $0x3e0] sm:$0xff]  ;;  %v9114_v36 = vld [vmem:[%s12123_s1 + $0x398] sm:$0xff] }
 0x1f3   :  { %2827 = vmatmul.bf16.gmra.mxu1 %v6781_v31  ;;  %2950 = vmatpush.bf16.msrb.mxu0 %v9098_v34  ;;  %v9103_v48 = vld [vmem:[%s12123_s1 + $0x340] sm:$0xff] }
 0x1f4   :  { %2876 = vmatmul.bf16.gmra.mxu2 %v6785_v40  ;;  %v9122_v40 = vld [vmem:[%s12123_s1 + $0x3d8] sm:$0xff] }
 0x1f5   :  { %2925 = vmatmul.bf16.gmra.mxu3 %v6789_v41  ;;  %3048 = vmatpush.bf16.msrb.mxu2 %v9114_v36  ;;  %v8994_v36 = vld [vmem:[%s12122_s0 + $0x454] sm:$0xf0] }
 0x1f6   :  { %3094 = vmatpush.bf16.msrb.mxu3 %v9125_v59  ;;  %v9112_v59 = vld [vmem:[%s12123_s1 + $0x388] sm:$0xff] }
 0x1f7   :  { %v2681_v0 = vpop.f32.mrf.mxu2  ;;  %v2585_v54 = vpop.f32.mrf.mxu0 }
 0x1f8   :  { %v2730_v49 = vpop.f32.mrf.mxu3  ;;  %v2682_v53 = vadd.f32 %v2681_v0, %v2633_v7  ;;  %v2634_v55 = vpop.f32.mrf.mxu1  ;;  %v2586_v57 = vadd.f32 %v2585_v54, %v10585_v39  ;;  %v8949_v39 = vld [vmem:[%s12122_s0 + $0x2f4] sm:$0xf] }
 0x1f9   :  { %v6853_v30 = vor.u32 %v8949_v39, %v6850_v8  ;;  %v9097_v7 = vld [vmem:[%s12123_s1 + $0x310] sm:$0xff]  ;;  %3049 = vmatpush.bf16.msrb.mxu2 %v9113_v46 }
 0x1fa   :  { %v10870_v60 = vadd.f32 %v2730_v49, %v2682_v53  ;;  %v2635_v1 = vadd.f32 %v2634_v55, %v2586_v57  ;;  %3095 = vmatpush.bf16.msrb.mxu3 %v9124_v35  ;;  %2951 = vmatpush.bf16.msrb.mxu0 %v9097_v7  ;;  %v8976_v53 = vld [vmem:[%s12122_s0 + $0x3c4] sm:$0xf0]  ;;  %v8977_v39 = vld [vmem:[%s12122_s0 + $0x3cc] sm:$0xf0]  ;;  %v9111_v35 = vld [vmem:[%s12123_s1 + $0x380] sm:$0xff] }
 0x1fb   :  { %v9096_v55 = vld [vmem:[%s12123_s1 + $0x308] sm:$0xff]  ;;  %v6921_v11 = vor.u32 %v8976_v53, %v6920_v21  ;;  %v8986_v7 = vld [vmem:[%s12122_s0 + $0x41c] sm:$0xf] }
 0x1fc   :  { %v9104_v57 = vld [vmem:[%s12123_s1 + $0x348] sm:$0xff] }
 0x1fd   :  { %3050 = vmatpush.bf16.msrb.mxu2 %v9112_v59 }
 0x1fe   :  { %3096 = vmatpush.bf16.msrb.mxu3 %v9123_v29  ;;  %2952 = vmatpush.bf16.msrb.mxu0 %v9096_v55 }
 0x1ff   :  { %v2683_v15 = vpop.f32.mrf.mxu2  ;;  %v2588_v22 = vpop.f32.mrf.mxu0 }
 0x200   :  { %v2732_v16 = vpop.f32.mrf.mxu3  ;;  %v2684_v52 = vadd.f32 %v2683_v15, %v2635_v1  ;;  %v2637_v23 = vpop.f32.mrf.mxu1  ;;  %v2589_v28 = vadd.f32 %v2588_v22, %v10612_v58  ;;  %v9106_v58 = vld [vmem:[%s12123_s1 + $0x358] sm:$0xff]  ;;  %v8968_v1 = vld [vmem:[%s12122_s0 + $0x38c] sm:$0xf] }
 0x201   :  { %2999 = vmatpush.bf16.msrb.mxu1 %v9106_v58  ;;  %v6933_v18 = vor.u32 %v8968_v1, %v6930_v2  ;;  %3051 = vmatpush.bf16.msrb.mxu2 %v9111_v35  ;;  %v6992_v58 = vld [vmem:[%s12122_s0 + $0x410] sm:$0xf]  ;;  %v6514_v35 = vld [vmem:[%s12122_s0 + $0x80] sm:$0xf0] }
 0x202   :  { %v10921_v31 = vadd.f32 %v2732_v16, %v2684_v52  ;;  %v2638_v33 = vadd.f32 %v2637_v23, %v2589_v28  ;;  %2783 = vmatmul.bf16.gmra.mxu0 %v6849_v56  ;;  %3097 = vmatpush.bf16.msrb.mxu3 %v9122_v40  ;;  %v8985_v40 = vld [vmem:[%s12122_s0 + $0x414] sm:$0xf] }
 0x203   :  { %2832 = vmatmul.bf16.gmra.mxu1 %v6853_v30  ;;  %v6929_v30 = vor.u32 %v8977_v39, %v6928_v63  ;;  %2953 = vmatpush.bf16.msrb.mxu0 %v9095_v13  ;;  %v8871_v13 = vld [vmem:[%s12122_s0 + $0x7c] sm:$0xf0] }
 0x204   :  { %2881 = vmatmul.bf16.gmra.mxu2 %v6857_v24 }
 0x205   :  { %2930 = vmatmul.bf16.gmra.mxu3 %v6861_v25  ;;  %3000 = vmatpush.bf16.msrb.mxu1 %v9105_v45  ;;  %v7002_v45 = vld [vmem:[%s12122_s0 + $0x460] sm:$0xf0] }
 0x206   :  { %3098 = vmatpush.bf16.msrb.mxu3 %v9121_v50 }
 0x207   :  { %v2686_v41 = vpop.f32.mrf.mxu2  ;;  %v2590_v6 = vpop.f32.mrf.mxu0 }
 0x208   :  { %v2735_v42 = vpop.f32.mrf.mxu3  ;;  %v2687_v27 = vadd.f32 %v2686_v41, %v2638_v33  ;;  %v2639_v0 = vpop.f32.mrf.mxu1  ;;  %v2591_v49 = vadd.f32 %v2590_v6, %v10663_v26  ;;  %v8967_v26 = vld [vmem:[%s12122_s0 + $0x384] sm:$0xf]  ;;  %v6994_v41 = vld [vmem:[%s12122_s0 + $0x458] sm:$0xf0]  ;;  %v6993_v6 = vor.u32 %v8994_v36, %v6992_v58 }
 0x209   :  { %3001 = vmatpush.bf16.msrb.mxu1 %v9104_v57  ;;  %v6925_v12 = vor.u32 %v8967_v26, %v6922_v61  ;;  %v7005_v26 = vor.u32 %v8986_v7, %v7002_v45  ;;  %v8879_v7 = vld [vmem:[%s12122_s0 + $0xc4] sm:$0xf]  ;;  %v6578_v45 = vld [vmem:[%s12122_s0 + $0x108] sm:$0xf0] }
 0x20a   :  { %v10948_v51 = vadd.f32 %v2735_v42, %v2687_v27  ;;  %v2640_v54 = vadd.f32 %v2639_v0, %v2591_v49  ;;  %3099 = vmatpush.bf16.msrb.mxu3 %v9120_v4  ;;  %v8995_v42 = vld [vmem:[%s12122_s0 + $0x45c] sm:$0xf0]  ;;  %v6997_v0 = vor.u32 %v8985_v40, %v6994_v41 }
 0x20d   :  { %3002 = vmatpush.bf16.msrb.mxu1 %v9103_v48  ;;  %v8862_v48 = vld [vmem:[%s12122_s0 + $0x3c] sm:$0xf] }
 0x20e   :  { %3100 = vmatpush.bf16.msrb.mxu3 %v9119_v20 }
 0x20f   :  { %v2688_v5 = vpop.f32.mrf.mxu2  ;;  %v2593_v16 = vpop.f32.mrf.mxu0 }
 0x210   :  { %v2737_v8 = vpop.f32.mrf.mxu3  ;;  %v2689_v15 = vadd.f32 %v2688_v5, %v2640_v54  ;;  %v2642_v56 = vpop.f32.mrf.mxu1  ;;  %v2594_v19 = vadd.f32 %v2593_v16, %v10666_v37 }
 0x212   :  { %v10999_v52 = vadd.f32 %v2737_v8, %v2689_v15  ;;  %v2643_v22 = vadd.f32 %v2642_v56, %v2594_v19  ;;  %2788 = vmatmul.bf16.gmra.mxu0 %v6921_v11  ;;  %v8870_v8 = vld [vmem:[%s12122_s0 + $0x74] sm:$0xf0]  ;;  %v8861_v11 = vld [vmem:[%s12122_s0 + $0x34] sm:$0xf] }
 0x213   :  { %2837 = vmatmul.bf16.gmra.mxu1 %v6925_v12  ;;  %v6506_v12 = vld [vmem:[%s12122_s0 + $0x78] sm:$0xf0] }
 0x214   :  { %2886 = vmatmul.bf16.gmra.mxu2 %v6929_v30  ;;  %v6509_v30 = vor.u32 %v8861_v11, %v6506_v12 }
 0x215   :  { %2935 = vmatmul.bf16.gmra.mxu3 %v6933_v18 }
 0x217   :  { %v2691_v23 = vpop.f32.mrf.mxu2  ;;  %v2595_v37 = vpop.f32.mrf.mxu0 }
 0x218   :  { %v2740_v24 = vpop.f32.mrf.mxu3  ;;  %v2692_v25 = vadd.f32 %v2691_v23, %v2643_v22  ;;  %v2644_v28 = vpop.f32.mrf.mxu1  ;;  %v2596_v29 = vadd.f32 %v2595_v37, %v10693_v62  ;;  %v7000_v62 = vld [vmem:[%s12122_s0 + $0x418] sm:$0xf]  ;;  %v6517_v23 = vor.u32 %v8862_v48, %v6514_v35  ;;  %v8897_v48 = vld [vmem:[%s12122_s0 + $0x154] sm:$0xf]  ;;  %v6650_v35 = vld [vmem:[%s12122_s0 + $0x198] sm:$0xf0] }
 0x219   :  { %v7001_v53 = vor.u32 %v8995_v42, %v7000_v62  ;;  %v8888_v42 = vld [vmem:[%s12122_s0 + $0x104] sm:$0xf0] }
 0x21a   :  { %v11002_v33 = vadd.f32 %v2740_v24, %v2692_v25  ;;  %v2645_v34 = vadd.f32 %v2644_v28, %v2596_v29 }
 0x21f   :  { %v2693_v46 = vpop.f32.mrf.mxu2  ;;  %v2598_v50 = vpop.f32.mrf.mxu0 }
 0x220   :  { %v2742_v27 = vpop.f32.mrf.mxu3  ;;  %v2694_v49 = vadd.f32 %v2693_v46, %v2645_v34  ;;  %v2647_v21 = vpop.f32.mrf.mxu1  ;;  %v2599_v54 = vadd.f32 %v2598_v50, %v10696_v9  ;;  %v6504_v9 = vld [vmem:[%s12122_s0 + $0x30] sm:$0xf] }
 0x221   :  { %v6505_v56 = vor.u32 %v8870_v8, %v6504_v9  ;;  %v8889_v46 = vld [vmem:[%s12122_s0 + $0x10c] sm:$0xf0] }
 0x222   :  { %v11029_v55 = vadd.f32 %v2742_v27, %v2694_v49  ;;  %v2648_v57 = vadd.f32 %v2647_v21, %v2599_v54  ;;  %2793 = vmatmul.bf16.gmra.mxu0 %v6993_v6  ;;  %v8880_v27 = vld [vmem:[%s12122_s0 + $0xcc] sm:$0xf]  ;;  %v6586_v6 = vld [vmem:[%s12122_s0 + $0x110] sm:$0xf0]  ;;  %v6581_v21 = vor.u32 %v8879_v7, %v6578_v45 }
 0x223   :  { %2842 = vmatmul.bf16.gmra.mxu1 %v6997_v0 }
 0x224   :  { %2891 = vmatmul.bf16.gmra.mxu2 %v7001_v53 }
 0x225   :  { %2940 = vmatmul.bf16.gmra.mxu3 %v7005_v26 }
 0x227   :  { %v2696_v59 = vpop.f32.mrf.mxu2  ;;  %v2600_v39 = vpop.f32.mrf.mxu0 }
 0x228   :  { %v2745_v61 = vpop.f32.mrf.mxu3  ;;  %v2697_v63 = vadd.f32 %v2696_v59, %v2648_v57  ;;  %v2649_v1 = vpop.f32.mrf.mxu1  ;;  %v2601_v2 = vadd.f32 %v2600_v39, %v10723_v32  ;;  %v6512_v32 = vld [vmem:[%s12122_s0 + $0x38] sm:$0xf]  ;;  %v6589_v59 = vor.u32 %v8880_v27, %v6586_v6  ;;  %v8915_v27 = vld [vmem:[%s12122_s0 + $0x1e4] sm:$0xf]  ;;  %v6722_v6 = vld [vmem:[%s12122_s0 + $0x228] sm:$0xf0] }
 0x229   :  { %v6513_v22 = vor.u32 %v8871_v13, %v6512_v32  ;;  %v8906_v13 = vld [vmem:[%s12122_s0 + $0x194] sm:$0xf0] }
 0x22a   :  { %v11032_v4 = vadd.f32 %v2745_v61, %v2697_v63  ;;  %v2650_v5 = vadd.f32 %v2649_v1, %v2601_v2 }
 0x22f   :  { %v2698_v15 = vpop.f32.mrf.mxu2  ;;  %v2759_v19 = vpop.f32.mrf.mxu0 }
 0x230   :  { %v2747_v16 = vpop.f32.mrf.mxu3  ;;  %v2699_v18 = vadd.f32 %v2698_v15, %v2650_v5  ;;  %v2808_v20 = vpop.f32.mrf.mxu1  ;;  %v2760_v24 = vadd.f32 %v2759_v19, %v10726_v43  ;;  %v6576_v43 = vld [vmem:[%s12122_s0 + $0xc0] sm:$0xf] }
 0x231   :  { %v6577_v50 = vor.u32 %v8888_v42, %v6576_v43  ;;  %v8907_v15 = vld [vmem:[%s12122_s0 + $0x19c] sm:$0xf0] }
 0x232   :  { %v11059_v25 = vadd.f32 %v2747_v16, %v2699_v18  ;;  %v2809_v37 = vadd.f32 %v2808_v20, %v2760_v24  ;;  %2954 = vmatmul.bf16.vlgmr.msrb.gmra.mxu0 %v6505_v56  ;;  %v8898_v16 = vld [vmem:[%s12122_s0 + $0x15c] sm:$0xf]  ;;  %v6658_v56 = vld [vmem:[%s12122_s0 + $0x1a0] sm:$0xf0]  ;;  %v6653_v20 = vor.u32 %v8897_v48, %v6650_v35 }
 0x233   :  { %3003 = vmatmul.bf16.vlgmr.msrb.gmra.mxu1 %v6509_v30 }
 0x234   :  { %3052 = vmatmul.bf16.vlgmr.msrb.gmra.mxu2 %v6513_v22 }
 0x235   :  { %3101 = vmatmul.bf16.vlgmr.msrb.gmra.mxu3 %v6517_v23 }
 0x237   :  { %v2857_v28 = vpop.f32.mrf.mxu2  ;;  %v2761_v58 = vpop.f32.mrf.mxu0 }
 0x238   :  { %v2906_v29 = vpop.f32.mrf.mxu3  ;;  %v2858_v34 = vadd.f32 %v2857_v28, %v2809_v37  ;;  %v2810_v36 = vpop.f32.mrf.mxu1  ;;  %v2762_v40 = vadd.f32 %v2761_v58, %v10753_v3  ;;  %v6584_v3 = vld [vmem:[%s12122_s0 + $0xc8] sm:$0xf]  ;;  %v6661_v28 = vor.u32 %v8898_v16, %v6658_v56  ;;  %v8933_v16 = vld [vmem:[%s12122_s0 + $0x274] sm:$0xf]  ;;  %v6794_v56 = vld [vmem:[%s12122_s0 + $0x2b8] sm:$0xf0] }
 0x239   :  { %v6585_v57 = vor.u32 %v8889_v46, %v6584_v3  ;;  %v8924_v46 = vld [vmem:[%s12122_s0 + $0x224] sm:$0xf0] }
 0x23a   :  { %v11062_v41 = vadd.f32 %v2906_v29, %v2858_v34  ;;  %v2811_v62 = vadd.f32 %v2810_v36, %v2762_v40 }
 0x23f   :  { %v2859_v0 = vpop.f32.mrf.mxu2  ;;  %v2764_v26 = vpop.f32.mrf.mxu0 }
 0x240   :  { %v2908_v49 = vpop.f32.mrf.mxu3  ;;  %v2860_v53 = vadd.f32 %v2859_v0, %v2811_v62  ;;  %v2813_v54 = vpop.f32.mrf.mxu1  ;;  %v2765_v61 = vadd.f32 %v2764_v26, %v10756_v14  ;;  %v6648_v14 = vld [vmem:[%s12122_s0 + $0x150] sm:$0xf] }
 0x241   :  { %v6649_v19 = vor.u32 %v8906_v13, %v6648_v14  ;;  %v8925_v0 = vld [vmem:[%s12122_s0 + $0x22c] sm:$0xf0] }
 0x242   :  { %v11089_v63 = vadd.f32 %v2908_v49, %v2860_v53  ;;  %v2814_v39 = vadd.f32 %v2813_v54, %v2765_v61  ;;  %2959 = vmatmul.bf16.gmra.mxu0 %v6577_v50  ;;  %v8916_v49 = vld [vmem:[%s12122_s0 + $0x1ec] sm:$0xf]  ;;  %v6730_v50 = vld [vmem:[%s12122_s0 + $0x230] sm:$0xf0]  ;;  %v6725_v54 = vor.u32 %v8915_v27, %v6722_v6 }
 0x243   :  { %3008 = vmatmul.bf16.gmra.mxu1 %v6581_v21 }
 0x244   :  { %3057 = vmatmul.bf16.gmra.mxu2 %v6585_v57 }
 0x245   :  { %3106 = vmatmul.bf16.gmra.mxu3 %v6589_v59 }
 0x247   :  { %v2862_v1 = vpop.f32.mrf.mxu2  ;;  %v2766_v9 = vpop.f32.mrf.mxu0 }
 0x248   :  { %v2911_v2 = vpop.f32.mrf.mxu3  ;;  %v2863_v5 = vadd.f32 %v2862_v1, %v2814_v39  ;;  %v2815_v8 = vpop.f32.mrf.mxu1  ;;  %v2767_v11 = vadd.f32 %v2766_v9, %v10783_v38  ;;  %v6656_v38 = vld [vmem:[%s12122_s0 + $0x158] sm:$0xf]  ;;  %v6733_v1 = vor.u32 %v8916_v49, %v6730_v50  ;;  %v6864_v50 = vld [vmem:[%s12122_s0 + $0x300] sm:$0xf] }
 0x249   :  { %v6657_v37 = vor.u32 %v8907_v15, %v6656_v38  ;;  %v8942_v15 = vld [vmem:[%s12122_s0 + $0x2b4] sm:$0xf0] }
 0x24a   :  { %v11092_v12 = vadd.f32 %v2911_v2, %v2863_v5  ;;  %v2816_v32 = vadd.f32 %v2815_v8, %v2767_v11 }
 0x24f   :  { %v2864_v30 = vpop.f32.mrf.mxu2  ;;  %v2769_v23 = vpop.f32.mrf.mxu0 }
 0x250   :  { %v2913_v18 = vpop.f32.mrf.mxu3  ;;  %v2865_v22 = vadd.f32 %v2864_v30, %v2816_v32  ;;  %v2818_v24 = vpop.f32.mrf.mxu1  ;;  %v2770_v29 = vadd.f32 %v2769_v23, %v10786_v47  ;;  %v6720_v47 = vld [vmem:[%s12122_s0 + $0x1e0] sm:$0xf] }
 0x251   :  { %v6721_v26 = vor.u32 %v8924_v46, %v6720_v47  ;;  %v8943_v30 = vld [vmem:[%s12122_s0 + $0x2bc] sm:$0xf0]  ;;  %v9141_v46 = vld [vmem:[%s12123_s1 + $0x470] sm:$0xff] }
 0x252   :  { %v11119_v34 = vadd.f32 %v2913_v18, %v2865_v22  ;;  %v2819_v58 = vadd.f32 %v2818_v24, %v2770_v29  ;;  %2964 = vmatmul.bf16.gmra.mxu0 %v6649_v19  ;;  %v8934_v18 = vld [vmem:[%s12122_s0 + $0x27c] sm:$0xf]  ;;  %v6802_v19 = vld [vmem:[%s12122_s0 + $0x2c0] sm:$0xf0]  ;;  %v6797_v24 = vor.u32 %v8933_v16, %v6794_v56 }
 0x253   :  { %3013 = vmatmul.bf16.gmra.mxu1 %v6653_v20  ;;  %v9130_v56 = vld [vmem:[%s12123_s1 + $0x418] sm:$0xff] }
 0x254   :  { %3062 = vmatmul.bf16.gmra.mxu2 %v6657_v37 }
 0x255   :  { %3111 = vmatmul.bf16.gmra.mxu3 %v6661_v28 }
 0x257   :  { %v2867_v36 = vpop.f32.mrf.mxu2  ;;  %v2771_v43 = vpop.f32.mrf.mxu0 }
 0x258   :  { %v2916_v40 = vpop.f32.mrf.mxu3  ;;  %v2868_v62 = vadd.f32 %v2867_v36, %v2819_v58  ;;  %v2820_v42 = vpop.f32.mrf.mxu1  ;;  %v2772_v7 = vadd.f32 %v2771_v43, %v10813_v10  ;;  %v6728_v10 = vld [vmem:[%s12122_s0 + $0x1e8] sm:$0xf]  ;;  %v6805_v36 = vor.u32 %v8934_v18, %v6802_v19  ;;  %v9137_v19 = vld [vmem:[%s12123_s1 + $0x450] sm:$0xff] }
 0x259   :  { %v6729_v39 = vor.u32 %v8925_v0, %v6728_v10 }
 0x25a   :  { %v11122_v45 = vadd.f32 %v2916_v40, %v2868_v62  ;;  %v2821_v3 = vadd.f32 %v2820_v42, %v2772_v7  ;;  %v9134_v42 = vld [vmem:[%s12123_s1 + $0x438] sm:$0xff] }
 0x25b   :  { %v9142_v7 = vld [vmem:[%s12123_s1 + $0x478] sm:$0xff]  ;;  %3142 = vmatpush.bf16.msra.mxu0 %v9134_v42 }
 0x25c   :  { %3191 = vmatpush.bf16.msra.mxu1 %v9142_v7  ;;  %v6944_v42 = vld [vmem:[%s12122_s0 + $0x398] sm:$0xf]  ;;  %v8979_v7 = vld [vmem:[%s12122_s0 + $0x3dc] sm:$0xf0] }
 0x25f   :  { %v2869_v21 = vpop.f32.mrf.mxu2  ;;  %v2774_v59 = vpop.f32.mrf.mxu0 }
 0x260   :  { %v2918_v53 = vpop.f32.mrf.mxu3  ;;  %v2870_v57 = vadd.f32 %v2869_v21, %v2821_v3  ;;  %v2823_v61 = vpop.f32.mrf.mxu1  ;;  %v2775_v2 = vadd.f32 %v2774_v59, %v10816_v17  ;;  %v6792_v17 = vld [vmem:[%s12122_s0 + $0x270] sm:$0xf]  ;;  %3192 = vmatpush.bf16.msra.mxu1 %v9141_v46  ;;  %v6872_v59 = vld [vmem:[%s12122_s0 + $0x308] sm:$0xf] }
 0x261   :  { %v6793_v23 = vor.u32 %v8942_v15, %v6792_v17 }
 0x262   :  { %v11149_v5 = vadd.f32 %v2918_v53, %v2870_v57  ;;  %v2824_v9 = vadd.f32 %v2823_v61, %v2775_v2  ;;  %2969 = vmatmul.bf16.gmra.mxu0 %v6721_v26  ;;  %v8960_v53 = vld [vmem:[%s12122_s0 + $0x344] sm:$0xf0]  ;;  %v6866_v57 = vld [vmem:[%s12122_s0 + $0x348] sm:$0xf0]  ;;  %v8961_v61 = vld [vmem:[%s12122_s0 + $0x34c] sm:$0xf0] }
 0x263   :  { %3018 = vmatmul.bf16.gmra.mxu1 %v6725_v54  ;;  %v9132_v26 = vld [vmem:[%s12123_s1 + $0x428] sm:$0xff]  ;;  %v8951_v54 = vld [vmem:[%s12122_s0 + $0x304] sm:$0xf] }
 0x264   :  { %3067 = vmatmul.bf16.gmra.mxu2 %v6729_v39  ;;  %v8952_v39 = vld [vmem:[%s12122_s0 + $0x30c] sm:$0xf] }
 0x265   :  { %3116 = vmatmul.bf16.gmra.mxu3 %v6733_v1  ;;  %v6874_v1 = vld [vmem:[%s12122_s0 + $0x350] sm:$0xf0] }
 0x266   :  { %v6877_v17 = vor.u32 %v8952_v39, %v6874_v1 }
 0x267   :  { %v2872_v8 = vpop.f32.mrf.mxu2  ;;  %v2776_v14 = vpop.f32.mrf.mxu0 }
 0x268   :  { %v2921_v11 = vpop.f32.mrf.mxu3  ;;  %v2873_v32 = vadd.f32 %v2872_v8, %v2824_v9  ;;  %v2825_v13 = vpop.f32.mrf.mxu1  ;;  %v2777_v48 = vadd.f32 %v2776_v14, %v10843_v44  ;;  %v6800_v44 = vld [vmem:[%s12122_s0 + $0x278] sm:$0xf]  ;;  %v6865_v8 = vor.u32 %v8960_v53, %v6864_v50  ;;  %v9139_v14 = vld [vmem:[%s12123_s1 + $0x460] sm:$0xff] }
 0x269   :  { %v6801_v58 = vor.u32 %v8943_v30, %v6800_v44  ;;  %v9138_v44 = vld [vmem:[%s12123_s1 + $0x458] sm:$0xff] }
 0x26a   :  { %v11152_v35 = vadd.f32 %v2921_v11, %v2873_v32  ;;  %v2826_v38 = vadd.f32 %v2825_v13, %v2777_v48  ;;  %v6869_v11 = vor.u32 %v8951_v54, %v6866_v57  ;;  %v9131_v32 = vld [vmem:[%s12123_s1 + $0x420] sm:$0xff] }
 0x26f   :  { %v2874_v20 = vpop.f32.mrf.mxu2  ;;  %v2779_v28 = vpop.f32.mrf.mxu0 }
 0x270   :  { %v2923_v22 = vpop.f32.mrf.mxu3  ;;  %v2875_v37 = vadd.f32 %v2874_v20, %v2826_v38  ;;  %v2828_v29 = vpop.f32.mrf.mxu1  ;;  %v2780_v40 = vadd.f32 %v2779_v28, %v10870_v60  ;;  %v9133_v60 = vld [vmem:[%s12123_s1 + $0x430] sm:$0xff]  ;;  %v6873_v38 = vor.u32 %v8961_v61, %v6872_v59 }
 0x271   :  { %3143 = vmatpush.bf16.msra.mxu0 %v9133_v60  ;;  %v6936_v28 = vld [vmem:[%s12122_s0 + $0x390] sm:$0xf] }
 0x272   :  { %v11179_v62 = vadd.f32 %v2923_v22, %v2875_v37  ;;  %v2829_v43 = vadd.f32 %v2828_v29, %v2780_v40  ;;  %2974 = vmatmul.bf16.gmra.mxu0 %v6793_v23  ;;  %v8969_v40 = vld [vmem:[%s12122_s0 + $0x394] sm:$0xf] }
 0x273   :  { %3023 = vmatmul.bf16.gmra.mxu1 %v6797_v24 }
 0x274   :  { %3072 = vmatmul.bf16.gmra.mxu2 %v6801_v58  ;;  %v8978_v58 = vld [vmem:[%s12122_s0 + $0x3d4] sm:$0xf0] }
 0x275   :  { %3121 = vmatmul.bf16.gmra.mxu3 %v6805_v36  ;;  %3144 = vmatpush.bf16.msra.mxu0 %v9132_v26  ;;  %v9128_v36 = vld [vmem:[%s12123_s1 + $0x408] sm:$0xff]  ;;  %v6945_v26 = vor.u32 %v8979_v7, %v6944_v42 }
 0x277   :  { %v2877_v3 = vpop.f32.mrf.mxu2  ;;  %v2781_v6 = vpop.f32.mrf.mxu0 }
 0x278   :  { %v2926_v47 = vpop.f32.mrf.mxu3  ;;  %v2878_v27 = vadd.f32 %v2877_v3, %v2829_v43  ;;  %v2830_v10 = vpop.f32.mrf.mxu1  ;;  %v2782_v0 = vadd.f32 %v2781_v6, %v10921_v31  ;;  %v9140_v31 = vld [vmem:[%s12123_s1 + $0x468] sm:$0xff]  ;;  %v6938_v43 = vld [vmem:[%s12122_s0 + $0x3d8] sm:$0xf0] }
 0x279   :  { %3193 = vmatpush.bf16.msra.mxu1 %v9140_v31  ;;  %3145 = vmatpush.bf16.msra.mxu0 %v9131_v32  ;;  %v8970_v3 = vld [vmem:[%s12122_s0 + $0x39c] sm:$0xf]  ;;  %v6941_v6 = vor.u32 %v8969_v40, %v6938_v43 }
 0x27a   :  { %v11194_v49 = vadd.f32 %v2926_v47, %v2878_v27  ;;  %v11199_v21 = vadd.f32 %v2830_v10, %v2782_v0  ;;  %v6946_v47 = vld [vmem:[%s12122_s0 + $0x3e0] sm:$0xf0]  ;;  %v6937_v27 = vor.u32 %v8978_v58, %v6936_v28 }
 0x27b   :  { %v9127_v10 = vld [vmem:[%s12123_s1 + $0x400] sm:$0xff]  ;;  %v6949_v31 = vor.u32 %v8970_v3, %v6946_v47  ;;  %v8872_v3 = vld [vmem:[%s12122_s0 + $0x84] sm:$0xf0] }
 0x27c   :  { %v9135_v0 = vld [vmem:[%s12123_s1 + $0x440] sm:$0xff] }
 0x27d   :  { %3194 = vmatpush.bf16.msra.mxu1 %v9139_v14  ;;  %3146 = vmatpush.bf16.msra.mxu0 %v9130_v56  ;;  %v8863_v47 = vld [vmem:[%s12122_s0 + $0x44] sm:$0xf] }
 0x27f   :  { %v11228_v2 = vpop.f32.mrf.mxu2  ;;  %v2784_v13 = vpop.f32.mrf.mxu0 }
 0x280   :  { %v11230_v9 = vpop.f32.mrf.mxu3  ;;  %v2833_v48 = vpop.f32.mrf.mxu1  ;;  %v2785_v15 = vadd.f32 %v2784_v13, %v10948_v51  ;;  %v9129_v51 = vld [vmem:[%s12123_s1 + $0x410] sm:$0xff]  ;;  %v8996_v13 = vld [vmem:[%s12122_s0 + $0x464] sm:$0xf0] }
 0x281   :  { %3195 = vmatpush.bf16.msra.mxu1 %v9138_v44  ;;  %3147 = vmatpush.bf16.msra.mxu0 %v9129_v51 }
 0x282   :  { %v2834_v16 = vadd.f32 %v2833_v48, %v2785_v15  ;;  %2979 = vmatmul.bf16.gmra.mxu0 %v6865_v8  ;;  %v8987_v48 = vld [vmem:[%s12122_s0 + $0x424] sm:$0xf]  ;;  %v8988_v15 = vld [vmem:[%s12122_s0 + $0x42c] sm:$0xf] }
 0x283   :  { %3028 = vmatmul.bf16.gmra.mxu1 %v6869_v11 }
 0x284   :  { %3077 = vmatmul.bf16.gmra.mxu2 %v6873_v38  ;;  %v7016_v38 = vld [vmem:[%s12122_s0 + $0x428] sm:$0xf] }
 0x285   :  { %3126 = vmatmul.bf16.gmra.mxu3 %v6877_v17  ;;  %3196 = vmatpush.bf16.msra.mxu1 %v9137_v19  ;;  %v8997_v17 = vld [vmem:[%s12122_s0 + $0x46c] sm:$0xf0] }
 0x286   :  { %3148 = vmatpush.bf16.msra.mxu0 %v9128_v36 }
 0x287   :  { %v2882_v30 = vpop.f32.mrf.mxu2  ;;  %v2786_v22 = vpop.f32.mrf.mxu0 }
 0x288   :  { %v2931_v18 = vpop.f32.mrf.mxu3  ;;  %v2883_v20 = vadd.f32 %v2882_v30, %v2834_v16  ;;  %v2835_v23 = vpop.f32.mrf.mxu1  ;;  %v2787_v24 = vadd.f32 %v2786_v22, %v10999_v52  ;;  %v9136_v52 = vld [vmem:[%s12123_s1 + $0x448] sm:$0xff]  ;;  %v7018_v16 = vld [vmem:[%s12122_s0 + $0x470] sm:$0xf0] }
 0x289   :  { %3197 = vmatpush.bf16.msra.mxu1 %v9136_v52  ;;  %v7021_v22 = vor.u32 %v8988_v15, %v7018_v16 }
 0x28a   :  { %v11252_v37 = vadd.f32 %v2931_v18, %v2883_v20  ;;  %v11257_v29 = vadd.f32 %v2835_v23, %v2787_v24  ;;  %3149 = vmatpush.bf16.msra.mxu0 %v9127_v10  ;;  %v7017_v20 = vor.u32 %v8997_v17, %v7016_v38 }
 0x28d   :  { %3198 = vmatpush.bf16.msra.mxu1 %v9135_v0 }
 0x28f   :  { %v11286_v60 = vpop.f32.mrf.mxu2  ;;  %v2789_v50 = vpop.f32.mrf.mxu0 }
 0x290   :  { %v11288_v46 = vpop.f32.mrf.mxu3  ;;  %v2838_v53 = vpop.f32.mrf.mxu1  ;;  %v2790_v54 = vadd.f32 %v2789_v50, %v11002_v33  ;;  %v7008_v33 = vld [vmem:[%s12122_s0 + $0x420] sm:$0xf] }
 0x291   :  { %v7009_v30 = vor.u32 %v8996_v13, %v7008_v33  ;;  %v6592_v33 = vld [vmem:[%s12122_s0 + $0xd0] sm:$0xf]  ;;  %v8881_v13 = vld [vmem:[%s12122_s0 + $0xd4] sm:$0xf] }
 0x292   :  { %v2839_v57 = vadd.f32 %v2838_v53, %v2790_v54  ;;  %2984 = vmatmul.bf16.gmra.mxu0 %v6937_v27 }
 0x293   :  { %3033 = vmatmul.bf16.gmra.mxu1 %v6941_v6 }
 0x294   :  { %3082 = vmatmul.bf16.gmra.mxu2 %v6945_v26 }
 0x295   :  { %3131 = vmatmul.bf16.gmra.mxu3 %v6949_v31 }
 0x297   :  { %v2887_v59 = vpop.f32.mrf.mxu2  ;;  %v2791_v1 = vpop.f32.mrf.mxu0 }
 0x298   :  { %v2936_v61 = vpop.f32.mrf.mxu3  ;;  %v2888_v39 = vadd.f32 %v2887_v59, %v2839_v57  ;;  %v2840_v8 = vpop.f32.mrf.mxu1  ;;  %v2792_v11 = vadd.f32 %v2791_v1, %v11029_v55  ;;  %v7010_v55 = vld [vmem:[%s12122_s0 + $0x468] sm:$0xf0] }
 0x299   :  { %v7013_v18 = vor.u32 %v8987_v48, %v7010_v55 }
 0x29a   :  { %v11298_v32 = vadd.f32 %v2936_v61, %v2888_v39  ;;  %v11300_v14 = vadd.f32 %v2840_v8, %v2792_v11 }
 0x29f   :  { %v11326_v56 = vpop.f32.mrf.mxu2  ;;  %v2794_v51 = vpop.f32.mrf.mxu0 }
 0x2a0   :  { %v11328_v44 = vpop.f32.mrf.mxu3  ;;  %v2843_v19 = vpop.f32.mrf.mxu1  ;;  %v2795_v23 = vadd.f32 %v2794_v51, %v11032_v4  ;;  %v6520_v4 = vld [vmem:[%s12122_s0 + $0x40] sm:$0xf] }
 0x2a1   :  { %v6521_v10 = vor.u32 %v8872_v3, %v6520_v4 }
 0x2a2   :  { %v2844_v24 = vadd.f32 %v2843_v19, %v2795_v23  ;;  %2989 = vmatmul.bf16.gmra.mxu0 %v7009_v30 }
 0x2a3   :  { %3038 = vmatmul.bf16.gmra.mxu1 %v7013_v18 }
 0x2a4   :  { %3087 = vmatmul.bf16.gmra.mxu2 %v7017_v20 }
 0x2a5   :  { %3136 = vmatmul.bf16.gmra.mxu3 %v7021_v22 }
 0x2a7   :  { %v2892_v28 = vpop.f32.mrf.mxu2  ;;  %v2796_v52 = vpop.f32.mrf.mxu0 }
 0x2a8   :  { %v2941_v58 = vpop.f32.mrf.mxu3  ;;  %v2893_v36 = vadd.f32 %v2892_v28, %v2844_v24  ;;  %v2845_v40 = vpop.f32.mrf.mxu1  ;;  %v2797_v43 = vadd.f32 %v2796_v52, %v11059_v25  ;;  %v6522_v25 = vld [vmem:[%s12122_s0 + $0x88] sm:$0xf0]  ;;  %v8899_v52 = vld [vmem:[%s12122_s0 + $0x164] sm:$0xf] }
 0x2a9   :  { %v6525_v0 = vor.u32 %v8863_v47, %v6522_v25 }
 0x2aa   :  { %v11332_v42 = vadd.f32 %v2941_v58, %v2893_v36  ;;  %v11334_v7 = vadd.f32 %v2845_v40, %v2797_v43  ;;  %v6664_v36 = vld [vmem:[%s12122_s0 + $0x160] sm:$0xf] }
 0x2af   :  { %v11348_v27 = vpop.f32.mrf.mxu2  ;;  %v2955_v50 = vpop.f32.mrf.mxu0 }
 0x2b0   :  { %v11350_v6 = vpop.f32.mrf.mxu3  ;;  %v3004_v53 = vpop.f32.mrf.mxu1  ;;  %v2956_v26 = vadd.f32 %v2955_v50, %v11062_v41  ;;  %v8890_v41 = vld [vmem:[%s12122_s0 + $0x114] sm:$0xf0] }
 0x2b1   :  { %v6593_v38 = vor.u32 %v8890_v41, %v6592_v33 }
 0x2b2   :  { %v3005_v31 = vadd.f32 %v3004_v53, %v2956_v26  ;;  %3150 = vmatmul.bf16.vlgmr.msra.gmra.mxu0 %v6521_v10 }
 0x2b3   :  { %3199 = vmatmul.bf16.vlgmr.msra.gmra.mxu1 %v6525_v0 }
 0x2b7   :  { %v3053_v54 = vpop.f32.mrf.mxu2  ;;  %v2957_v61 = vpop.f32.mrf.mxu0 }
 0x2b8   :  { %v3102_v57 = vpop.f32.mrf.mxu3  ;;  %v3054_v59 = vadd.f32 %v3053_v54, %v3005_v31  ;;  %v3006_v39 = vpop.f32.mrf.mxu1  ;;  %v2958_v1 = vadd.f32 %v2957_v61, %v11089_v63  ;;  %v6594_v63 = vld [vmem:[%s12122_s0 + $0x118] sm:$0xf0] }
 0x2b9   :  { %v6597_v17 = vor.u32 %v8881_v13, %v6594_v63 }
 0x2ba   :  { %v11354_v8 = vadd.f32 %v3102_v57, %v3054_v59  ;;  %v11356_v11 = vadd.f32 %v3006_v39, %v2958_v1  ;;  %v6736_v39 = vld [vmem:[%s12122_s0 + $0x1f0] sm:$0xf]  ;;  %v8917_v1 = vld [vmem:[%s12122_s0 + $0x1f4] sm:$0xf] }
 0x2bf   :  { %v11370_v48 = vpop.f32.mrf.mxu2  ;;  %v2960_v15 = vpop.f32.mrf.mxu0 }
 0x2c0   :  { %v11372_v55 = vpop.f32.mrf.mxu3  ;;  %v3009_v16 = vpop.f32.mrf.mxu1  ;;  %v2961_v30 = vadd.f32 %v2960_v15, %v11092_v12  ;;  %v8908_v12 = vld [vmem:[%s12122_s0 + $0x1a4] sm:$0xf0] }
 0x2c1   :  { %v6665_v4 = vor.u32 %v8908_v12, %v6664_v36  ;;  %v6808_v36 = vld [vmem:[%s12122_s0 + $0x280] sm:$0xf]  ;;  %v8935_v12 = vld [vmem:[%s12122_s0 + $0x284] sm:$0xf] }
 0x2c2   :  { %v3010_v18 = vadd.f32 %v3009_v16, %v2961_v30  ;;  %3155 = vmatmul.bf16.gmra.mxu0 %v6593_v38 }
 0x2c3   :  { %3204 = vmatmul.bf16.gmra.mxu1 %v6597_v17 }
 0x2c7   :  { %v3058_v51 = vpop.f32.mrf.mxu2  ;;  %v2962_v22 = vpop.f32.mrf.mxu0 }
 0x2c8   :  { %v3107_v19 = vpop.f32.mrf.mxu3  ;;  %v3059_v20 = vadd.f32 %v3058_v51, %v3010_v18  ;;  %v3011_v23 = vpop.f32.mrf.mxu1  ;;  %v2963_v24 = vadd.f32 %v2962_v22, %v11119_v34  ;;  %v6666_v34 = vld [vmem:[%s12122_s0 + $0x1a8] sm:$0xf0] }
 0x2c9   :  { %v6669_v3 = vor.u32 %v8899_v52, %v6666_v34 }
 0x2ca   :  { %v11376_v28 = vadd.f32 %v3107_v19, %v3059_v20  ;;  %v11378_v58 = vadd.f32 %v3011_v23, %v2963_v24 }
 0x2cf   :  { %v11392_v40 = vpop.f32.mrf.mxu2  ;;  %v2965_v47 = vpop.f32.mrf.mxu0 }
 0x2d0   :  { %v11394_v43 = vpop.f32.mrf.mxu3  ;;  %v3014_v25 = vpop.f32.mrf.mxu1  ;;  %v2966_v10 = vadd.f32 %v2965_v47, %v11122_v45  ;;  %v8926_v45 = vld [vmem:[%s12122_s0 + $0x234] sm:$0xf0] }
 0x2d1   :  { %v6737_v13 = vor.u32 %v8926_v45, %v6736_v39  ;;  %v6880_v39 = vld [vmem:[%s12122_s0 + $0x310] sm:$0xf]  ;;  %v8953_v45 = vld [vmem:[%s12122_s0 + $0x314] sm:$0xf] }
 0x2d2   :  { %v3015_v0 = vadd.f32 %v3014_v25, %v2966_v10  ;;  %3160 = vmatmul.bf16.gmra.mxu0 %v6665_v4 }
 0x2d3   :  { %3209 = vmatmul.bf16.gmra.mxu1 %v6669_v3 }
 0x2d7   :  { %v3063_v50 = vpop.f32.mrf.mxu2  ;;  %v2967_v31 = vpop.f32.mrf.mxu0 }
 0x2d8   :  { %v3112_v53 = vpop.f32.mrf.mxu3  ;;  %v3064_v26 = vadd.f32 %v3063_v50, %v3015_v0  ;;  %v3016_v54 = vpop.f32.mrf.mxu1  ;;  %v2968_v57 = vadd.f32 %v2967_v31, %v11149_v5  ;;  %v6738_v5 = vld [vmem:[%s12122_s0 + $0x238] sm:$0xf0] }
 0x2d9   :  { %v6741_v63 = vor.u32 %v8917_v1, %v6738_v5  ;;  %v6882_v1 = vld [vmem:[%s12122_s0 + $0x358] sm:$0xf0] }
 0x2da   :  { %v11398_v59 = vadd.f32 %v3112_v53, %v3064_v26  ;;  %v11400_v61 = vadd.f32 %v3016_v54, %v2968_v57 }
 0x2df   :  { %v11414_v33 = vpop.f32.mrf.mxu2  ;;  %v2970_v38 = vpop.f32.mrf.mxu0 }
 0x2e0   :  { %v11416_v41 = vpop.f32.mrf.mxu3  ;;  %v3019_v17 = vpop.f32.mrf.mxu1  ;;  %v2971_v15 = vadd.f32 %v2970_v38, %v11152_v35  ;;  %v8944_v35 = vld [vmem:[%s12122_s0 + $0x2c4] sm:$0xf0] }
 0x2e1   :  { %v6809_v4 = vor.u32 %v8944_v35, %v6808_v36 }
 0x2e2   :  { %v3020_v16 = vadd.f32 %v3019_v17, %v2971_v15  ;;  %3165 = vmatmul.bf16.gmra.mxu0 %v6737_v13  ;;  %v6885_v13 = vor.u32 %v8953_v45, %v6882_v1 }
 0x2e3   :  { %3214 = vmatmul.bf16.gmra.mxu1 %v6741_v63 }
 0x2e7   :  { %v3068_v30 = vpop.f32.mrf.mxu2  ;;  %v2972_v19 = vpop.f32.mrf.mxu0 }
 0x2e8   :  { %v3117_v18 = vpop.f32.mrf.mxu3  ;;  %v3069_v51 = vadd.f32 %v3068_v30, %v3020_v16  ;;  %v3021_v20 = vpop.f32.mrf.mxu1  ;;  %v2973_v22 = vadd.f32 %v2972_v19, %v11179_v62  ;;  %v6810_v62 = vld [vmem:[%s12122_s0 + $0x2c8] sm:$0xf0] }
 0x2e9   :  { %v6813_v3 = vor.u32 %v8935_v12, %v6810_v62  ;;  %v6954_v19 = vld [vmem:[%s12122_s0 + $0x3e8] sm:$0xf0] }
 0x2ea   :  { %v11420_v23 = vadd.f32 %v3117_v18, %v3069_v51  ;;  %v11422_v24 = vadd.f32 %v3021_v20, %v2973_v22  ;;  %v6952_v18 = vld [vmem:[%s12122_s0 + $0x3a0] sm:$0xf]  ;;  %v8980_v51 = vld [vmem:[%s12122_s0 + $0x3e4] sm:$0xf0] }
 0x2eb   :  { %v6953_v20 = vor.u32 %v8980_v51, %v6952_v18 }
 0x2ef   :  { %v11436_v52 = vpop.f32.mrf.mxu2  ;;  %v2975_v47 = vpop.f32.mrf.mxu0 }
 0x2f0   :  { %v11438_v34 = vpop.f32.mrf.mxu3  ;;  %v3024_v25 = vpop.f32.mrf.mxu1  ;;  %v2976_v10 = vadd.f32 %v2975_v47, %v11194_v49  ;;  %v8962_v49 = vld [vmem:[%s12122_s0 + $0x354] sm:$0xf0]  ;;  %v7024_v47 = vld [vmem:[%s12122_s0 + $0x430] sm:$0xf] }
 0x2f1   :  { %v6881_v5 = vor.u32 %v8962_v49, %v6880_v39 }
 0x2f2   :  { %v3025_v0 = vadd.f32 %v3024_v25, %v2976_v10  ;;  %3170 = vmatmul.bf16.gmra.mxu0 %v6809_v4  ;;  %v8998_v25 = vld [vmem:[%s12122_s0 + $0x474] sm:$0xf0]  ;;  %v7026_v10 = vld [vmem:[%s12122_s0 + $0x478] sm:$0xf0] }
 0x2f3   :  { %3219 = vmatmul.bf16.gmra.mxu1 %v6813_v3 }
 0x2f7   :  { %v3073_v50 = vpop.f32.mrf.mxu2  ;;  %v11441_v31 = vpop.f32.mrf.mxu0 }
 0x2f8   :  { %v3122_v53 = vpop.f32.mrf.mxu3  ;;  %v3074_v26 = vadd.f32 %v3073_v50, %v3025_v0  ;;  %v11443_v54 = vpop.f32.mrf.mxu1  ;;  %v7025_v0 = vor.u32 %v8998_v25, %v7024_v47 }
 0x2fa   :  { %v11445_v57 = vadd.f32 %v3122_v53, %v3074_v26 }
 0x2ff   :  { %v2980_v63 = vpop.f32.mrf.mxu0 }
 0x300   :  { %v3029_v38 = vpop.f32.mrf.mxu1  ;;  %v2981_v17 = vadd.f32 %v2980_v63, %v11252_v37  ;;  %v8971_v37 = vld [vmem:[%s12122_s0 + $0x3a4] sm:$0xf] }
 0x301   :  { %v6957_v22 = vor.u32 %v8971_v37, %v6954_v19 }
 0x302   :  { %v11460_v15 = vadd.f32 %v3029_v38, %v2981_v17  ;;  %3175 = vmatmul.bf16.gmra.mxu0 %v6881_v5  ;;  %v3056_v38 = vadd.f32 %v11370_v48, %v11356_v11 }
 0x303   :  { %3224 = vmatmul.bf16.gmra.mxu1 %v6885_v13 }
 0x304   :  { %v3105_v18 = vadd.f32 %v11372_v55, %v3056_v38 }
 0x307   :  { %v11462_v16 = vpop.f32.mrf.mxu0 }
 0x308   :  { %v11464_v30 = vpop.f32.mrf.mxu1 }
 0x30f   :  { %v2985_v36 = vpop.f32.mrf.mxu0 }
 0x310   :  { %v3034_v35 = vpop.f32.mrf.mxu1  ;;  %v2986_v12 = vadd.f32 %v2985_v36, %v11298_v32  ;;  %v8989_v32 = vld [vmem:[%s12122_s0 + $0x434] sm:$0xf] }
 0x311   :  { %v7029_v50 = vor.u32 %v8989_v32, %v7026_v10 }
 0x312   :  { %v11479_v62 = vadd.f32 %v3034_v35, %v2986_v12  ;;  %3180 = vmatmul.bf16.gmra.mxu0 %v6953_v20 }
 0x313   :  { %3229 = vmatmul.bf16.gmra.mxu1 %v6957_v22 }
 0x317   :  { %v11481_v4 = vpop.f32.mrf.mxu0 }
 0x318   :  { %v11483_v3 = vpop.f32.mrf.mxu1 }
 0x31f   :  { %v2990_v53 = vpop.f32.mrf.mxu0 }
 0x320   :  { %v3039_v26 = vpop.f32.mrf.mxu1  ;;  %v2991_v39 = vadd.f32 %v2990_v53, %v11332_v42 }
 0x322   :  { %v11498_v49 = vadd.f32 %v3039_v26, %v2991_v39  ;;  %3185 = vmatmul.bf16.gmra.mxu0 %v7025_v0 }
 0x323   :  { %3234 = vmatmul.bf16.gmra.mxu1 %v7029_v50 }
 0x327   :  { %v11500_v45 = vpop.f32.mrf.mxu0 }
 0x328   :  { %v11502_v1 = vpop.f32.mrf.mxu1 }
 0x32f   :  { %v3151_v5 = vpop.f32.mrf.mxu0 }
 0x330   :  { %v3200_v13 = vpop.f32.mrf.mxu1  ;;  %v3152_v63 = vadd.f32 %v3151_v5, %v11354_v8  ;;  %v3061_v8 = vadd.f32 %v11392_v40, %v11378_v58  ;;  %v3066_v58 = vadd.f32 %v11414_v33, %v11400_v61  ;;  %v3071_v61 = vadd.f32 %v11436_v52, %v11422_v24  ;;  %v3075_v33 = vpop.f32.mrf.mxu2 }
 0x332   :  { %v3201_v17 = vadd.f32 %v3200_v13, %v3152_v63  ;;  %v3110_v48 = vadd.f32 %v11394_v43, %v3061_v8  ;;  %v3115_v43 = vadd.f32 %v11416_v41, %v3066_v58  ;;  %v2880_v41 = vadd.f32 %v11228_v2, %v11199_v21  ;;  %v3124_v8 = vpop.f32.mrf.mxu3 }
 0x334   :  { %v3240_v19 = vmul.f32 0.01, %v3201_v17 }
 0x336   :  { %v3256_v36 = vmax.f32 %v3201_v17, %v3240_v19 }
 0x337   :  { %v3153_v51 = vpop.f32.mrf.mxu0 }
 0x338   :  { %v3202_v42 = vpop.f32.mrf.mxu1  ;;  %v3154_v37 = vadd.f32 %v3153_v51, %v3105_v18 }
 0x33a   :  { %v3203_v20 = vadd.f32 %v3202_v42, %v3154_v37  ;;  %v3127_v2 = vpop.f32.mrf.mxu3 }
 0x33c   :  { %v3241_v22 = vmul.f32 0.01, %v3203_v20 }
 0x33e   :  { %v3257_v35 = vmax.f32 %v3203_v20, %v3241_v22 }
 0x33f   :  { %v3156_v12 = vpop.f32.mrf.mxu0 }
 0x340   :  { %v3205_v47 = vpop.f32.mrf.mxu1  ;;  %v3157_v25 = vadd.f32 %v3156_v12, %v11376_v28  ;;  %v11509_v32 = vpack.c.bf16 %v3257_v35, %v3256_v36 }
 0x342   :  { %v3206_v11 = vadd.f32 %v3205_v47, %v3157_v25  ;;  %v3120_v25 = vadd.f32 %v11438_v34, %v3071_v61 }
 0x344   :  { %v3242_v50 = vmul.f32 0.01, %v3206_v11 }
 0x346   :  { %v3258_v39 = vmax.f32 %v3206_v11, %v3242_v50 }
 0x347   :  { %v3158_v55 = vpop.f32.mrf.mxu0 }
 0x348   :  { %v3207_v10 = vpop.f32.mrf.mxu1  ;;  %v3159_v0 = vadd.f32 %v3158_v55, %v3110_v48 }
 0x34a   :  { %v3208_v53 = vadd.f32 %v3207_v10, %v3159_v0  ;;  %v2929_v10 = vadd.f32 %v11230_v9, %v2880_v41  ;;  %v2885_v9 = vadd.f32 %v11286_v60, %v11257_v29  ;;  %v2890_v41 = vadd.f32 %v11326_v56, %v11300_v14 }
 0x34c   :  { %v3243_v26 = vmul.f32 0.01, %v3208_v53  ;;  %v2978_v50 = vadd.f32 %v11441_v31, %v2929_v10 }
 0x34e   :  { %v3259_v5 = vmax.f32 %v3208_v53, %v3243_v26  ;;  %v3078_v53 = vpop.f32.mrf.mxu2  ;;  %v3027_v21 = vadd.f32 %v11443_v54, %v2978_v50 }
 0x34f   :  { %v3161_v13 = vpop.f32.mrf.mxu0 }
 0x350   :  { %v3210_v63 = vpop.f32.mrf.mxu1  ;;  %v3162_v28 = vadd.f32 %v3161_v13, %v11398_v59  ;;  %v11515_v38 = vpack.c.bf16 %v3259_v5, %v3258_v39 }
 0x352   :  { %v3211_v40 = vadd.f32 %v3210_v63, %v3162_v28  ;;  %v3076_v63 = vadd.f32 %v3075_v33, %v3027_v21 }
 0x354   :  { %v3244_v42 = vmul.f32 0.01, %v3211_v40  ;;  %v3125_v58 = vadd.f32 %v3124_v8, %v3076_v63 }
 0x356   :  { %v3260_v20 = vmax.f32 %v3211_v40, %v3244_v42  ;;  %v3080_v31 = vpop.f32.mrf.mxu2 }
 0x357   :  { %v3163_v17 = vpop.f32.mrf.mxu0 }
 0x358   :  { %v3212_v18 = vpop.f32.mrf.mxu1  ;;  %v3164_v51 = vadd.f32 %v3163_v17, %v3115_v43 }
 0x35a   :  { %v3213_v37 = vadd.f32 %v3212_v18, %v3164_v51  ;;  %v2934_v18 = vadd.f32 %v11288_v46, %v2885_v9  ;;  %v3129_v51 = vpop.f32.mrf.mxu3 }
 0x35c   :  { %v3245_v19 = vmul.f32 0.01, %v3213_v37 }
 0x35e   :  { %v3261_v22 = vmax.f32 %v3213_v37, %v3245_v19  ;;  %v3079_v37 = vadd.f32 %v3078_v53, %v11460_v15 }
 0x35f   :  { %v3166_v36 = vpop.f32.mrf.mxu0 }
 0x360   :  { %v3215_v35 = vpop.f32.mrf.mxu1  ;;  %v3167_v59 = vadd.f32 %v3166_v36, %v11420_v23  ;;  %v11521_v12 = vpack.c.bf16 %v3261_v22, %v3260_v20  ;;  %v3128_v60 = vadd.f32 %v3127_v2, %v3079_v37 }
 0x362   :  { %v3216_v47 = vadd.f32 %v3215_v35, %v3167_v59  ;;  %v3083_v59 = vpop.f32.mrf.mxu2 }
 0x364   :  { %v3246_v0 = vmul.f32 0.01, %v3216_v47 }
 0x366   :  { %v3262_v24 = vmax.f32 %v3216_v47, %v3246_v0  ;;  %v3132_v47 = vpop.f32.mrf.mxu3  ;;  %v3084_v0 = vadd.f32 %v3083_v59, %v11479_v62 }
 0x367   :  { %v3168_v11 = vpop.f32.mrf.mxu0 }
 0x368   :  { %v3217_v48 = vpop.f32.mrf.mxu1  ;;  %v3169_v55 = vadd.f32 %v3168_v11, %v3120_v25 }
 0x36a   :  { %v3218_v23 = vadd.f32 %v3217_v48, %v3169_v55  ;;  %v2939_v48 = vadd.f32 %v11328_v44, %v2890_v41  ;;  %v3085_v55 = vpop.f32.mrf.mxu2 }
 0x36c   :  { %v3247_v26 = vmul.f32 0.01, %v3218_v23 }
 0x36e   :  { %v3263_v52 = vmax.f32 %v3218_v23, %v3247_v26  ;;  %v2988_v23 = vadd.f32 %v11481_v4, %v2939_v48  ;;  %v3134_v53 = vpop.f32.mrf.mxu3  ;;  %v9170_v48 = vld [vmem:[%s12126_s4 + $0x18] sm:$0xff] }
 0x36f   :  { %v3171_v39 = vpop.f32.mrf.mxu0 }
 0x370   :  { %v3220_v5 = vpop.f32.mrf.mxu1  ;;  %v3172_v34 = vadd.f32 %v3171_v39, %v11445_v57  ;;  %v11532_v13 = vpack.c.bf16 %v3263_v52, %v3262_v24  ;;  %v2983_v57 = vadd.f32 %v11462_v16, %v2934_v18  ;;  %v3037_v56 = vadd.f32 %v11483_v3, %v2988_v23  ;;  %v9182_v23 = vld [vmem:[%s12126_s4 + $0x78] sm:$0xff] }
 0x371   :  { %v3133_v39 = vadd.f32 %v3132_v47, %v3084_v0  ;;  %v9167_v0 = vld [vmem:[%s12126_s4] sm:$0xff] }
 0x372   :  { %v3221_v28 = vadd.f32 %v3220_v5, %v3172_v34  ;;  %v3032_v29 = vadd.f32 %v11464_v30, %v2983_v57  ;;  %v3086_v21 = vadd.f32 %v3085_v55, %v3037_v56  ;;  %v3088_v44 = vpop.f32.mrf.mxu2  ;;  %v2895_v34 = vadd.f32 %v11348_v27, %v11334_v7  ;;  %v9169_v55 = vld [vmem:[%s12126_s4 + $0x10] sm:$0xff] }
 0x373   :  { %v3089_v3 = vadd.f32 %v3088_v44, %v11498_v49  ;;  %v9177_v56 = vld [vmem:[%s12126_s4 + $0x50] sm:$0xff]  ;;  %v9152_v44 = vld [vmem:[%s12125_s3 + $0x48] sm:$0xff] }
 0x374   :  { %v3248_v42 = vmul.f32 0.01, %v3221_v28  ;;  %v3081_v33 = vadd.f32 %v3080_v31, %v3032_v29  ;;  %v3135_v63 = vadd.f32 %v3134_v53, %v3086_v21  ;;  %v2944_v31 = vadd.f32 %v11350_v6, %v2895_v34  ;;  %v9180_v53 = vld [vmem:[%s12126_s4 + $0x68] sm:$0xff] }
 0x376   :  { %v3264_v20 = vmax.f32 %v3221_v28, %v3248_v42  ;;  %v3130_v15 = vadd.f32 %v3129_v51, %v3081_v33 }
 0x377   :  { %v3173_v40 = vpop.f32.mrf.mxu0 }
 0x378   :  { %v3222_v43 = vpop.f32.mrf.mxu1  ;;  %v3174_v17 = vadd.f32 %v3173_v40, %v3125_v58  ;;  %v3137_v58 = vpop.f32.mrf.mxu3 }
 0x379   :  { %v3138_v57 = vadd.f32 %v3137_v58, %v3089_v3  ;;  %v9189_v58 = vld [vmem:[%s12126_s4 + $0xb0] sm:$0xff] }
 0x37a   :  { %v3223_v54 = vadd.f32 %v3222_v43, %v3174_v17  ;;  %v2993_v17 = vadd.f32 %v11500_v45, %v2944_v31  ;;  %v3090_v51 = vpop.f32.mrf.mxu2 }
 0x37c   :  { %v3249_v19 = vmul.f32 0.01, %v3223_v54  ;;  %v3042_v27 = vadd.f32 %v11502_v1, %v2993_v17  ;;  %v9143_v1 = vld [vmem:[%s12125_s3] sm:$0xff]  ;;  %v9153_v17 = vld [vmem:[%s12125_s3 + $0x50] sm:$0xff] }
 0x37e   :  { %v3265_v22 = vmax.f32 %v3223_v54, %v3249_v19 }
 0x37f   :  { %v3176_v36 = vpop.f32.mrf.mxu0 }
 0x380   :  { %v3225_v35 = vpop.f32.mrf.mxu1  ;;  %v11540_v61 = vpack.c.bf16 %v3265_v22, %v3264_v20  ;;  %v3177_v46 = vadd.f32 %v3176_v36, %v3128_v60  ;;  %v3091_v20 = vadd.f32 %v3090_v51, %v3042_v27  ;;  %v3139_v36 = vpop.f32.mrf.mxu3 }
 0x382   :  { %v3226_v25 = vadd.f32 %v3225_v35, %v3177_v46  ;;  %v3140_v6 = vadd.f32 %v3139_v36, %v3091_v20 }
 0x384   :  { %v3250_v10 = vmul.f32 0.01, %v3226_v25 }
 0x386   :  { %v3266_v26 = vmax.f32 %v3226_v25, %v3250_v10  ;;  %v9173_v25 = vld [vmem:[%s12126_s4 + $0x30] sm:$0xff]  ;;  %v9168_v10 = vld [vmem:[%s12126_s4 + $0x8] sm:$0xff] }
 0x387   :  { %v3178_v16 = vpop.f32.mrf.mxu0 }
 0x388   :  { %v3227_v8 = vpop.f32.mrf.mxu1  ;;  %v3179_v11 = vadd.f32 %v3178_v16, %v3130_v15  ;;  %v9144_v15 = vld [vmem:[%s12125_s3 + $0x8] sm:$0xff] }
 0x389   :  { %v9172_v16 = vld [vmem:[%s12126_s4 + $0x28] sm:$0xff] }
 0x38a   :  { %v3228_v30 = vadd.f32 %v3227_v8, %v3179_v11  ;;  %v9171_v8 = vld [vmem:[%s12126_s4 + $0x20] sm:$0xff]  ;;  %v9149_v11 = vld [vmem:[%s12125_s3 + $0x30] sm:$0xff] }
 0x38c   :  { %v3251_v50 = vmul.f32 0.01, %v3228_v30 }
 0x38e   :  { %v3267_v24 = vmax.f32 %v3228_v30, %v3251_v50  ;;  %v9150_v30 = vld [vmem:[%s12125_s3 + $0x38] sm:$0xff]  ;;  %v9181_v50 = vld [vmem:[%s12126_s4 + $0x70] sm:$0xff] }
 0x38f   :  { %v3181_v52 = vpop.f32.mrf.mxu0 }
 0x390   :  { %v3230_v14 = vpop.f32.mrf.mxu1  ;;  %v3325_v5 = vpack.c.bf16 %v3267_v24, %v3266_v26  ;;  %v3182_v2 = vadd.f32 %v3181_v52, %v3133_v39  ;;  %v9151_v26 = vld [vmem:[%s12125_s3 + $0x40] sm:$0xff]  ;;  %v9178_v52 = vld [vmem:[%s12126_s4 + $0x58] sm:$0xff] }
 0x391   :  { %v9179_v24 = vld [vmem:[%s12126_s4 + $0x60] sm:$0xff] }
 0x392   :  { %v3231_v62 = vadd.f32 %v3230_v14, %v3182_v2 }
 0x394   :  { %v3252_v40 = vmul.f32 0.01, %v3231_v62 }
 0x396   :  { %v3268_v42 = vmax.f32 %v3231_v62, %v3252_v40  ;;  %v9175_v62 = vld [vmem:[%s12126_s4 + $0x40] sm:$0xff]  ;;  %v9188_v40 = vld [vmem:[%s12126_s4 + $0xa8] sm:$0xff] }
 0x397   :  { %v3183_v28 = vpop.f32.mrf.mxu0 }
 0x398   :  { %v3232_v4 = vpop.f32.mrf.mxu1  ;;  %v3184_v9 = vadd.f32 %v3183_v28, %v3135_v63 }
 0x39a   :  { %v3233_v43 = vadd.f32 %v3232_v4, %v3184_v9  ;;  %v9190_v4 = vld [vmem:[%s12126_s4 + $0xb8] sm:$0xff] }
 0x39c   :  { %v3253_v18 = vmul.f32 0.01, %v3233_v43 }
 0x39e   :  { %v3269_v54 = vmax.f32 %v3233_v43, %v3253_v18  ;;  %v9187_v18 = vld [vmem:[%s12126_s4 + $0xa0] sm:$0xff] }
 0x39f   :  { %v3186_v37 = vpop.f32.mrf.mxu0 }
 0x3a0   :  { %v3235_v7 = vpop.f32.mrf.mxu1  ;;  %v3326_v19 = vpack.c.bf16 %v3269_v54, %v3268_v42  ;;  %v3187_v22 = vadd.f32 %v3186_v37, %v3138_v57  ;;  %v9186_v42 = vld [vmem:[%s12126_s4 + $0x98] sm:$0xff]  ;;  %v9185_v37 = vld [vmem:[%s12126_s4 + $0x90] sm:$0xff]  ;;  %v9184_v57 = vld [vmem:[%s12126_s4 + $0x88] sm:$0xff] }
 0x3a2   :  { %v3236_v35 = vadd.f32 %v3235_v7, %v3187_v22  ;;  %v9154_v22 = vld [vmem:[%s12125_s3 + $0x58] sm:$0xff] }
 0x3a4   :  { %v3254_v59 = vmul.f32 0.01, %v3236_v35 }
 0x3a6   :  { %v3270_v46 = vmax.f32 %v3236_v35, %v3254_v59  ;;  %v9197_v59 = vld [vmem:[%s12126_s4 + $0xf0] sm:$0xff] }
 0x3a7   :  { %v3188_v29 = vpop.f32.mrf.mxu0 }
 0x3a8   :  { %v3189_v60 = vadd.f32 %v3188_v29, %v3140_v6  ;;  %v3237_v49 = vpop.f32.mrf.mxu1  ;;  %v9183_v6 = vld [vmem:[%s12126_s4 + $0x80] sm:$0xff]  ;;  %v9198_v29 = vld [vmem:[%s12126_s4 + $0xf8] sm:$0xff] }
 0x3aa   :  { %v3238_v45 = vadd.f32 %v3237_v49, %v3189_v60  ;;  %v9206_v60 = vld [vmem:[%s12126_s4 + $0x138] sm:$0xff] }
 0x3ab   :  { %4909 = vmatpush.bf16.msrb.mxu0 %v9206_v60 }
 0x3ac   :  { %v3255_v33 = vmul.f32 0.01, %v3238_v45 }
 0x3ae   :  { %v3271_v47 = vmax.f32 %v3238_v45, %v3255_v33  ;;  %v9205_v45 = vld [vmem:[%s12126_s4 + $0x130] sm:$0xff] }
 0x3af   :  { %4910 = vmatpush.bf16.msrb.mxu0 %v9205_v45 }
 0x3b0   :  { %v3327_v41 = vpack.c.bf16 %v3271_v47, %v3270_v46  ;;  %v9196_v46 = vld [vmem:[%s12126_s4 + $0xe8] sm:$0xff] }
 0x3b1   :  { %v9204_v47 = vld [vmem:[%s12126_s4 + $0x128] sm:$0xff] }
 0x3b2   :  { %3472 = vmatpush.bf16.msra.mxu2 %v3327_v41 }
 0x3b3   :  { %4911 = vmatpush.bf16.msrb.mxu0 %v9204_v47  ;;  %v9159_v47 = vld [vmem:[%s12125_s3 + $0x80] sm:$0xff] }
 0x3b6   :  { %3473 = vmatpush.bf16.msra.mxu2 %v3326_v19 }
 0x3ba   :  { %3474 = vmatpush.bf16.msra.mxu2 %v3325_v5  ;;  %v9176_v5 = vld [vmem:[%s12126_s4 + $0x48] sm:$0xff] }
 0x3be   :  { %3475 = vmatpush.bf16.msra.mxu2 %v11540_v61  ;;  %v9174_v61 = vld [vmem:[%s12126_s4 + $0x38] sm:$0xff] }
 0x3bf   :  { %4837 = vmatpush.bf16.msra.mxu3 %v9174_v61  ;;  %v9202_v61 = vld [vmem:[%s12126_s4 + $0x118] sm:$0xff] }
 0x3c2   :  { %3476 = vmatpush.bf16.msra.mxu2 %v11532_v13  ;;  %v9145_v13 = vld [vmem:[%s12125_s3 + $0x10] sm:$0xff] }
 0x3c3   :  { %4838 = vmatpush.bf16.msra.mxu3 %v9173_v25 }
 0x3c6   :  { %3477 = vmatpush.bf16.msra.mxu2 %v11521_v12  ;;  %v9148_v12 = vld [vmem:[%s12125_s3 + $0x28] sm:$0xff] }
 0x3c7   :  { %4839 = vmatpush.bf16.msra.mxu3 %v9172_v16  ;;  %v9193_v16 = vld [vmem:[%s12126_s4 + $0xd0] sm:$0xff] }
 0x3ca   :  { %3478 = vmatpush.bf16.msra.mxu2 %v11515_v38  ;;  %v9146_v38 = vld [vmem:[%s12125_s3 + $0x18] sm:$0xff] }
 0x3cb   :  { %4840 = vmatpush.bf16.msra.mxu3 %v9171_v8  ;;  %v9201_v8 = vld [vmem:[%s12126_s4 + $0x110] sm:$0xff] }
 0x3ce   :  { %3479 = vmatpush.bf16.msra.mxu2 %v11509_v32  ;;  %v9147_v32 = vld [vmem:[%s12125_s3 + $0x20] sm:$0xff] }
 0x3cf   :  { %4841 = vmatpush.bf16.msra.mxu3 %v9170_v48 }
 0x3d1   :  { %3480 = vmatmul.bf16.vlgmr.msra.gmra.mxu2 %v9143_v1 }
 0x3d3   :  { %4842 = vmatpush.bf16.msra.mxu3 %v9169_v55  ;;  %v9192_v55 = vld [vmem:[%s12126_s4 + $0xc8] sm:$0xff] }
 0x3d7   :  { %4843 = vmatpush.bf16.msra.mxu3 %v9168_v10  ;;  %v9214_v10 = vld [vmem:[%s12126_s4 + $0x178] sm:$0xff] }
 0x3d8   :  { %4927 = vmatpush.bf16.msrb.mxu1 %v9214_v10  ;;  %v9160_v10 = vld [vmem:[%s12125_s3 + $0x88] sm:$0xff] }
 0x3db   :  { %4844 = vmatpush.bf16.msra.mxu3 %v9167_v0 }
 0x3df   :  { %4855 = vmatpush.bf16.msrb.mxu3 %v9182_v23 }
 0x3e1   :  { %3485 = vmatmul.bf16.gmra.mxu2 %v9144_v15  ;;  %v9155_v15 = vld [vmem:[%s12125_s3 + $0x60] sm:$0xff] }
 0x3e3   :  { %4856 = vmatpush.bf16.msrb.mxu3 %v9181_v50  ;;  %v9156_v50 = vld [vmem:[%s12125_s3 + $0x68] sm:$0xff] }
 0x3e7   :  { %4857 = vmatpush.bf16.msrb.mxu3 %v9180_v53 }
 0x3eb   :  { %4858 = vmatpush.bf16.msrb.mxu3 %v9179_v24  ;;  %v9213_v24 = vld [vmem:[%s12126_s4 + $0x170] sm:$0xff] }
 0x3ec   :  { %4928 = vmatpush.bf16.msrb.mxu1 %v9213_v24 }
 0x3ef   :  { %4859 = vmatpush.bf16.msrb.mxu3 %v9178_v52  ;;  %v9199_v52 = vld [vmem:[%s12126_s4 + $0x100] sm:$0xff] }
 0x3f1   :  { %3490 = vmatmul.bf16.gmra.mxu2 %v9145_v13  ;;  %v9195_v13 = vld [vmem:[%s12126_s4 + $0xe0] sm:$0xff] }
 0x3f3   :  { %4860 = vmatpush.bf16.msrb.mxu3 %v9177_v56  ;;  %v9212_v56 = vld [vmem:[%s12126_s4 + $0x168] sm:$0xff] }
 0x3f4   :  { %4929 = vmatpush.bf16.msrb.mxu1 %v9212_v56 }
 0x3f7   :  { %4861 = vmatpush.bf16.msrb.mxu3 %v9176_v5  ;;  %v9211_v5 = vld [vmem:[%s12126_s4 + $0x160] sm:$0xff] }
 0x3f8   :  { %4930 = vmatpush.bf16.msrb.mxu1 %v9211_v5  ;;  %v9236_v5 = vld [vmem:[%s12126_s4 + $0x228] sm:$0xff] }
 0x3fb   :  { %4862 = vmatpush.bf16.msrb.mxu3 %v9175_v62  ;;  %v9209_v62 = vld [vmem:[%s12126_s4 + $0x150] sm:$0xff] }
 0x401   :  { %3495 = vmatmul.bf16.gmra.mxu2 %v9146_v38  ;;  %v9203_v38 = vld [vmem:[%s12126_s4 + $0x120] sm:$0xff] }
 0x402   :  { %4912 = vmatpush.bf16.msrb.mxu0 %v9203_v38 }
 0x406   :  { %4913 = vmatpush.bf16.msrb.mxu0 %v9202_v61 }
 0x40a   :  { %4914 = vmatpush.bf16.msrb.mxu0 %v9201_v8  ;;  %v9227_v8 = vld [vmem:[%s12126_s4 + $0x1e0] sm:$0xff] }
 0x411   :  { %3500 = vmatmul.bf16.gmra.mxu2 %v9147_v32 }
 0x421   :  { %3505 = vmatmul.bf16.gmra.mxu2 %v9148_v12  ;;  %v9194_v12 = vld [vmem:[%s12126_s4 + $0xd8] sm:$0xff] }
 0x431   :  { %3510 = vmatmul.bf16.gmra.mxu2 %v9149_v11 }
 0x441   :  { %3515 = vmatmul.bf16.gmra.mxu2 %v9150_v30  ;;  %v9200_v30 = vld [vmem:[%s12126_s4 + $0x108] sm:$0xff] }
 0x442   :  { %4915 = vmatpush.bf16.msrb.mxu0 %v9200_v30  ;;  %v9225_v30 = vld [vmem:[%s12126_s4 + $0x1d0] sm:$0xff] }
 0x446   :  { %4916 = vmatpush.bf16.msrb.mxu0 %v9199_v52  ;;  %v9223_v52 = vld [vmem:[%s12126_s4 + $0x1c0] sm:$0xff] }
 0x451   :  { %3520 = vmatmul.bf16.gmra.mxu2 %v9151_v26  ;;  %v9191_v26 = vld [vmem:[%s12126_s4 + $0xc0] sm:$0xff] }
 0x454   :  { %v3481_v14 = vpop.f32.mrf.mxu2 }
 0x455   :  { %v3601_v39 = vpack.c.bf16 %v3481_v14, %v3481_v14 }
 0x457   :  { %v3652_v34 = vunpack.c.l.b16 %v3601_v39 }
 0x45c   :  { %v3483_v21 = vpop.f32.mrf.mxu2 }
 0x45d   :  { %v3602_v2 = vpack.c.bf16 %v3483_v21, %v3483_v21 }
 0x45f   :  { %v3653_v63 = vunpack.c.l.b16 %v3602_v2  ;;  %v9210_v2 = vld [vmem:[%s12126_s4 + $0x158] sm:$0xff] }
 0x460   :  { %4931 = vmatpush.bf16.msrb.mxu1 %v9210_v2 }
 0x461   :  { %v3655_v28 = vpack.c.b16 %v3653_v63, %v3652_v34  ;;  %3525 = vmatmul.bf16.gmra.mxu2 %v9152_v44  ;;  %v9157_v63 = vld [vmem:[%s12125_s3 + $0x70] sm:$0xff] }
 0x463   :  { %4845 = vmatmul.bf16.vlgmr.msra.gmra.mxu3 %v3655_v28 }
 0x464   :  { %v3486_v9 = vpop.f32.mrf.mxu2  ;;  %4873 = vmatpush.bf16.msra.mxu3 %v9190_v4  ;;  %4932 = vmatpush.bf16.msrb.mxu1 %v9209_v62  ;;  %v9208_v4 = vld [vmem:[%s12126_s4 + $0x148] sm:$0xff] }
 0x465   :  { %v3603_v31 = vpack.c.bf16 %v3486_v9, %v3486_v9  ;;  %v9222_v9 = vld [vmem:[%s12126_s4 + $0x1b8] sm:$0xff] }
 0x467   :  { %v3654_v3 = vunpack.c.l.b16 %v3603_v31  ;;  %v9207_v31 = vld [vmem:[%s12126_s4 + $0x140] sm:$0xff] }
 0x468   :  { %4874 = vmatpush.bf16.msra.mxu3 %v9189_v58  ;;  %4933 = vmatpush.bf16.msrb.mxu1 %v9208_v4 }
 0x469   :  { %v3656_v51 = vpack.c.b16 %v3654_v3, %v3654_v3 }
 0x46c   :  { %v3488_v43 = vpop.f32.mrf.mxu2  ;;  %4875 = vmatpush.bf16.msra.mxu3 %v9188_v40  ;;  %v9221_v40 = vld [vmem:[%s12126_s4 + $0x1b0] sm:$0xff]  ;;  %4934 = vmatpush.bf16.msrb.mxu1 %v9207_v31 }
 0x46d   :  { %v3604_v27 = vpack.c.bf16 %v3488_v43, %v3488_v43 }
 0x46f   :  { %v3662_v36 = vunpack.c.l.b16 %v3604_v27 }
 0x470   :  { %4876 = vmatpush.bf16.msra.mxu3 %v9187_v18  ;;  %v9220_v18 = vld [vmem:[%s12126_s4 + $0x1a8] sm:$0xff] }
 0x471   :  { %3530 = vmatmul.bf16.gmra.mxu2 %v9153_v17 }
 0x473   :  { %4850 = vmatmul.bf16.gmra.mxu3 %v3656_v51 }
 0x474   :  { %v3491_v54 = vpop.f32.mrf.mxu2  ;;  %4877 = vmatpush.bf16.msra.mxu3 %v9186_v42 }
 0x475   :  { %v3605_v7 = vpack.c.bf16 %v3491_v54, %v3491_v54 }
 0x477   :  { %v3663_v20 = vunpack.c.l.b16 %v3605_v7 }
 0x478   :  { %4878 = vmatpush.bf16.msra.mxu3 %v9185_v37  ;;  %v9158_v37 = vld [vmem:[%s12125_s3 + $0x78] sm:$0xff] }
 0x479   :  { %v3665_v35 = vpack.c.b16 %v3663_v20, %v3662_v36  ;;  %v9218_v36 = vld [vmem:[%s12126_s4 + $0x198] sm:$0xff] }
 0x47c   :  { %v3493_v19 = vpop.f32.mrf.mxu2  ;;  %4879 = vmatpush.bf16.msra.mxu3 %v9184_v57 }
 0x47d   :  { %v3606_v33 = vpack.c.bf16 %v3493_v19, %v3493_v19  ;;  %v9219_v19 = vld [vmem:[%s12126_s4 + $0x1a0] sm:$0xff] }
 0x47f   :  { %v3664_v1 = vunpack.c.l.b16 %v3606_v33 }
 0x480   :  { %4880 = vmatpush.bf16.msra.mxu3 %v9183_v6 }
 0x481   :  { %3535 = vmatmul.bf16.gmra.mxu2 %v9154_v22  ;;  %v3666_v32 = vpack.c.b16 %v3664_v1, %v3664_v1  ;;  %v9229_v1 = vld [vmem:[%s12126_s4 + $0x1f0] sm:$0xff] }
 0x483   :  { %4863 = vmatmul.bf16.vlgmr.msrb.gmra.mxu3 %v3665_v35  ;;  %v9217_v35 = vld [vmem:[%s12126_s4 + $0x190] sm:$0xff] }
 0x484   :  { %v3496_v49 = vpop.f32.mrf.mxu2  ;;  %4891 = vmatpush.bf16.msrb.mxu3 %v9198_v29 }
 0x485   :  { %v3607_v48 = vpack.c.bf16 %v3496_v49, %v3496_v49  ;;  %v9216_v49 = vld [vmem:[%s12126_s4 + $0x188] sm:$0xff] }
 0x487   :  { %v3672_v53 = vunpack.c.l.b16 %v3607_v48  ;;  %v9226_v48 = vld [vmem:[%s12126_s4 + $0x1d8] sm:$0xff] }
 0x488   :  { %4892 = vmatpush.bf16.msrb.mxu3 %v9197_v59  ;;  %v9230_v59 = vld [vmem:[%s12126_s4 + $0x1f8] sm:$0xff] }
 0x489   :  { %4963 = vmatpush.bf16.msra.mxu0 %v9230_v59  ;;  %v9243_v59 = vld [vmem:[%s12126_s4 + $0x260] sm:$0xff] }
 0x48c   :  { %v3498_v41 = vpop.f32.mrf.mxu2  ;;  %4893 = vmatpush.bf16.msrb.mxu3 %v9196_v46 }
 0x48d   :  { %v3608_v11 = vpack.c.bf16 %v3498_v41, %v3498_v41  ;;  %v9215_v41 = vld [vmem:[%s12126_s4 + $0x180] sm:$0xff]  ;;  %4964 = vmatpush.bf16.msra.mxu0 %v9229_v1  ;;  %v9241_v1 = vld [vmem:[%s12126_s4 + $0x250] sm:$0xff] }
 0x48f   :  { %v3673_v23 = vunpack.c.l.b16 %v3608_v11 }
 0x490   :  { %4894 = vmatpush.bf16.msrb.mxu3 %v9195_v13 }
 0x491   :  { %3540 = vmatmul.bf16.gmra.mxu2 %v9155_v15  ;;  %v3675_v14 = vpack.c.b16 %v3673_v23, %v3672_v53  ;;  %v9224_v23 = vld [vmem:[%s12126_s4 + $0x1c8] sm:$0xff] }
 0x493   :  { %4868 = vmatmul.bf16.gmra.mxu3 %v3666_v32  ;;  %v9228_v32 = vld [vmem:[%s12126_s4 + $0x1e8] sm:$0xff] }
 0x494   :  { %v3501_v25 = vpop.f32.mrf.mxu2  ;;  %4895 = vmatpush.bf16.msrb.mxu3 %v9194_v12  ;;  %4965 = vmatpush.bf16.msra.mxu0 %v9228_v32 }
 0x495   :  { %v3609_v21 = vpack.c.bf16 %v3501_v25, %v3501_v25 }
 0x497   :  { %v3674_v34 = vunpack.c.l.b16 %v3609_v21 }
 0x498   :  { %4896 = vmatpush.bf16.msrb.mxu3 %v9193_v16  ;;  %4966 = vmatpush.bf16.msra.mxu0 %v9227_v8  ;;  %v9239_v8 = vld [vmem:[%s12126_s4 + $0x240] sm:$0xff] }
 0x499   :  { %v3676_v28 = vpack.c.b16 %v3674_v34, %v3674_v34 }
 0x49c   :  { %v3503_v0 = vpop.f32.mrf.mxu2  ;;  %4897 = vmatpush.bf16.msrb.mxu3 %v9192_v55  ;;  %4967 = vmatpush.bf16.msra.mxu0 %v9226_v48 }
 0x49d   :  { %v3610_v3 = vpack.c.bf16 %v3503_v0, %v3503_v0 }
 0x49f   :  { %v3682_v7 = vunpack.c.l.b16 %v3610_v3  ;;  %v9232_v3 = vld [vmem:[%s12126_s4 + $0x208] sm:$0xff] }
 0x4a0   :  { %4898 = vmatpush.bf16.msrb.mxu3 %v9191_v26  ;;  %4968 = vmatpush.bf16.msra.mxu0 %v9225_v30 }
 0x4a1   :  { %3545 = vmatmul.bf16.gmra.mxu2 %v9156_v50  ;;  %v9238_v50 = vld [vmem:[%s12126_s4 + $0x238] sm:$0xff] }
 0x4a2   :  { %4981 = vmatpush.bf16.msra.mxu1 %v9238_v50 }
 0x4a3   :  { %4881 = vmatmul.bf16.vlgmr.msra.gmra.mxu3 %v3675_v14  ;;  %v9237_v14 = vld [vmem:[%s12126_s4 + $0x230] sm:$0xff] }
 0x4a4   :  { %v3506_v39 = vpop.f32.mrf.mxu2  ;;  %4945 = vmatpush.bf16.msra.mxu3 %v9222_v9  ;;  %4969 = vmatpush.bf16.msra.mxu0 %v9224_v23  ;;  %v9234_v9 = vld [vmem:[%s12126_s4 + $0x218] sm:$0xff]  ;;  %v9164_v23 = vld [vmem:[%s12125_s3 + $0xa8] sm:$0xff] }
 0x4a5   :  { %v3611_v43 = vpack.c.bf16 %v3506_v39, %v3506_v39 }
 0x4a6   :  { %4982 = vmatpush.bf16.msra.mxu1 %v9237_v14  ;;  %v9250_v14 = vld [vmem:[%s12126_s4 + $0x298] sm:$0xff] }
 0x4a7   :  { %v3683_v42 = vunpack.c.l.b16 %v3611_v43 }
 0x4a8   :  { %4946 = vmatpush.bf16.msra.mxu3 %v9221_v40  ;;  %4970 = vmatpush.bf16.msra.mxu0 %v9223_v52  ;;  %v9233_v40 = vld [vmem:[%s12126_s4 + $0x210] sm:$0xff] }
 0x4a9   :  { %v3685_v20 = vpack.c.b16 %v3683_v42, %v3682_v7  ;;  %v9162_v42 = vld [vmem:[%s12125_s3 + $0x98] sm:$0xff]  ;;  %v9245_v7 = vld [vmem:[%s12126_s4 + $0x270] sm:$0xff] }
 0x4aa   :  { %4983 = vmatpush.bf16.msra.mxu1 %v9236_v5 }
 0x4ac   :  { %v3508_v44 = vpop.f32.mrf.mxu2  ;;  %4947 = vmatpush.bf16.msra.mxu3 %v9220_v18 }
 0x4ad   :  { %v3612_v29 = vpack.c.bf16 %v3508_v44, %v3508_v44  ;;  %v9161_v44 = vld [vmem:[%s12125_s3 + $0x90] sm:$0xff] }
 0x4af   :  { %v3684_v33 = vunpack.c.l.b16 %v3612_v29 }
 0x4b0   :  { %4948 = vmatpush.bf16.msra.mxu3 %v9219_v19 }
 0x4b1   :  { %3550 = vmatmul.bf16.gmra.mxu2 %v9157_v63  ;;  %v3686_v15 = vpack.c.b16 %v3684_v33, %v3684_v33  ;;  %v9242_v33 = vld [vmem:[%s12126_s4 + $0x258] sm:$0xff] }
 0x4b3   :  { %4886 = vmatmul.bf16.gmra.mxu3 %v3676_v28  ;;  %v9235_v28 = vld [vmem:[%s12126_s4 + $0x220] sm:$0xff] }
 0x4b4   :  { %v3511_v58 = vpop.f32.mrf.mxu2  ;;  %4949 = vmatpush.bf16.msra.mxu3 %v9218_v36  ;;  %4984 = vmatpush.bf16.msra.mxu1 %v9235_v28 }
 0x4b5   :  { %v3613_v17 = vpack.c.bf16 %v3511_v58, %v3511_v58 }
 0x4b7   :  { %v3692_v27 = vunpack.c.l.b16 %v3613_v17  ;;  %v9246_v17 = vld [vmem:[%s12126_s4 + $0x278] sm:$0xff] }
 0x4b8   :  { %4950 = vmatpush.bf16.msra.mxu3 %v9217_v35  ;;  %4985 = vmatpush.bf16.msra.mxu1 %v9234_v9 }
 0x4bc   :  { %v3513_v51 = vpop.f32.mrf.mxu2  ;;  %4951 = vmatpush.bf16.msra.mxu3 %v9216_v49  ;;  %4986 = vmatpush.bf16.msra.mxu1 %v9233_v40 }
 0x4bd   :  { %v3614_v54 = vpack.c.bf16 %v3513_v51, %v3513_v51 }
 0x4bf   :  { %v3693_v57 = vunpack.c.l.b16 %v3614_v54 }
 0x4c0   :  { %4952 = vmatpush.bf16.msra.mxu3 %v9215_v41  ;;  %4987 = vmatpush.bf16.msra.mxu1 %v9232_v3  ;;  %v9260_v3 = vld [vmem:[%s12126_s4 + $0x2e8] sm:$0xff] }
 0x4c1   :  { %v3695_v22 = vpack.c.b16 %v3693_v57, %v3692_v27  ;;  %3555 = vmatmul.bf16.gmra.mxu2 %v9158_v37  ;;  %v9231_v37 = vld [vmem:[%s12126_s4 + $0x200] sm:$0xff] }
 0x4c2   :  { %v11846_v27 = vld [vmem:[%s12127_s5] ss:$0 sm:$0xff] }
 0x4c3   :  { %4899 = vmatmul.bf16.vlgmr.msrb.gmra.mxu3 %v3685_v20  ;;  %4917 = vmatmul.bf16.vlgmr.msrb.gmra.mxu0 %v3695_v22  ;;  %v9244_v20 = vld [vmem:[%s12126_s4 + $0x268] sm:$0xff] }
 0x4c4   :  { %v3516_v6 = vpop.f32.mrf.mxu2  ;;  %4999 = vmatpush.bf16.msrb.mxu3 %v9246_v17  ;;  %4988 = vmatpush.bf16.msra.mxu1 %v9231_v37 }
 0x4c5   :  { %v3615_v60 = vpack.c.bf16 %v3516_v6, %v3516_v6 }
 0x4c7   :  { %v3694_v46 = vunpack.c.l.b16 %v3615_v60 }
 0x4c8   :  { %5000 = vmatpush.bf16.msrb.mxu3 %v9245_v7  ;;  %v9259_v7 = vld [vmem:[%s12126_s4 + $0x2e0] sm:$0xff] }
 0x4c9   :  { %v3696_v13 = vpack.c.b16 %v3694_v46, %v3694_v46 }
 0x4cc   :  { %v3518_v45 = vpop.f32.mrf.mxu2  ;;  %5001 = vmatpush.bf16.msrb.mxu3 %v9244_v20 }
 0x4cd   :  { %v3616_v38 = vpack.c.bf16 %v3518_v45, %v3518_v45 }
 0x4cf   :  { %v3702_v25 = vunpack.c.l.b16 %v3616_v38  ;;  %v9254_v38 = vld [vmem:[%s12126_s4 + $0x2b8] sm:$0xff] }
 0x4d0   :  { %5002 = vmatpush.bf16.msrb.mxu3 %v9243_v59  ;;  %5017 = vmatpush.bf16.msrb.mxu0 %v9254_v38 }
 0x4d1   :  { %3560 = vmatmul.bf16.gmra.mxu2 %v9159_v47  ;;  %v9163_v47 = vld [vmem:[%s12125_s3 + $0xa0] sm:$0xff] }
 0x4d3   :  { %4904 = vmatmul.bf16.gmra.mxu3 %v3686_v15  ;;  %4922 = vmatmul.bf16.gmra.mxu0 %v3696_v13  ;;  %v9240_v13 = vld [vmem:[%s12126_s4 + $0x248] sm:$0xff] }
 0x4d4   :  { %v3521_v12 = vpop.f32.mrf.mxu2  ;;  %5003 = vmatpush.bf16.msrb.mxu3 %v9242_v33 }
 0x4d5   :  { %v3617_v61 = vpack.c.bf16 %v3521_v12, %v3521_v12 }
 0x4d7   :  { %v3703_v16 = vunpack.c.l.b16 %v3617_v61 }
 0x4d8   :  { %5004 = vmatpush.bf16.msrb.mxu3 %v9241_v1  ;;  %v9269_v1 = vld [vmem:[%s12126_s4 + $0x330] sm:$0xff] }
 0x4d9   :  { %v3705_v11 = vpack.c.b16 %v3703_v16, %v3702_v25 }
 0x4db   :  { %4935 = vmatmul.bf16.vlgmr.msrb.gmra.mxu1 %v3705_v11  ;;  %v9253_v11 = vld [vmem:[%s12126_s4 + $0x2b0] sm:$0xff] }
 0x4dc   :  { %v3523_v55 = vpop.f32.mrf.mxu2  ;;  %5005 = vmatpush.bf16.msrb.mxu3 %v9240_v13  ;;  %5018 = vmatpush.bf16.msrb.mxu0 %v9253_v11 }
 0x4dd   :  { %v3618_v0 = vpack.c.bf16 %v3523_v55, %v3523_v55 }
 0x4df   :  { %v3704_v26 = vunpack.c.l.b16 %v3618_v0 }
 0x4e0   :  { %5006 = vmatpush.bf16.msrb.mxu3 %v9239_v8 }
 0x4e1   :  { %3565 = vmatmul.bf16.gmra.mxu2 %v9160_v10  ;;  %v3706_v56 = vpack.c.b16 %v3704_v26, %v3704_v26  ;;  %v9252_v10 = vld [vmem:[%s12126_s4 + $0x2a8] sm:$0xff] }
 0x4e2   :  { %5019 = vmatpush.bf16.msrb.mxu0 %v9252_v10 }
 0x4e4   :  { %v3526_v53 = vpop.f32.mrf.mxu2 }
 0x4e5   :  { %v3619_v39 = vpack.c.bf16 %v3526_v53, %v3526_v53 }
 0x4e6   :  { %v4846_v24 = vpop.f32.mrf.mxu3 }
 0x4e7   :  { %v3712_v63 = vunpack.c.l.b16 %v3619_v39  ;;  %v4847_v36 = vadd.f32 %v11846_v27, %v4846_v24  ;;  %v9251_v24 = vld [vmem:[%s12126_s4 + $0x2a0] sm:$0xff] }
 0x4e8   :  { %5020 = vmatpush.bf16.msrb.mxu0 %v9251_v24  ;;  %v9265_v24 = vld [vmem:[%s12126_s4 + $0x310] sm:$0xff] }
 0x4eb   :  { %4940 = vmatmul.bf16.gmra.mxu1 %v3706_v56 }
 0x4ec   :  { %v3528_v21 = vpop.f32.mrf.mxu2  ;;  %5021 = vmatpush.bf16.msrb.mxu0 %v9250_v14 }
 0x4ed   :  { %v3620_v2 = vpack.c.bf16 %v3528_v21, %v3528_v21  ;;  %v9249_v21 = vld [vmem:[%s12126_s4 + $0x290] sm:$0xff] }
 0x4ee   :  { %v11817_v34 = vpop.f32.mrf.mxu3 }
 0x4ef   :  { %v3713_v62 = vunpack.c.l.b16 %v3620_v2  ;;  %v4849_v13 = vadd.f32 %v11846_v27, %v11817_v34 }
 0x4f0   :  { %5022 = vmatpush.bf16.msrb.mxu0 %v9249_v21  ;;  %v9264_v21 = vld [vmem:[%s12126_s4 + $0x308] sm:$0xff] }
 0x4f1   :  { %v3715_v4 = vpack.c.b16 %v3713_v62, %v3712_v63  ;;  %3570 = vmatmul.bf16.gmra.mxu2 %v9161_v44  ;;  %v9248_v44 = vld [vmem:[%s12126_s4 + $0x288] sm:$0xff]  ;;  %v9262_v63 = vld [vmem:[%s12126_s4 + $0x2f8] sm:$0xff] }
 0x4f2   :  { %5035 = vmatpush.bf16.msrb.mxu1 %v9262_v63 }
 0x4f3   :  { %4953 = vmatmul.bf16.vlgmr.msra.gmra.mxu3 %v3715_v4  ;;  %v9165_v4 = vld [vmem:[%s12125_s3 + $0xb0] sm:$0xff] }
 0x4f4   :  { %v3531_v58 = vpop.f32.mrf.mxu2  ;;  %5023 = vmatpush.bf16.msrb.mxu0 %v9248_v44 }
 0x4f5   :  { %v3621_v43 = vpack.c.bf16 %v3531_v58, %v3531_v58  ;;  %v9247_v58 = vld [vmem:[%s12126_s4 + $0x280] sm:$0xff] }
 0x4f6   :  { %v4851_v31 = vpop.f32.mrf.mxu3 }
 0x4f7   :  { %v3714_v51 = vunpack.c.l.b16 %v3621_v43  ;;  %v4852_v12 = vadd.f32 %v11846_v27, %v4851_v31  ;;  %v9261_v31 = vld [vmem:[%s12126_s4 + $0x2f0] sm:$0xff]  ;;  %v9267_v27 = vld [vmem:[%s12126_s4 + $0x320] sm:$0xff] }
 0x4f8   :  { %5024 = vmatpush.bf16.msrb.mxu0 %v9247_v58  ;;  %5036 = vmatpush.bf16.msrb.mxu1 %v9261_v31 }
 0x4f9   :  { %v3716_v57 = vpack.c.b16 %v3714_v51, %v3714_v51 }
 0x4fc   :  { %v3533_v18 = vpop.f32.mrf.mxu2  ;;  %5037 = vmatpush.bf16.msrb.mxu1 %v9260_v3 }
 0x4fd   :  { %v3622_v19 = vpack.c.bf16 %v3533_v18, %v3533_v18 }
 0x4fe   :  { %v4853_v54 = vpop.f32.mrf.mxu3 }
 0x4ff   :  { %v3722_v29 = vunpack.c.l.b16 %v3622_v19  ;;  %v9258_v19 = vld [vmem:[%s12126_s4 + $0x2d8] sm:$0xff] }
 0x500   :  { %5038 = vmatpush.bf16.msrb.mxu1 %v9259_v7 }
 0x501   :  { %3575 = vmatmul.bf16.gmra.mxu2 %v9162_v42 }
 0x503   :  { %4958 = vmatmul.bf16.gmra.mxu3 %v3716_v57 }
 0x504   :  { %v3536_v22 = vpop.f32.mrf.mxu2  ;;  %5039 = vmatpush.bf16.msrb.mxu1 %v9258_v19 }
 0x505   :  { %v3623_v6 = vpack.c.bf16 %v3536_v22, %v3536_v22  ;;  %v9166_v22 = vld [vmem:[%s12125_s3 + $0xb8] sm:$0xff] }
 0x506   :  { %v4864_v35 = vpop.f32.mrf.mxu3 }
 0x507   :  { %v3723_v60 = vunpack.c.l.b16 %v3623_v6  ;;  %v4865_v49 = vadd.f32 %v4864_v35, %v4847_v36  ;;  %v9257_v6 = vld [vmem:[%s12126_s4 + $0x2d0] sm:$0xff] }
 0x508   :  { %5040 = vmatpush.bf16.msrb.mxu1 %v9257_v6  ;;  %v9272_v6 = vld [vmem:[%s12126_s4 + $0x348] sm:$0xff] }
 0x509   :  { %v3725_v45 = vpack.c.b16 %v3723_v60, %v3722_v29  ;;  %v9256_v60 = vld [vmem:[%s12126_s4 + $0x2c8] sm:$0xff] }
 0x50b   :  { %4971 = vmatmul.bf16.vlgmr.msra.gmra.mxu0 %v3725_v45 }
 0x50c   :  { %v3538_v46 = vpop.f32.mrf.mxu2  ;;  %5041 = vmatpush.bf16.msrb.mxu1 %v9256_v60 }
 0x50d   :  { %v3624_v15 = vpack.c.bf16 %v3538_v46, %v3538_v46 }
 0x50e   :  { %v11861_v41 = vpop.f32.mrf.mxu3 }
 0x50f   :  { %v3724_v61 = vunpack.c.l.b16 %v3624_v15 }
 0x511   :  { %3580 = vmatmul.bf16.gmra.mxu2 %v9163_v47  ;;  %v3726_v48 = vpack.c.b16 %v3724_v61, %v3724_v61  ;;  %v9255_v47 = vld [vmem:[%s12126_s4 + $0x2c0] sm:$0xff] }
 0x512   :  { %5042 = vmatpush.bf16.msrb.mxu1 %v9255_v47 }
 0x514   :  { %v3541_v32 = vpop.f32.mrf.mxu2 }
 0x515   :  { %v3625_v55 = vpack.c.bf16 %v3541_v32, %v3541_v32 }
 0x516   :  { %v4869_v25 = vpop.f32.mrf.mxu3 }
 0x517   :  { %v4870_v16 = vadd.f32 %v4869_v25, %v4852_v12  ;;  %v3732_v53 = vunpack.c.l.b16 %v3625_v55  ;;  %v4867_v12 = vadd.f32 %v11861_v41, %v4849_v13  ;;  %v9268_v25 = vld [vmem:[%s12126_s4 + $0x328] sm:$0xff] }
 0x51b   :  { %4976 = vmatmul.bf16.gmra.mxu0 %v3726_v48 }
 0x51c   :  { %v3543_v30 = vpop.f32.mrf.mxu2 }
 0x51d   :  { %v3626_v0 = vpack.c.bf16 %v3543_v30, %v3543_v30 }
 0x51e   :  { %v4871_v50 = vpop.f32.mrf.mxu3 }
 0x51f   :  { %v3733_v26 = vunpack.c.l.b16 %v3626_v0 }
 0x521   :  { %v3735_v52 = vpack.c.b16 %v3733_v26, %v3732_v53  ;;  %3585 = vmatmul.bf16.gmra.mxu2 %v9164_v23  ;;  %v9266_v23 = vld [vmem:[%s12126_s4 + $0x318] sm:$0xff] }
 0x523   :  { %4989 = vmatmul.bf16.vlgmr.msra.gmra.mxu1 %v3735_v52 }
 0x524   :  { %v3546_v56 = vpop.f32.mrf.mxu2 }
 0x525   :  { %v3627_v2 = vpack.c.bf16 %v3546_v56, %v3546_v56 }
 0x526   :  { %v4882_v39 = vpop.f32.mrf.mxu3 }
 0x527   :  { %v4883_v5 = vadd.f32 %v4882_v39, %v4865_v49  ;;  %v3734_v28 = vunpack.c.l.b16 %v3627_v2  ;;  %v9270_v49 = vld [vmem:[%s12126_s4 + $0x338] sm:$0xff] }
 0x528   :  { %5053 = vmatpush.bf16.msra.mxu3 %v9270_v49  ;;  %v9278_v2 = vld [vmem:[%s12126_s4 + $0x378] sm:$0xff] }
 0x529   :  { %v3736_v40 = vpack.c.b16 %v3734_v28, %v3734_v28  ;;  %5071 = vmatpush.bf16.msra.mxu0 %v9278_v2  ;;  %v9263_v28 = vld [vmem:[%s12126_s4 + $0x300] sm:$0xff] }
 0x52c   :  { %v3548_v62 = vpop.f32.mrf.mxu2  ;;  %5054 = vmatpush.bf16.msra.mxu3 %v9269_v1  ;;  %v9284_v1 = vld [vmem:[%s12126_s4 + $0x3a8] sm:$0xff] }
 0x52d   :  { %v3628_v43 = vpack.c.bf16 %v3548_v62, %v3548_v62 }
 0x52e   :  { %v4884_v9 = vpop.f32.mrf.mxu3 }
 0x52f   :  { %v3742_v42 = vunpack.c.l.b16 %v3628_v43  ;;  %v4885_v8 = vadd.f32 %v4884_v9, %v4867_v12  ;;  %v9276_v43 = vld [vmem:[%s12126_s4 + $0x368] sm:$0xff] }
 0x530   :  { %5055 = vmatpush.bf16.msra.mxu3 %v9268_v25  ;;  %v9283_v25 = vld [vmem:[%s12126_s4 + $0x3a0] sm:$0xff] }
 0x531   :  { %3590 = vmatmul.bf16.gmra.mxu2 %v9165_v4  ;;  %v9277_v4 = vld [vmem:[%s12126_s4 + $0x370] sm:$0xff] }
 0x532   :  { %5072 = vmatpush.bf16.msra.mxu0 %v9277_v4 }
 0x533   :  { %4994 = vmatmul.bf16.gmra.mxu1 %v3736_v40 }
 0x534   :  { %v3551_v17 = vpop.f32.mrf.mxu2  ;;  %5056 = vmatpush.bf16.msra.mxu3 %v9267_v27 }
 0x535   :  { %v3629_v18 = vpack.c.bf16 %v3551_v17, %v3551_v17 }
 0x536   :  { %v4887_v51 = vpop.f32.mrf.mxu3  ;;  %5073 = vmatpush.bf16.msra.mxu0 %v9276_v43 }
 0x537   :  { %v3743_v54 = vunpack.c.l.b16 %v3629_v18  ;;  %v4888_v37 = vadd.f32 %v4887_v51, %v4870_v16 }
 0x538   :  { %5057 = vmatpush.bf16.msra.mxu3 %v9266_v23 }
 0x539   :  { %v3745_v57 = vpack.c.b16 %v3743_v54, %v3742_v42  ;;  %v9275_v42 = vld [vmem:[%s12126_s4 + $0x360] sm:$0xff] }
 0x53a   :  { %5074 = vmatpush.bf16.msra.mxu0 %v9275_v42 }
 0x53b   :  { %5007 = vmatmul.bf16.vlgmr.msrb.gmra.mxu3 %v3745_v57  ;;  %v9274_v57 = vld [vmem:[%s12126_s4 + $0x358] sm:$0xff] }
 0x53c   :  { %v3553_v20 = vpop.f32.mrf.mxu2  ;;  %5058 = vmatpush.bf16.msra.mxu3 %v9265_v24  ;;  %v9293_v24 = vld [vmem:[%s12126_s4 + $0x3f0] sm:$0xff] }
 0x53d   :  { %v3630_v29 = vpack.c.bf16 %v3553_v20, %v3553_v20  ;;  %v9273_v20 = vld [vmem:[%s12126_s4 + $0x350] sm:$0xff] }
 0x53e   :  { %v4889_v36 = vpop.f32.mrf.mxu3  ;;  %5075 = vmatpush.bf16.msra.mxu0 %v9274_v57 }
 0x53f   :  { %v3744_v45 = vunpack.c.l.b16 %v3630_v29 }
 0x540   :  { %v4918_v35 = vpop.f32.mrf.mxu0  ;;  %5059 = vmatpush.bf16.msra.mxu3 %v9264_v21 }
 0x541   :  { %3595 = vmatmul.bf16.gmra.mxu2 %v9166_v22  ;;  %v3746_v38 = vpack.c.b16 %v3744_v45, %v3744_v45  ;;  %v9271_v45 = vld [vmem:[%s12126_s4 + $0x340] sm:$0xff] }
 0x542   :  { %5076 = vmatpush.bf16.msra.mxu0 %v9273_v20 }
 0x544   :  { %v3556_v59 = vpop.f32.mrf.mxu2  ;;  %5060 = vmatpush.bf16.msra.mxu3 %v9263_v28 }
 0x545   :  { %v3631_v61 = vpack.c.bf16 %v3556_v59, %v3556_v59 }
 0x546   :  { %v4900_v33 = vpop.f32.mrf.mxu3  ;;  %5077 = vmatpush.bf16.msra.mxu0 %v9272_v6 }
 0x547   :  { %v4901_v46 = vadd.f32 %v4900_v33, %v4883_v5  ;;  %v3752_v55 = vunpack.c.l.b16 %v3631_v61  ;;  %v9285_v33 = vld [vmem:[%s12126_s4 + $0x3b0] sm:$0xff] }
 0x548   :  { %v4920_v15 = vpop.f32.mrf.mxu0 }
 0x549   :  { %v4919_v32 = vadd.f32 %v4918_v35, %v4901_v46  ;;  %v9286_v35 = vld [vmem:[%s12126_s4 + $0x3b8] sm:$0xff] }
 0x54a   :  { %5089 = vmatpush.bf16.msra.mxu1 %v9286_v35  ;;  %5078 = vmatpush.bf16.msra.mxu0 %v9271_v45 }
 0x54b   :  { %5012 = vmatmul.bf16.gmra.mxu3 %v3746_v38 }
 0x54c   :  { %v3558_v16 = vpop.f32.mrf.mxu2 }
 0x54d   :  { %v3632_v11 = vpack.c.bf16 %v3558_v16, %v3558_v16 }
 0x54e   :  { %v4902_v48 = vpop.f32.mrf.mxu3  ;;  %5090 = vmatpush.bf16.msra.mxu1 %v9285_v33 }
 0x54f   :  { %v3753_v10 = vunpack.c.l.b16 %v3632_v11  ;;  %v4903_v34 = vadd.f32 %v4902_v48, %v4885_v8  ;;  %v9282_v8 = vld [vmem:[%s12126_s4 + $0x398] sm:$0xff] }
 0x550   :  { %v4923_v30 = vpop.f32.mrf.mxu0 }
 0x551   :  { %v3755_v41 = vpack.c.b16 %v3753_v10, %v3752_v55  ;;  %v4921_v0 = vadd.f32 %v4920_v15, %v4903_v34  ;;  %v9281_v10 = vld [vmem:[%s12126_s4 + $0x390] sm:$0xff] }
 0x552   :  { %5091 = vmatpush.bf16.msra.mxu1 %v9284_v1 }
 0x553   :  { %5025 = vmatmul.bf16.vlgmr.msrb.gmra.mxu0 %v3755_v41  ;;  %v9280_v41 = vld [vmem:[%s12126_s4 + $0x388] sm:$0xff] }
 0x554   :  { %v3561_v50 = vpop.f32.mrf.mxu2 }
 0x555   :  { %v3633_v56 = vpack.c.bf16 %v3561_v50, %v3561_v50 }
 0x556   :  { %v4905_v53 = vpop.f32.mrf.mxu3  ;;  %5092 = vmatpush.bf16.msra.mxu1 %v9283_v25 }
 0x557   :  { %v4906_v26 = vadd.f32 %v4905_v53, %v4888_v37  ;;  %v3754_v63 = vunpack.c.l.b16 %v3633_v56 }
 0x558   :  { %v4936_v52 = vpop.f32.mrf.mxu1  ;;  %v4925_v14 = vpop.f32.mrf.mxu0 }
 0x559   :  { %v4924_v39 = vadd.f32 %v4923_v30, %v4906_v26  ;;  %v4937_v5 = vadd.f32 %v4936_v52, %v4919_v32  ;;  %v3756_v58 = vpack.c.b16 %v3754_v63, %v3754_v63  ;;  %v9279_v26 = vld [vmem:[%s12126_s4 + $0x380] sm:$0xff] }
 0x55a   :  { %5093 = vmatpush.bf16.msra.mxu1 %v9282_v8 }
 0x55c   :  { %v3563_v44 = vpop.f32.mrf.mxu2 }
 0x55d   :  { %v3634_v40 = vpack.c.bf16 %v3563_v44, %v3563_v44 }
 0x55e   :  { %v4907_v62 = vpop.f32.mrf.mxu3  ;;  %5094 = vmatpush.bf16.msra.mxu1 %v9281_v10 }
 0x55f   :  { %v3762_v18 = vunpack.c.l.b16 %v3634_v40  ;;  %v9291_v62 = vld [vmem:[%s12126_s4 + $0x3e0] sm:$0xff]  ;;  %v9289_v40 = vld [vmem:[%s12126_s4 + $0x3d0] sm:$0xff] }
 0x560   :  { %v4938_v9 = vpop.f32.mrf.mxu1 }
 0x561   :  { %v4939_v31 = vadd.f32 %v4938_v9, %v4921_v0  ;;  %v9294_v0 = vld [vmem:[%s12126_s4 + $0x3f8] sm:$0xff] }
 0x562   :  { %5095 = vmatpush.bf16.msra.mxu1 %v9280_v41  ;;  %5107 = vmatpush.bf16.msrb.mxu3 %v9294_v0 }
 0x563   :  { %5030 = vmatmul.bf16.gmra.mxu0 %v3756_v58  ;;  %v9290_v58 = vld [vmem:[%s12126_s4 + $0x3d8] sm:$0xff] }
 0x564   :  { %v3566_v3 = vpop.f32.mrf.mxu2 }
 0x565   :  { %v3635_v17 = vpack.c.bf16 %v3566_v3, %v3566_v3 }
 0x566   :  { %5096 = vmatpush.bf16.msra.mxu1 %v9279_v26  ;;  %5108 = vmatpush.bf16.msrb.mxu3 %v9293_v24 }
 0x567   :  { %v3763_v51 = vunpack.c.l.b16 %v3635_v17 }
 0x568   :  { %v4941_v54 = vpop.f32.mrf.mxu1 }
 0x569   :  { %v3765_v37 = vpack.c.b16 %v3763_v51, %v3762_v18  ;;  %v4942_v7 = vadd.f32 %v4941_v54, %v4924_v39  ;;  %v9288_v51 = vld [vmem:[%s12126_s4 + $0x3c8] sm:$0xff] }
 0x56b   :  { %5043 = vmatmul.bf16.vlgmr.msrb.gmra.mxu1 %v3765_v37  ;;  %v9287_v37 = vld [vmem:[%s12126_s4 + $0x3c0] sm:$0xff] }
 0x56c   :  { %v3568_v19 = vpop.f32.mrf.mxu2 }
 0x56d   :  { %v3636_v36 = vpack.c.bf16 %v3568_v19, %v3568_v19 }
 0x56f   :  { %v3764_v60 = vunpack.c.l.b16 %v3636_v36 }
 0x570   :  { %v4943_v22 = vpop.f32.mrf.mxu1 }
 0x571   :  { %v3766_v46 = vpack.c.b16 %v3764_v60, %v3764_v60 }
 0x574   :  { %v3571_v29 = vpop.f32.mrf.mxu2 }
 0x575   :  { %v3637_v47 = vpack.c.bf16 %v3571_v29, %v3571_v29 }
 0x576   :  { %v4954_v49 = vpop.f32.mrf.mxu3 }
 0x577   :  { %v4955_v59 = vadd.f32 %v4954_v49, %v4937_v5  ;;  %v3772_v32 = vunpack.c.l.b16 %v3637_v47  ;;  %v9292_v5 = vld [vmem:[%s12126_s4 + $0x3e8] sm:$0xff] }
 0x578   :  { %5109 = vmatpush.bf16.msrb.mxu3 %v9292_v5 }
 0x57b   :  { %5048 = vmatmul.bf16.gmra.mxu1 %v3766_v46 }
 0x57c   :  { %v3573_v15 = vpop.f32.mrf.mxu2  ;;  %5110 = vmatpush.bf16.msrb.mxu3 %v9291_v62 }
 0x57d   :  { %v3638_v13 = vpack.c.bf16 %v3573_v15, %v3573_v15 }
 0x57e   :  { %v4956_v38 = vpop.f32.mrf.mxu3 }
 0x57f   :  { %v3773_v12 = vunpack.c.l.b16 %v3638_v13  ;;  %v4957_v61 = vadd.f32 %v4956_v38, %v4939_v31 }
 0x580   :  { %5111 = vmatpush.bf16.msrb.mxu3 %v9290_v58 }
 0x581   :  { %v3775_v16 = vpack.c.b16 %v3773_v12, %v3772_v32 }
 0x583   :  { %5061 = vmatmul.bf16.vlgmr.msra.gmra.mxu3 %v3775_v16 }
 0x584   :  { %v3576_v11 = vpop.f32.mrf.mxu2  ;;  %5112 = vmatpush.bf16.msrb.mxu3 %v9289_v40 }
 0x585   :  { %v3639_v27 = vpack.c.bf16 %v3576_v11, %v3576_v11 }
 0x586   :  { %v4959_v48 = vpop.f32.mrf.mxu3 }
 0x587   :  { %v4960_v55 = vadd.f32 %v4959_v48, %v4942_v7  ;;  %v3774_v50 = vunpack.c.l.b16 %v3639_v27 }
 0x588   :  { %v4972_v34 = vpop.f32.mrf.mxu0  ;;  %5113 = vmatpush.bf16.msrb.mxu3 %v9288_v51 }
 0x589   :  { %v4973_v30 = vadd.f32 %v4972_v34, %v4955_v59  ;;  %v3776_v14 = vpack.c.b16 %v3774_v50, %v3774_v50 }
 0x58c   :  { %v3578_v23 = vpop.f32.mrf.mxu2  ;;  %5114 = vmatpush.bf16.msrb.mxu3 %v9287_v37 }
 0x58d   :  { %v3640_v39 = vpack.c.bf16 %v3578_v23, %v3578_v23 }
 0x58e   :  { %v4961_v53 = vpop.f32.mrf.mxu3 }
 0x58f   :  { %v3782_v44 = vunpack.c.l.b16 %v3640_v39 }
 0x590   :  { %v4974_v52 = vpop.f32.mrf.mxu0 }
 0x591   :  { %v4975_v56 = vadd.f32 %v4974_v52, %v4957_v61 }
 0x593   :  { %5066 = vmatmul.bf16.gmra.mxu3 %v3776_v14 }
 0x594   :  { %v3581_v21 = vpop.f32.mrf.mxu2 }
 0x595   :  { %v3641_v2 = vpack.c.bf16 %v3581_v21, %v3581_v21 }
 0x597   :  { %v3783_v63 = vunpack.c.l.b16 %v3641_v2 }
 0x598   :  { %v4977_v28 = vpop.f32.mrf.mxu0 }
 0x599   :  { %v3785_v4 = vpack.c.b16 %v3783_v63, %v3782_v44  ;;  %v4978_v9 = vadd.f32 %v4977_v28, %v4960_v55 }
 0x59b   :  { %5079 = vmatmul.bf16.vlgmr.msra.gmra.mxu0 %v3785_v4 }
 0x59c   :  { %v3583_v31 = vpop.f32.mrf.mxu2 }
 0x59d   :  { %v3642_v17 = vpack.c.bf16 %v3583_v31, %v3583_v31 }
 0x59f   :  { %v3784_v54 = vunpack.c.l.b16 %v3642_v17 }
 0x5a0   :  { %v4990_v43 = vpop.f32.mrf.mxu1  ;;  %v4979_v3 = vpop.f32.mrf.mxu0 }
 0x5a1   :  { %v4991_v18 = vadd.f32 %v4990_v43, %v4973_v30  ;;  %v3786_v57 = vpack.c.b16 %v3784_v54, %v3784_v54 }
 0x5a4   :  { %v3586_v42 = vpop.f32.mrf.mxu2 }
 0x5a5   :  { %v3643_v20 = vpack.c.bf16 %v3586_v42, %v3586_v42 }
 0x5a7   :  { %v3792_v6 = vunpack.c.l.b16 %v3643_v20 }
 0x5a8   :  { %v4992_v7 = vpop.f32.mrf.mxu1 }
 0x5a9   :  { %v4993_v19 = vadd.f32 %v4992_v7, %v4975_v56 }
 0x5ab   :  { %5084 = vmatmul.bf16.gmra.mxu0 %v3786_v57 }
 0x5ac   :  { %v3588_v22 = vpop.f32.mrf.mxu2 }
 0x5ad   :  { %v3644_v36 = vpack.c.bf16 %v3588_v22, %v3588_v22 }
 0x5af   :  { %v3793_v35 = vunpack.c.l.b16 %v3644_v36 }
 0x5b0   :  { %v4995_v29 = vpop.f32.mrf.mxu1 }
 0x5b1   :  { %v3795_v60 = vpack.c.b16 %v3793_v35, %v3792_v6  ;;  %v4996_v49 = vadd.f32 %v4995_v29, %v4978_v9 }
 0x5b3   :  { %5097 = vmatmul.bf16.vlgmr.msra.gmra.mxu1 %v3795_v60 }
 0x5b4   :  { %v3591_v59 = vpop.f32.mrf.mxu2 }
 0x5b5   :  { %v3645_v33 = vpack.c.bf16 %v3591_v59, %v3591_v59 }
 0x5b7   :  { %v3794_v47 = vunpack.c.l.b16 %v3645_v33 }
 0x5b8   :  { %v4997_v45 = vpop.f32.mrf.mxu1 }
 0x5b9   :  { %v3796_v13 = vpack.c.b16 %v3794_v47, %v3794_v47 }
 0x5bc   :  { %v3593_v46 = vpop.f32.mrf.mxu2 }
 0x5bd   :  { %v3646_v38 = vpack.c.bf16 %v3593_v46, %v3593_v46 }
 0x5be   :  { %v5008_v1 = vpop.f32.mrf.mxu3 }
 0x5bf   :  { %v5009_v15 = vadd.f32 %v5008_v1, %v4991_v18  ;;  %v3802_v25 = vunpack.c.l.b16 %v3646_v38 }
 0x5c3   :  { %5102 = vmatmul.bf16.gmra.mxu1 %v3796_v13 }
 0x5c4   :  { %v3596_v32 = vpop.f32.mrf.mxu2 }
 0x5c5   :  { %v3647_v12 = vpack.c.bf16 %v3596_v32, %v3596_v32 }
 0x5c6   :  { %v5010_v61 = vpop.f32.mrf.mxu3 }
 0x5c7   :  { %v3803_v16 = vunpack.c.l.b16 %v3647_v12  ;;  %v5011_v8 = vadd.f32 %v5010_v61, %v4993_v19 }
 0x5c9   :  { %v3805_v11 = vpack.c.b16 %v3803_v16, %v3802_v25 }
 0x5cb   :  { %5115 = vmatmul.bf16.vlgmr.msrb.gmra.mxu3 %v3805_v11 }
 0x5cc   :  { %v3598_v55 = vpop.f32.mrf.mxu2 }
 0x5cd   :  { %v3648_v30 = vpack.c.bf16 %v3598_v55, %v3598_v55 }
 0x5ce   :  { %v5013_v48 = vpop.f32.mrf.mxu3 }
 0x5cf   :  { %v5014_v10 = vadd.f32 %v5013_v48, %v4996_v49  ;;  %v3804_v41 = vunpack.c.l.b16 %v3648_v30 }
 0x5d0   :  { %v5026_v34 = vpop.f32.mrf.mxu0 }
 0x5d1   :  { %v5027_v27 = vadd.f32 %v5026_v34, %v5009_v15  ;;  %v3806_v50 = vpack.c.b16 %v3804_v41, %v3804_v41 }
 0x5d6   :  { %v5015_v0 = vpop.f32.mrf.mxu3 }
 0x5d8   :  { %v5028_v23 = vpop.f32.mrf.mxu0 }
 0x5d9   :  { %v5029_v53 = vadd.f32 %v5028_v23, %v5011_v8 }
 0x5db   :  { %5120 = vmatmul.bf16.gmra.mxu3 %v3806_v50 }
 0x5e0   :  { %v5031_v26 = vpop.f32.mrf.mxu0 }
 0x5e1   :  { %v5032_v24 = vadd.f32 %v5031_v26, %v5014_v10 }
 0x5e8   :  { %v5044_v52 = vpop.f32.mrf.mxu1  ;;  %v5033_v14 = vpop.f32.mrf.mxu0 }
 0x5e9   :  { %v5045_v56 = vadd.f32 %v5044_v52, %v5027_v27 }
 0x5f0   :  { %v5046_v39 = vpop.f32.mrf.mxu1 }
 0x5f1   :  { %v5047_v5 = vadd.f32 %v5046_v39, %v5029_v53 }
 0x5f8   :  { %v5049_v21 = vpop.f32.mrf.mxu1 }
 0x5f9   :  { %v5050_v2 = vadd.f32 %v5049_v21, %v5032_v24 }
 0x600   :  { %v5051_v44 = vpop.f32.mrf.mxu1 }
 0x606   :  { %v5062_v63 = vpop.f32.mrf.mxu3 }
 0x607   :  { %v5063_v62 = vadd.f32 %v5062_v63, %v5045_v56 }
 0x60e   :  { %v5064_v28 = vpop.f32.mrf.mxu3 }
 0x60f   :  { %v5065_v4 = vadd.f32 %v5064_v28, %v5047_v5 }
 0x616   :  { %v5067_v9 = vpop.f32.mrf.mxu3 }
 0x617   :  { %v5068_v58 = vadd.f32 %v5067_v9, %v5050_v2 }
 0x618   :  { %v5080_v31 = vpop.f32.mrf.mxu0 }
 0x619   :  { %v5081_v40 = vadd.f32 %v5080_v31, %v5063_v62 }
 0x61e   :  { %v5069_v43 = vpop.f32.mrf.mxu3 }
 0x620   :  { %v5082_v3 = vpop.f32.mrf.mxu0 }
 0x621   :  { %v5083_v22 = vadd.f32 %v5082_v3, %v5065_v4 }
 0x628   :  { %v5085_v17 = vpop.f32.mrf.mxu0 }
 0x629   :  { %v5086_v15 = vadd.f32 %v5085_v17, %v5068_v58 }
 0x630   :  { %v5098_v18 = vpop.f32.mrf.mxu1  ;;  %v5087_v51 = vpop.f32.mrf.mxu0 }
 0x631   :  { %v5099_v7 = vadd.f32 %v5098_v18, %v5081_v40 }
 0x638   :  { %v5100_v42 = vpop.f32.mrf.mxu1 }
 0x639   :  { %v5101_v6 = vadd.f32 %v5100_v42, %v5083_v22 }
 0x640   :  { %v5103_v54 = vpop.f32.mrf.mxu1 }
 0x641   :  { %v5104_v38 = vadd.f32 %v5103_v54, %v5086_v15 }
 0x648   :  { %v5105_v37 = vpop.f32.mrf.mxu1 }
 0x64e   :  { %v5116_v57 = vpop.f32.mrf.mxu3 }
 0x64f   :  { %v5117_v19 = vadd.f32 %v5116_v57, %v5099_v7 }
 0x651   :  { %v5125_v20 = vmul.f32 0.01, %v5117_v19 }
 0x653   :  { %v5128_v36 = vmax.f32 %v5117_v19, %v5125_v20 }
 0x655   :  { %v5132_v35 = vrot.slane %v5128_v36, 2  ;;  %v5134_v29 = vrot.slane %v5128_v36, 4  ;;  %v5136_v60 = vrot.slane %v5128_v36, 6  ;;  %v12029_v49 = vpack.c.bf16 %v5128_v36, %v5128_v36 }
 0x656   :  { %v5118_v59 = vpop.f32.mrf.mxu3 }
 0x657   :  { %v12031_v45 = vpack.c.bf16 %v5132_v35, %v5132_v35  ;;  %v12033_v33 = vpack.c.bf16 %v5134_v29, %v5134_v29  ;;  %v12035_v46 = vpack.c.bf16 %v5136_v60, %v5136_v60  ;;  %v5119_v47 = vadd.f32 %v5118_v59, %v5101_v6 }
 0x659   :  { %v5126_v1 = vmul.f32 0.01, %v5119_v47 }
 0x65b   :  { %v5129_v13 = vmax.f32 %v5119_v47, %v5126_v1 }
 0x65d   :  { %v5139_v32 = vrot.slane %v5129_v13, 2  ;;  %v5141_v12 = vrot.slane %v5129_v13, 4  ;;  %v5143_v61 = vrot.slane %v5129_v13, 6  ;;  %v12037_v25 = vpack.c.bf16 %v5129_v13, %v5129_v13 }
 0x65e   :  { %v5121_v16 = vpop.f32.mrf.mxu3 }
 0x65f   :  { %v12039_v8 = vpack.c.bf16 %v5139_v32, %v5139_v32  ;;  %v12041_v11 = vpack.c.bf16 %v5141_v12, %v5141_v12  ;;  %v12043_v48 = vpack.c.bf16 %v5143_v61, %v5143_v61  ;;  %v5122_v55 = vadd.f32 %v5121_v16, %v5104_v38 }
 0x661   :  { %v5127_v10 = vmul.f32 0.01, %v5122_v55 }
 0x663   :  { %v5130_v34 = vmax.f32 %v5122_v55, %v5127_v10 }
 0x665   :  { %v12045_v27 = vpack.c.bf16 %v5130_v34, %v5130_v34 }
 0x666   :  { %v5123_v30 = vpop.f32.mrf.mxu3 }
 0x667   :  { %9483 = dma.done.wait [#allocation3], 18432 }
 0x668   :  { %9484 = vsyncadd [#allocation3], 4294948864  ;;  %v8272_v41 = vld [vmem:[#allocation2 + $0x70] sm:$0xf]  ;;  %v9310_v0 = vld [vmem:[#allocation2 + $0x74] sm:$0xf0] }
 0x669   :  { %v8336_v23 = vld [vmem:[#allocation2 + $0xf0] sm:$0xf]  ;;  %v8273_v50 = vor.u32 %v9310_v0, %v8272_v41  ;;  %v9326_v53 = vld [vmem:[#allocation2 + $0xf4] sm:$0xf0]  ;;  %v8264_v56 = vld [vmem:[#allocation2 + $0x60] sm:$0xf] }
 0x66a   :  { %v8400_v26 = vld [vmem:[#allocation2 + $0x170] sm:$0xf]  ;;  %v9342_v24 = vld [vmem:[#allocation2 + $0x174] sm:$0xf0]  ;;  %v8337_v52 = vor.u32 %v9326_v53, %v8336_v23  ;;  %v9308_v39 = vld [vmem:[#allocation2 + $0x64] sm:$0xf0] }
 0x66b   :  { %v8401_v14 = vor.u32 %v9342_v24, %v8400_v26  ;;  %v8328_v5 = vld [vmem:[#allocation2 + $0xe0] sm:$0xf]  ;;  %6028 = vmatpush.bf16.msrb.mxu0 %v8273_v50  ;;  %v8265_v21 = vor.u32 %v9308_v39, %v8264_v56  ;;  %v9324_v2 = vld [vmem:[#allocation2 + $0xe4] sm:$0xf0]  ;;  %v8256_v4 = vld [vmem:[#allocation2 + $0x50] sm:$0xf] }
 0x66c   :  { %v8392_v44 = vld [vmem:[#allocation2 + $0x160] sm:$0xf]  ;;  %v9340_v63 = vld [vmem:[#allocation2 + $0x164] sm:$0xf0]  ;;  %6041 = vmatpush.bf16.msrb.mxu1 %v8337_v52  ;;  %v8329_v62 = vor.u32 %v9324_v2, %v8328_v5  ;;  %v9306_v9 = vld [vmem:[#allocation2 + $0x54] sm:$0xf0] }
 0x66d   :  { %6054 = vmatpush.bf16.msra.mxu3 %v8401_v14  ;;  %v8393_v28 = vor.u32 %v9340_v63, %v8392_v44  ;;  %v8320_v58 = vld [vmem:[#allocation2 + $0xd0] sm:$0xf]  ;;  %v9322_v31 = vld [vmem:[#allocation2 + $0xd4] sm:$0xf0]  ;;  %v8257_v3 = vor.u32 %v9306_v9, %v8256_v4  ;;  %v8248_v51 = vld [vmem:[#allocation2 + $0x40] sm:$0xf] }
 0x66e   :  { %v8384_v40 = vld [vmem:[#allocation2 + $0x150] sm:$0xf]  ;;  %v9338_v43 = vld [vmem:[#allocation2 + $0x154] sm:$0xf0]  ;;  %v8321_v17 = vor.u32 %v9322_v31, %v8320_v58  ;;  %v9304_v42 = vld [vmem:[#allocation2 + $0x44] sm:$0xf0] }
 0x66f   :  { %6029 = vmatpush.bf16.msrb.mxu0 %v8265_v21  ;;  %v8385_v18 = vor.u32 %v9338_v43, %v8384_v40  ;;  %v8312_v54 = vld [vmem:[#allocation2 + $0xc0] sm:$0xf]  ;;  %v9320_v37 = vld [vmem:[#allocation2 + $0xc4] sm:$0xf0]  ;;  %v8249_v19 = vor.u32 %v9304_v42, %v8248_v51  ;;  %v8240_v36 = vld [vmem:[#allocation2 + $0x30] sm:$0xf] }
 0x670   :  { %6042 = vmatpush.bf16.msrb.mxu1 %v8329_v62  ;;  %v8376_v7 = vld [vmem:[#allocation2 + $0x140] sm:$0xf]  ;;  %v9336_v57 = vld [vmem:[#allocation2 + $0x144] sm:$0xf0]  ;;  %v8313_v20 = vor.u32 %v9320_v37, %v8312_v54  ;;  %v9302_v6 = vld [vmem:[#allocation2 + $0x34] sm:$0xf0] }
 0x671   :  { %6055 = vmatpush.bf16.msra.mxu3 %v8393_v28  ;;  %v8377_v22 = vor.u32 %v9336_v57, %v8376_v7  ;;  %v8304_v35 = vld [vmem:[#allocation2 + $0xb0] sm:$0xf]  ;;  %v9318_v29 = vld [vmem:[#allocation2 + $0xb4] sm:$0xf0]  ;;  %v8241_v47 = vor.u32 %v9302_v6, %v8240_v36  ;;  %v8232_v13 = vld [vmem:[#allocation2 + $0x20] sm:$0xf] }
 0x672   :  { %v8368_v60 = vld [vmem:[#allocation2 + $0x130] sm:$0xf]  ;;  %v9334_v59 = vld [vmem:[#allocation2 + $0x134] sm:$0xf0]  ;;  %v8305_v1 = vor.u32 %v9318_v29, %v8304_v35  ;;  %v9300_v38 = vld [vmem:[#allocation2 + $0x24] sm:$0xf0] }
 0x673   :  { %6030 = vmatpush.bf16.msrb.mxu0 %v8257_v3  ;;  %v8369_v15 = vor.u32 %v9334_v59, %v8368_v60  ;;  %v8296_v32 = vld [vmem:[#allocation2 + $0xa0] sm:$0xf]  ;;  %v9316_v12 = vld [vmem:[#allocation2 + $0xa4] sm:$0xf0]  ;;  %v8233_v55 = vor.u32 %v9300_v38, %v8232_v13  ;;  %v8224_v30 = vld [vmem:[#allocation2 + $0x10] sm:$0xf] }
 0x674   :  { %6043 = vmatpush.bf16.msrb.mxu1 %v8321_v17  ;;  %v8360_v61 = vld [vmem:[#allocation2 + $0x120] sm:$0xf]  ;;  %v9332_v16 = vld [vmem:[#allocation2 + $0x124] sm:$0xf0]  ;;  %v8297_v10 = vor.u32 %v9316_v12, %v8296_v32  ;;  %v9298_v41 = vld [vmem:[#allocation2 + $0x14] sm:$0xf0] }
 0x675   :  { %6056 = vmatpush.bf16.msra.mxu3 %v8385_v18  ;;  %v8361_v34 = vor.u32 %v9332_v16, %v8360_v61  ;;  %v8288_v0 = vld [vmem:[#allocation2 + $0x90] sm:$0xf]  ;;  %v9314_v23 = vld [vmem:[#allocation2 + $0x94] sm:$0xf0]  ;;  %v8225_v26 = vor.u32 %v9298_v41, %v8224_v30  ;;  %v8216_v24 = vld [vmem:[#allocation2] sm:$0xf] }
 0x676   :  { %v8352_v50 = vld [vmem:[#allocation2 + $0x110] sm:$0xf]  ;;  %v9330_v53 = vld [vmem:[#allocation2 + $0x114] sm:$0xf0]  ;;  %v8289_v52 = vor.u32 %v9314_v23, %v8288_v0  ;;  %v9296_v56 = vld [vmem:[#allocation2 + $0x4] sm:$0xf0] }
 0x677   :  { %6031 = vmatpush.bf16.msrb.mxu0 %v8249_v19  ;;  %v8353_v14 = vor.u32 %v9330_v53, %v8352_v50  ;;  %v8280_v39 = vld [vmem:[#allocation2 + $0x80] sm:$0xf]  ;;  %v9312_v5 = vld [vmem:[#allocation2 + $0x84] sm:$0xf0]  ;;  %v8464_v44 = vld [vmem:[#allocation2 + $0x1f0] sm:$0xf]  ;;  %v8217_v4 = vor.u32 %v9296_v56, %v8216_v24 }
 0x678   :  { %6044 = vmatpush.bf16.msrb.mxu1 %v8313_v20  ;;  %v8344_v21 = vld [vmem:[#allocation2 + $0x100] sm:$0xf]  ;;  %v9328_v2 = vld [vmem:[#allocation2 + $0x104] sm:$0xf0]  ;;  %v9358_v63 = vld [vmem:[#allocation2 + $0x1f4] sm:$0xf0]  ;;  %v8281_v31 = vor.u32 %v9312_v5, %v8280_v39 }
 0x679   :  { %6057 = vmatpush.bf16.msra.mxu3 %v8377_v22  ;;  %v8528_v62 = vld [vmem:[#allocation2 + $0x270] sm:$0xf]  ;;  %v9374_v28 = vld [vmem:[#allocation2 + $0x274] sm:$0xf0]  ;;  %v8345_v40 = vor.u32 %v9328_v2, %v8344_v21  ;;  %v8465_v43 = vor.u32 %v9358_v63, %v8464_v44  ;;  %v8456_v17 = vld [vmem:[#allocation2 + $0x1e0] sm:$0xf] }
 0x67a   :  { %v8592_v9 = vld [vmem:[#allocation2 + $0x2f0] sm:$0xf]  ;;  %v9390_v58 = vld [vmem:[#allocation2 + $0x2f4] sm:$0xf0]  ;;  %v8529_v3 = vor.u32 %v9374_v28, %v8528_v62  ;;  %v9356_v51 = vld [vmem:[#allocation2 + $0x1e4] sm:$0xf0] }
 0x67b   :  { %6032 = vmatpush.bf16.msrb.mxu0 %v8241_v47  ;;  %v8593_v18 = vor.u32 %v9390_v58, %v8592_v9  ;;  %v8520_v42 = vld [vmem:[#allocation2 + $0x260] sm:$0xf]  ;;  %v9372_v54 = vld [vmem:[#allocation2 + $0x264] sm:$0xf0]  ;;  %v8457_v57 = vor.u32 %v9356_v51, %v8456_v17  ;;  %v8448_v20 = vld [vmem:[#allocation2 + $0x1d0] sm:$0xf] }
 0x67c   :  { %6045 = vmatpush.bf16.msrb.mxu1 %v8305_v1  ;;  %v8584_v37 = vld [vmem:[#allocation2 + $0x2e0] sm:$0xf]  ;;  %v9388_v7 = vld [vmem:[#allocation2 + $0x2e4] sm:$0xf0]  ;;  %v8521_v19 = vor.u32 %v9372_v54, %v8520_v42  ;;  %v9354_v36 = vld [vmem:[#allocation2 + $0x1d4] sm:$0xf0] }
 0x67d   :  { %6058 = vmatpush.bf16.msra.mxu3 %v8369_v15  ;;  %v8585_v22 = vor.u32 %v9388_v7, %v8584_v37  ;;  %v8512_v6 = vld [vmem:[#allocation2 + $0x250] sm:$0xf]  ;;  %v9370_v35 = vld [vmem:[#allocation2 + $0x254] sm:$0xf0]  ;;  %v8449_v59 = vor.u32 %v9354_v36, %v8448_v20  ;;  %v8440_v1 = vld [vmem:[#allocation2 + $0x1c0] sm:$0xf] }
 0x67e   :  { %v8576_v29 = vld [vmem:[#allocation2 + $0x2d0] sm:$0xf]  ;;  %v9386_v60 = vld [vmem:[#allocation2 + $0x2d4] sm:$0xf0]  ;;  %v8513_v47 = vor.u32 %v9370_v35, %v8512_v6  ;;  %v9352_v15 = vld [vmem:[#allocation2 + $0x1c4] sm:$0xf0] }
 0x67f   :  { %6033 = vmatpush.bf16.msrb.mxu0 %v8233_v55  ;;  %v8577_v13 = vor.u32 %v9386_v60, %v8576_v29  ;;  %v8504_v38 = vld [vmem:[#allocation2 + $0x240] sm:$0xf]  ;;  %v9368_v32 = vld [vmem:[#allocation2 + $0x244] sm:$0xf0]  ;;  %v8441_v16 = vor.u32 %v9352_v15, %v8440_v1  ;;  %v9350_v30 = vld [vmem:[#allocation2 + $0x1b4] sm:$0xf0] }
 0x680   :  { %6046 = vmatpush.bf16.msrb.mxu1 %v8297_v10  ;;  %v8568_v12 = vld [vmem:[#allocation2 + $0x2c0] sm:$0xf]  ;;  %v9384_v61 = vld [vmem:[#allocation2 + $0x2c4] sm:$0xf0]  ;;  %v8505_v55 = vor.u32 %v9368_v32, %v8504_v38  ;;  %v8432_v10 = vld [vmem:[#allocation2 + $0x1b0] sm:$0xf] }
 0x681   :  { %6059 = vmatpush.bf16.msra.mxu3 %v8361_v34  ;;  %v8569_v34 = vor.u32 %v9384_v61, %v8568_v12  ;;  %v8496_v41 = vld [vmem:[#allocation2 + $0x230] sm:$0xf]  ;;  %v9366_v0 = vld [vmem:[#allocation2 + $0x234] sm:$0xf0]  ;;  %v8433_v53 = vor.u32 %v9350_v30, %v8432_v10  ;;  %v8424_v24 = vld [vmem:[#allocation2 + $0x1a0] sm:$0xf] }
 0x682   :  { %v8560_v23 = vld [vmem:[#allocation2 + $0x2b0] sm:$0xf]  ;;  %v9382_v50 = vld [vmem:[#allocation2 + $0x2b4] sm:$0xf0]  ;;  %v8488_v56 = vld [vmem:[#allocation2 + $0x220] sm:$0xf] }
 0x683   :  { %6034 = vmatpush.bf16.msrb.mxu0 %v8225_v26  ;;  %v8497_v26 = vor.u32 %v9366_v0, %v8496_v41  ;;  %v9364_v39 = vld [vmem:[#allocation2 + $0x224] sm:$0xf0]  ;;  %v8552_v5 = vld [vmem:[#allocation2 + $0x2a0] sm:$0xf]  ;;  %v8416_v63 = vld [vmem:[#allocation2 + $0x190] sm:$0xf] }
 0x684   :  { %6047 = vmatpush.bf16.msrb.mxu1 %v8289_v52  ;;  %v8561_v52 = vor.u32 %v9382_v50, %v8560_v23  ;;  %v9380_v21 = vld [vmem:[#allocation2 + $0x2a4] sm:$0xf0]  ;;  %v8489_v44 = vor.u32 %v9364_v39, %v8488_v56  ;;  %v9346_v28 = vld [vmem:[#allocation2 + $0x194] sm:$0xf0]  ;;  %v8544_v58 = vld [vmem:[#allocation2 + $0x290] sm:$0xf] }
 0x685   :  { %6060 = vmatpush.bf16.msra.mxu3 %v8353_v14  ;;  %v9348_v14 = vld [vmem:[#allocation2 + $0x1a4] sm:$0xf0]  ;;  %v8553_v62 = vor.u32 %v9380_v21, %v8552_v5  ;;  %v9362_v9 = vld [vmem:[#allocation2 + $0x214] sm:$0xf0]  ;;  %v8536_v54 = vld [vmem:[#allocation2 + $0x280] sm:$0xf] }
 0x686   :  { %v8425_v2 = vor.u32 %v9348_v14, %v8424_v24  ;;  %v9344_v17 = vld [vmem:[#allocation2 + $0x184] sm:$0xf0]  ;;  %v8656_v7 = vld [vmem:[#allocation2 + $0x370] sm:$0xf]  ;;  %v9422_v20 = vld [vmem:[#allocation2 + $0x3f4] sm:$0xf0] }
 0x687   :  { %6035 = vmatpush.bf16.msrb.mxu0 %v8217_v4  ;;  %v8480_v4 = vld [vmem:[#allocation2 + $0x210] sm:$0xf]  ;;  %v9360_v42 = vld [vmem:[#allocation2 + $0x204] sm:$0xf0]  ;;  %v9438_v36 = vld [vmem:[#allocation2 + $0x474] sm:$0xf0] }
 0x688   :  { %6048 = vmatpush.bf16.msrb.mxu1 %v8281_v31  ;;  %v9378_v31 = vld [vmem:[#allocation2 + $0x294] sm:$0xf0]  ;;  %v9376_v37 = vld [vmem:[#allocation2 + $0x284] sm:$0xf0]  ;;  %v8648_v1 = vld [vmem:[#allocation2 + $0x360] sm:$0xf] }
 0x689   :  { %6061 = vmatpush.bf16.msra.mxu3 %v8345_v40  ;;  %v8417_v40 = vor.u32 %v9346_v28, %v8416_v63  ;;  %v8545_v51 = vor.u32 %v9378_v31, %v8544_v58  ;;  %v8537_v29 = vor.u32 %v9376_v37, %v8536_v54  ;;  %v9404_v15 = vld [vmem:[#allocation2 + $0x364] sm:$0xf0]  ;;  %v8776_v32 = vld [vmem:[#allocation2 + $0x460] sm:$0xf]  ;;  %v8640_v10 = vld [vmem:[#allocation2 + $0x350] sm:$0xf] }
 0x68a   :  { %6036 = vmatmul.bf16.vlgmr.msrb.gmra.mxu0 %v12029_v49  ;;  %v9420_v38 = vld [vmem:[#allocation2 + $0x3e4] sm:$0xf0]  ;;  %v8649_v61 = vor.u32 %v9404_v15, %v8648_v1  ;;  %v8704_v30 = vld [vmem:[#allocation2 + $0x3d0] sm:$0xf]  ;;  %v9418_v41 = vld [vmem:[#allocation2 + $0x3d4] sm:$0xf0] }
 0x68b   :  { %6067 = vmatpush.bf16.msra.mxu0 %v8465_v43  ;;  %6049 = vmatmul.bf16.vlgmr.msrb.gmra.mxu1 %v12031_v45  ;;  %v8481_v43 = vor.u32 %v9362_v9, %v8480_v4  ;;  %v9436_v12 = vld [vmem:[#allocation2 + $0x464] sm:$0xf0]  ;;  %v8768_v0 = vld [vmem:[#allocation2 + $0x450] sm:$0xf]  ;;  %v9434_v23 = vld [vmem:[#allocation2 + $0x454] sm:$0xf0] }
 0x68c   :  { %6080 = vmatpush.bf16.msra.mxu1 %v8529_v3  ;;  %6062 = vmatmul.bf16.vlgmr.msra.gmra.mxu3 %v12033_v33  ;;  %v8408_v3 = vld [vmem:[#allocation2 + $0x180] sm:$0xf]  ;;  %v9416_v56 = vld [vmem:[#allocation2 + $0x3c4] sm:$0xf0]  ;;  %v8624_v63 = vld [vmem:[#allocation2 + $0x330] sm:$0xf] }
 0x68d   :  { %6093 = vmatpush.bf16.msrb.mxu3 %v8593_v18  ;;  %v8472_v18 = vld [vmem:[#allocation2 + $0x200] sm:$0xf]  ;;  %v8409_v6 = vor.u32 %v9344_v17, %v8408_v3  ;;  %v9432_v5 = vld [vmem:[#allocation2 + $0x444] sm:$0xf0]  ;;  %v8688_v28 = vld [vmem:[#allocation2 + $0x3b0] sm:$0xf] }
 0x68e   :  { %v8473_v35 = vor.u32 %v9360_v42, %v8472_v18  ;;  %v8632_v24 = vld [vmem:[#allocation2 + $0x340] sm:$0xf]  ;;  %v9414_v4 = vld [vmem:[#allocation2 + $0x3b4] sm:$0xf0]  ;;  %v8752_v9 = vld [vmem:[#allocation2 + $0x430] sm:$0xf] }
 0x68f   :  { %6068 = vmatpush.bf16.msra.mxu0 %v8457_v57  ;;  %v9406_v57 = vld [vmem:[#allocation2 + $0x374] sm:$0xf0]  ;;  %v8696_v14 = vld [vmem:[#allocation2 + $0x3c0] sm:$0xf]  ;;  %v9396_v17 = vld [vmem:[#allocation2 + $0x324] sm:$0xf0] }
 0x690   :  { %6081 = vmatpush.bf16.msra.mxu1 %v8521_v19  ;;  %v8720_v19 = vld [vmem:[#allocation2 + $0x3f0] sm:$0xf]  ;;  %v8657_v60 = vor.u32 %v9406_v57, %v8656_v7  ;;  %v8760_v39 = vld [vmem:[#allocation2 + $0x440] sm:$0xf]  ;;  %v9430_v58 = vld [vmem:[#allocation2 + $0x434] sm:$0xf0] }
 0x691   :  { %6094 = vmatpush.bf16.msrb.mxu3 %v8585_v22  ;;  %v8784_v22 = vld [vmem:[#allocation2 + $0x470] sm:$0xf]  ;;  %v8616_v3 = vld [vmem:[#allocation2 + $0x320] sm:$0xf]  ;;  %v9428_v54 = vld [vmem:[#allocation2 + $0x424] sm:$0xf0] }
 0x692   :  { %v8680_v18 = vld [vmem:[#allocation2 + $0x3a0] sm:$0xf]  ;;  %v8617_v37 = vor.u32 %v9396_v17, %v8616_v3  ;;  %v9392_v1 = vld [vmem:[#allocation2 + $0x304] sm:$0xf0]  ;;  %v8386_v3 = vld [vmem:[#allocation2 + $0x158] sm:$0xf0] }
 0x693   :  { %6069 = vmatpush.bf16.msra.mxu0 %v8449_v59  ;;  %v8721_v59 = vor.u32 %v9422_v20, %v8720_v19  ;;  %v8744_v42 = vld [vmem:[#allocation2 + $0x420] sm:$0xf]  ;;  %v8608_v19 = vld [vmem:[#allocation2 + $0x310] sm:$0xf]  ;;  %v9394_v20 = vld [vmem:[#allocation2 + $0x314] sm:$0xf0] }
 0x694   :  { %6082 = vmatpush.bf16.msra.mxu1 %v8513_v47  ;;  %v8785_v47 = vor.u32 %v9438_v36, %v8784_v22  ;;  %v8745_v57 = vor.u32 %v9428_v54, %v8744_v42  ;;  %v8672_v22 = vld [vmem:[#allocation2 + $0x390] sm:$0xf]  ;;  %v9410_v36 = vld [vmem:[#allocation2 + $0x394] sm:$0xf0]  ;;  %v8664_v15 = vld [vmem:[#allocation2 + $0x380] sm:$0xf] }
 0x695   :  { %6095 = vmatpush.bf16.msrb.mxu3 %v8577_v13  ;;  %v8712_v13 = vld [vmem:[#allocation2 + $0x3e0] sm:$0xf]  ;;  %v9303_v42 = vld [vmem:[#allocation2 + $0x44] sm:$0xf]  ;;  %v9385_v54 = vld [vmem:[#allocation2 + $0x2d4] sm:$0xf] }
 0x696   :  { %s9487_s6 = smov [#allocation4]   ;;  %s6435_s12 = sshll.u32 %s12132_s10, 4  ;;  %vm6426_vm0 = vcmask 41984   ;;  %s6436_s12 = int_to_ptr.hbm [resolvable:$true] %s6435_s12 }
 0x697   :  { %6070 = vmatpush.bf16.msra.mxu0 %v8441_v16  ;;  %v8713_v16 = vor.u32 %v9420_v38, %v8712_v13  ;;  %v9408_v13 = vld [vmem:[#allocation2 + $0x384] sm:$0xf0]  ;;  %v8728_v38 = vld [vmem:[#allocation2 + $0x400] sm:$0xf]  ;;  %s6433_s29 = sshll.u32 %s9487_s6, 4  ;;  %s6434_s29 = int_to_ptr.vmem [resolvable:$true] %s6433_s29 }
 0x698   :  { %6083 = vmatpush.bf16.msra.mxu1 %v8505_v55  ;;  %v8777_v55 = vor.u32 %v9436_v12, %v8776_v32  ;;  %v9424_v32 = vld [vmem:[#allocation2 + $0x404] sm:$0xf0]  ;;  %v9309_v12 = vld [vmem:[#allocation2 + $0x74] sm:$0xf] }
 0x699   :  { %6096 = vmatpush.bf16.msrb.mxu3 %v8569_v34  ;;  %v9402_v34 = vld [vmem:[#allocation2 + $0x354] sm:$0xf0] }
 0x69a   :  { %v8641_v50 = vor.u32 %v9402_v34, %v8640_v10  ;;  %v9341_v34 = vld [vmem:[#allocation2 + $0x174] sm:$0xf] }
 0x69b   :  { %6071 = vmatpush.bf16.msra.mxu0 %v8433_v53  ;;  %v8705_v53 = vor.u32 %v9418_v41, %v8704_v30  ;;  %v8402_v30 = vld [vmem:[#allocation2 + $0x178] sm:$0xf0]  ;;  %v8665_v41 = vor.u32 %v9408_v13, %v8664_v15  ;;  %v9317_v13 = vld [vmem:[#allocation2 + $0xb4] sm:$0xf] }
 0x69c   :  { %6084 = vmatpush.bf16.msra.mxu1 %v8497_v26  ;;  %v8769_v26 = vor.u32 %v9434_v23, %v8768_v0  ;;  %v8729_v0 = vor.u32 %v9424_v32, %v8728_v38  ;;  %v8242_v15 = vld [vmem:[#allocation2 + $0x38] sm:$0xf0]  ;;  %v9333_v32 = vld [vmem:[#allocation2 + $0x134] sm:$0xf] }
 0x69d   :  { %6097 = vmatpush.bf16.msrb.mxu3 %v8561_v52  ;;  %v9400_v52 = vld [vmem:[#allocation2 + $0x344] sm:$0xf0]  ;;  %v8306_v38 = vld [vmem:[#allocation2 + $0xb8] sm:$0xf0] }
 0x69e   :  { %v8633_v21 = vor.u32 %v9400_v52, %v8632_v24  ;;  %v8594_v24 = vld [vmem:[#allocation2 + $0x2f8] sm:$0xf0]  ;;  %v8405_v52 = vor.u32 %v9341_v34, %v8402_v30  ;;  %v9381_v34 = vld [vmem:[#allocation2 + $0x2b4] sm:$0xf] }
 0x69f   :  { %6072 = vmatpush.bf16.msra.mxu0 %v8425_v2  ;;  %v8697_v2 = vor.u32 %v9416_v56, %v8696_v14  ;;  %v8266_v14 = vld [vmem:[#allocation2 + $0x68] sm:$0xf0]  ;;  %v9323_v56 = vld [vmem:[#allocation2 + $0xe4] sm:$0xf]  ;;  %v8562_v30 = vld [vmem:[#allocation2 + $0x2b8] sm:$0xf0] }
 0x6a0   :  { %6085 = vmatpush.bf16.msra.mxu1 %v8489_v44  ;;  %v8761_v44 = vor.u32 %v9432_v5, %v8760_v39  ;;  %v8330_v39 = vld [vmem:[#allocation2 + $0xe8] sm:$0xf0]  ;;  %v9339_v5 = vld [vmem:[#allocation2 + $0x164] sm:$0xf] }
 0x6a1   :  { %6098 = vmatpush.bf16.msrb.mxu3 %v8553_v62  ;;  %v9398_v62 = vld [vmem:[#allocation2 + $0x334] sm:$0xf0] }
 0x6a2   :  { %v8625_v31 = vor.u32 %v9398_v62, %v8624_v63  ;;  %v8333_v63 = vor.u32 %v9323_v56, %v8330_v39  ;;  %v9305_v62 = vld [vmem:[#allocation2 + $0x54] sm:$0xf]  ;;  %v9379_v39 = vld [vmem:[#allocation2 + $0x2a4] sm:$0xf] }
 0x6a3   :  { %6073 = vmatpush.bf16.msra.mxu0 %v8417_v40  ;;  %v8689_v40 = vor.u32 %v9414_v4, %v8688_v28  ;;  %v9387_v28 = vld [vmem:[#allocation2 + $0x2e4] sm:$0xf]  ;;  %v8586_v4 = vld [vmem:[#allocation2 + $0x2e8] sm:$0xf0]  ;;  %v9297_v56 = vld [vmem:[#allocation2 + $0x14] sm:$0xf] }
 0x6a4   :  { %6086 = vmatpush.bf16.msra.mxu1 %v8481_v43  ;;  %v8753_v43 = vor.u32 %v9430_v58, %v8752_v9  ;;  %v8258_v58 = vld [vmem:[#allocation2 + $0x58] sm:$0xf0]  ;;  %v8589_v17 = vor.u32 %v9387_v28, %v8586_v4  ;;  %v9295_v4 = vld [vmem:[#allocation2 + $0x4] sm:$0xf] }
 0x6a5   :  { %6099 = vmatpush.bf16.msrb.mxu3 %v8545_v51  ;;  %v9412_v51 = vld [vmem:[#allocation2 + $0x3a4] sm:$0xf0]  ;;  %v8354_v28 = vld [vmem:[#allocation2 + $0x118] sm:$0xf0] }
 0x6a6   :  { %v8681_v7 = vor.u32 %v9412_v51, %v8680_v18  ;;  %v8261_v18 = vor.u32 %v9305_v62, %v8258_v58  ;;  %v9329_v62 = vld [vmem:[#allocation2 + $0x114] sm:$0xf] }
 0x6a7   :  { %6074 = vmatpush.bf16.msra.mxu0 %v8409_v6  ;;  %v8736_v6 = vld [vmem:[#allocation2 + $0x410] sm:$0xf] }
 0x6a8   :  { %6087 = vmatpush.bf16.msra.mxu1 %v8473_v35  ;;  %v9426_v35 = vld [vmem:[#allocation2 + $0x414] sm:$0xf0] }
 0x6a9   :  { %6100 = vmatpush.bf16.msrb.mxu3 %v8537_v29  ;;  %v8609_v29 = vor.u32 %v9394_v20, %v8608_v19  ;;  %v9319_v19 = vld [vmem:[#allocation2 + $0xc4] sm:$0xf]  ;;  %v8314_v20 = vld [vmem:[#allocation2 + $0xc8] sm:$0xf0] }
 0x6aa   :  { %6075 = vmatmul.bf16.vlgmr.msra.gmra.mxu0 %v12035_v46 }
 0x6ab   :  { %6106 = vmatpush.bf16.msrb.mxu0 %v8657_v60  ;;  %6088 = vmatmul.bf16.vlgmr.msra.gmra.mxu1 %v12037_v25  ;;  %v8600_v60 = vld [vmem:[#allocation2 + $0x300] sm:$0xf] }
 0x6ac   :  { %6119 = vmatpush.bf16.msrb.mxu1 %v8721_v59  ;;  %6101 = vmatmul.bf16.vlgmr.msrb.gmra.mxu3 %v12039_v8  ;;  %v8673_v59 = vor.u32 %v9410_v36, %v8672_v22  ;;  %v8601_v10 = vor.u32 %v9392_v1, %v8600_v60  ;;  %v9335_v22 = vld [vmem:[#allocation2 + $0x144] sm:$0xf]  ;;  %v8378_v36 = vld [vmem:[#allocation2 + $0x148] sm:$0xf0]  ;;  %v9301_v60 = vld [vmem:[#allocation2 + $0x34] sm:$0xf] }
 0x6ad   :  { %6132 = vmatpush.bf16.msra.mxu3 %v8785_v47  ;;  %v8737_v47 = vor.u32 %v9426_v35, %v8736_v6  ;;  %v8381_v1 = vor.u32 %v9335_v22, %v8378_v36 }
 0x6af   :  { %6107 = vmatpush.bf16.msrb.mxu0 %v8649_v61  ;;  %v8274_v61 = vld [vmem:[#allocation2 + $0x78] sm:$0xf0] }
 0x6b0   :  { %6120 = vmatpush.bf16.msrb.mxu1 %v8713_v16  ;;  %v9325_v16 = vld [vmem:[#allocation2 + $0xf4] sm:$0xf]  ;;  %v8277_v23 = vor.u32 %v9309_v12, %v8274_v61  ;;  %v8370_v12 = vld [vmem:[#allocation2 + $0x138] sm:$0xf0] }
 0x6b1   :  { %6133 = vmatpush.bf16.msra.mxu3 %v8777_v55  ;;  %v8338_v55 = vld [vmem:[#allocation2 + $0xf8] sm:$0xf0] }
 0x6b3   :  { %6108 = vmatpush.bf16.msrb.mxu0 %v8641_v50  ;;  %v8341_v50 = vor.u32 %v9325_v16, %v8338_v55  ;;  %v8245_v16 = vor.u32 %v9301_v60, %v8242_v15  ;;  %v8309_v55 = vor.u32 %v9317_v13, %v8306_v38  ;;  %v8458_v13 = vld [vmem:[#allocation2 + $0x1e8] sm:$0xf0]  ;;  %v9371_v38 = vld [vmem:[#allocation2 + $0x264] sm:$0xf] }
 0x6b4   :  { %6121 = vmatpush.bf16.msrb.mxu1 %v8705_v53  ;;  %v9307_v53 = vld [vmem:[#allocation2 + $0x64] sm:$0xf] }
 0x6b5   :  { %6134 = vmatpush.bf16.msra.mxu3 %v8769_v26  ;;  %v9389_v26 = vld [vmem:[#allocation2 + $0x2f4] sm:$0xf] }
 0x6b7   :  { %6109 = vmatpush.bf16.msrb.mxu0 %v8633_v21  ;;  %v8394_v21 = vld [vmem:[#allocation2 + $0x168] sm:$0xf0] }
 0x6b8   :  { %6122 = vmatpush.bf16.msrb.mxu1 %v8697_v2  ;;  %v8597_v2 = vor.u32 %v9389_v26, %v8594_v24  ;;  %v8397_v9 = vor.u32 %v9339_v5, %v8394_v21  ;;  %v8362_v26 = vld [vmem:[#allocation2 + $0x128] sm:$0xf0]  ;;  %v8565_v24 = vor.u32 %v9381_v34, %v8562_v30  ;;  %v9353_v30 = vld [vmem:[#allocation2 + $0x1d4] sm:$0xf] }
 0x6b9   :  { %6135 = vmatpush.bf16.msra.mxu3 %v8761_v44  ;;  %v8269_v44 = vor.u32 %v9307_v53, %v8266_v14  ;;  %v9331_v53 = vld [vmem:[#allocation2 + $0x124] sm:$0xf]  ;;  %v8554_v5 = vld [vmem:[#allocation2 + $0x2a8] sm:$0xf0] }
 0x6ba   :  { %6210 = vmatpush.bf16.msrb.mxu2 %v8597_v2  ;;  %v8365_v21 = vor.u32 %v9331_v53, %v8362_v26  ;;  %v8226_v2 = vld [vmem:[#allocation2 + $0x18] sm:$0xf0]  ;;  %v9401_v53 = vld [vmem:[#allocation2 + $0x354] sm:$0xf] }
 0x6bb   :  { %6110 = vmatpush.bf16.msrb.mxu0 %v8625_v31  ;;  %v9321_v31 = vld [vmem:[#allocation2 + $0xd4] sm:$0xf]  ;;  %v8229_v58 = vor.u32 %v9297_v56, %v8226_v2  ;;  %v8642_v26 = vld [vmem:[#allocation2 + $0x358] sm:$0xf0]  ;;  %v8442_v56 = vld [vmem:[#allocation2 + $0x1c8] sm:$0xf0] }
 0x6bc   :  { %6123 = vmatpush.bf16.msrb.mxu1 %v8689_v40  ;;  %v8322_v40 = vld [vmem:[#allocation2 + $0xd8] sm:$0xf0]  ;;  %v8634_v2 = vld [vmem:[#allocation2 + $0x348] sm:$0xf0] }
 0x6bd   :  { %6136 = vmatpush.bf16.msra.mxu3 %v8753_v43  ;;  %v9337_v43 = vld [vmem:[#allocation2 + $0x154] sm:$0xf]  ;;  %v8325_v51 = vor.u32 %v9321_v31, %v8322_v40  ;;  %v8218_v40 = vld [vmem:[#allocation2 + $0x8] sm:$0xf0] }
 0x6be   :  { %6211 = vmatpush.bf16.msrb.mxu2 %v8589_v17  ;;  %v8357_v17 = vor.u32 %v9329_v62, %v8354_v28  ;;  %v8221_v22 = vor.u32 %v9295_v4, %v8218_v40  ;;  %v8434_v62 = vld [vmem:[#allocation2 + $0x1b8] sm:$0xf0]  ;;  %v9365_v28 = vld [vmem:[#allocation2 + $0x234] sm:$0xf] }
 0x6bf   :  { %6111 = vmatpush.bf16.msrb.mxu0 %v8617_v37  ;;  %v8578_v37 = vld [vmem:[#allocation2 + $0x2d8] sm:$0xf0] }
 0x6c0   :  { %6124 = vmatpush.bf16.msrb.mxu1 %v8681_v7  ;;  %v8389_v7 = vor.u32 %v9337_v43, %v8386_v3  ;;  %v8581_v6 = vor.u32 %v9385_v54, %v8578_v37  ;;  %v9377_v43 = vld [vmem:[#allocation2 + $0x294] sm:$0xf]  ;;  %v8546_v3 = vld [vmem:[#allocation2 + $0x298] sm:$0xf0] }
 0x6c1   :  { %6137 = vmatpush.bf16.msra.mxu3 %v8745_v57  ;;  %v8250_v57 = vld [vmem:[#allocation2 + $0x48] sm:$0xf0]  ;;  %v8466_v54 = vld [vmem:[#allocation2 + $0x1f8] sm:$0xf0]  ;;  %v9373_v37 = vld [vmem:[#allocation2 + $0x274] sm:$0xf] }
 0x6c2   :  { %v8253_v35 = vor.u32 %v9303_v42, %v8250_v57  ;;  %6212 = vmatpush.bf16.msrb.mxu2 %v8581_v6  ;;  %v9357_v42 = vld [vmem:[#allocation2 + $0x1f4] sm:$0xf]  ;;  %v9327_v57 = vld [vmem:[#allocation2 + $0x104] sm:$0xf]  ;;  %v8498_v4 = vld [vmem:[#allocation2 + $0x238] sm:$0xf0] }
 0x6c3   :  { %6112 = vmatpush.bf16.msrb.mxu0 %v8609_v29  ;;  %v8317_v29 = vor.u32 %v9319_v19, %v8314_v20  ;;  %v8346_v19 = vld [vmem:[#allocation2 + $0x108] sm:$0xf0]  ;;  %v8549_v20 = vor.u32 %v9377_v43, %v8546_v3  ;;  %v9405_v6 = vld [vmem:[#allocation2 + $0x374] sm:$0xf]  ;;  %v8501_v40 = vor.u32 %v9365_v28, %v8498_v4  ;;  %v9347_v43 = vld [vmem:[#allocation2 + $0x1a4] sm:$0xf] }
 0x6c4   :  { %6125 = vmatpush.bf16.msrb.mxu1 %v8673_v59  ;;  %v9383_v59 = vld [vmem:[#allocation2 + $0x2c4] sm:$0xf]  ;;  %v8349_v15 = vor.u32 %v9327_v57, %v8346_v19  ;;  %v8418_v57 = vld [vmem:[#allocation2 + $0x198] sm:$0xf0]  ;;  %v9361_v19 = vld [vmem:[#allocation2 + $0x214] sm:$0xf] }
 0x6c5   :  { %6138 = vmatpush.bf16.msra.mxu3 %v8737_v47  ;;  %v8570_v47 = vld [vmem:[#allocation2 + $0x2c8] sm:$0xf0]  ;;  %v9363_v3 = vld [vmem:[#allocation2 + $0x224] sm:$0xf]  ;;  %v9413_v28 = vld [vmem:[#allocation2 + $0x3b4] sm:$0xf] }
 0x6c6   :  { %v8573_v61 = vor.u32 %v9383_v59, %v8570_v47  ;;  %v9355_v59 = vld [vmem:[#allocation2 + $0x1e4] sm:$0xf]  ;;  %v8690_v4 = vld [vmem:[#allocation2 + $0x3b8] sm:$0xf0] }
 0x6c7   :  { %6113 = vmatpush.bf16.msrb.mxu0 %v8601_v10  ;;  %v9299_v10 = vld [vmem:[#allocation2 + $0x24] sm:$0xf] }
 0x6c8   :  { %6126 = vmatpush.bf16.msrb.mxu1 %v8665_v41  ;;  %v8373_v41 = vor.u32 %v9333_v32, %v8370_v12  ;;  %6213 = vmatpush.bf16.msrb.mxu2 %v8573_v61  ;;  %v9375_v47 = vld [vmem:[#allocation2 + $0x284] sm:$0xf]  ;;  %v8522_v32 = vld [vmem:[#allocation2 + $0x268] sm:$0xf0] }
 0x6c9   :  { %6139 = vmatpush.bf16.msra.mxu3 %v8729_v0  ;;  %v8234_v0 = vld [vmem:[#allocation2 + $0x28] sm:$0xf0]  ;;  %v9403_v61 = vld [vmem:[#allocation2 + $0x364] sm:$0xf]  ;;  %v8525_v34 = vor.u32 %v9371_v38, %v8522_v32  ;;  %v8722_v38 = vld [vmem:[#allocation2 + $0x3f8] sm:$0xf0] }
 0x6ca   :  { %6114 = vmatmul.bf16.vlgmr.msrb.gmra.mxu0 %v12041_v11  ;;  %v9437_v32 = vld [vmem:[#allocation2 + $0x474] sm:$0xf] }
 0x6cb   :  { %6145 = vmatpush.bf16.msra.mxu0 %v8277_v23  ;;  %6127 = vmatmul.bf16.vlgmr.msrb.gmra.mxu1 %v12043_v48  ;;  %v9315_v23 = vld [vmem:[#allocation2 + $0xa4] sm:$0xf] }
 0x6cc   :  { %6158 = vmatpush.bf16.msra.mxu1 %v8341_v50  ;;  %6140 = vmatmul.bf16.vlgmr.msra.gmra.mxu3 %v12045_v27  ;;  %v8298_v50 = vld [vmem:[#allocation2 + $0xa8] sm:$0xf0] }
 0x6cd   :  { %6171 = vmatpush.bf16.msrb.mxu3 %v8405_v52  ;;  %v8237_v52 = vor.u32 %v9299_v10, %v8234_v0  ;;  %v8301_v14 = vor.u32 %v9315_v23, %v8298_v50  ;;  %6214 = vmatpush.bf16.msrb.mxu2 %v8565_v24  ;;  %v8461_v10 = vor.u32 %v9355_v59, %v8458_v13  ;;  %v9369_v0 = vld [vmem:[#allocation2 + $0x254] sm:$0xf]  ;;  %v8514_v23 = vld [vmem:[#allocation2 + $0x258] sm:$0xf0]  ;;  %v8410_v59 = vld [vmem:[#allocation2 + $0x188] sm:$0xf0] }
 0x6cf   :  { %6146 = vmatpush.bf16.msra.mxu0 %v8269_v44  ;;  %v9313_v44 = vld [vmem:[#allocation2 + $0x94] sm:$0xf] }
 0x6d0   :  { %6159 = vmatpush.bf16.msra.mxu1 %v8333_v63  ;;  %v8290_v63 = vld [vmem:[#allocation2 + $0x98] sm:$0xf0] }
 0x6d1   :  { %6172 = vmatpush.bf16.msrb.mxu3 %v8397_v9  ;;  %v8557_v9 = vor.u32 %v9379_v39, %v8554_v5  ;;  %v8293_v31 = vor.u32 %v9313_v44, %v8290_v63  ;;  %v9367_v39 = vld [vmem:[#allocation2 + $0x244] sm:$0xf]  ;;  %v8506_v5 = vld [vmem:[#allocation2 + $0x248] sm:$0xf0]  ;;  %v9349_v63 = vld [vmem:[#allocation2 + $0x1b4] sm:$0xf] }
 0x6d2   :  { %v8509_v44 = vor.u32 %v9367_v39, %v8506_v5  ;;  %v8770_v39 = vld [vmem:[#allocation2 + $0x458] sm:$0xf0] }
 0x6d3   :  { %6147 = vmatpush.bf16.msra.mxu0 %v8261_v18  ;;  %v9311_v18 = vld [vmem:[#allocation2 + $0x84] sm:$0xf]  ;;  %6215 = vmatpush.bf16.msrb.mxu2 %v8557_v9 }
 0x6d4   :  { %6160 = vmatpush.bf16.msra.mxu1 %v8325_v51  ;;  %v8282_v51 = vld [vmem:[#allocation2 + $0x88] sm:$0xf0] }
 0x6d5   :  { %6173 = vmatpush.bf16.msrb.mxu3 %v8389_v7  ;;  %v8530_v7 = vld [vmem:[#allocation2 + $0x278] sm:$0xf0]  ;;  %v8285_v36 = vor.u32 %v9311_v18, %v8282_v51  ;;  %v9395_v51 = vld [vmem:[#allocation2 + $0x324] sm:$0xf] }
 0x6d6   :  { %v8533_v60 = vor.u32 %v9373_v37, %v8530_v7  ;;  %v9345_v7 = vld [vmem:[#allocation2 + $0x194] sm:$0xf] }
 0x6d7   :  { %6148 = vmatpush.bf16.msra.mxu0 %v8253_v35  ;;  %v8658_v35 = vld [vmem:[#allocation2 + $0x378] sm:$0xf0]  ;;  %6216 = vmatpush.bf16.msrb.mxu2 %v8549_v20 }
 0x6d8   :  { %6161 = vmatpush.bf16.msra.mxu1 %v8317_v29  ;;  %v8469_v29 = vor.u32 %v9357_v42, %v8466_v54  ;;  %v8661_v12 = vor.u32 %v9405_v6, %v8658_v35  ;;  %v8618_v42 = vld [vmem:[#allocation2 + $0x328] sm:$0xf0]  ;;  %v8482_v20 = vld [vmem:[#allocation2 + $0x218] sm:$0xf0]  ;;  %v8421_v35 = vor.u32 %v9345_v7, %v8418_v57 }
 0x6d9   :  { %6174 = vmatpush.bf16.msrb.mxu3 %v8381_v1  ;;  %v8538_v1 = vld [vmem:[#allocation2 + $0x288] sm:$0xf0]  ;;  %v8610_v6 = vld [vmem:[#allocation2 + $0x318] sm:$0xf0] }
 0x6da   :  { %v8738_v7 = vld [vmem:[#allocation2 + $0x418] sm:$0xf0] }
 0x6db   :  { %6149 = vmatpush.bf16.msra.mxu0 %v8245_v16  ;;  %v8650_v16 = vld [vmem:[#allocation2 + $0x368] sm:$0xf0] }
 0x6dc   :  { %6162 = vmatpush.bf16.msra.mxu1 %v8309_v55  ;;  %v8541_v55 = vor.u32 %v9375_v47, %v8538_v1  ;;  %v8653_v50 = vor.u32 %v9403_v61, %v8650_v16  ;;  %v9359_v47 = vld [vmem:[#allocation2 + $0x204] sm:$0xf]  ;;  %v8474_v1 = vld [vmem:[#allocation2 + $0x208] sm:$0xf0] }
 0x6dd   :  { %6175 = vmatpush.bf16.msrb.mxu3 %v8373_v41  ;;  %v8450_v41 = vld [vmem:[#allocation2 + $0x1d8] sm:$0xf0]  ;;  %v9391_v61 = vld [vmem:[#allocation2 + $0x304] sm:$0xf]  ;;  %v8602_v16 = vld [vmem:[#allocation2 + $0x308] sm:$0xf0] }
 0x6de   :  { %6217 = vmatpush.bf16.msrb.mxu2 %v8541_v55  ;;  %v8453_v24 = vor.u32 %v9353_v30, %v8450_v41  ;;  %v9419_v41 = vld [vmem:[#allocation2 + $0x3e4] sm:$0xf] }
 0x6df   :  { %6150 = vmatpush.bf16.msra.mxu0 %v8237_v52  ;;  %v8517_v52 = vor.u32 %v9369_v0, %v8514_v23  ;;  %v8605_v0 = vor.u32 %v9391_v61, %v8602_v16  ;;  %v8714_v23 = vld [vmem:[#allocation2 + $0x3e8] sm:$0xf0]  ;;  %v9441_v61 = vld [vmem:[%s12130_s8 + $0x10] sm:$0xff]  ;;  %v5302_v16 = vld [vmem:[%s12129_s7] sm:$0x3] }
 0x6e0   :  { %6163 = vmatpush.bf16.msra.mxu1 %v8301_v14  ;;  %v9351_v14 = vld [vmem:[#allocation2 + $0x1c4] sm:$0xf] }
 0x6e1   :  { %6176 = vmatpush.bf16.msrb.mxu3 %v8365_v21  ;;  %v8645_v21 = vor.u32 %v9401_v53, %v8642_v26  ;;  %6218 = vmatmul.bf16.vlgmr.msrb.gmra.mxu2 %v12039_v8  ;;  %v8426_v8 = vld [vmem:[#allocation2 + $0x1a8] sm:$0xf0]  ;;  %v8717_v26 = vor.u32 %v9419_v41, %v8714_v23 }
 0x6e2   :  { %v8429_v54 = vor.u32 %v9347_v43, %v8426_v8  ;;  %v8778_v53 = vld [vmem:[#allocation2 + $0x468] sm:$0xf0] }
 0x6e3   :  { %6151 = vmatpush.bf16.msra.mxu0 %v8229_v58  ;;  %v9397_v58 = vld [vmem:[#allocation2 + $0x334] sm:$0xf]  ;;  %v8682_v43 = vld [vmem:[#allocation2 + $0x3a8] sm:$0xf0] }
 0x6e4   :  { %6164 = vmatpush.bf16.msra.mxu1 %v8293_v31  ;;  %v8626_v31 = vld [vmem:[#allocation2 + $0x338] sm:$0xf0]  ;;  %v8746_v8 = vld [vmem:[#allocation2 + $0x428] sm:$0xf0] }
 0x6e5   :  { %6177 = vmatpush.bf16.msrb.mxu3 %v8357_v17  ;;  %v8490_v17 = vld [vmem:[#allocation2 + $0x228] sm:$0xf0]  ;;  %v8629_v18 = vor.u32 %v9397_v58, %v8626_v31  ;;  %v8693_v31 = vor.u32 %v9413_v28, %v8690_v4 }
 0x6e6   :  { %v8493_v37 = vor.u32 %v9363_v3, %v8490_v17  ;;  %v9446_v3 = vld [vmem:[%s12130_s8 + $0x38] sm:$0xff] }
 0x6e7   :  { %6152 = vmatpush.bf16.msra.mxu0 %v8221_v22  ;;  %v8621_v22 = vor.u32 %v9395_v51, %v8618_v42  ;;  %v9409_v51 = vld [vmem:[#allocation2 + $0x394] sm:$0xf]  ;;  %v8674_v42 = vld [vmem:[#allocation2 + $0x398] sm:$0xf0]  ;;  %6400 = vmatpush.bf16.msra.mxu2 %v9446_v3 }
 0x6e8   :  { %6165 = vmatpush.bf16.msra.mxu1 %v8285_v36  ;;  %v9393_v36 = vld [vmem:[#allocation2 + $0x314] sm:$0xf]  ;;  %v9450_v3 = vld [vmem:[%s12130_s8 + $0x58] sm:$0xff] }
 0x6e9   :  { %6178 = vmatpush.bf16.msrb.mxu3 %v8349_v15  ;;  %v9421_v15 = vld [vmem:[#allocation2 + $0x3f4] sm:$0xf]  ;;  %v8613_v13 = vor.u32 %v9393_v36, %v8610_v6  ;;  %v9407_v6 = vld [vmem:[#allocation2 + $0x384] sm:$0xf] }
 0x6ea   :  { %6153 = vmatmul.bf16.vlgmr.msra.gmra.mxu0 %v12029_v49  ;;  %v9399_v49 = vld [vmem:[#allocation2 + $0x344] sm:$0xf] }
 0x6eb   :  { %6184 = vmatpush.bf16.msrb.mxu0 %v8469_v29  ;;  %6166 = vmatmul.bf16.vlgmr.msra.gmra.mxu1 %v12031_v45  ;;  %v8445_v45 = vor.u32 %v9351_v14, %v8442_v56  ;;  %v8637_v9 = vor.u32 %v9399_v49, %v8634_v2  ;;  %v8485_v29 = vor.u32 %v9361_v19, %v8482_v20  ;;  %v8706_v14 = vld [vmem:[#allocation2 + $0x3d8] sm:$0xf0]  ;;  %v9433_v56 = vld [vmem:[#allocation2 + $0x454] sm:$0xf]  ;;  %v9415_v49 = vld [vmem:[#allocation2 + $0x3c4] sm:$0xf] }
 0x6ec   :  { %6197 = vmatpush.bf16.msrb.mxu1 %v8533_v60  ;;  %6179 = vmatmul.bf16.vlgmr.msrb.gmra.mxu3 %v12033_v33  ;;  %v8437_v33 = vor.u32 %v9349_v63, %v8434_v62  ;;  %v9343_v60 = vld [vmem:[#allocation2 + $0x184] sm:$0xf]  ;;  %v8698_v2 = vld [vmem:[#allocation2 + $0x3c8] sm:$0xf0]  ;;  %v9445_v19 = vld [vmem:[%s12130_s8 + $0x30] sm:$0xff] }
 0x6ed   :  { %6223 = vmatpush.bf16.msra.mxu3 %v8661_v12  ;;  %v8786_v12 = vld [vmem:[#allocation2 + $0x478] sm:$0xf0]  ;;  %v8413_v55 = vor.u32 %v9343_v60, %v8410_v59  ;;  %v8701_v63 = vor.u32 %v9415_v49, %v8698_v2  ;;  %v8730_v60 = vld [vmem:[#allocation2 + $0x408] sm:$0xf0]  ;;  %6401 = vmatpush.bf16.msra.mxu2 %v9445_v19 }
 0x6ee   :  { %v8789_v30 = vor.u32 %v9437_v32, %v8786_v12  ;;  %v9444_v59 = vld [vmem:[%s12130_s8 + $0x28] sm:$0xff] }
 0x6ef   :  { %6185 = vmatpush.bf16.msrb.mxu0 %v8461_v10  ;;  %v8477_v10 = vor.u32 %v9359_v47, %v8474_v1 }
 0x6f0   :  { %6198 = vmatpush.bf16.msrb.mxu1 %v8525_v34  ;;  %v8725_v34 = vor.u32 %v9421_v15, %v8722_v38  ;;  %v9442_v38 = vld [vmem:[%s12130_s8 + $0x18] sm:$0xff] }
 0x6f1   :  { %6224 = vmatpush.bf16.msra.mxu3 %v8653_v50  ;;  %v9435_v50 = vld [vmem:[#allocation2 + $0x464] sm:$0xf]  ;;  %6402 = vmatpush.bf16.msra.mxu2 %v9444_v59 }
 0x6f3   :  { %6186 = vmatpush.bf16.msrb.mxu0 %v8453_v24  ;;  %v8781_v24 = vor.u32 %v9435_v50, %v8778_v53 }
 0x6f4   :  { %6199 = vmatpush.bf16.msrb.mxu1 %v8517_v52  ;;  %v9417_v52 = vld [vmem:[#allocation2 + $0x3d4] sm:$0xf] }
 0x6f5   :  { %6225 = vmatpush.bf16.msra.mxu3 %v8645_v21  ;;  %v8709_v5 = vor.u32 %v9417_v52, %v8706_v14  ;;  %v8773_v21 = vor.u32 %v9433_v56, %v8770_v39 }
 0x6f7   :  { %6187 = vmatpush.bf16.msrb.mxu0 %v8445_v45  ;;  %v9431_v45 = vld [vmem:[#allocation2 + $0x444] sm:$0xf] }
 0x6f8   :  { %6200 = vmatpush.bf16.msrb.mxu1 %v8509_v44  ;;  %v8762_v44 = vld [vmem:[#allocation2 + $0x448] sm:$0xf0] }
 0x6f9   :  { %6226 = vmatpush.bf16.msra.mxu3 %v8637_v9  ;;  %v8765_v62 = vor.u32 %v9431_v45, %v8762_v44  ;;  %v9429_v9 = vld [vmem:[#allocation2 + $0x434] sm:$0xf] }
 0x6fb   :  { %6188 = vmatpush.bf16.msrb.mxu0 %v8437_v33 }
 0x6fc   :  { %6201 = vmatpush.bf16.msrb.mxu1 %v8501_v40  ;;  %v9411_v40 = vld [vmem:[#allocation2 + $0x3a4] sm:$0xf] }
 0x6fd   :  { %6227 = vmatpush.bf16.msra.mxu3 %v8629_v18  ;;  %v8685_v17 = vor.u32 %v9411_v40, %v8682_v43  ;;  %v9452_v40 = vld [vmem:[%s12130_s8 + $0x68] sm:$0xff]  ;;  %v9451_v43 = vld [vmem:[%s12130_s8 + $0x60] sm:$0xff] }
 0x6ff   :  { %6189 = vmatpush.bf16.msrb.mxu0 %v8429_v54 }
 0x700   :  { %6202 = vmatpush.bf16.msrb.mxu1 %v8493_v37  ;;  %v9425_v37 = vld [vmem:[#allocation2 + $0x414] sm:$0xf] }
 0x701   :  { %6228 = vmatpush.bf16.msra.mxu3 %v8621_v22  ;;  %v8677_v22 = vor.u32 %v9409_v51, %v8674_v42  ;;  %v8741_v36 = vor.u32 %v9425_v37, %v8738_v7  ;;  %v5305_v51 = vperm.slane %v5302_v16, 1  ;;  %v9447_v37 = vld [vmem:[%s12130_s8 + $0x40] sm:$0xff] }
 0x703   :  { %6190 = vmatpush.bf16.msrb.mxu0 %v8421_v35  ;;  %v8666_v35 = vld [vmem:[#allocation2 + $0x388] sm:$0xf0] }
 0x704   :  { %6203 = vmatpush.bf16.msrb.mxu1 %v8485_v29  ;;  %v9423_v29 = vld [vmem:[#allocation2 + $0x404] sm:$0xf]  ;;  %v8669_v47 = vor.u32 %v9407_v6, %v8666_v35 }
 0x705   :  { %6229 = vmatpush.bf16.msra.mxu3 %v8613_v13  ;;  %v8733_v1 = vor.u32 %v9423_v29, %v8730_v60  ;;  %v9443_v13 = vld [vmem:[%s12130_s8 + $0x20] sm:$0xff] }
 0x706   :  { %6403 = vmatpush.bf16.msra.mxu2 %v9443_v13 }
 0x707   :  { %6191 = vmatpush.bf16.msrb.mxu0 %v8413_v55  ;;  %v6037_v58 = vpop.f32.mrf.mxu0 }
 0x708   :  { %6204 = vmatpush.bf16.msrb.mxu1 %v8477_v10 }
 0x709   :  { %6230 = vmatpush.bf16.msra.mxu3 %v8605_v0 }
 0x70a   :  { %6192 = vmatmul.bf16.vlgmr.msrb.gmra.mxu0 %v12035_v46  ;;  %v8754_v46 = vld [vmem:[#allocation2 + $0x438] sm:$0xf0]  ;;  %6404 = vmatpush.bf16.msra.mxu2 %v9442_v38 }
 0x70b   :  { %6236 = vmatpush.bf16.msra.mxu0 %v8725_v34  ;;  %6205 = vmatmul.bf16.vlgmr.msrb.gmra.mxu1 %v12037_v25  ;;  %v6050_v25 = vpop.f32.mrf.mxu1  ;;  %v8757_v33 = vor.u32 %v9429_v9, %v8754_v46  ;;  %v9454_v9 = vld [vmem:[%s12130_s8 + $0x78] sm:$0xff]  ;;  %v9453_v46 = vld [vmem:[%s12130_s8 + $0x70] sm:$0xff] }
 0x70c   :  { %6249 = vmatpush.bf16.msra.mxu1 %v8789_v30  ;;  %6231 = vmatmul.bf16.vlgmr.msra.gmra.mxu3 %v12041_v11  ;;  %v9427_v11 = vld [vmem:[#allocation2 + $0x424] sm:$0xf] }
 0x70d   :  { %v8749_v18 = vor.u32 %v9427_v11, %v8746_v8  ;;  %v9439_v30 = vld [vmem:[%s12130_s8] sm:$0xff]  ;;  %6413 = vmatpush.bf16.msrb.mxu3 %v9454_v9 }
 0x70e   :  { %6405 = vmatpush.bf16.msra.mxu2 %v9441_v61 }
 0x70f   :  { %6237 = vmatpush.bf16.msra.mxu0 %v8717_v26  ;;  %v6063_v54 = vpop.f32.mrf.mxu3  ;;  %v6039_v57 = vpop.f32.mrf.mxu0 }
 0x710   :  { %6250 = vmatpush.bf16.msra.mxu1 %v8781_v24 }
 0x711   :  { %6414 = vmatpush.bf16.msrb.mxu3 %v9453_v46 }
 0x713   :  { %6238 = vmatpush.bf16.msra.mxu0 %v8709_v5  ;;  %v6052_v20 = vpop.f32.mrf.mxu1 }
 0x714   :  { %6251 = vmatpush.bf16.msra.mxu1 %v8773_v21 }
 0x715   :  { %6415 = vmatpush.bf16.msrb.mxu3 %v9452_v40 }
 0x717   :  { %6239 = vmatpush.bf16.msra.mxu0 %v8701_v63  ;;  %v6065_v15 = vpop.f32.mrf.mxu3 }
 0x718   :  { %6252 = vmatpush.bf16.msra.mxu1 %v8765_v62 }
 0x719   :  { %6416 = vmatpush.bf16.msrb.mxu3 %v9451_v43 }
 0x71b   :  { %6240 = vmatpush.bf16.msra.mxu0 %v8693_v31 }
 0x71c   :  { %6253 = vmatpush.bf16.msra.mxu1 %v8757_v33 }
 0x71d   :  { %6417 = vmatpush.bf16.msrb.mxu3 %v9450_v3 }
 0x71f   :  { %6241 = vmatpush.bf16.msra.mxu0 %v8685_v17  ;;  %v9449_v17 = vld [vmem:[%s12130_s8 + $0x50] sm:$0xff] }
 0x720   :  { %6254 = vmatpush.bf16.msra.mxu1 %v8749_v18  ;;  %v9448_v18 = vld [vmem:[%s12130_s8 + $0x48] sm:$0xff] }
 0x721   :  { %6418 = vmatpush.bf16.msrb.mxu3 %v9449_v17 }
 0x723   :  { %6242 = vmatpush.bf16.msra.mxu0 %v8677_v22 }
 0x724   :  { %6255 = vmatpush.bf16.msra.mxu1 %v8741_v36 }
 0x725   :  { %6419 = vmatpush.bf16.msrb.mxu3 %v9448_v18 }
 0x727   :  { %6243 = vmatpush.bf16.msra.mxu0 %v8669_v47  ;;  %v6076_v32 = vpop.f32.mrf.mxu0 }
 0x728   :  { %6256 = vmatpush.bf16.msra.mxu1 %v8733_v1  ;;  %v6089_v12 = vpop.f32.mrf.mxu1 }
 0x729   :  { %6420 = vmatpush.bf16.msrb.mxu3 %v9447_v37 }
 0x72a   :  { %6244 = vmatmul.bf16.vlgmr.msra.gmra.mxu0 %v12043_v48  ;;  %v9440_v48 = vld [vmem:[%s12130_s8 + $0x8] sm:$0xff] }
 0x72b   :  { %6257 = vmatmul.bf16.vlgmr.msra.gmra.mxu1 %v12045_v27  ;;  %v5304_v27 = vperm.slane %v5302_v16, 0  ;;  %6406 = vmatpush.bf16.msra.mxu2 %v9440_v48 }
 0x72d   :  { %v6038_v41 = vadd.f32 %v6037_v58, %v5304_v27 }
 0x72f   :  { %v6102_v55 = vpop.f32.mrf.mxu3  ;;  %v6078_v10 = vpop.f32.mrf.mxu0  ;;  %6407 = vmatpush.bf16.msra.mxu2 %v9439_v30  ;;  %v6051_v0 = vadd.f32 %v6050_v25, %v6038_v41 }
 0x730   :  { %v6091_v34 = vpop.f32.mrf.mxu1 }
 0x731   :  { %v6064_v50 = vadd.f32 %v6063_v54, %v6051_v0 }
 0x733   :  { %v6077_v53 = vadd.f32 %v6076_v32, %v6064_v50 }
 0x735   :  { %v6090_v26 = vadd.f32 %v6089_v12, %v6077_v53 }
 0x737   :  { %v6104_v23 = vpop.f32.mrf.mxu3  ;;  %v6103_v24 = vadd.f32 %v6102_v55, %v6090_v26  ;;  %v9458_v55 = vld [vmem:[%s12131_s9] ss:$0 sm:$0xff] }
 0x747   :  { %v6115_v52 = vpop.f32.mrf.mxu0 }
 0x748   :  { %v6128_v14 = vpop.f32.mrf.mxu1  ;;  %v6116_v56 = vadd.f32 %v6115_v52, %v6103_v24 }
 0x74a   :  { %v6129_v39 = vadd.f32 %v6128_v14, %v6116_v56 }
 0x74f   :  { %v6141_v5 = vpop.f32.mrf.mxu3  ;;  %v6117_v49 = vpop.f32.mrf.mxu0 }
 0x750   :  { %v6142_v21 = vadd.f32 %v6141_v5, %v6129_v39  ;;  %v6130_v2 = vpop.f32.mrf.mxu1 }
 0x752   :  { %v6262_v45 = vmul.f32 0.01, %v6142_v21 }
 0x754   :  { %v6264_v44 = vmax.f32 %v6142_v21, %v6262_v45 }
 0x756   :  { %v6266_v63 = vpack.c.bf16 %v6264_v44, %v6264_v44 }
 0x757   :  { %v6143_v62 = vpop.f32.mrf.mxu3 }
 0x758   :  { %6408 = vmatmul.bf16.vlgmr.msra.gmra.mxu2 %v6266_v63 }
 0x764   :  { %v6219_v33 = vpop.f32.mrf.mxu2 }
 0x767   :  { %v6154_v28 = vpop.f32.mrf.mxu0 }
 0x768   :  { %v6167_v4 = vpop.f32.mrf.mxu1  ;;  %v6155_v7 = vadd.f32 %v6154_v28, %v5305_v51 }
 0x76a   :  { %v6168_v57 = vadd.f32 %v6167_v4, %v6155_v7 }
 0x76c   :  { %v6221_v8 = vpop.f32.mrf.mxu2 }
 0x76f   :  { %v6156_v58 = vpop.f32.mrf.mxu0  ;;  %v6180_v25 = vpop.f32.mrf.mxu3 }
 0x770   :  { %v6169_v31 = vpop.f32.mrf.mxu1  ;;  %v6181_v36 = vadd.f32 %v6180_v25, %v6168_v57 }
 0x777   :  { %v6182_v11 = vpop.f32.mrf.mxu3 }
 0x787   :  { %v6193_v42 = vpop.f32.mrf.mxu0 }
 0x788   :  { %v6206_v54 = vpop.f32.mrf.mxu1  ;;  %v6194_v6 = vadd.f32 %v6193_v42, %v6181_v36 }
 0x78a   :  { %v6207_v29 = vadd.f32 %v6206_v54, %v6194_v6 }
 0x78c   :  { %v6220_v60 = vadd.f32 %v6219_v33, %v6207_v29 }
 0x78f   :  { %v6195_v19 = vpop.f32.mrf.mxu0  ;;  %v6232_v22 = vpop.f32.mrf.mxu3 }
 0x790   :  { %v6208_v20 = vpop.f32.mrf.mxu1  ;;  %v6233_v59 = vadd.f32 %v6232_v22, %v6220_v60 }
 0x797   :  { %v6234_v35 = vpop.f32.mrf.mxu3 }
 0x7a7   :  { %v6245_v47 = vpop.f32.mrf.mxu0 }
 0x7a8   :  { %v6258_v1 = vpop.f32.mrf.mxu1  ;;  %v6246_v15 = vadd.f32 %v6245_v47, %v6233_v59 }
 0x7aa   :  { %v6259_v13 = vadd.f32 %v6258_v1, %v6246_v15 }
 0x7ac   :  { %v6263_v38 = vmul.f32 0.01, %v6259_v13 }
 0x7ae   :  { %v6265_v32 = vmax.f32 %v6259_v13, %v6263_v38 }
 0x7af   :  { %v6247_v12 = vpop.f32.mrf.mxu0 }
 0x7b0   :  { %v6260_v61 = vpop.f32.mrf.mxu1  ;;  %v6267_v16 = vpack.c.bf16 %v6265_v32, %v6265_v32 }
 0x7b2   :  { %6421 = vmatmul.bf16.vlgmr.msrb.gmra.mxu3 %v6267_v16 }
 0x7db   :  { %v6409_v48 = vpop.f32.mrf.mxu2 }
 0x7dc   :  { %v6410_v10 = vadd.f32 %v9458_v55, %v6409_v48 }
 0x7e3   :  { %v6411_v27 = vpop.f32.mrf.mxu2 }
 0x835   :  { %v6422_v34 = vpop.f32.mrf.mxu3 }
 0x836   :  { %v6423_v30 = vadd.f32 %v6422_v34, %v6410_v10 }
 0x838   :  { %6427 = vst.msk [vmem:[#allocation4] sm:$0x3] %vm6426_vm0, %v6423_v30 }
 0x839   :  { %6438 = dma.vmem_to_hbm [thread:$0]  %s6434_s29, 32, %s6436_s12, [#allocation5]  }
 0x83d   :  { %v6424_v41 = vpop.f32.mrf.mxu3 }
 0x83e   :  { %9485 = dma.done.wait [#allocation5], 32  }
 0x83f   :  { %9486 = vsyncadd [#allocation5], 4294967264 }
 0x840   :  { %6443 = vsyncpa [#allocation5], 1 }
 0x841   :  { %6444 = vsyncmov [#allocation3] }
 0x844   :  { %s6445_s9 = vpop.sfrf %6444 }
 0x845   :  { %p8854_p0 = scmp.ne.s32.totalorder %s6445_s9, 0 }
 0x847   :  { %6449 = shalt.err (%p8854_p0)  }

</bundles_post_ra>
